<compile_context>
chip_gen: v5e
topology: v5e:2x2
jax: 0.10.0
libtpu: 0.0.40
codegen_flags: <defaults>
</compile_context>

<pallas_src>
import jax
import jax.numpy as jnp
from jax.experimental import pallas as pl
from jax.experimental.pallas import tpu as pltpu

EPS = 1e-5


# ----------------------------------------------------------------------------
# In-kernel helpers
# ----------------------------------------------------------------------------
def _dw_conv(v, w_ref, b_ref, pad_ref, *, k, shift, n_acc):
    """Depthwise k x k conv on a lane-folded (H, L) slab, L = W * c.

    v:       (H, L) f32 activations (channel fastest on lanes).
    w_ref:   (k*k, L) per-tap weights, tiled along W and pre-masked at the
             horizontal borders so lane-roll wrap-around contributes zero.
    b_ref:   (1, L) bias, tiled along W.
    pad_ref: (k, H+2p, L) VMEM scratch; plane j holds the input lane-rolled by
             horizontal tap offset j, with zeroed vertical halo rows.
    shift:   lanes per pixel (= channels) -> lane shift of one horizontal tap.
    n_acc:   number of independent accumulators (breaks the f32-add chain).
    """
    H, L = v.shape
    p = k // 2
    halo = jnp.zeros((p, L), jnp.float32)

    # k lane-rolls total (instead of k*k per-tap rolls), stored once per plane.
    for j in range(k):
        dj = j - p
        vj = v if dj == 0 else pltpu.roll(v, (-dj * shift) % L, axis=1)
        pad_ref[j, :p, :] = halo
        pad_ref[j, p:p + H, :] = vj
        pad_ref[j, p + H:, :] = halo

    # Accumulator starts at the bias; several chains for add-latency ILP.
    accs = [jnp.broadcast_to(b_ref[...], (H, L))]
    accs += [jnp.zeros((H, L), jnp.float32) for _ in range(n_acc - 1)]
    t = 0
    for i in range(k):                       # vertical tap (row-slab offset)
        for j in range(k):                   # horizontal tap (rolled plane)
            w_row = w_ref[i * k + j:i * k + j + 1, :]            # (1, L)
            accs[t % n_acc] = accs[t % n_acc] + pad_ref[j, i:i + H, :] * w_row
            t += 1
    acc = accs[0]
    for extra in accs[1:]:
        acc = acc + extra
    return acc


def _make_attn_kernel(chans):
    """ConvMod branch: x1 = x + proj'(dw11(relu(a1'(x))) * v'(x)).
    BN1 and layer_scale_1 are pre-folded into a1'/v'/proj' (wrapper side)."""

    def attn_kernel(x_ref, wa_ref, ba_ref, wdw_ref, bdw_ref,
                    wv_ref, bv_ref, wp_ref, bp_ref,
                    x1_ref, pad_ref):
        x = x_ref[...]                                       # (H, W*C) f32
        xb = x.astype(jnp.bfloat16)
        a = jnp.dot(xb, wa_ref[...],
                    preferred_element_type=jnp.float32) + ba_ref[...]
        a = jnp.maximum(a, 0.0)
        a = _dw_conv(a, wdw_ref, bdw_ref, pad_ref, k=11, shift=chans, n_acc=4)
        v = jnp.dot(xb, wv_ref[...],
                    preferred_element_type=jnp.float32) + bv_ref[...]
        av = (a * v).astype(jnp.bfloat16)
        x1_ref[...] = x + jnp.dot(av, wp_ref[...],
                                  preferred_element_type=jnp.float32) + bp_ref[...]

    return attn_kernel


def _make_mlp_kernel(hid_chans):
    """MLP branch: x2 = x1 + fc2'(h + relu(dw3(h))), h = relu(fc1'(x1)).
    BN2 and layer_scale_2 are pre-folded into fc1'/fc2' (wrapper side)."""

    def mlp_kernel(x1_ref, w1_ref, b1_ref, wpos_ref, bpos_ref,
                   w2_ref, b2_ref, out_ref, pad_ref):
        x1 = x1_ref[...]                                     # (H, W*C) f32
        h = jnp.dot(x1.astype(jnp.bfloat16), w1_ref[...],
                    preferred_element_type=jnp.float32) + b1_ref[...]
        h = jnp.maximum(h, 0.0)                              # (H, W*Ch)
        hp = _dw_conv(h, wpos_ref, bpos_ref, pad_ref, k=3, shift=hid_chans,
                      n_acc=2)
        h2 = (h + jnp.maximum(hp, 0.0)).astype(jnp.bfloat16)
        out_ref[...] = x1 + jnp.dot(h2, w2_ref[...],
                                    preferred_element_type=jnp.float32) + b2_ref[...]

    return mlp_kernel


# ----------------------------------------------------------------------------
# Wrapper-side (hoisted) parameter folding
# ----------------------------------------------------------------------------
def _bn_fold(v_nhwc, gamma, beta):
    """Training-mode BN batch stats (biased var) -> per-channel scale/shift."""
    mean = jnp.mean(v_nhwc, axis=(0, 1, 2))
    var = jnp.mean((v_nhwc - mean) ** 2, axis=(0, 1, 2))
    inv = jax.lax.rsqrt(var + EPS)
    scale = gamma.reshape(-1) * inv
    shift = beta.reshape(-1) - mean * scale
    return scale, shift


def _dw_effective_weights(w_flat, k, c, W):
    """(k*k, c) depthwise taps -> (k*k, W*c): tiled along W and masked at the
    horizontal borders so lane-roll wrap-around lanes contribute exactly zero."""
    p = k // 2
    wt = jnp.tile(w_flat, (1, W))                            # (k*k, W*c)
    wpix = jnp.repeat(jnp.arange(W), c)                      # lane -> pixel index
    dj = (jnp.arange(k * k) % k) - p                         # tap -> horiz offset
    pos = wpix[None, :] + dj[:, None]
    valid = ((pos >= 0) & (pos < W)).astype(w_flat.dtype)
    return wt * valid


@jax.jit
def block_forward(x_nchw, params):
    B, C, H, W = x_nchw.shape
    x = jnp.transpose(x_nchw, (0, 2, 3, 1)).astype(jnp.float32)   # NCHW -> NHWC
    Ch = params["w_fc1"].shape[1]
    L, Lh = W * C, W * Ch

    tile = lambda t: jnp.tile(t.reshape(1, -1), (1, W))
    eye_w = jnp.eye(W, dtype=jnp.float32)
    bdiag = lambda w: jnp.kron(eye_w, w).astype(jnp.bfloat16)  # 1x1 conv -> matmul

    row_spec = pl.BlockSpec((None, H, L), lambda b: (b, 0, 0))
    full = lambda a: pl.BlockSpec(a.shape, lambda b: (0, 0))
    cparams = pltpu.CompilerParams(dimension_semantics=("parallel",),
                                   vmem_limit_bytes=32 * 1024 * 1024)

    # ---- ConvMod (attention) branch -----------------------------------------
    s1, t1 = _bn_fold(x, params["bn1_g"], params["bn1_b"])
    # (x*s + t) @ W + b  ==  x @ (diag(s) W) + (t @ W + b)   -> fold BN into a1/v
    wa = bdiag(s1[:, None] * params["w_a1"])
    ba = tile(t1 @ params["w_a1"] + params["b_a1"].reshape(-1))
    wv = bdiag(s1[:, None] * params["w_v"])
    bv = tile(t1 @ params["w_v"] + params["b_v"].reshape(-1))
    # ls1 * (y @ Wp + bp)  ==  y @ (Wp * ls1) + bp * ls1      -> fold layer_scale_1
    wp = bdiag(params["w_proj"] * params["ls1"].reshape(1, -1))
    bp = tile(params["b_proj"].reshape(-1) * params["ls1"].reshape(-1))
    wdw = _dw_effective_weights(params["w_dw"], 11, C, W)      # (121, L) f32
    bdw = tile(params["b_dw"])

    args_a = [wa, ba, wdw, bdw, wv, bv, wp, bp]
    x_f = x.reshape(B, H, L)
    x1_f = pl.pallas_call(
        _make_attn_kernel(C),
        out_shape=jax.ShapeDtypeStruct((B, H, L), jnp.float32),
        grid=(B,),
        in_specs=[row_spec] + [full(a) for a in args_a],
        out_specs=row_spec,
        scratch_shapes=[pltpu.VMEM((11, H + 10, L), jnp.float32)],  # rolled+padded planes
        compiler_params=cparams,
    )(x_f, *args_a)

    # ---- MLP branch ----------------------------------------------------------
    s2, t2 = _bn_fold(x1_f.reshape(B, H, W, C),
                      params["bn2_g"], params["bn2_b"])
    w1 = bdiag(s2[:, None] * params["w_fc1"])                  # BN2 folded into fc1
    b1 = tile(t2 @ params["w_fc1"] + params["b_fc1"].reshape(-1))
    w2 = bdiag(params["w_fc2"] * params["ls2"].reshape(1, -1))  # ls2 folded into fc2
    b2 = tile(params["b_fc2"].reshape(-1) * params["ls2"].reshape(-1))
    wpos = _dw_effective_weights(params["w_pos"], 3, Ch, W)    # (9, Lh) f32
    bpos = tile(params["b_pos"])

    args_b = [w1, b1, wpos, bpos, w2, b2]
    out_f = pl.pallas_call(
        _make_mlp_kernel(Ch),
        out_shape=jax.ShapeDtypeStruct((B, H, L), jnp.float32),
        grid=(B,),
        in_specs=[row_spec] + [full(a) for a in args_b],
        out_specs=row_spec,
        scratch_shapes=[pltpu.VMEM((3, H + 2, Lh), jnp.float32)],
        compiler_params=cparams,
    )(x1_f, *args_b)

    out = out_f.reshape(B, H, W, C)
    return jnp.transpose(out, (0, 3, 1, 2))                    # NHWC -> NCHW


# ----------------------------------------------------------------------------
# Parameters + pure-JAX reference
# ----------------------------------------------------------------------------
def init_params(key, dim, mlp_ratio=4):
    hid = dim * mlp_ratio
    ks = jax.random.split(key, 18)
    w = lambda k, s, sc: sc * jax.random.normal(k, s, jnp.float32)
    return {
        "bn1_g": 1.0 + 0.1 * jax.random.normal(ks[0], (1, dim), jnp.float32),
        "bn1_b": w(ks[1], (1, dim), 0.1),
        "w_a1": w(ks[2], (dim, dim), 0.3), "b_a1": w(ks[3], (1, dim), 0.1),
        "w_dw": w(ks[4], (121, dim), 0.1), "b_dw": w(ks[5], (1, dim), 0.1),
        "w_v": w(ks[6], (dim, dim), 0.3), "b_v": w(ks[7], (1, dim), 0.1),
        "w_proj": w(ks[8], (dim, dim), 0.3), "b_proj": w(ks[9], (1, dim), 0.1),
        # torch init is 1e-6*ones; larger constant so the branch is numerically visible
        "ls1": jnp.full((1, dim), 0.1, jnp.float32),
        "bn2_g": 1.0 + 0.1 * jax.random.normal(ks[10], (1, dim), jnp.float32),
        "bn2_b": w(ks[11], (1, dim), 0.1),
        "w_fc1": w(ks[12], (dim, hid), 0.3), "b_fc1": w(ks[13], (1, hid), 0.1),
        "w_pos": w(ks[14], (9, hid), 0.2), "b_pos": w(ks[15], (1, hid), 0.1),
        "w_fc2": w(ks[16], (hid, dim), 0.2), "b_fc2": w(ks[17], (1, dim), 0.1),
        "ls2": jnp.full((1, dim), 0.1, jnp.float32),
    }


def block_ref(x_nchw, p):
    # pure-JAX reference (XLA convs, f32 HIGHEST precision) for correctness check
    x = jnp.transpose(x_nchw, (0, 2, 3, 1)).astype(jnp.float32)

    def bn(v, g, b):
        mean = v.mean(axis=(0, 1, 2), keepdims=True)
        var = ((v - mean) ** 2).mean(axis=(0, 1, 2), keepdims=True)
        return (v - mean) / jnp.sqrt(var + EPS) * g.reshape(1, 1, 1, -1) + b.reshape(1, 1, 1, -1)

    def conv1x1(v, w, b):
        return jnp.einsum("bhwc,cd->bhwd", v, w,
                          precision=jax.lax.Precision.HIGHEST) + b.reshape(1, 1, 1, -1)

    def dwconv(v, w_flat, b, k):
        c = v.shape[-1]
        w = w_flat.reshape(k, k, 1, c)
        y = jax.lax.conv_general_dilated(
            v, w, (1, 1), [(k // 2, k // 2), (k // 2, k // 2)],
            dimension_numbers=("NHWC", "HWIO", "NHWC"),
            feature_group_count=c, precision=jax.lax.Precision.HIGHEST)
        return y + b.reshape(1, 1, 1, -1)

    relu = lambda t: jnp.maximum(t, 0.0)

    xn = bn(x, p["bn1_g"], p["bn1_b"])
    a = relu(conv1x1(xn, p["w_a1"], p["b_a1"]))
    a = dwconv(a, p["w_dw"], p["b_dw"], 11)
    v = conv1x1(xn, p["w_v"], p["b_v"])
    attn = conv1x1(a * v, p["w_proj"], p["b_proj"])
    x1 = x + p["ls1"].reshape(1, 1, 1, -1) * attn

    xn2 = bn(x1, p["bn2_g"], p["bn2_b"])
    h = relu(conv1x1(xn2, p["w_fc1"], p["b_fc1"]))
    h = h + relu(dwconv(h, p["w_pos"], p["b_pos"], 3))
    mlp_out = conv1x1(h, p["w_fc2"], p["b_fc2"])
    x2 = x1 + p["ls2"].reshape(1, 1, 1, -1) * mlp_out
    return jnp.transpose(x2, (0, 3, 1, 2))


if __name__ == "__main__":
    key = jax.random.PRNGKey(0)
    kx, kp = jax.random.split(key)
    dim, mlp_ratio = 8, 4          # W*C = 16*8 = 128 -> fully lane-dense layout
    B, H, W = 2, 16, 16

    x = jax.random.normal(kx, (B, dim, H, W), jnp.float32)  # NCHW, like PyTorch
    params = init_params(kp, dim, mlp_ratio)

    out = jax.block_until_ready(block_forward(x, params))
    ref = jax.block_until_ready(block_ref(x, params))

    assert out.shape == x.shape
    assert bool(jnp.all(jnp.isfinite(out)))
    err = float(jnp.max(jnp.abs(out - ref)))
    # kernel uses bf16 MXU operands vs an f32 HIGHEST-precision reference
    if not jnp.allclose(out, ref, rtol=5e-3, atol=5e-3):
        raise AssertionError(f"kernel/ref mismatch, max abs err = {err}")
    print("KERNEL_OK")
</pallas_src>

<mosaic_0001>
module attributes {stable_mosaic.version = 11 : i64} {
  func.func @attn_kernel(%arg0: i32, %arg1: memref<1x16x128xf32, #tpu.memory_space<vmem>>, %arg2: memref<128x128xbf16, #tpu.memory_space<vmem>>, %arg3: memref<1x128xf32, #tpu.memory_space<vmem>>, %arg4: memref<121x128xf32, #tpu.memory_space<vmem>>, %arg5: memref<1x128xf32, #tpu.memory_space<vmem>>, %arg6: memref<128x128xbf16, #tpu.memory_space<vmem>>, %arg7: memref<1x128xf32, #tpu.memory_space<vmem>>, %arg8: memref<128x128xbf16, #tpu.memory_space<vmem>>, %arg9: memref<1x128xf32, #tpu.memory_space<vmem>>, %arg10: memref<1x16x128xf32, #tpu.memory_space<vmem>>, %arg11: memref<11x26x128xf32, #tpu.memory_space<vmem>>) attributes {dimension_semantics = [#tpu.dimension_semantics<parallel>], iteration_bounds = array<i64: 2>, scalar_prefetch = 0 : i64, scratch_operands = 1 : i64, tpu.core_type = #tpu.core_type<tc>, window_params = [{transform_indices = @transform_0, window_bounds = array<i64: 1, 16, 128>}, {pipeline_mode = #tpu.pipeline_mode<synchronous>, transform_indices = @transform_1, window_bounds = array<i64: 128, 128>}, {pipeline_mode = #tpu.pipeline_mode<synchronous>, transform_indices = @transform_2, window_bounds = array<i64: 1, 128>}, {pipeline_mode = #tpu.pipeline_mode<synchronous>, transform_indices = @transform_3, window_bounds = array<i64: 121, 128>}, {pipeline_mode = #tpu.pipeline_mode<synchronous>, transform_indices = @transform_4, window_bounds = array<i64: 1, 128>}, {pipeline_mode = #tpu.pipeline_mode<synchronous>, transform_indices = @transform_5, window_bounds = array<i64: 128, 128>}, {pipeline_mode = #tpu.pipeline_mode<synchronous>, transform_indices = @transform_6, window_bounds = array<i64: 1, 128>}, {pipeline_mode = #tpu.pipeline_mode<synchronous>, transform_indices = @transform_7, window_bounds = array<i64: 128, 128>}, {pipeline_mode = #tpu.pipeline_mode<synchronous>, transform_indices = @transform_8, window_bounds = array<i64: 1, 128>}, {transform_indices = @transform_9, window_bounds = array<i64: 1, 16, 128>}]} {
    %c0 = arith.constant 0 : index
    %c0_0 = arith.constant 0 : index
    %c0_1 = arith.constant 0 : index
    %0 = vector.load %arg1[%c0, %c0_0, %c0_1] : memref<1x16x128xf32, #tpu.memory_space<vmem>>, vector<1x16x128xf32>
    %1 = vector.shape_cast %0 : vector<1x16x128xf32> to vector<16x128xf32>
    %2 = arith.truncf %1 : vector<16x128xf32> to vector<16x128xbf16>
    %c0_2 = arith.constant 0 : index
    %c0_3 = arith.constant 0 : index
    %3 = vector.load %arg2[%c0_2, %c0_3] : memref<128x128xbf16, #tpu.memory_space<vmem>>, vector<128x128xbf16>
    %cst = arith.constant dense<0.000000e+00> : vector<16x128xf32>
    %4 = tpu.matmul %2, %3, %cst {dimension_numbers = #tpu.dot_dimension_numbers<[1], [0], [0], [1], [0, 0, 1, 1], [], []>} : vector<16x128xbf16>, vector<128x128xbf16>, vector<16x128xf32> -> vector<16x128xf32>
    %c0_4 = arith.constant 0 : index
    %c0_5 = arith.constant 0 : index
    %5 = vector.load %arg3[%c0_4, %c0_5] : memref<1x128xf32, #tpu.memory_space<vmem>>, vector<1x128xf32>
    %6 = vector.broadcast %5 : vector<1x128xf32> to vector<16x128xf32>
    %7 = arith.addf %4, %6 : vector<16x128xf32>
    %cst_6 = arith.constant 0.000000e+00 : f32
    %8 = vector.broadcast %cst_6 : f32 to vector<16x128xf32>
    %9 = arith.maximumf %7, %8 : vector<16x128xf32>
    %cst_7 = arith.constant 0.000000e+00 : f32
    %10 = vector.broadcast %cst_7 : f32 to vector<5x128xf32>
    %c40_i32 = arith.constant 40 : i32
    %11 = tpu.dynamic_rotate %9 by %c40_i32 dim 1 : vector<16x128xf32>, i32 -> vector<16x128xf32>
    %c0_8 = arith.constant 0 : index
    %c0_9 = arith.constant 0 : index
    %c0_10 = arith.constant 0 : index
    %12 = vector.load %arg11[%c0_8, %c0_9, %c0_10] : memref<11x26x128xf32, #tpu.memory_space<vmem>>, vector<1x5x128xf32>
    %13 = vector.shape_cast %12 : vector<1x5x128xf32> to vector<5x128xf32>
    %14 = vector.shape_cast %10 : vector<5x128xf32> to vector<1x5x128xf32>
    tpu.vector_store %arg11[%c0_8, %c0_9, %c0_10], %14 {strides = array<i32>} : memref<11x26x128xf32, #tpu.memory_space<vmem>>, vector<1x5x128xf32>,
    %c0_11 = arith.constant 0 : index
    %c5 = arith.constant 5 : index
    %c0_12 = arith.constant 0 : index
    %15 = vector.load %arg11[%c0_11, %c5, %c0_12] : memref<11x26x128xf32, #tpu.memory_space<vmem>>, vector<1x16x128xf32>
    %16 = vector.shape_cast %15 : vector<1x16x128xf32> to vector<16x128xf32>
    %17 = vector.shape_cast %11 : vector<16x128xf32> to vector<1x16x128xf32>
    tpu.vector_store %arg11[%c0_11, %c5, %c0_12], %17 {strides = array<i32>} : memref<11x26x128xf32, #tpu.memory_space<vmem>>, vector<1x16x128xf32>,
    %c0_13 = arith.constant 0 : index
    %c21 = arith.constant 21 : index
    %c0_14 = arith.constant 0 : index
    %18 = vector.load %arg11[%c0_13, %c21, %c0_14] : memref<11x26x128xf32, #tpu.memory_space<vmem>>, vector<1x5x128xf32>
    %19 = vector.shape_cast %18 : vector<1x5x128xf32> to vector<5x128xf32>
    %20 = vector.shape_cast %10 : vector<5x128xf32> to vector<1x5x128xf32>
    tpu.vector_store %arg11[%c0_13, %c21, %c0_14], %20 {strides = array<i32>} : memref<11x26x128xf32, #tpu.memory_space<vmem>>, vector<1x5x128xf32>,
    %c32_i32 = arith.constant 32 : i32
    %21 = tpu.dynamic_rotate %9 by %c32_i32 dim 1 : vector<16x128xf32>, i32 -> vector<16x128xf32>
    %c1 = arith.constant 1 : index
    %c0_15 = arith.constant 0 : index
    %c0_16 = arith.constant 0 : index
    %22 = vector.load %arg11[%c1, %c0_15, %c0_16] : memref<11x26x128xf32, #tpu.memory_space<vmem>>, vector<1x5x128xf32>
    %23 = vector.shape_cast %22 : vector<1x5x128xf32> to vector<5x128xf32>
    %24 = vector.shape_cast %10 : vector<5x128xf32> to vector<1x5x128xf32>
    tpu.vector_store %arg11[%c1, %c0_15, %c0_16], %24 {strides = array<i32>} : memref<11x26x128xf32, #tpu.memory_space<vmem>>, vector<1x5x128xf32>,
    %c1_17 = arith.constant 1 : index
    %c5_18 = arith.constant 5 : index
    %c0_19 = arith.constant 0 : index
    %25 = vector.load %arg11[%c1_17, %c5_18, %c0_19] : memref<11x26x128xf32, #tpu.memory_space<vmem>>, vector<1x16x128xf32>
    %26 = vector.shape_cast %25 : vector<1x16x128xf32> to vector<16x128xf32>
    %27 = vector.shape_cast %21 : vector<16x128xf32> to vector<1x16x128xf32>
    tpu.vector_store %arg11[%c1_17, %c5_18, %c0_19], %27 {strides = array<i32>} : memref<11x26x128xf32, #tpu.memory_space<vmem>>, vector<1x16x128xf32>,
    %c1_20 = arith.constant 1 : index
    %c21_21 = arith.constant 21 : index
    %c0_22 = arith.constant 0 : index
    %28 = vector.load %arg11[%c1_20, %c21_21, %c0_22] : memref<11x26x128xf32, #tpu.memory_space<vmem>>, vector<1x5x128xf32>
    %29 = vector.shape_cast %28 : vector<1x5x128xf32> to vector<5x128xf32>
    %30 = vector.shape_cast %10 : vector<5x128xf32> to vector<1x5x128xf32>
    tpu.vector_store %arg11[%c1_20, %c21_21, %c0_22], %30 {strides = array<i32>} : memref<11x26x128xf32, #tpu.memory_space<vmem>>, vector<1x5x128xf32>,
    %c24_i32 = arith.constant 24 : i32
    %31 = tpu.dynamic_rotate %9 by %c24_i32 dim 1 : vector<16x128xf32>, i32 -> vector<16x128xf32>
    %c2 = arith.constant 2 : index
    %c0_23 = arith.constant 0 : index
    %c0_24 = arith.constant 0 : index
    %32 = vector.load %arg11[%c2, %c0_23, %c0_24] : memref<11x26x128xf32, #tpu.memory_space<vmem>>, vector<1x5x128xf32>
    %33 = vector.shape_cast %32 : vector<1x5x128xf32> to vector<5x128xf32>
    %34 = vector.shape_cast %10 : vector<5x128xf32> to vector<1x5x128xf32>
    tpu.vector_store %arg11[%c2, %c0_23, %c0_24], %34 {strides = array<i32>} : memref<11x26x128xf32, #tpu.memory_space<vmem>>, vector<1x5x128xf32>,
    %c2_25 = arith.constant 2 : index
    %c5_26 = arith.constant 5 : index
    %c0_27 = arith.constant 0 : index
    %35 = vector.load %arg11[%c2_25, %c5_26, %c0_27] : memref<11x26x128xf32, #tpu.memory_space<vmem>>, vector<1x16x128xf32>
    %36 = vector.shape_cast %35 : vector<1x16x128xf32> to vector<16x128xf32>
    %37 = vector.shape_cast %31 : vector<16x128xf32> to vector<1x16x128xf32>
    tpu.vector_store %arg11[%c2_25, %c5_26, %c0_27], %37 {strides = array<i32>} : memref<11x26x128xf32, #tpu.memory_space<vmem>>, vector<1x16x128xf32>,
    %c2_28 = arith.constant 2 : index
    %c21_29 = arith.constant 21 : index
    %c0_30 = arith.constant 0 : index
    %38 = vector.load %arg11[%c2_28, %c21_29, %c0_30] : memref<11x26x128xf32, #tpu.memory_space<vmem>>, vector<1x5x128xf32>
    %39 = vector.shape_cast %38 : vector<1x5x128xf32> to vector<5x128xf32>
    %40 = vector.shape_cast %10 : vector<5x128xf32> to vector<1x5x128xf32>
    tpu.vector_store %arg11[%c2_28, %c21_29, %c0_30], %40 {strides = array<i32>} : memref<11x26x128xf32, #tpu.memory_space<vmem>>, vector<1x5x128xf32>,
    %c16_i32 = arith.constant 16 : i32
    %41 = tpu.dynamic_rotate %9 by %c16_i32 dim 1 : vector<16x128xf32>, i32 -> vector<16x128xf32>
    %c3 = arith.constant 3 : index
    %c0_31 = arith.constant 0 : index
    %c0_32 = arith.constant 0 : index
    %42 = vector.load %arg11[%c3, %c0_31, %c0_32] : memref<11x26x128xf32, #tpu.memory_space<vmem>>, vector<1x5x128xf32>
    %43 = vector.shape_cast %42 : vector<1x5x128xf32> to vector<5x128xf32>
    %44 = vector.shape_cast %10 : vector<5x128xf32> to vector<1x5x128xf32>
    tpu.vector_store %arg11[%c3, %c0_31, %c0_32], %44 {strides = array<i32>} : memref<11x26x128xf32, #tpu.memory_space<vmem>>, vector<1x5x128xf32>,
    %c3_33 = arith.constant 3 : index
    %c5_34 = arith.constant 5 : index
    %c0_35 = arith.constant 0 : index
    %45 = vector.load %arg11[%c3_33, %c5_34, %c0_35] : memref<11x26x128xf32, #tpu.memory_space<vmem>>, vector<1x16x128xf32>
    %46 = vector.shape_cast %45 : vector<1x16x128xf32> to vector<16x128xf32>
    %47 = vector.shape_cast %41 : vector<16x128xf32> to vector<1x16x128xf32>
    tpu.vector_store %arg11[%c3_33, %c5_34, %c0_35], %47 {strides = array<i32>} : memref<11x26x128xf32, #tpu.memory_space<vmem>>, vector<1x16x128xf32>,
    %c3_36 = arith.constant 3 : index
    %c21_37 = arith.constant 21 : index
    %c0_38 = arith.constant 0 : index
    %48 = vector.load %arg11[%c3_36, %c21_37, %c0_38] : memref<11x26x128xf32, #tpu.memory_space<vmem>>, vector<1x5x128xf32>
    %49 = vector.shape_cast %48 : vector<1x5x128xf32> to vector<5x128xf32>
    %50 = vector.shape_cast %10 : vector<5x128xf32> to vector<1x5x128xf32>
    tpu.vector_store %arg11[%c3_36, %c21_37, %c0_38], %50 {strides = array<i32>} : memref<11x26x128xf32, #tpu.memory_space<vmem>>, vector<1x5x128xf32>,
    %c8_i32 = arith.constant 8 : i32
    %51 = tpu.dynamic_rotate %9 by %c8_i32 dim 1 : vector<16x128xf32>, i32 -> vector<16x128xf32>
    %c4 = arith.constant 4 : index
    %c0_39 = arith.constant 0 : index
    %c0_40 = arith.constant 0 : index
    %52 = vector.load %arg11[%c4, %c0_39, %c0_40] : memref<11x26x128xf32, #tpu.memory_space<vmem>>, vector<1x5x128xf32>
    %53 = vector.shape_cast %52 : vector<1x5x128xf32> to vector<5x128xf32>
    %54 = vector.shape_cast %10 : vector<5x128xf32> to vector<1x5x128xf32>
    tpu.vector_store %arg11[%c4, %c0_39, %c0_40], %54 {strides = array<i32>} : memref<11x26x128xf32, #tpu.memory_space<vmem>>, vector<1x5x128xf32>,
    %c4_41 = arith.constant 4 : index
    %c5_42 = arith.constant 5 : index
    %c0_43 = arith.constant 0 : index
    %55 = vector.load %arg11[%c4_41, %c5_42, %c0_43] : memref<11x26x128xf32, #tpu.memory_space<vmem>>, vector<1x16x128xf32>
    %56 = vector.shape_cast %55 : vector<1x16x128xf32> to vector<16x128xf32>
    %57 = vector.shape_cast %51 : vector<16x128xf32> to vector<1x16x128xf32>
    tpu.vector_store %arg11[%c4_41, %c5_42, %c0_43], %57 {strides = array<i32>} : memref<11x26x128xf32, #tpu.memory_space<vmem>>, vector<1x16x128xf32>,
    %c4_44 = arith.constant 4 : index
    %c21_45 = arith.constant 21 : index
    %c0_46 = arith.constant 0 : index
    %58 = vector.load %arg11[%c4_44, %c21_45, %c0_46] : memref<11x26x128xf32, #tpu.memory_space<vmem>>, vector<1x5x128xf32>
    %59 = vector.shape_cast %58 : vector<1x5x128xf32> to vector<5x128xf32>
    %60 = vector.shape_cast %10 : vector<5x128xf32> to vector<1x5x128xf32>
    tpu.vector_store %arg11[%c4_44, %c21_45, %c0_46], %60 {strides = array<i32>} : memref<11x26x128xf32, #tpu.memory_space<vmem>>, vector<1x5x128xf32>,
    %c5_47 = arith.constant 5 : index
    %c0_48 = arith.constant 0 : index
    %c0_49 = arith.constant 0 : index
    %61 = vector.load %arg11[%c5_47, %c0_48, %c0_49] : memref<11x26x128xf32, #tpu.memory_space<vmem>>, vector<1x5x128xf32>
    %62 = vector.shape_cast %61 : vector<1x5x128xf32> to vector<5x128xf32>
    %63 = vector.shape_cast %10 : vector<5x128xf32> to vector<1x5x128xf32>
    tpu.vector_store %arg11[%c5_47, %c0_48, %c0_49], %63 {strides = array<i32>} : memref<11x26x128xf32, #tpu.memory_space<vmem>>, vector<1x5x128xf32>,
    %c5_50 = arith.constant 5 : index
    %c5_51 = arith.constant 5 : index
    %c0_52 = arith.constant 0 : index
    %64 = vector.load %arg11[%c5_50, %c5_51, %c0_52] : memref<11x26x128xf32, #tpu.memory_space<vmem>>, vector<1x16x128xf32>
    %65 = vector.shape_cast %64 : vector<1x16x128xf32> to vector<16x128xf32>
    %66 = vector.shape_cast %9 : vector<16x128xf32> to vector<1x16x128xf32>
    tpu.vector_store %arg11[%c5_50, %c5_51, %c0_52], %66 {strides = array<i32>} : memref<11x26x128xf32, #tpu.memory_space<vmem>>, vector<1x16x128xf32>,
    %c5_53 = arith.constant 5 : index
    %c21_54 = arith.constant 21 : index
    %c0_55 = arith.constant 0 : index
    %67 = vector.load %arg11[%c5_53, %c21_54, %c0_55] : memref<11x26x128xf32, #tpu.memory_space<vmem>>, vector<1x5x128xf32>
    %68 = vector.shape_cast %67 : vector<1x5x128xf32> to vector<5x128xf32>
    %69 = vector.shape_cast %10 : vector<5x128xf32> to vector<1x5x128xf32>
    tpu.vector_store %arg11[%c5_53, %c21_54, %c0_55], %69 {strides = array<i32>} : memref<11x26x128xf32, #tpu.memory_space<vmem>>, vector<1x5x128xf32>,
    %c120_i32 = arith.constant 120 : i32
    %70 = tpu.dynamic_rotate %9 by %c120_i32 dim 1 : vector<16x128xf32>, i32 -> vector<16x128xf32>
    %c6 = arith.constant 6 : index
    %c0_56 = arith.constant 0 : index
    %c0_57 = arith.constant 0 : index
    %71 = vector.load %arg11[%c6, %c0_56, %c0_57] : memref<11x26x128xf32, #tpu.memory_space<vmem>>, vector<1x5x128xf32>
    %72 = vector.shape_cast %71 : vector<1x5x128xf32> to vector<5x128xf32>
    %73 = vector.shape_cast %10 : vector<5x128xf32> to vector<1x5x128xf32>
    tpu.vector_store %arg11[%c6, %c0_56, %c0_57], %73 {strides = array<i32>} : memref<11x26x128xf32, #tpu.memory_space<vmem>>, vector<1x5x128xf32>,
    %c6_58 = arith.constant 6 : index
    %c5_59 = arith.constant 5 : index
    %c0_60 = arith.constant 0 : index
    %74 = vector.load %arg11[%c6_58, %c5_59, %c0_60] : memref<11x26x128xf32, #tpu.memory_space<vmem>>, vector<1x16x128xf32>
    %75 = vector.shape_cast %74 : vector<1x16x128xf32> to vector<16x128xf32>
    %76 = vector.shape_cast %70 : vector<16x128xf32> to vector<1x16x128xf32>
    tpu.vector_store %arg11[%c6_58, %c5_59, %c0_60], %76 {strides = array<i32>} : memref<11x26x128xf32, #tpu.memory_space<vmem>>, vector<1x16x128xf32>,
    %c6_61 = arith.constant 6 : index
    %c21_62 = arith.constant 21 : index
    %c0_63 = arith.constant 0 : index
    %77 = vector.load %arg11[%c6_61, %c21_62, %c0_63] : memref<11x26x128xf32, #tpu.memory_space<vmem>>, vector<1x5x128xf32>
    %78 = vector.shape_cast %77 : vector<1x5x128xf32> to vector<5x128xf32>
    %79 = vector.shape_cast %10 : vector<5x128xf32> to vector<1x5x128xf32>
    tpu.vector_store %arg11[%c6_61, %c21_62, %c0_63], %79 {strides = array<i32>} : memref<11x26x128xf32, #tpu.memory_space<vmem>>, vector<1x5x128xf32>,
    %c112_i32 = arith.constant 112 : i32
    %80 = tpu.dynamic_rotate %9 by %c112_i32 dim 1 : vector<16x128xf32>, i32 -> vector<16x128xf32>
    %c7 = arith.constant 7 : index
    %c0_64 = arith.constant 0 : index
    %c0_65 = arith.constant 0 : index
    %81 = vector.load %arg11[%c7, %c0_64, %c0_65] : memref<11x26x128xf32, #tpu.memory_space<vmem>>, vector<1x5x128xf32>
    %82 = vector.shape_cast %81 : vector<1x5x128xf32> to vector<5x128xf32>
    %83 = vector.shape_cast %10 : vector<5x128xf32> to vector<1x5x128xf32>
    tpu.vector_store %arg11[%c7, %c0_64, %c0_65], %83 {strides = array<i32>} : memref<11x26x128xf32, #tpu.memory_space<vmem>>, vector<1x5x128xf32>,
    %c7_66 = arith.constant 7 : index
    %c5_67 = arith.constant 5 : index
    %c0_68 = arith.constant 0 : index
    %84 = vector.load %arg11[%c7_66, %c5_67, %c0_68] : memref<11x26x128xf32, #tpu.memory_space<vmem>>, vector<1x16x128xf32>
    %85 = vector.shape_cast %84 : vector<1x16x128xf32> to vector<16x128xf32>
    %86 = vector.shape_cast %80 : vector<16x128xf32> to vector<1x16x128xf32>
    tpu.vector_store %arg11[%c7_66, %c5_67, %c0_68], %86 {strides = array<i32>} : memref<11x26x128xf32, #tpu.memory_space<vmem>>, vector<1x16x128xf32>,
    %c7_69 = arith.constant 7 : index
    %c21_70 = arith.constant 21 : index
    %c0_71 = arith.constant 0 : index
    %87 = vector.load %arg11[%c7_69, %c21_70, %c0_71] : memref<11x26x128xf32, #tpu.memory_space<vmem>>, vector<1x5x128xf32>
    %88 = vector.shape_cast %87 : vector<1x5x128xf32> to vector<5x128xf32>
    %89 = vector.shape_cast %10 : vector<5x128xf32> to vector<1x5x128xf32>
    tpu.vector_store %arg11[%c7_69, %c21_70, %c0_71], %89 {strides = array<i32>} : memref<11x26x128xf32, #tpu.memory_space<vmem>>, vector<1x5x128xf32>,
    %c104_i32 = arith.constant 104 : i32
    %90 = tpu.dynamic_rotate %9 by %c104_i32 dim 1 : vector<16x128xf32>, i32 -> vector<16x128xf32>
    %c8 = arith.constant 8 : index
    %c0_72 = arith.constant 0 : index
    %c0_73 = arith.constant 0 : index
    %91 = vector.load %arg11[%c8, %c0_72, %c0_73] : memref<11x26x128xf32, #tpu.memory_space<vmem>>, vector<1x5x128xf32>
    %92 = vector.shape_cast %91 : vector<1x5x128xf32> to vector<5x128xf32>
    %93 = vector.shape_cast %10 : vector<5x128xf32> to vector<1x5x128xf32>
    tpu.vector_store %arg11[%c8, %c0_72, %c0_73], %93 {strides = array<i32>} : memref<11x26x128xf32, #tpu.memory_space<vmem>>, vector<1x5x128xf32>,
    %c8_74 = arith.constant 8 : index
    %c5_75 = arith.constant 5 : index
    %c0_76 = arith.constant 0 : index
    %94 = vector.load %arg11[%c8_74, %c5_75, %c0_76] : memref<11x26x128xf32, #tpu.memory_space<vmem>>, vector<1x16x128xf32>
    %95 = vector.shape_cast %94 : vector<1x16x128xf32> to vector<16x128xf32>
    %96 = vector.shape_cast %90 : vector<16x128xf32> to vector<1x16x128xf32>
    tpu.vector_store %arg11[%c8_74, %c5_75, %c0_76], %96 {strides = array<i32>} : memref<11x26x128xf32, #tpu.memory_space<vmem>>, vector<1x16x128xf32>,
    %c8_77 = arith.constant 8 : index
    %c21_78 = arith.constant 21 : index
    %c0_79 = arith.constant 0 : index
    %97 = vector.load %arg11[%c8_77, %c21_78, %c0_79] : memref<11x26x128xf32, #tpu.memory_space<vmem>>, vector<1x5x128xf32>
    %98 = vector.shape_cast %97 : vector<1x5x128xf32> to vector<5x128xf32>
    %99 = vector.shape_cast %10 : vector<5x128xf32> to vector<1x5x128xf32>
    tpu.vector_store %arg11[%c8_77, %c21_78, %c0_79], %99 {strides = array<i32>} : memref<11x26x128xf32, #tpu.memory_space<vmem>>, vector<1x5x128xf32>,
    %c96_i32 = arith.constant 96 : i32
    %100 = tpu.dynamic_rotate %9 by %c96_i32 dim 1 : vector<16x128xf32>, i32 -> vector<16x128xf32>
    %c9 = arith.constant 9 : index
    %c0_80 = arith.constant 0 : index
    %c0_81 = arith.constant 0 : index
    %101 = vector.load %arg11[%c9, %c0_80, %c0_81] : memref<11x26x128xf32, #tpu.memory_space<vmem>>, vector<1x5x128xf32>
    %102 = vector.shape_cast %101 : vector<1x5x128xf32> to vector<5x128xf32>
    %103 = vector.shape_cast %10 : vector<5x128xf32> to vector<1x5x128xf32>
    tpu.vector_store %arg11[%c9, %c0_80, %c0_81], %103 {strides = array<i32>} : memref<11x26x128xf32, #tpu.memory_space<vmem>>, vector<1x5x128xf32>,
    %c9_82 = arith.constant 9 : index
    %c5_83 = arith.constant 5 : index
    %c0_84 = arith.constant 0 : index
    %104 = vector.load %arg11[%c9_82, %c5_83, %c0_84] : memref<11x26x128xf32, #tpu.memory_space<vmem>>, vector<1x16x128xf32>
    %105 = vector.shape_cast %104 : vector<1x16x128xf32> to vector<16x128xf32>
    %106 = vector.shape_cast %100 : vector<16x128xf32> to vector<1x16x128xf32>
    tpu.vector_store %arg11[%c9_82, %c5_83, %c0_84], %106 {strides = array<i32>} : memref<11x26x128xf32, #tpu.memory_space<vmem>>, vector<1x16x128xf32>,
    %c9_85 = arith.constant 9 : index
    %c21_86 = arith.constant 21 : index
    %c0_87 = arith.constant 0 : index
    %107 = vector.load %arg11[%c9_85, %c21_86, %c0_87] : memref<11x26x128xf32, #tpu.memory_space<vmem>>, vector<1x5x128xf32>
    %108 = vector.shape_cast %107 : vector<1x5x128xf32> to vector<5x128xf32>
    %109 = vector.shape_cast %10 : vector<5x128xf32> to vector<1x5x128xf32>
    tpu.vector_store %arg11[%c9_85, %c21_86, %c0_87], %109 {strides = array<i32>} : memref<11x26x128xf32, #tpu.memory_space<vmem>>, vector<1x5x128xf32>,
    %c88_i32 = arith.constant 88 : i32
    %110 = tpu.dynamic_rotate %9 by %c88_i32 dim 1 : vector<16x128xf32>, i32 -> vector<16x128xf32>
    %c10 = arith.constant 10 : index
    %c0_88 = arith.constant 0 : index
    %c0_89 = arith.constant 0 : index
    %111 = vector.load %arg11[%c10, %c0_88, %c0_89] : memref<11x26x128xf32, #tpu.memory_space<vmem>>, vector<1x5x128xf32>
    %112 = vector.shape_cast %111 : vector<1x5x128xf32> to vector<5x128xf32>
    %113 = vector.shape_cast %10 : vector<5x128xf32> to vector<1x5x128xf32>
    tpu.vector_store %arg11[%c10, %c0_88, %c0_89], %113 {strides = array<i32>} : memref<11x26x128xf32, #tpu.memory_space<vmem>>, vector<1x5x128xf32>,
    %c10_90 = arith.constant 10 : index
    %c5_91 = arith.constant 5 : index
    %c0_92 = arith.constant 0 : index
    %114 = vector.load %arg11[%c10_90, %c5_91, %c0_92] : memref<11x26x128xf32, #tpu.memory_space<vmem>>, vector<1x16x128xf32>
    %115 = vector.shape_cast %114 : vector<1x16x128xf32> to vector<16x128xf32>
    %116 = vector.shape_cast %110 : vector<16x128xf32> to vector<1x16x128xf32>
    tpu.vector_store %arg11[%c10_90, %c5_91, %c0_92], %116 {strides = array<i32>} : memref<11x26x128xf32, #tpu.memory_space<vmem>>, vector<1x16x128xf32>,
    %c10_93 = arith.constant 10 : index
    %c21_94 = arith.constant 21 : index
    %c0_95 = arith.constant 0 : index
    %117 = vector.load %arg11[%c10_93, %c21_94, %c0_95] : memref<11x26x128xf32, #tpu.memory_space<vmem>>, vector<1x5x128xf32>
    %118 = vector.shape_cast %117 : vector<1x5x128xf32> to vector<5x128xf32>
    %119 = vector.shape_cast %10 : vector<5x128xf32> to vector<1x5x128xf32>
    tpu.vector_store %arg11[%c10_93, %c21_94, %c0_95], %119 {strides = array<i32>} : memref<11x26x128xf32, #tpu.memory_space<vmem>>, vector<1x5x128xf32>,
    %c0_96 = arith.constant 0 : index
    %c0_97 = arith.constant 0 : index
    %120 = vector.load %arg5[%c0_96, %c0_97] : memref<1x128xf32, #tpu.memory_space<vmem>>, vector<1x128xf32>
    %121 = vector.shape_cast %120 : vector<1x128xf32> to vector<1x128xf32>
    %122 = vector.broadcast %121 : vector<1x128xf32> to vector<16x128xf32>
    %cst_98 = arith.constant 0.000000e+00 : f32
    %123 = vector.broadcast %cst_98 : f32 to vector<16x128xf32>
    %cst_99 = arith.constant 0.000000e+00 : f32
    %124 = vector.broadcast %cst_99 : f32 to vector<16x128xf32>
    %cst_100 = arith.constant 0.000000e+00 : f32
    %125 = vector.broadcast %cst_100 : f32 to vector<16x128xf32>
    %c0_101 = arith.constant 0 : index
    %c0_102 = arith.constant 0 : index
    %126 = vector.load %arg4[%c0_101, %c0_102] : memref<121x128xf32, #tpu.memory_space<vmem>>, vector<1x128xf32>
    %c0_103 = arith.constant 0 : index
    %c0_104 = arith.constant 0 : index
    %c0_105 = arith.constant 0 : index
    %127 = vector.load %arg11[%c0_103, %c0_104, %c0_105] : memref<11x26x128xf32, #tpu.memory_space<vmem>>, vector<1x16x128xf32>
    %128 = vector.shape_cast %127 : vector<1x16x128xf32> to vector<16x128xf32>
    %129 = vector.broadcast %126 : vector<1x128xf32> to vector<16x128xf32>
    %130 = arith.mulf %128, %129 : vector<16x128xf32>
    %131 = arith.addf %122, %130 : vector<16x128xf32>
    %c1_106 = arith.constant 1 : index
    %c0_107 = arith.constant 0 : index
    %132 = vector.load %arg4[%c1_106, %c0_107] : memref<121x128xf32, #tpu.memory_space<vmem>>, vector<1x128xf32>
    %c1_108 = arith.constant 1 : index
    %c0_109 = arith.constant 0 : index
    %c0_110 = arith.constant 0 : index
    %133 = vector.load %arg11[%c1_108, %c0_109, %c0_110] : memref<11x26x128xf32, #tpu.memory_space<vmem>>, vector<1x16x128xf32>
    %134 = vector.shape_cast %133 : vector<1x16x128xf32> to vector<16x128xf32>
    %135 = vector.broadcast %132 : vector<1x128xf32> to vector<16x128xf32>
    %136 = arith.mulf %134, %135 : vector<16x128xf32>
    %137 = arith.addf %123, %136 : vector<16x128xf32>
    %c2_111 = arith.constant 2 : index
    %c0_112 = arith.constant 0 : index
    %138 = vector.load %arg4[%c2_111, %c0_112] : memref<121x128xf32, #tpu.memory_space<vmem>>, vector<1x128xf32>
    %c2_113 = arith.constant 2 : index
    %c0_114 = arith.constant 0 : index
    %c0_115 = arith.constant 0 : index
    %139 = vector.load %arg11[%c2_113, %c0_114, %c0_115] : memref<11x26x128xf32, #tpu.memory_space<vmem>>, vector<1x16x128xf32>
    %140 = vector.shape_cast %139 : vector<1x16x128xf32> to vector<16x128xf32>
    %141 = vector.broadcast %138 : vector<1x128xf32> to vector<16x128xf32>
    %142 = arith.mulf %140, %141 : vector<16x128xf32>
    %143 = arith.addf %124, %142 : vector<16x128xf32>
    %c3_116 = arith.constant 3 : index
    %c0_117 = arith.constant 0 : index
    %144 = vector.load %arg4[%c3_116, %c0_117] : memref<121x128xf32, #tpu.memory_space<vmem>>, vector<1x128xf32>
    %c3_118 = arith.constant 3 : index
    %c0_119 = arith.constant 0 : index
    %c0_120 = arith.constant 0 : index
    %145 = vector.load %arg11[%c3_118, %c0_119, %c0_120] : memref<11x26x128xf32, #tpu.memory_space<vmem>>, vector<1x16x128xf32>
    %146 = vector.shape_cast %145 : vector<1x16x128xf32> to vector<16x128xf32>
    %147 = vector.broadcast %144 : vector<1x128xf32> to vector<16x128xf32>
    %148 = arith.mulf %146, %147 : vector<16x128xf32>
    %149 = arith.addf %125, %148 : vector<16x128xf32>
    %c4_121 = arith.constant 4 : index
    %c0_122 = arith.constant 0 : index
    %150 = vector.load %arg4[%c4_121, %c0_122] : memref<121x128xf32, #tpu.memory_space<vmem>>, vector<1x128xf32>
    %c4_123 = arith.constant 4 : index
    %c0_124 = arith.constant 0 : index
    %c0_125 = arith.constant 0 : index
    %151 = vector.load %arg11[%c4_123, %c0_124, %c0_125] : memref<11x26x128xf32, #tpu.memory_space<vmem>>, vector<1x16x128xf32>
    %152 = vector.shape_cast %151 : vector<1x16x128xf32> to vector<16x128xf32>
    %153 = vector.broadcast %150 : vector<1x128xf32> to vector<16x128xf32>
    %154 = arith.mulf %152, %153 : vector<16x128xf32>
    %155 = arith.addf %131, %154 : vector<16x128xf32>
    %c5_126 = arith.constant 5 : index
    %c0_127 = arith.constant 0 : index
    %156 = vector.load %arg4[%c5_126, %c0_127] : memref<121x128xf32, #tpu.memory_space<vmem>>, vector<1x128xf32>
    %c5_128 = arith.constant 5 : index
    %c0_129 = arith.constant 0 : index
    %c0_130 = arith.constant 0 : index
    %157 = vector.load %arg11[%c5_128, %c0_129, %c0_130] : memref<11x26x128xf32, #tpu.memory_space<vmem>>, vector<1x16x128xf32>
    %158 = vector.shape_cast %157 : vector<1x16x128xf32> to vector<16x128xf32>
    %159 = vector.broadcast %156 : vector<1x128xf32> to vector<16x128xf32>
    %160 = arith.mulf %158, %159 : vector<16x128xf32>
    %161 = arith.addf %137, %160 : vector<16x128xf32>
    %c6_131 = arith.constant 6 : index
    %c0_132 = arith.constant 0 : index
    %162 = vector.load %arg4[%c6_131, %c0_132] : memref<121x128xf32, #tpu.memory_space<vmem>>, vector<1x128xf32>
    %c6_133 = arith.constant 6 : index
    %c0_134 = arith.constant 0 : index
    %c0_135 = arith.constant 0 : index
    %163 = vector.load %arg11[%c6_133, %c0_134, %c0_135] : memref<11x26x128xf32, #tpu.memory_space<vmem>>, vector<1x16x128xf32>
    %164 = vector.shape_cast %163 : vector<1x16x128xf32> to vector<16x128xf32>
    %165 = vector.broadcast %162 : vector<1x128xf32> to vector<16x128xf32>
    %166 = arith.mulf %164, %165 : vector<16x128xf32>
    %167 = arith.addf %143, %166 : vector<16x128xf32>
    %c7_136 = arith.constant 7 : index
    %c0_137 = arith.constant 0 : index
    %168 = vector.load %arg4[%c7_136, %c0_137] : memref<121x128xf32, #tpu.memory_space<vmem>>, vector<1x128xf32>
    %c7_138 = arith.constant 7 : index
    %c0_139 = arith.constant 0 : index
    %c0_140 = arith.constant 0 : index
    %169 = vector.load %arg11[%c7_138, %c0_139, %c0_140] : memref<11x26x128xf32, #tpu.memory_space<vmem>>, vector<1x16x128xf32>
    %170 = vector.shape_cast %169 : vector<1x16x128xf32> to vector<16x128xf32>
    %171 = vector.broadcast %168 : vector<1x128xf32> to vector<16x128xf32>
    %172 = arith.mulf %170, %171 : vector<16x128xf32>
    %173 = arith.addf %149, %172 : vector<16x128xf32>
    %c8_141 = arith.constant 8 : index
    %c0_142 = arith.constant 0 : index
    %174 = vector.load %arg4[%c8_141, %c0_142] : memref<121x128xf32, #tpu.memory_space<vmem>>, vector<1x128xf32>
    %c8_143 = arith.constant 8 : index
    %c0_144 = arith.constant 0 : index
    %c0_145 = arith.constant 0 : index
    %175 = vector.load %arg11[%c8_143, %c0_144, %c0_145] : memref<11x26x128xf32, #tpu.memory_space<vmem>>, vector<1x16x128xf32>
    %176 = vector.shape_cast %175 : vector<1x16x128xf32> to vector<16x128xf32>
    %177 = vector.broadcast %174 : vector<1x128xf32> to vector<16x128xf32>
    %178 = arith.mulf %176, %177 : vector<16x128xf32>
    %179 = arith.addf %155, %178 : vector<16x128xf32>
    %c9_146 = arith.constant 9 : index
    %c0_147 = arith.constant 0 : index
    %180 = vector.load %arg4[%c9_146, %c0_147] : memref<121x128xf32, #tpu.memory_space<vmem>>, vector<1x128xf32>
    %c9_148 = arith.constant 9 : index
    %c0_149 = arith.constant 0 : index
    %c0_150 = arith.constant 0 : index
    %181 = vector.load %arg11[%c9_148, %c0_149, %c0_150] : memref<11x26x128xf32, #tpu.memory_space<vmem>>, vector<1x16x128xf32>
    %182 = vector.shape_cast %181 : vector<1x16x128xf32> to vector<16x128xf32>
    %183 = vector.broadcast %180 : vector<1x128xf32> to vector<16x128xf32>
    %184 = arith.mulf %182, %183 : vector<16x128xf32>
    %185 = arith.addf %161, %184 : vector<16x128xf32>
    %c10_151 = arith.constant 10 : index
    %c0_152 = arith.constant 0 : index
    %186 = vector.load %arg4[%c10_151, %c0_152] : memref<121x128xf32, #tpu.memory_space<vmem>>, vector<1x128xf32>
    %c10_153 = arith.constant 10 : index
    %c0_154 = arith.constant 0 : index
    %c0_155 = arith.constant 0 : index
    %187 = vector.load %arg11[%c10_153, %c0_154, %c0_155] : memref<11x26x128xf32, #tpu.memory_space<vmem>>, vector<1x16x128xf32>
    %188 = vector.shape_cast %187 : vector<1x16x128xf32> to vector<16x128xf32>
    %189 = vector.broadcast %186 : vector<1x128xf32> to vector<16x128xf32>
    %190 = arith.mulf %188, %189 : vector<16x128xf32>
    %191 = arith.addf %167, %190 : vector<16x128xf32>
    %c11 = arith.constant 11 : index
    %c0_156 = arith.constant 0 : index
    %192 = vector.load %arg4[%c11, %c0_156] : memref<121x128xf32, #tpu.memory_space<vmem>>, vector<1x128xf32>
    %c0_157 = arith.constant 0 : index
    %c1_158 = arith.constant 1 : index
    %c0_159 = arith.constant 0 : index
    %193 = vector.load %arg11[%c0_157, %c1_158, %c0_159] : memref<11x26x128xf32, #tpu.memory_space<vmem>>, vector<1x16x128xf32>
    %194 = vector.shape_cast %193 : vector<1x16x128xf32> to vector<16x128xf32>
    %195 = vector.broadcast %192 : vector<1x128xf32> to vector<16x128xf32>
    %196 = arith.mulf %194, %195 : vector<16x128xf32>
    %197 = arith.addf %173, %196 : vector<16x128xf32>
    %c12 = arith.constant 12 : index
    %c0_160 = arith.constant 0 : index
    %198 = vector.load %arg4[%c12, %c0_160] : memref<121x128xf32, #tpu.memory_space<vmem>>, vector<1x128xf32>
    %c1_161 = arith.constant 1 : index
    %c1_162 = arith.constant 1 : index
    %c0_163 = arith.constant 0 : index
    %199 = vector.load %arg11[%c1_161, %c1_162, %c0_163] : memref<11x26x128xf32, #tpu.memory_space<vmem>>, vector<1x16x128xf32>
    %200 = vector.shape_cast %199 : vector<1x16x128xf32> to vector<16x128xf32>
    %201 = vector.broadcast %198 : vector<1x128xf32> to vector<16x128xf32>
    %202 = arith.mulf %200, %201 : vector<16x128xf32>
    %203 = arith.addf %179, %202 : vector<16x128xf32>
    %c13 = arith.constant 13 : index
    %c0_164 = arith.constant 0 : index
    %204 = vector.load %arg4[%c13, %c0_164] : memref<121x128xf32, #tpu.memory_space<vmem>>, vector<1x128xf32>
    %c2_165 = arith.constant 2 : index
    %c1_166 = arith.constant 1 : index
    %c0_167 = arith.constant 0 : index
    %205 = vector.load %arg11[%c2_165, %c1_166, %c0_167] : memref<11x26x128xf32, #tpu.memory_space<vmem>>, vector<1x16x128xf32>
    %206 = vector.shape_cast %205 : vector<1x16x128xf32> to vector<16x128xf32>
    %207 = vector.broadcast %204 : vector<1x128xf32> to vector<16x128xf32>
    %208 = arith.mulf %206, %207 : vector<16x128xf32>
    %209 = arith.addf %185, %208 : vector<16x128xf32>
    %c14 = arith.constant 14 : index
    %c0_168 = arith.constant 0 : index
    %210 = vector.load %arg4[%c14, %c0_168] : memref<121x128xf32, #tpu.memory_space<vmem>>, vector<1x128xf32>
    %c3_169 = arith.constant 3 : index
    %c1_170 = arith.constant 1 : index
    %c0_171 = arith.constant 0 : index
    %211 = vector.load %arg11[%c3_169, %c1_170, %c0_171] : memref<11x26x128xf32, #tpu.memory_space<vmem>>, vector<1x16x128xf32>
    %212 = vector.shape_cast %211 : vector<1x16x128xf32> to vector<16x128xf32>
    %213 = vector.broadcast %210 : vector<1x128xf32> to vector<16x128xf32>
    %214 = arith.mulf %212, %213 : vector<16x128xf32>
    %215 = arith.addf %191, %214 : vector<16x128xf32>
    %c15 = arith.constant 15 : index
    %c0_172 = arith.constant 0 : index
    %216 = vector.load %arg4[%c15, %c0_172] : memref<121x128xf32, #tpu.memory_space<vmem>>, vector<1x128xf32>
    %c4_173 = arith.constant 4 : index
    %c1_174 = arith.constant 1 : index
    %c0_175 = arith.constant 0 : index
    %217 = vector.load %arg11[%c4_173, %c1_174, %c0_175] : memref<11x26x128xf32, #tpu.memory_space<vmem>>, vector<1x16x128xf32>
    %218 = vector.shape_cast %217 : vector<1x16x128xf32> to vector<16x128xf32>
    %219 = vector.broadcast %216 : vector<1x128xf32> to vector<16x128xf32>
    %220 = arith.mulf %218, %219 : vector<16x128xf32>
    %221 = arith.addf %197, %220 : vector<16x128xf32>
    %c16 = arith.constant 16 : index
    %c0_176 = arith.constant 0 : index
    %222 = vector.load %arg4[%c16, %c0_176] : memref<121x128xf32, #tpu.memory_space<vmem>>, vector<1x128xf32>
    %c5_177 = arith.constant 5 : index
    %c1_178 = arith.constant 1 : index
    %c0_179 = arith.constant 0 : index
    %223 = vector.load %arg11[%c5_177, %c1_178, %c0_179] : memref<11x26x128xf32, #tpu.memory_space<vmem>>, vector<1x16x128xf32>
    %224 = vector.shape_cast %223 : vector<1x16x128xf32> to vector<16x128xf32>
    %225 = vector.broadcast %222 : vector<1x128xf32> to vector<16x128xf32>
    %226 = arith.mulf %224, %225 : vector<16x128xf32>
    %227 = arith.addf %203, %226 : vector<16x128xf32>
    %c17 = arith.constant 17 : index
    %c0_180 = arith.constant 0 : index
    %228 = vector.load %arg4[%c17, %c0_180] : memref<121x128xf32, #tpu.memory_space<vmem>>, vector<1x128xf32>
    %c6_181 = arith.constant 6 : index
    %c1_182 = arith.constant 1 : index
    %c0_183 = arith.constant 0 : index
    %229 = vector.load %arg11[%c6_181, %c1_182, %c0_183] : memref<11x26x128xf32, #tpu.memory_space<vmem>>, vector<1x16x128xf32>
    %230 = vector.shape_cast %229 : vector<1x16x128xf32> to vector<16x128xf32>
    %231 = vector.broadcast %228 : vector<1x128xf32> to vector<16x128xf32>
    %232 = arith.mulf %230, %231 : vector<16x128xf32>
    %233 = arith.addf %209, %232 : vector<16x128xf32>
    %c18 = arith.constant 18 : index
    %c0_184 = arith.constant 0 : index
    %234 = vector.load %arg4[%c18, %c0_184] : memref<121x128xf32, #tpu.memory_space<vmem>>, vector<1x128xf32>
    %c7_185 = arith.constant 7 : index
    %c1_186 = arith.constant 1 : index
    %c0_187 = arith.constant 0 : index
    %235 = vector.load %arg11[%c7_185, %c1_186, %c0_187] : memref<11x26x128xf32, #tpu.memory_space<vmem>>, vector<1x16x128xf32>
    %236 = vector.shape_cast %235 : vector<1x16x128xf32> to vector<16x128xf32>
    %237 = vector.broadcast %234 : vector<1x128xf32> to vector<16x128xf32>
    %238 = arith.mulf %236, %237 : vector<16x128xf32>
    %239 = arith.addf %215, %238 : vector<16x128xf32>
    %c19 = arith.constant 19 : index
    %c0_188 = arith.constant 0 : index
    %240 = vector.load %arg4[%c19, %c0_188] : memref<121x128xf32, #tpu.memory_space<vmem>>, vector<1x128xf32>
    %c8_189 = arith.constant 8 : index
    %c1_190 = arith.constant 1 : index
    %c0_191 = arith.constant 0 : index
    %241 = vector.load %arg11[%c8_189, %c1_190, %c0_191] : memref<11x26x128xf32, #tpu.memory_space<vmem>>, vector<1x16x128xf32>
    %242 = vector.shape_cast %241 : vector<1x16x128xf32> to vector<16x128xf32>
    %243 = vector.broadcast %240 : vector<1x128xf32> to vector<16x128xf32>
    %244 = arith.mulf %242, %243 : vector<16x128xf32>
    %245 = arith.addf %221, %244 : vector<16x128xf32>
    %c20 = arith.constant 20 : index
    %c0_192 = arith.constant 0 : index
    %246 = vector.load %arg4[%c20, %c0_192] : memref<121x128xf32, #tpu.memory_space<vmem>>, vector<1x128xf32>
    %c9_193 = arith.constant 9 : index
    %c1_194 = arith.constant 1 : index
    %c0_195 = arith.constant 0 : index
    %247 = vector.load %arg11[%c9_193, %c1_194, %c0_195] : memref<11x26x128xf32, #tpu.memory_space<vmem>>, vector<1x16x128xf32>
    %248 = vector.shape_cast %247 : vector<1x16x128xf32> to vector<16x128xf32>
    %249 = vector.broadcast %246 : vector<1x128xf32> to vector<16x128xf32>
    %250 = arith.mulf %248, %249 : vector<16x128xf32>
    %251 = arith.addf %227, %250 : vector<16x128xf32>
    %c21_196 = arith.constant 21 : index
    %c0_197 = arith.constant 0 : index
    %252 = vector.load %arg4[%c21_196, %c0_197] : memref<121x128xf32, #tpu.memory_space<vmem>>, vector<1x128xf32>
    %c10_198 = arith.constant 10 : index
    %c1_199 = arith.constant 1 : index
    %c0_200 = arith.constant 0 : index
    %253 = vector.load %arg11[%c10_198, %c1_199, %c0_200] : memref<11x26x128xf32, #tpu.memory_space<vmem>>, vector<1x16x128xf32>
    %254 = vector.shape_cast %253 : vector<1x16x128xf32> to vector<16x128xf32>
    %255 = vector.broadcast %252 : vector<1x128xf32> to vector<16x128xf32>
    %256 = arith.mulf %254, %255 : vector<16x128xf32>
    %257 = arith.addf %233, %256 : vector<16x128xf32>
    %c22 = arith.constant 22 : index
    %c0_201 = arith.constant 0 : index
    %258 = vector.load %arg4[%c22, %c0_201] : memref<121x128xf32, #tpu.memory_space<vmem>>, vector<1x128xf32>
    %c0_202 = arith.constant 0 : index
    %c2_203 = arith.constant 2 : index
    %c0_204 = arith.constant 0 : index
    %259 = vector.load %arg11[%c0_202, %c2_203, %c0_204] : memref<11x26x128xf32, #tpu.memory_space<vmem>>, vector<1x16x128xf32>
    %260 = vector.shape_cast %259 : vector<1x16x128xf32> to vector<16x128xf32>
    %261 = vector.broadcast %258 : vector<1x128xf32> to vector<16x128xf32>
    %262 = arith.mulf %260, %261 : vector<16x128xf32>
    %263 = arith.addf %239, %262 : vector<16x128xf32>
    %c23 = arith.constant 23 : index
    %c0_205 = arith.constant 0 : index
    %264 = vector.load %arg4[%c23, %c0_205] : memref<121x128xf32, #tpu.memory_space<vmem>>, vector<1x128xf32>
    %c1_206 = arith.constant 1 : index
    %c2_207 = arith.constant 2 : index
    %c0_208 = arith.constant 0 : index
    %265 = vector.load %arg11[%c1_206, %c2_207, %c0_208] : memref<11x26x128xf32, #tpu.memory_space<vmem>>, vector<1x16x128xf32>
    %266 = vector.shape_cast %265 : vector<1x16x128xf32> to vector<16x128xf32>
    %267 = vector.broadcast %264 : vector<1x128xf32> to vector<16x128xf32>
    %268 = arith.mulf %266, %267 : vector<16x128xf32>
    %269 = arith.addf %245, %268 : vector<16x128xf32>
    %c24 = arith.constant 24 : index
    %c0_209 = arith.constant 0 : index
    %270 = vector.load %arg4[%c24, %c0_209] : memref<121x128xf32, #tpu.memory_space<vmem>>, vector<1x128xf32>
    %c2_210 = arith.constant 2 : index
    %c2_211 = arith.constant 2 : index
    %c0_212 = arith.constant 0 : index
    %271 = vector.load %arg11[%c2_210, %c2_211, %c0_212] : memref<11x26x128xf32, #tpu.memory_space<vmem>>, vector<1x16x128xf32>
    %272 = vector.shape_cast %271 : vector<1x16x128xf32> to vector<16x128xf32>
    %273 = vector.broadcast %270 : vector<1x128xf32> to vector<16x128xf32>
    %274 = arith.mulf %272, %273 : vector<16x128xf32>
    %275 = arith.addf %251, %274 : vector<16x128xf32>
    %c25 = arith.constant 25 : index
    %c0_213 = arith.constant 0 : index
    %276 = vector.load %arg4[%c25, %c0_213] : memref<121x128xf32, #tpu.memory_space<vmem>>, vector<1x128xf32>
    %c3_214 = arith.constant 3 : index
    %c2_215 = arith.constant 2 : index
    %c0_216 = arith.constant 0 : index
    %277 = vector.load %arg11[%c3_214, %c2_215, %c0_216] : memref<11x26x128xf32, #tpu.memory_space<vmem>>, vector<1x16x128xf32>
    %278 = vector.shape_cast %277 : vector<1x16x128xf32> to vector<16x128xf32>
    %279 = vector.broadcast %276 : vector<1x128xf32> to vector<16x128xf32>
    %280 = arith.mulf %278, %279 : vector<16x128xf32>
    %281 = arith.addf %257, %280 : vector<16x128xf32>
    %c26 = arith.constant 26 : index
    %c0_217 = arith.constant 0 : index
    %282 = vector.load %arg4[%c26, %c0_217] : memref<121x128xf32, #tpu.memory_space<vmem>>, vector<1x128xf32>
    %c4_218 = arith.constant 4 : index
    %c2_219 = arith.constant 2 : index
    %c0_220 = arith.constant 0 : index
    %283 = vector.load %arg11[%c4_218, %c2_219, %c0_220] : memref<11x26x128xf32, #tpu.memory_space<vmem>>, vector<1x16x128xf32>
    %284 = vector.shape_cast %283 : vector<1x16x128xf32> to vector<16x128xf32>
    %285 = vector.broadcast %282 : vector<1x128xf32> to vector<16x128xf32>
    %286 = arith.mulf %284, %285 : vector<16x128xf32>
    %287 = arith.addf %263, %286 : vector<16x128xf32>
    %c27 = arith.constant 27 : index
    %c0_221 = arith.constant 0 : index
    %288 = vector.load %arg4[%c27, %c0_221] : memref<121x128xf32, #tpu.memory_space<vmem>>, vector<1x128xf32>
    %c5_222 = arith.constant 5 : index
    %c2_223 = arith.constant 2 : index
    %c0_224 = arith.constant 0 : index
    %289 = vector.load %arg11[%c5_222, %c2_223, %c0_224] : memref<11x26x128xf32, #tpu.memory_space<vmem>>, vector<1x16x128xf32>
    %290 = vector.shape_cast %289 : vector<1x16x128xf32> to vector<16x128xf32>
    %291 = vector.broadcast %288 : vector<1x128xf32> to vector<16x128xf32>
    %292 = arith.mulf %290, %291 : vector<16x128xf32>
    %293 = arith.addf %269, %292 : vector<16x128xf32>
    %c28 = arith.constant 28 : index
    %c0_225 = arith.constant 0 : index
    %294 = vector.load %arg4[%c28, %c0_225] : memref<121x128xf32, #tpu.memory_space<vmem>>, vector<1x128xf32>
    %c6_226 = arith.constant 6 : index
    %c2_227 = arith.constant 2 : index
    %c0_228 = arith.constant 0 : index
    %295 = vector.load %arg11[%c6_226, %c2_227, %c0_228] : memref<11x26x128xf32, #tpu.memory_space<vmem>>, vector<1x16x128xf32>
    %296 = vector.shape_cast %295 : vector<1x16x128xf32> to vector<16x128xf32>
    %297 = vector.broadcast %294 : vector<1x128xf32> to vector<16x128xf32>
    %298 = arith.mulf %296, %297 : vector<16x128xf32>
    %299 = arith.addf %275, %298 : vector<16x128xf32>
    %c29 = arith.constant 29 : index
    %c0_229 = arith.constant 0 : index
    %300 = vector.load %arg4[%c29, %c0_229] : memref<121x128xf32, #tpu.memory_space<vmem>>, vector<1x128xf32>
    %c7_230 = arith.constant 7 : index
    %c2_231 = arith.constant 2 : index
    %c0_232 = arith.constant 0 : index
    %301 = vector.load %arg11[%c7_230, %c2_231, %c0_232] : memref<11x26x128xf32, #tpu.memory_space<vmem>>, vector<1x16x128xf32>
    %302 = vector.shape_cast %301 : vector<1x16x128xf32> to vector<16x128xf32>
    %303 = vector.broadcast %300 : vector<1x128xf32> to vector<16x128xf32>
    %304 = arith.mulf %302, %303 : vector<16x128xf32>
    %305 = arith.addf %281, %304 : vector<16x128xf32>
    %c30 = arith.constant 30 : index
    %c0_233 = arith.constant 0 : index
    %306 = vector.load %arg4[%c30, %c0_233] : memref<121x128xf32, #tpu.memory_space<vmem>>, vector<1x128xf32>
    %c8_234 = arith.constant 8 : index
    %c2_235 = arith.constant 2 : index
    %c0_236 = arith.constant 0 : index
    %307 = vector.load %arg11[%c8_234, %c2_235, %c0_236] : memref<11x26x128xf32, #tpu.memory_space<vmem>>, vector<1x16x128xf32>
    %308 = vector.shape_cast %307 : vector<1x16x128xf32> to vector<16x128xf32>
    %309 = vector.broadcast %306 : vector<1x128xf32> to vector<16x128xf32>
    %310 = arith.mulf %308, %309 : vector<16x128xf32>
    %311 = arith.addf %287, %310 : vector<16x128xf32>
    %c31 = arith.constant 31 : index
    %c0_237 = arith.constant 0 : index
    %312 = vector.load %arg4[%c31, %c0_237] : memref<121x128xf32, #tpu.memory_space<vmem>>, vector<1x128xf32>
    %c9_238 = arith.constant 9 : index
    %c2_239 = arith.constant 2 : index
    %c0_240 = arith.constant 0 : index
    %313 = vector.load %arg11[%c9_238, %c2_239, %c0_240] : memref<11x26x128xf32, #tpu.memory_space<vmem>>, vector<1x16x128xf32>
    %314 = vector.shape_cast %313 : vector<1x16x128xf32> to vector<16x128xf32>
    %315 = vector.broadcast %312 : vector<1x128xf32> to vector<16x128xf32>
    %316 = arith.mulf %314, %315 : vector<16x128xf32>
    %317 = arith.addf %293, %316 : vector<16x128xf32>
    %c32 = arith.constant 32 : index
    %c0_241 = arith.constant 0 : index
    %318 = vector.load %arg4[%c32, %c0_241] : memref<121x128xf32, #tpu.memory_space<vmem>>, vector<1x128xf32>
    %c10_242 = arith.constant 10 : index
    %c2_243 = arith.constant 2 : index
    %c0_244 = arith.constant 0 : index
    %319 = vector.load %arg11[%c10_242, %c2_243, %c0_244] : memref<11x26x128xf32, #tpu.memory_space<vmem>>, vector<1x16x128xf32>
    %320 = vector.shape_cast %319 : vector<1x16x128xf32> to vector<16x128xf32>
    %321 = vector.broadcast %318 : vector<1x128xf32> to vector<16x128xf32>
    %322 = arith.mulf %320, %321 : vector<16x128xf32>
    %323 = arith.addf %299, %322 : vector<16x128xf32>
    %c33 = arith.constant 33 : index
    %c0_245 = arith.constant 0 : index
    %324 = vector.load %arg4[%c33, %c0_245] : memref<121x128xf32, #tpu.memory_space<vmem>>, vector<1x128xf32>
    %c0_246 = arith.constant 0 : index
    %c3_247 = arith.constant 3 : index
    %c0_248 = arith.constant 0 : index
    %325 = vector.load %arg11[%c0_246, %c3_247, %c0_248] : memref<11x26x128xf32, #tpu.memory_space<vmem>>, vector<1x16x128xf32>
    %326 = vector.shape_cast %325 : vector<1x16x128xf32> to vector<16x128xf32>
    %327 = vector.broadcast %324 : vector<1x128xf32> to vector<16x128xf32>
    %328 = arith.mulf %326, %327 : vector<16x128xf32>
    %329 = arith.addf %305, %328 : vector<16x128xf32>
    %c34 = arith.constant 34 : index
    %c0_249 = arith.constant 0 : index
    %330 = vector.load %arg4[%c34, %c0_249] : memref<121x128xf32, #tpu.memory_space<vmem>>, vector<1x128xf32>
    %c1_250 = arith.constant 1 : index
    %c3_251 = arith.constant 3 : index
    %c0_252 = arith.constant 0 : index
    %331 = vector.load %arg11[%c1_250, %c3_251, %c0_252] : memref<11x26x128xf32, #tpu.memory_space<vmem>>, vector<1x16x128xf32>
    %332 = vector.shape_cast %331 : vector<1x16x128xf32> to vector<16x128xf32>
    %333 = vector.broadcast %330 : vector<1x128xf32> to vector<16x128xf32>
    %334 = arith.mulf %332, %333 : vector<16x128xf32>
    %335 = arith.addf %311, %334 : vector<16x128xf32>
    %c35 = arith.constant 35 : index
    %c0_253 = arith.constant 0 : index
    %336 = vector.load %arg4[%c35, %c0_253] : memref<121x128xf32, #tpu.memory_space<vmem>>, vector<1x128xf32>
    %c2_254 = arith.constant 2 : index
    %c3_255 = arith.constant 3 : index
    %c0_256 = arith.constant 0 : index
    %337 = vector.load %arg11[%c2_254, %c3_255, %c0_256] : memref<11x26x128xf32, #tpu.memory_space<vmem>>, vector<1x16x128xf32>
    %338 = vector.shape_cast %337 : vector<1x16x128xf32> to vector<16x128xf32>
    %339 = vector.broadcast %336 : vector<1x128xf32> to vector<16x128xf32>
    %340 = arith.mulf %338, %339 : vector<16x128xf32>
    %341 = arith.addf %317, %340 : vector<16x128xf32>
    %c36 = arith.constant 36 : index
    %c0_257 = arith.constant 0 : index
    %342 = vector.load %arg4[%c36, %c0_257] : memref<121x128xf32, #tpu.memory_space<vmem>>, vector<1x128xf32>
    %c3_258 = arith.constant 3 : index
    %c3_259 = arith.constant 3 : index
    %c0_260 = arith.constant 0 : index
    %343 = vector.load %arg11[%c3_258, %c3_259, %c0_260] : memref<11x26x128xf32, #tpu.memory_space<vmem>>, vector<1x16x128xf32>
    %344 = vector.shape_cast %343 : vector<1x16x128xf32> to vector<16x128xf32>
    %345 = vector.broadcast %342 : vector<1x128xf32> to vector<16x128xf32>
    %346 = arith.mulf %344, %345 : vector<16x128xf32>
    %347 = arith.addf %323, %346 : vector<16x128xf32>
    %c37 = arith.constant 37 : index
    %c0_261 = arith.constant 0 : index
    %348 = vector.load %arg4[%c37, %c0_261] : memref<121x128xf32, #tpu.memory_space<vmem>>, vector<1x128xf32>
    %c4_262 = arith.constant 4 : index
    %c3_263 = arith.constant 3 : index
    %c0_264 = arith.constant 0 : index
    %349 = vector.load %arg11[%c4_262, %c3_263, %c0_264] : memref<11x26x128xf32, #tpu.memory_space<vmem>>, vector<1x16x128xf32>
    %350 = vector.shape_cast %349 : vector<1x16x128xf32> to vector<16x128xf32>
    %351 = vector.broadcast %348 : vector<1x128xf32> to vector<16x128xf32>
    %352 = arith.mulf %350, %351 : vector<16x128xf32>
    %353 = arith.addf %329, %352 : vector<16x128xf32>
    %c38 = arith.constant 38 : index
    %c0_265 = arith.constant 0 : index
    %354 = vector.load %arg4[%c38, %c0_265] : memref<121x128xf32, #tpu.memory_space<vmem>>, vector<1x128xf32>
    %c5_266 = arith.constant 5 : index
    %c3_267 = arith.constant 3 : index
    %c0_268 = arith.constant 0 : index
    %355 = vector.load %arg11[%c5_266, %c3_267, %c0_268] : memref<11x26x128xf32, #tpu.memory_space<vmem>>, vector<1x16x128xf32>
    %356 = vector.shape_cast %355 : vector<1x16x128xf32> to vector<16x128xf32>
    %357 = vector.broadcast %354 : vector<1x128xf32> to vector<16x128xf32>
    %358 = arith.mulf %356, %357 : vector<16x128xf32>
    %359 = arith.addf %335, %358 : vector<16x128xf32>
    %c39 = arith.constant 39 : index
    %c0_269 = arith.constant 0 : index
    %360 = vector.load %arg4[%c39, %c0_269] : memref<121x128xf32, #tpu.memory_space<vmem>>, vector<1x128xf32>
    %c6_270 = arith.constant 6 : index
    %c3_271 = arith.constant 3 : index
    %c0_272 = arith.constant 0 : index
    %361 = vector.load %arg11[%c6_270, %c3_271, %c0_272] : memref<11x26x128xf32, #tpu.memory_space<vmem>>, vector<1x16x128xf32>
    %362 = vector.shape_cast %361 : vector<1x16x128xf32> to vector<16x128xf32>
    %363 = vector.broadcast %360 : vector<1x128xf32> to vector<16x128xf32>
    %364 = arith.mulf %362, %363 : vector<16x128xf32>
    %365 = arith.addf %341, %364 : vector<16x128xf32>
    %c40 = arith.constant 40 : index
    %c0_273 = arith.constant 0 : index
    %366 = vector.load %arg4[%c40, %c0_273] : memref<121x128xf32, #tpu.memory_space<vmem>>, vector<1x128xf32>
    %c7_274 = arith.constant 7 : index
    %c3_275 = arith.constant 3 : index
    %c0_276 = arith.constant 0 : index
    %367 = vector.load %arg11[%c7_274, %c3_275, %c0_276] : memref<11x26x128xf32, #tpu.memory_space<vmem>>, vector<1x16x128xf32>
    %368 = vector.shape_cast %367 : vector<1x16x128xf32> to vector<16x128xf32>
    %369 = vector.broadcast %366 : vector<1x128xf32> to vector<16x128xf32>
    %370 = arith.mulf %368, %369 : vector<16x128xf32>
    %371 = arith.addf %347, %370 : vector<16x128xf32>
    %c41 = arith.constant 41 : index
    %c0_277 = arith.constant 0 : index
    %372 = vector.load %arg4[%c41, %c0_277] : memref<121x128xf32, #tpu.memory_space<vmem>>, vector<1x128xf32>
    %c8_278 = arith.constant 8 : index
    %c3_279 = arith.constant 3 : index
    %c0_280 = arith.constant 0 : index
    %373 = vector.load %arg11[%c8_278, %c3_279, %c0_280] : memref<11x26x128xf32, #tpu.memory_space<vmem>>, vector<1x16x128xf32>
    %374 = vector.shape_cast %373 : vector<1x16x128xf32> to vector<16x128xf32>
    %375 = vector.broadcast %372 : vector<1x128xf32> to vector<16x128xf32>
    %376 = arith.mulf %374, %375 : vector<16x128xf32>
    %377 = arith.addf %353, %376 : vector<16x128xf32>
    %c42 = arith.constant 42 : index
    %c0_281 = arith.constant 0 : index
    %378 = vector.load %arg4[%c42, %c0_281] : memref<121x128xf32, #tpu.memory_space<vmem>>, vector<1x128xf32>
    %c9_282 = arith.constant 9 : index
    %c3_283 = arith.constant 3 : index
    %c0_284 = arith.constant 0 : index
    %379 = vector.load %arg11[%c9_282, %c3_283, %c0_284] : memref<11x26x128xf32, #tpu.memory_space<vmem>>, vector<1x16x128xf32>
    %380 = vector.shape_cast %379 : vector<1x16x128xf32> to vector<16x128xf32>
    %381 = vector.broadcast %378 : vector<1x128xf32> to vector<16x128xf32>
    %382 = arith.mulf %380, %381 : vector<16x128xf32>
    %383 = arith.addf %359, %382 : vector<16x128xf32>
    %c43 = arith.constant 43 : index
    %c0_285 = arith.constant 0 : index
    %384 = vector.load %arg4[%c43, %c0_285] : memref<121x128xf32, #tpu.memory_space<vmem>>, vector<1x128xf32>
    %c10_286 = arith.constant 10 : index
    %c3_287 = arith.constant 3 : index
    %c0_288 = arith.constant 0 : index
    %385 = vector.load %arg11[%c10_286, %c3_287, %c0_288] : memref<11x26x128xf32, #tpu.memory_space<vmem>>, vector<1x16x128xf32>
    %386 = vector.shape_cast %385 : vector<1x16x128xf32> to vector<16x128xf32>
    %387 = vector.broadcast %384 : vector<1x128xf32> to vector<16x128xf32>
    %388 = arith.mulf %386, %387 : vector<16x128xf32>
    %389 = arith.addf %365, %388 : vector<16x128xf32>
    %c44 = arith.constant 44 : index
    %c0_289 = arith.constant 0 : index
    %390 = vector.load %arg4[%c44, %c0_289] : memref<121x128xf32, #tpu.memory_space<vmem>>, vector<1x128xf32>
    %c0_290 = arith.constant 0 : index
    %c4_291 = arith.constant 4 : index
    %c0_292 = arith.constant 0 : index
    %391 = vector.load %arg11[%c0_290, %c4_291, %c0_292] : memref<11x26x128xf32, #tpu.memory_space<vmem>>, vector<1x16x128xf32>
    %392 = vector.shape_cast %391 : vector<1x16x128xf32> to vector<16x128xf32>
    %393 = vector.broadcast %390 : vector<1x128xf32> to vector<16x128xf32>
    %394 = arith.mulf %392, %393 : vector<16x128xf32>
    %395 = arith.addf %371, %394 : vector<16x128xf32>
    %c45 = arith.constant 45 : index
    %c0_293 = arith.constant 0 : index
    %396 = vector.load %arg4[%c45, %c0_293] : memref<121x128xf32, #tpu.memory_space<vmem>>, vector<1x128xf32>
    %c1_294 = arith.constant 1 : index
    %c4_295 = arith.constant 4 : index
    %c0_296 = arith.constant 0 : index
    %397 = vector.load %arg11[%c1_294, %c4_295, %c0_296] : memref<11x26x128xf32, #tpu.memory_space<vmem>>, vector<1x16x128xf32>
    %398 = vector.shape_cast %397 : vector<1x16x128xf32> to vector<16x128xf32>
    %399 = vector.broadcast %396 : vector<1x128xf32> to vector<16x128xf32>
    %400 = arith.mulf %398, %399 : vector<16x128xf32>
    %401 = arith.addf %377, %400 : vector<16x128xf32>
    %c46 = arith.constant 46 : index
    %c0_297 = arith.constant 0 : index
    %402 = vector.load %arg4[%c46, %c0_297] : memref<121x128xf32, #tpu.memory_space<vmem>>, vector<1x128xf32>
    %c2_298 = arith.constant 2 : index
    %c4_299 = arith.constant 4 : index
    %c0_300 = arith.constant 0 : index
    %403 = vector.load %arg11[%c2_298, %c4_299, %c0_300] : memref<11x26x128xf32, #tpu.memory_space<vmem>>, vector<1x16x128xf32>
    %404 = vector.shape_cast %403 : vector<1x16x128xf32> to vector<16x128xf32>
    %405 = vector.broadcast %402 : vector<1x128xf32> to vector<16x128xf32>
    %406 = arith.mulf %404, %405 : vector<16x128xf32>
    %407 = arith.addf %383, %406 : vector<16x128xf32>
    %c47 = arith.constant 47 : index
    %c0_301 = arith.constant 0 : index
    %408 = vector.load %arg4[%c47, %c0_301] : memref<121x128xf32, #tpu.memory_space<vmem>>, vector<1x128xf32>
    %c3_302 = arith.constant 3 : index
    %c4_303 = arith.constant 4 : index
    %c0_304 = arith.constant 0 : index
    %409 = vector.load %arg11[%c3_302, %c4_303, %c0_304] : memref<11x26x128xf32, #tpu.memory_space<vmem>>, vector<1x16x128xf32>
    %410 = vector.shape_cast %409 : vector<1x16x128xf32> to vector<16x128xf32>
    %411 = vector.broadcast %408 : vector<1x128xf32> to vector<16x128xf32>
    %412 = arith.mulf %410, %411 : vector<16x128xf32>
    %413 = arith.addf %389, %412 : vector<16x128xf32>
    %c48 = arith.constant 48 : index
    %c0_305 = arith.constant 0 : index
    %414 = vector.load %arg4[%c48, %c0_305] : memref<121x128xf32, #tpu.memory_space<vmem>>, vector<1x128xf32>
    %c4_306 = arith.constant 4 : index
    %c4_307 = arith.constant 4 : index
    %c0_308 = arith.constant 0 : index
    %415 = vector.load %arg11[%c4_306, %c4_307, %c0_308] : memref<11x26x128xf32, #tpu.memory_space<vmem>>, vector<1x16x128xf32>
    %416 = vector.shape_cast %415 : vector<1x16x128xf32> to vector<16x128xf32>
    %417 = vector.broadcast %414 : vector<1x128xf32> to vector<16x128xf32>
    %418 = arith.mulf %416, %417 : vector<16x128xf32>
    %419 = arith.addf %395, %418 : vector<16x128xf32>
    %c49 = arith.constant 49 : index
    %c0_309 = arith.constant 0 : index
    %420 = vector.load %arg4[%c49, %c0_309] : memref<121x128xf32, #tpu.memory_space<vmem>>, vector<1x128xf32>
    %c5_310 = arith.constant 5 : index
    %c4_311 = arith.constant 4 : index
    %c0_312 = arith.constant 0 : index
    %421 = vector.load %arg11[%c5_310, %c4_311, %c0_312] : memref<11x26x128xf32, #tpu.memory_space<vmem>>, vector<1x16x128xf32>
    %422 = vector.shape_cast %421 : vector<1x16x128xf32> to vector<16x128xf32>
    %423 = vector.broadcast %420 : vector<1x128xf32> to vector<16x128xf32>
    %424 = arith.mulf %422, %423 : vector<16x128xf32>
    %425 = arith.addf %401, %424 : vector<16x128xf32>
    %c50 = arith.constant 50 : index
    %c0_313 = arith.constant 0 : index
    %426 = vector.load %arg4[%c50, %c0_313] : memref<121x128xf32, #tpu.memory_space<vmem>>, vector<1x128xf32>
    %c6_314 = arith.constant 6 : index
    %c4_315 = arith.constant 4 : index
    %c0_316 = arith.constant 0 : index
    %427 = vector.load %arg11[%c6_314, %c4_315, %c0_316] : memref<11x26x128xf32, #tpu.memory_space<vmem>>, vector<1x16x128xf32>
    %428 = vector.shape_cast %427 : vector<1x16x128xf32> to vector<16x128xf32>
    %429 = vector.broadcast %426 : vector<1x128xf32> to vector<16x128xf32>
    %430 = arith.mulf %428, %429 : vector<16x128xf32>
    %431 = arith.addf %407, %430 : vector<16x128xf32>
    %c51 = arith.constant 51 : index
    %c0_317 = arith.constant 0 : index
    %432 = vector.load %arg4[%c51, %c0_317] : memref<121x128xf32, #tpu.memory_space<vmem>>, vector<1x128xf32>
    %c7_318 = arith.constant 7 : index
    %c4_319 = arith.constant 4 : index
    %c0_320 = arith.constant 0 : index
    %433 = vector.load %arg11[%c7_318, %c4_319, %c0_320] : memref<11x26x128xf32, #tpu.memory_space<vmem>>, vector<1x16x128xf32>
    %434 = vector.shape_cast %433 : vector<1x16x128xf32> to vector<16x128xf32>
    %435 = vector.broadcast %432 : vector<1x128xf32> to vector<16x128xf32>
    %436 = arith.mulf %434, %435 : vector<16x128xf32>
    %437 = arith.addf %413, %436 : vector<16x128xf32>
    %c52 = arith.constant 52 : index
    %c0_321 = arith.constant 0 : index
    %438 = vector.load %arg4[%c52, %c0_321] : memref<121x128xf32, #tpu.memory_space<vmem>>, vector<1x128xf32>
    %c8_322 = arith.constant 8 : index
    %c4_323 = arith.constant 4 : index
    %c0_324 = arith.constant 0 : index
    %439 = vector.load %arg11[%c8_322, %c4_323, %c0_324] : memref<11x26x128xf32, #tpu.memory_space<vmem>>, vector<1x16x128xf32>
    %440 = vector.shape_cast %439 : vector<1x16x128xf32> to vector<16x128xf32>
    %441 = vector.broadcast %438 : vector<1x128xf32> to vector<16x128xf32>
    %442 = arith.mulf %440, %441 : vector<16x128xf32>
    %443 = arith.addf %419, %442 : vector<16x128xf32>
    %c53 = arith.constant 53 : index
    %c0_325 = arith.constant 0 : index
    %444 = vector.load %arg4[%c53, %c0_325] : memref<121x128xf32, #tpu.memory_space<vmem>>, vector<1x128xf32>
    %c9_326 = arith.constant 9 : index
    %c4_327 = arith.constant 4 : index
    %c0_328 = arith.constant 0 : index
    %445 = vector.load %arg11[%c9_326, %c4_327, %c0_328] : memref<11x26x128xf32, #tpu.memory_space<vmem>>, vector<1x16x128xf32>
    %446 = vector.shape_cast %445 : vector<1x16x128xf32> to vector<16x128xf32>
    %447 = vector.broadcast %444 : vector<1x128xf32> to vector<16x128xf32>
    %448 = arith.mulf %446, %447 : vector<16x128xf32>
    %449 = arith.addf %425, %448 : vector<16x128xf32>
    %c54 = arith.constant 54 : index
    %c0_329 = arith.constant 0 : index
    %450 = vector.load %arg4[%c54, %c0_329] : memref<121x128xf32, #tpu.memory_space<vmem>>, vector<1x128xf32>
    %c10_330 = arith.constant 10 : index
    %c4_331 = arith.constant 4 : index
    %c0_332 = arith.constant 0 : index
    %451 = vector.load %arg11[%c10_330, %c4_331, %c0_332] : memref<11x26x128xf32, #tpu.memory_space<vmem>>, vector<1x16x128xf32>
    %452 = vector.shape_cast %451 : vector<1x16x128xf32> to vector<16x128xf32>
    %453 = vector.broadcast %450 : vector<1x128xf32> to vector<16x128xf32>
    %454 = arith.mulf %452, %453 : vector<16x128xf32>
    %455 = arith.addf %431, %454 : vector<16x128xf32>
    %c55 = arith.constant 55 : index
    %c0_333 = arith.constant 0 : index
    %456 = vector.load %arg4[%c55, %c0_333] : memref<121x128xf32, #tpu.memory_space<vmem>>, vector<1x128xf32>
    %c0_334 = arith.constant 0 : index
    %c5_335 = arith.constant 5 : index
    %c0_336 = arith.constant 0 : index
    %457 = vector.load %arg11[%c0_334, %c5_335, %c0_336] : memref<11x26x128xf32, #tpu.memory_space<vmem>>, vector<1x16x128xf32>
    %458 = vector.shape_cast %457 : vector<1x16x128xf32> to vector<16x128xf32>
    %459 = vector.broadcast %456 : vector<1x128xf32> to vector<16x128xf32>
    %460 = arith.mulf %458, %459 : vector<16x128xf32>
    %461 = arith.addf %437, %460 : vector<16x128xf32>
    %c56 = arith.constant 56 : index
    %c0_337 = arith.constant 0 : index
    %462 = vector.load %arg4[%c56, %c0_337] : memref<121x128xf32, #tpu.memory_space<vmem>>, vector<1x128xf32>
    %c1_338 = arith.constant 1 : index
    %c5_339 = arith.constant 5 : index
    %c0_340 = arith.constant 0 : index
    %463 = vector.load %arg11[%c1_338, %c5_339, %c0_340] : memref<11x26x128xf32, #tpu.memory_space<vmem>>, vector<1x16x128xf32>
    %464 = vector.shape_cast %463 : vector<1x16x128xf32> to vector<16x128xf32>
    %465 = vector.broadcast %462 : vector<1x128xf32> to vector<16x128xf32>
    %466 = arith.mulf %464, %465 : vector<16x128xf32>
    %467 = arith.addf %443, %466 : vector<16x128xf32>
    %c57 = arith.constant 57 : index
    %c0_341 = arith.constant 0 : index
    %468 = vector.load %arg4[%c57, %c0_341] : memref<121x128xf32, #tpu.memory_space<vmem>>, vector<1x128xf32>
    %c2_342 = arith.constant 2 : index
    %c5_343 = arith.constant 5 : index
    %c0_344 = arith.constant 0 : index
    %469 = vector.load %arg11[%c2_342, %c5_343, %c0_344] : memref<11x26x128xf32, #tpu.memory_space<vmem>>, vector<1x16x128xf32>
    %470 = vector.shape_cast %469 : vector<1x16x128xf32> to vector<16x128xf32>
    %471 = vector.broadcast %468 : vector<1x128xf32> to vector<16x128xf32>
    %472 = arith.mulf %470, %471 : vector<16x128xf32>
    %473 = arith.addf %449, %472 : vector<16x128xf32>
    %c58 = arith.constant 58 : index
    %c0_345 = arith.constant 0 : index
    %474 = vector.load %arg4[%c58, %c0_345] : memref<121x128xf32, #tpu.memory_space<vmem>>, vector<1x128xf32>
    %c3_346 = arith.constant 3 : index
    %c5_347 = arith.constant 5 : index
    %c0_348 = arith.constant 0 : index
    %475 = vector.load %arg11[%c3_346, %c5_347, %c0_348] : memref<11x26x128xf32, #tpu.memory_space<vmem>>, vector<1x16x128xf32>
    %476 = vector.shape_cast %475 : vector<1x16x128xf32> to vector<16x128xf32>
    %477 = vector.broadcast %474 : vector<1x128xf32> to vector<16x128xf32>
    %478 = arith.mulf %476, %477 : vector<16x128xf32>
    %479 = arith.addf %455, %478 : vector<16x128xf32>
    %c59 = arith.constant 59 : index
    %c0_349 = arith.constant 0 : index
    %480 = vector.load %arg4[%c59, %c0_349] : memref<121x128xf32, #tpu.memory_space<vmem>>, vector<1x128xf32>
    %c4_350 = arith.constant 4 : index
    %c5_351 = arith.constant 5 : index
    %c0_352 = arith.constant 0 : index
    %481 = vector.load %arg11[%c4_350, %c5_351, %c0_352] : memref<11x26x128xf32, #tpu.memory_space<vmem>>, vector<1x16x128xf32>
    %482 = vector.shape_cast %481 : vector<1x16x128xf32> to vector<16x128xf32>
    %483 = vector.broadcast %480 : vector<1x128xf32> to vector<16x128xf32>
    %484 = arith.mulf %482, %483 : vector<16x128xf32>
    %485 = arith.addf %461, %484 : vector<16x128xf32>
    %c60 = arith.constant 60 : index
    %c0_353 = arith.constant 0 : index
    %486 = vector.load %arg4[%c60, %c0_353] : memref<121x128xf32, #tpu.memory_space<vmem>>, vector<1x128xf32>
    %c5_354 = arith.constant 5 : index
    %c5_355 = arith.constant 5 : index
    %c0_356 = arith.constant 0 : index
    %487 = vector.load %arg11[%c5_354, %c5_355, %c0_356] : memref<11x26x128xf32, #tpu.memory_space<vmem>>, vector<1x16x128xf32>
    %488 = vector.shape_cast %487 : vector<1x16x128xf32> to vector<16x128xf32>
    %489 = vector.broadcast %486 : vector<1x128xf32> to vector<16x128xf32>
    %490 = arith.mulf %488, %489 : vector<16x128xf32>
    %491 = arith.addf %467, %490 : vector<16x128xf32>
    %c61 = arith.constant 61 : index
    %c0_357 = arith.constant 0 : index
    %492 = vector.load %arg4[%c61, %c0_357] : memref<121x128xf32, #tpu.memory_space<vmem>>, vector<1x128xf32>
    %c6_358 = arith.constant 6 : index
    %c5_359 = arith.constant 5 : index
    %c0_360 = arith.constant 0 : index
    %493 = vector.load %arg11[%c6_358, %c5_359, %c0_360] : memref<11x26x128xf32, #tpu.memory_space<vmem>>, vector<1x16x128xf32>
    %494 = vector.shape_cast %493 : vector<1x16x128xf32> to vector<16x128xf32>
    %495 = vector.broadcast %492 : vector<1x128xf32> to vector<16x128xf32>
    %496 = arith.mulf %494, %495 : vector<16x128xf32>
    %497 = arith.addf %473, %496 : vector<16x128xf32>
    %c62 = arith.constant 62 : index
    %c0_361 = arith.constant 0 : index
    %498 = vector.load %arg4[%c62, %c0_361] : memref<121x128xf32, #tpu.memory_space<vmem>>, vector<1x128xf32>
    %c7_362 = arith.constant 7 : index
    %c5_363 = arith.constant 5 : index
    %c0_364 = arith.constant 0 : index
    %499 = vector.load %arg11[%c7_362, %c5_363, %c0_364] : memref<11x26x128xf32, #tpu.memory_space<vmem>>, vector<1x16x128xf32>
    %500 = vector.shape_cast %499 : vector<1x16x128xf32> to vector<16x128xf32>
    %501 = vector.broadcast %498 : vector<1x128xf32> to vector<16x128xf32>
    %502 = arith.mulf %500, %501 : vector<16x128xf32>
    %503 = arith.addf %479, %502 : vector<16x128xf32>
    %c63 = arith.constant 63 : index
    %c0_365 = arith.constant 0 : index
    %504 = vector.load %arg4[%c63, %c0_365] : memref<121x128xf32, #tpu.memory_space<vmem>>, vector<1x128xf32>
    %c8_366 = arith.constant 8 : index
    %c5_367 = arith.constant 5 : index
    %c0_368 = arith.constant 0 : index
    %505 = vector.load %arg11[%c8_366, %c5_367, %c0_368] : memref<11x26x128xf32, #tpu.memory_space<vmem>>, vector<1x16x128xf32>
    %506 = vector.shape_cast %505 : vector<1x16x128xf32> to vector<16x128xf32>
    %507 = vector.broadcast %504 : vector<1x128xf32> to vector<16x128xf32>
    %508 = arith.mulf %506, %507 : vector<16x128xf32>
    %509 = arith.addf %485, %508 : vector<16x128xf32>
    %c64 = arith.constant 64 : index
    %c0_369 = arith.constant 0 : index
    %510 = vector.load %arg4[%c64, %c0_369] : memref<121x128xf32, #tpu.memory_space<vmem>>, vector<1x128xf32>
    %c9_370 = arith.constant 9 : index
    %c5_371 = arith.constant 5 : index
    %c0_372 = arith.constant 0 : index
    %511 = vector.load %arg11[%c9_370, %c5_371, %c0_372] : memref<11x26x128xf32, #tpu.memory_space<vmem>>, vector<1x16x128xf32>
    %512 = vector.shape_cast %511 : vector<1x16x128xf32> to vector<16x128xf32>
    %513 = vector.broadcast %510 : vector<1x128xf32> to vector<16x128xf32>
    %514 = arith.mulf %512, %513 : vector<16x128xf32>
    %515 = arith.addf %491, %514 : vector<16x128xf32>
    %c65 = arith.constant 65 : index
    %c0_373 = arith.constant 0 : index
    %516 = vector.load %arg4[%c65, %c0_373] : memref<121x128xf32, #tpu.memory_space<vmem>>, vector<1x128xf32>
    %c10_374 = arith.constant 10 : index
    %c5_375 = arith.constant 5 : index
    %c0_376 = arith.constant 0 : index
    %517 = vector.load %arg11[%c10_374, %c5_375, %c0_376] : memref<11x26x128xf32, #tpu.memory_space<vmem>>, vector<1x16x128xf32>
    %518 = vector.shape_cast %517 : vector<1x16x128xf32> to vector<16x128xf32>
    %519 = vector.broadcast %516 : vector<1x128xf32> to vector<16x128xf32>
    %520 = arith.mulf %518, %519 : vector<16x128xf32>
    %521 = arith.addf %497, %520 : vector<16x128xf32>
    %c66 = arith.constant 66 : index
    %c0_377 = arith.constant 0 : index
    %522 = vector.load %arg4[%c66, %c0_377] : memref<121x128xf32, #tpu.memory_space<vmem>>, vector<1x128xf32>
    %c0_378 = arith.constant 0 : index
    %c6_379 = arith.constant 6 : index
    %c0_380 = arith.constant 0 : index
    %523 = vector.load %arg11[%c0_378, %c6_379, %c0_380] : memref<11x26x128xf32, #tpu.memory_space<vmem>>, vector<1x16x128xf32>
    %524 = vector.shape_cast %523 : vector<1x16x128xf32> to vector<16x128xf32>
    %525 = vector.broadcast %522 : vector<1x128xf32> to vector<16x128xf32>
    %526 = arith.mulf %524, %525 : vector<16x128xf32>
    %527 = arith.addf %503, %526 : vector<16x128xf32>
    %c67 = arith.constant 67 : index
    %c0_381 = arith.constant 0 : index
    %528 = vector.load %arg4[%c67, %c0_381] : memref<121x128xf32, #tpu.memory_space<vmem>>, vector<1x128xf32>
    %c1_382 = arith.constant 1 : index
    %c6_383 = arith.constant 6 : index
    %c0_384 = arith.constant 0 : index
    %529 = vector.load %arg11[%c1_382, %c6_383, %c0_384] : memref<11x26x128xf32, #tpu.memory_space<vmem>>, vector<1x16x128xf32>
    %530 = vector.shape_cast %529 : vector<1x16x128xf32> to vector<16x128xf32>
    %531 = vector.broadcast %528 : vector<1x128xf32> to vector<16x128xf32>
    %532 = arith.mulf %530, %531 : vector<16x128xf32>
    %533 = arith.addf %509, %532 : vector<16x128xf32>
    %c68 = arith.constant 68 : index
    %c0_385 = arith.constant 0 : index
    %534 = vector.load %arg4[%c68, %c0_385] : memref<121x128xf32, #tpu.memory_space<vmem>>, vector<1x128xf32>
    %c2_386 = arith.constant 2 : index
    %c6_387 = arith.constant 6 : index
    %c0_388 = arith.constant 0 : index
    %535 = vector.load %arg11[%c2_386, %c6_387, %c0_388] : memref<11x26x128xf32, #tpu.memory_space<vmem>>, vector<1x16x128xf32>
    %536 = vector.shape_cast %535 : vector<1x16x128xf32> to vector<16x128xf32>
    %537 = vector.broadcast %534 : vector<1x128xf32> to vector<16x128xf32>
    %538 = arith.mulf %536, %537 : vector<16x128xf32>
    %539 = arith.addf %515, %538 : vector<16x128xf32>
    %c69 = arith.constant 69 : index
    %c0_389 = arith.constant 0 : index
    %540 = vector.load %arg4[%c69, %c0_389] : memref<121x128xf32, #tpu.memory_space<vmem>>, vector<1x128xf32>
    %c3_390 = arith.constant 3 : index
    %c6_391 = arith.constant 6 : index
    %c0_392 = arith.constant 0 : index
    %541 = vector.load %arg11[%c3_390, %c6_391, %c0_392] : memref<11x26x128xf32, #tpu.memory_space<vmem>>, vector<1x16x128xf32>
    %542 = vector.shape_cast %541 : vector<1x16x128xf32> to vector<16x128xf32>
    %543 = vector.broadcast %540 : vector<1x128xf32> to vector<16x128xf32>
    %544 = arith.mulf %542, %543 : vector<16x128xf32>
    %545 = arith.addf %521, %544 : vector<16x128xf32>
    %c70 = arith.constant 70 : index
    %c0_393 = arith.constant 0 : index
    %546 = vector.load %arg4[%c70, %c0_393] : memref<121x128xf32, #tpu.memory_space<vmem>>, vector<1x128xf32>
    %c4_394 = arith.constant 4 : index
    %c6_395 = arith.constant 6 : index
    %c0_396 = arith.constant 0 : index
    %547 = vector.load %arg11[%c4_394, %c6_395, %c0_396] : memref<11x26x128xf32, #tpu.memory_space<vmem>>, vector<1x16x128xf32>
    %548 = vector.shape_cast %547 : vector<1x16x128xf32> to vector<16x128xf32>
    %549 = vector.broadcast %546 : vector<1x128xf32> to vector<16x128xf32>
    %550 = arith.mulf %548, %549 : vector<16x128xf32>
    %551 = arith.addf %527, %550 : vector<16x128xf32>
    %c71 = arith.constant 71 : index
    %c0_397 = arith.constant 0 : index
    %552 = vector.load %arg4[%c71, %c0_397] : memref<121x128xf32, #tpu.memory_space<vmem>>, vector<1x128xf32>
    %c5_398 = arith.constant 5 : index
    %c6_399 = arith.constant 6 : index
    %c0_400 = arith.constant 0 : index
    %553 = vector.load %arg11[%c5_398, %c6_399, %c0_400] : memref<11x26x128xf32, #tpu.memory_space<vmem>>, vector<1x16x128xf32>
    %554 = vector.shape_cast %553 : vector<1x16x128xf32> to vector<16x128xf32>
    %555 = vector.broadcast %552 : vector<1x128xf32> to vector<16x128xf32>
    %556 = arith.mulf %554, %555 : vector<16x128xf32>
    %557 = arith.addf %533, %556 : vector<16x128xf32>
    %c72 = arith.constant 72 : index
    %c0_401 = arith.constant 0 : index
    %558 = vector.load %arg4[%c72, %c0_401] : memref<121x128xf32, #tpu.memory_space<vmem>>, vector<1x128xf32>
    %c6_402 = arith.constant 6 : index
    %c6_403 = arith.constant 6 : index
    %c0_404 = arith.constant 0 : index
    %559 = vector.load %arg11[%c6_402, %c6_403, %c0_404] : memref<11x26x128xf32, #tpu.memory_space<vmem>>, vector<1x16x128xf32>
    %560 = vector.shape_cast %559 : vector<1x16x128xf32> to vector<16x128xf32>
    %561 = vector.broadcast %558 : vector<1x128xf32> to vector<16x128xf32>
    %562 = arith.mulf %560, %561 : vector<16x128xf32>
    %563 = arith.addf %539, %562 : vector<16x128xf32>
    %c73 = arith.constant 73 : index
    %c0_405 = arith.constant 0 : index
    %564 = vector.load %arg4[%c73, %c0_405] : memref<121x128xf32, #tpu.memory_space<vmem>>, vector<1x128xf32>
    %c7_406 = arith.constant 7 : index
    %c6_407 = arith.constant 6 : index
    %c0_408 = arith.constant 0 : index
    %565 = vector.load %arg11[%c7_406, %c6_407, %c0_408] : memref<11x26x128xf32, #tpu.memory_space<vmem>>, vector<1x16x128xf32>
    %566 = vector.shape_cast %565 : vector<1x16x128xf32> to vector<16x128xf32>
    %567 = vector.broadcast %564 : vector<1x128xf32> to vector<16x128xf32>
    %568 = arith.mulf %566, %567 : vector<16x128xf32>
    %569 = arith.addf %545, %568 : vector<16x128xf32>
    %c74 = arith.constant 74 : index
    %c0_409 = arith.constant 0 : index
    %570 = vector.load %arg4[%c74, %c0_409] : memref<121x128xf32, #tpu.memory_space<vmem>>, vector<1x128xf32>
    %c8_410 = arith.constant 8 : index
    %c6_411 = arith.constant 6 : index
    %c0_412 = arith.constant 0 : index
    %571 = vector.load %arg11[%c8_410, %c6_411, %c0_412] : memref<11x26x128xf32, #tpu.memory_space<vmem>>, vector<1x16x128xf32>
    %572 = vector.shape_cast %571 : vector<1x16x128xf32> to vector<16x128xf32>
    %573 = vector.broadcast %570 : vector<1x128xf32> to vector<16x128xf32>
    %574 = arith.mulf %572, %573 : vector<16x128xf32>
    %575 = arith.addf %551, %574 : vector<16x128xf32>
    %c75 = arith.constant 75 : index
    %c0_413 = arith.constant 0 : index
    %576 = vector.load %arg4[%c75, %c0_413] : memref<121x128xf32, #tpu.memory_space<vmem>>, vector<1x128xf32>
    %c9_414 = arith.constant 9 : index
    %c6_415 = arith.constant 6 : index
    %c0_416 = arith.constant 0 : index
    %577 = vector.load %arg11[%c9_414, %c6_415, %c0_416] : memref<11x26x128xf32, #tpu.memory_space<vmem>>, vector<1x16x128xf32>
    %578 = vector.shape_cast %577 : vector<1x16x128xf32> to vector<16x128xf32>
    %579 = vector.broadcast %576 : vector<1x128xf32> to vector<16x128xf32>
    %580 = arith.mulf %578, %579 : vector<16x128xf32>
    %581 = arith.addf %557, %580 : vector<16x128xf32>
    %c76 = arith.constant 76 : index
    %c0_417 = arith.constant 0 : index
    %582 = vector.load %arg4[%c76, %c0_417] : memref<121x128xf32, #tpu.memory_space<vmem>>, vector<1x128xf32>
    %c10_418 = arith.constant 10 : index
    %c6_419 = arith.constant 6 : index
    %c0_420 = arith.constant 0 : index
    %583 = vector.load %arg11[%c10_418, %c6_419, %c0_420] : memref<11x26x128xf32, #tpu.memory_space<vmem>>, vector<1x16x128xf32>
    %584 = vector.shape_cast %583 : vector<1x16x128xf32> to vector<16x128xf32>
    %585 = vector.broadcast %582 : vector<1x128xf32> to vector<16x128xf32>
    %586 = arith.mulf %584, %585 : vector<16x128xf32>
    %587 = arith.addf %563, %586 : vector<16x128xf32>
    %c77 = arith.constant 77 : index
    %c0_421 = arith.constant 0 : index
    %588 = vector.load %arg4[%c77, %c0_421] : memref<121x128xf32, #tpu.memory_space<vmem>>, vector<1x128xf32>
    %c0_422 = arith.constant 0 : index
    %c7_423 = arith.constant 7 : index
    %c0_424 = arith.constant 0 : index
    %589 = vector.load %arg11[%c0_422, %c7_423, %c0_424] : memref<11x26x128xf32, #tpu.memory_space<vmem>>, vector<1x16x128xf32>
    %590 = vector.shape_cast %589 : vector<1x16x128xf32> to vector<16x128xf32>
    %591 = vector.broadcast %588 : vector<1x128xf32> to vector<16x128xf32>
    %592 = arith.mulf %590, %591 : vector<16x128xf32>
    %593 = arith.addf %569, %592 : vector<16x128xf32>
    %c78 = arith.constant 78 : index
    %c0_425 = arith.constant 0 : index
    %594 = vector.load %arg4[%c78, %c0_425] : memref<121x128xf32, #tpu.memory_space<vmem>>, vector<1x128xf32>
    %c1_426 = arith.constant 1 : index
    %c7_427 = arith.constant 7 : index
    %c0_428 = arith.constant 0 : index
    %595 = vector.load %arg11[%c1_426, %c7_427, %c0_428] : memref<11x26x128xf32, #tpu.memory_space<vmem>>, vector<1x16x128xf32>
    %596 = vector.shape_cast %595 : vector<1x16x128xf32> to vector<16x128xf32>
    %597 = vector.broadcast %594 : vector<1x128xf32> to vector<16x128xf32>
    %598 = arith.mulf %596, %597 : vector<16x128xf32>
    %599 = arith.addf %575, %598 : vector<16x128xf32>
    %c79 = arith.constant 79 : index
    %c0_429 = arith.constant 0 : index
    %600 = vector.load %arg4[%c79, %c0_429] : memref<121x128xf32, #tpu.memory_space<vmem>>, vector<1x128xf32>
    %c2_430 = arith.constant 2 : index
    %c7_431 = arith.constant 7 : index
    %c0_432 = arith.constant 0 : index
    %601 = vector.load %arg11[%c2_430, %c7_431, %c0_432] : memref<11x26x128xf32, #tpu.memory_space<vmem>>, vector<1x16x128xf32>
    %602 = vector.shape_cast %601 : vector<1x16x128xf32> to vector<16x128xf32>
    %603 = vector.broadcast %600 : vector<1x128xf32> to vector<16x128xf32>
    %604 = arith.mulf %602, %603 : vector<16x128xf32>
    %605 = arith.addf %581, %604 : vector<16x128xf32>
    %c80 = arith.constant 80 : index
    %c0_433 = arith.constant 0 : index
    %606 = vector.load %arg4[%c80, %c0_433] : memref<121x128xf32, #tpu.memory_space<vmem>>, vector<1x128xf32>
    %c3_434 = arith.constant 3 : index
    %c7_435 = arith.constant 7 : index
    %c0_436 = arith.constant 0 : index
    %607 = vector.load %arg11[%c3_434, %c7_435, %c0_436] : memref<11x26x128xf32, #tpu.memory_space<vmem>>, vector<1x16x128xf32>
    %608 = vector.shape_cast %607 : vector<1x16x128xf32> to vector<16x128xf32>
    %609 = vector.broadcast %606 : vector<1x128xf32> to vector<16x128xf32>
    %610 = arith.mulf %608, %609 : vector<16x128xf32>
    %611 = arith.addf %587, %610 : vector<16x128xf32>
    %c81 = arith.constant 81 : index
    %c0_437 = arith.constant 0 : index
    %612 = vector.load %arg4[%c81, %c0_437] : memref<121x128xf32, #tpu.memory_space<vmem>>, vector<1x128xf32>
    %c4_438 = arith.constant 4 : index
    %c7_439 = arith.constant 7 : index
    %c0_440 = arith.constant 0 : index
    %613 = vector.load %arg11[%c4_438, %c7_439, %c0_440] : memref<11x26x128xf32, #tpu.memory_space<vmem>>, vector<1x16x128xf32>
    %614 = vector.shape_cast %613 : vector<1x16x128xf32> to vector<16x128xf32>
    %615 = vector.broadcast %612 : vector<1x128xf32> to vector<16x128xf32>
    %616 = arith.mulf %614, %615 : vector<16x128xf32>
    %617 = arith.addf %593, %616 : vector<16x128xf32>
    %c82 = arith.constant 82 : index
    %c0_441 = arith.constant 0 : index
    %618 = vector.load %arg4[%c82, %c0_441] : memref<121x128xf32, #tpu.memory_space<vmem>>, vector<1x128xf32>
    %c5_442 = arith.constant 5 : index
    %c7_443 = arith.constant 7 : index
    %c0_444 = arith.constant 0 : index
    %619 = vector.load %arg11[%c5_442, %c7_443, %c0_444] : memref<11x26x128xf32, #tpu.memory_space<vmem>>, vector<1x16x128xf32>
    %620 = vector.shape_cast %619 : vector<1x16x128xf32> to vector<16x128xf32>
    %621 = vector.broadcast %618 : vector<1x128xf32> to vector<16x128xf32>
    %622 = arith.mulf %620, %621 : vector<16x128xf32>
    %623 = arith.addf %599, %622 : vector<16x128xf32>
    %c83 = arith.constant 83 : index
    %c0_445 = arith.constant 0 : index
    %624 = vector.load %arg4[%c83, %c0_445] : memref<121x128xf32, #tpu.memory_space<vmem>>, vector<1x128xf32>
    %c6_446 = arith.constant 6 : index
    %c7_447 = arith.constant 7 : index
    %c0_448 = arith.constant 0 : index
    %625 = vector.load %arg11[%c6_446, %c7_447, %c0_448] : memref<11x26x128xf32, #tpu.memory_space<vmem>>, vector<1x16x128xf32>
    %626 = vector.shape_cast %625 : vector<1x16x128xf32> to vector<16x128xf32>
    %627 = vector.broadcast %624 : vector<1x128xf32> to vector<16x128xf32>
    %628 = arith.mulf %626, %627 : vector<16x128xf32>
    %629 = arith.addf %605, %628 : vector<16x128xf32>
    %c84 = arith.constant 84 : index
    %c0_449 = arith.constant 0 : index
    %630 = vector.load %arg4[%c84, %c0_449] : memref<121x128xf32, #tpu.memory_space<vmem>>, vector<1x128xf32>
    %c7_450 = arith.constant 7 : index
    %c7_451 = arith.constant 7 : index
    %c0_452 = arith.constant 0 : index
    %631 = vector.load %arg11[%c7_450, %c7_451, %c0_452] : memref<11x26x128xf32, #tpu.memory_space<vmem>>, vector<1x16x128xf32>
    %632 = vector.shape_cast %631 : vector<1x16x128xf32> to vector<16x128xf32>
    %633 = vector.broadcast %630 : vector<1x128xf32> to vector<16x128xf32>
    %634 = arith.mulf %632, %633 : vector<16x128xf32>
    %635 = arith.addf %611, %634 : vector<16x128xf32>
    %c85 = arith.constant 85 : index
    %c0_453 = arith.constant 0 : index
    %636 = vector.load %arg4[%c85, %c0_453] : memref<121x128xf32, #tpu.memory_space<vmem>>, vector<1x128xf32>
    %c8_454 = arith.constant 8 : index
    %c7_455 = arith.constant 7 : index
    %c0_456 = arith.constant 0 : index
    %637 = vector.load %arg11[%c8_454, %c7_455, %c0_456] : memref<11x26x128xf32, #tpu.memory_space<vmem>>, vector<1x16x128xf32>
    %638 = vector.shape_cast %637 : vector<1x16x128xf32> to vector<16x128xf32>
    %639 = vector.broadcast %636 : vector<1x128xf32> to vector<16x128xf32>
    %640 = arith.mulf %638, %639 : vector<16x128xf32>
    %641 = arith.addf %617, %640 : vector<16x128xf32>
    %c86 = arith.constant 86 : index
    %c0_457 = arith.constant 0 : index
    %642 = vector.load %arg4[%c86, %c0_457] : memref<121x128xf32, #tpu.memory_space<vmem>>, vector<1x128xf32>
    %c9_458 = arith.constant 9 : index
    %c7_459 = arith.constant 7 : index
    %c0_460 = arith.constant 0 : index
    %643 = vector.load %arg11[%c9_458, %c7_459, %c0_460] : memref<11x26x128xf32, #tpu.memory_space<vmem>>, vector<1x16x128xf32>
    %644 = vector.shape_cast %643 : vector<1x16x128xf32> to vector<16x128xf32>
    %645 = vector.broadcast %642 : vector<1x128xf32> to vector<16x128xf32>
    %646 = arith.mulf %644, %645 : vector<16x128xf32>
    %647 = arith.addf %623, %646 : vector<16x128xf32>
    %c87 = arith.constant 87 : index
    %c0_461 = arith.constant 0 : index
    %648 = vector.load %arg4[%c87, %c0_461] : memref<121x128xf32, #tpu.memory_space<vmem>>, vector<1x128xf32>
    %c10_462 = arith.constant 10 : index
    %c7_463 = arith.constant 7 : index
    %c0_464 = arith.constant 0 : index
    %649 = vector.load %arg11[%c10_462, %c7_463, %c0_464] : memref<11x26x128xf32, #tpu.memory_space<vmem>>, vector<1x16x128xf32>
    %650 = vector.shape_cast %649 : vector<1x16x128xf32> to vector<16x128xf32>
    %651 = vector.broadcast %648 : vector<1x128xf32> to vector<16x128xf32>
    %652 = arith.mulf %650, %651 : vector<16x128xf32>
    %653 = arith.addf %629, %652 : vector<16x128xf32>
    %c88 = arith.constant 88 : index
    %c0_465 = arith.constant 0 : index
    %654 = vector.load %arg4[%c88, %c0_465] : memref<121x128xf32, #tpu.memory_space<vmem>>, vector<1x128xf32>
    %c0_466 = arith.constant 0 : index
    %c8_467 = arith.constant 8 : index
    %c0_468 = arith.constant 0 : index
    %655 = vector.load %arg11[%c0_466, %c8_467, %c0_468] : memref<11x26x128xf32, #tpu.memory_space<vmem>>, vector<1x16x128xf32>
    %656 = vector.shape_cast %655 : vector<1x16x128xf32> to vector<16x128xf32>
    %657 = vector.broadcast %654 : vector<1x128xf32> to vector<16x128xf32>
    %658 = arith.mulf %656, %657 : vector<16x128xf32>
    %659 = arith.addf %635, %658 : vector<16x128xf32>
    %c89 = arith.constant 89 : index
    %c0_469 = arith.constant 0 : index
    %660 = vector.load %arg4[%c89, %c0_469] : memref<121x128xf32, #tpu.memory_space<vmem>>, vector<1x128xf32>
    %c1_470 = arith.constant 1 : index
    %c8_471 = arith.constant 8 : index
    %c0_472 = arith.constant 0 : index
    %661 = vector.load %arg11[%c1_470, %c8_471, %c0_472] : memref<11x26x128xf32, #tpu.memory_space<vmem>>, vector<1x16x128xf32>
    %662 = vector.shape_cast %661 : vector<1x16x128xf32> to vector<16x128xf32>
    %663 = vector.broadcast %660 : vector<1x128xf32> to vector<16x128xf32>
    %664 = arith.mulf %662, %663 : vector<16x128xf32>
    %665 = arith.addf %641, %664 : vector<16x128xf32>
    %c90 = arith.constant 90 : index
    %c0_473 = arith.constant 0 : index
    %666 = vector.load %arg4[%c90, %c0_473] : memref<121x128xf32, #tpu.memory_space<vmem>>, vector<1x128xf32>
    %c2_474 = arith.constant 2 : index
    %c8_475 = arith.constant 8 : index
    %c0_476 = arith.constant 0 : index
    %667 = vector.load %arg11[%c2_474, %c8_475, %c0_476] : memref<11x26x128xf32, #tpu.memory_space<vmem>>, vector<1x16x128xf32>
    %668 = vector.shape_cast %667 : vector<1x16x128xf32> to vector<16x128xf32>
    %669 = vector.broadcast %666 : vector<1x128xf32> to vector<16x128xf32>
    %670 = arith.mulf %668, %669 : vector<16x128xf32>
    %671 = arith.addf %647, %670 : vector<16x128xf32>
    %c91 = arith.constant 91 : index
    %c0_477 = arith.constant 0 : index
    %672 = vector.load %arg4[%c91, %c0_477] : memref<121x128xf32, #tpu.memory_space<vmem>>, vector<1x128xf32>
    %c3_478 = arith.constant 3 : index
    %c8_479 = arith.constant 8 : index
    %c0_480 = arith.constant 0 : index
    %673 = vector.load %arg11[%c3_478, %c8_479, %c0_480] : memref<11x26x128xf32, #tpu.memory_space<vmem>>, vector<1x16x128xf32>
    %674 = vector.shape_cast %673 : vector<1x16x128xf32> to vector<16x128xf32>
    %675 = vector.broadcast %672 : vector<1x128xf32> to vector<16x128xf32>
    %676 = arith.mulf %674, %675 : vector<16x128xf32>
    %677 = arith.addf %653, %676 : vector<16x128xf32>
    %c92 = arith.constant 92 : index
    %c0_481 = arith.constant 0 : index
    %678 = vector.load %arg4[%c92, %c0_481] : memref<121x128xf32, #tpu.memory_space<vmem>>, vector<1x128xf32>
    %c4_482 = arith.constant 4 : index
    %c8_483 = arith.constant 8 : index
    %c0_484 = arith.constant 0 : index
    %679 = vector.load %arg11[%c4_482, %c8_483, %c0_484] : memref<11x26x128xf32, #tpu.memory_space<vmem>>, vector<1x16x128xf32>
    %680 = vector.shape_cast %679 : vector<1x16x128xf32> to vector<16x128xf32>
    %681 = vector.broadcast %678 : vector<1x128xf32> to vector<16x128xf32>
    %682 = arith.mulf %680, %681 : vector<16x128xf32>
    %683 = arith.addf %659, %682 : vector<16x128xf32>
    %c93 = arith.constant 93 : index
    %c0_485 = arith.constant 0 : index
    %684 = vector.load %arg4[%c93, %c0_485] : memref<121x128xf32, #tpu.memory_space<vmem>>, vector<1x128xf32>
    %c5_486 = arith.constant 5 : index
    %c8_487 = arith.constant 8 : index
    %c0_488 = arith.constant 0 : index
    %685 = vector.load %arg11[%c5_486, %c8_487, %c0_488] : memref<11x26x128xf32, #tpu.memory_space<vmem>>, vector<1x16x128xf32>
    %686 = vector.shape_cast %685 : vector<1x16x128xf32> to vector<16x128xf32>
    %687 = vector.broadcast %684 : vector<1x128xf32> to vector<16x128xf32>
    %688 = arith.mulf %686, %687 : vector<16x128xf32>
    %689 = arith.addf %665, %688 : vector<16x128xf32>
    %c94 = arith.constant 94 : index
    %c0_489 = arith.constant 0 : index
    %690 = vector.load %arg4[%c94, %c0_489] : memref<121x128xf32, #tpu.memory_space<vmem>>, vector<1x128xf32>
    %c6_490 = arith.constant 6 : index
    %c8_491 = arith.constant 8 : index
    %c0_492 = arith.constant 0 : index
    %691 = vector.load %arg11[%c6_490, %c8_491, %c0_492] : memref<11x26x128xf32, #tpu.memory_space<vmem>>, vector<1x16x128xf32>
    %692 = vector.shape_cast %691 : vector<1x16x128xf32> to vector<16x128xf32>
    %693 = vector.broadcast %690 : vector<1x128xf32> to vector<16x128xf32>
    %694 = arith.mulf %692, %693 : vector<16x128xf32>
    %695 = arith.addf %671, %694 : vector<16x128xf32>
    %c95 = arith.constant 95 : index
    %c0_493 = arith.constant 0 : index
    %696 = vector.load %arg4[%c95, %c0_493] : memref<121x128xf32, #tpu.memory_space<vmem>>, vector<1x128xf32>
    %c7_494 = arith.constant 7 : index
    %c8_495 = arith.constant 8 : index
    %c0_496 = arith.constant 0 : index
    %697 = vector.load %arg11[%c7_494, %c8_495, %c0_496] : memref<11x26x128xf32, #tpu.memory_space<vmem>>, vector<1x16x128xf32>
    %698 = vector.shape_cast %697 : vector<1x16x128xf32> to vector<16x128xf32>
    %699 = vector.broadcast %696 : vector<1x128xf32> to vector<16x128xf32>
    %700 = arith.mulf %698, %699 : vector<16x128xf32>
    %701 = arith.addf %677, %700 : vector<16x128xf32>
    %c96 = arith.constant 96 : index
    %c0_497 = arith.constant 0 : index
    %702 = vector.load %arg4[%c96, %c0_497] : memref<121x128xf32, #tpu.memory_space<vmem>>, vector<1x128xf32>
    %c8_498 = arith.constant 8 : index
    %c8_499 = arith.constant 8 : index
    %c0_500 = arith.constant 0 : index
    %703 = vector.load %arg11[%c8_498, %c8_499, %c0_500] : memref<11x26x128xf32, #tpu.memory_space<vmem>>, vector<1x16x128xf32>
    %704 = vector.shape_cast %703 : vector<1x16x128xf32> to vector<16x128xf32>
    %705 = vector.broadcast %702 : vector<1x128xf32> to vector<16x128xf32>
    %706 = arith.mulf %704, %705 : vector<16x128xf32>
    %707 = arith.addf %683, %706 : vector<16x128xf32>
    %c97 = arith.constant 97 : index
    %c0_501 = arith.constant 0 : index
    %708 = vector.load %arg4[%c97, %c0_501] : memref<121x128xf32, #tpu.memory_space<vmem>>, vector<1x128xf32>
    %c9_502 = arith.constant 9 : index
    %c8_503 = arith.constant 8 : index
    %c0_504 = arith.constant 0 : index
    %709 = vector.load %arg11[%c9_502, %c8_503, %c0_504] : memref<11x26x128xf32, #tpu.memory_space<vmem>>, vector<1x16x128xf32>
    %710 = vector.shape_cast %709 : vector<1x16x128xf32> to vector<16x128xf32>
    %711 = vector.broadcast %708 : vector<1x128xf32> to vector<16x128xf32>
    %712 = arith.mulf %710, %711 : vector<16x128xf32>
    %713 = arith.addf %689, %712 : vector<16x128xf32>
    %c98 = arith.constant 98 : index
    %c0_505 = arith.constant 0 : index
    %714 = vector.load %arg4[%c98, %c0_505] : memref<121x128xf32, #tpu.memory_space<vmem>>, vector<1x128xf32>
    %c10_506 = arith.constant 10 : index
    %c8_507 = arith.constant 8 : index
    %c0_508 = arith.constant 0 : index
    %715 = vector.load %arg11[%c10_506, %c8_507, %c0_508] : memref<11x26x128xf32, #tpu.memory_space<vmem>>, vector<1x16x128xf32>
    %716 = vector.shape_cast %715 : vector<1x16x128xf32> to vector<16x128xf32>
    %717 = vector.broadcast %714 : vector<1x128xf32> to vector<16x128xf32>
    %718 = arith.mulf %716, %717 : vector<16x128xf32>
    %719 = arith.addf %695, %718 : vector<16x128xf32>
    %c99 = arith.constant 99 : index
    %c0_509 = arith.constant 0 : index
    %720 = vector.load %arg4[%c99, %c0_509] : memref<121x128xf32, #tpu.memory_space<vmem>>, vector<1x128xf32>
    %c0_510 = arith.constant 0 : index
    %c9_511 = arith.constant 9 : index
    %c0_512 = arith.constant 0 : index
    %721 = vector.load %arg11[%c0_510, %c9_511, %c0_512] : memref<11x26x128xf32, #tpu.memory_space<vmem>>, vector<1x16x128xf32>
    %722 = vector.shape_cast %721 : vector<1x16x128xf32> to vector<16x128xf32>
    %723 = vector.broadcast %720 : vector<1x128xf32> to vector<16x128xf32>
    %724 = arith.mulf %722, %723 : vector<16x128xf32>
    %725 = arith.addf %701, %724 : vector<16x128xf32>
    %c100 = arith.constant 100 : index
    %c0_513 = arith.constant 0 : index
    %726 = vector.load %arg4[%c100, %c0_513] : memref<121x128xf32, #tpu.memory_space<vmem>>, vector<1x128xf32>
    %c1_514 = arith.constant 1 : index
    %c9_515 = arith.constant 9 : index
    %c0_516 = arith.constant 0 : index
    %727 = vector.load %arg11[%c1_514, %c9_515, %c0_516] : memref<11x26x128xf32, #tpu.memory_space<vmem>>, vector<1x16x128xf32>
    %728 = vector.shape_cast %727 : vector<1x16x128xf32> to vector<16x128xf32>
    %729 = vector.broadcast %726 : vector<1x128xf32> to vector<16x128xf32>
    %730 = arith.mulf %728, %729 : vector<16x128xf32>
    %731 = arith.addf %707, %730 : vector<16x128xf32>
    %c101 = arith.constant 101 : index
    %c0_517 = arith.constant 0 : index
    %732 = vector.load %arg4[%c101, %c0_517] : memref<121x128xf32, #tpu.memory_space<vmem>>, vector<1x128xf32>
    %c2_518 = arith.constant 2 : index
    %c9_519 = arith.constant 9 : index
    %c0_520 = arith.constant 0 : index
    %733 = vector.load %arg11[%c2_518, %c9_519, %c0_520] : memref<11x26x128xf32, #tpu.memory_space<vmem>>, vector<1x16x128xf32>
    %734 = vector.shape_cast %733 : vector<1x16x128xf32> to vector<16x128xf32>
    %735 = vector.broadcast %732 : vector<1x128xf32> to vector<16x128xf32>
    %736 = arith.mulf %734, %735 : vector<16x128xf32>
    %737 = arith.addf %713, %736 : vector<16x128xf32>
    %c102 = arith.constant 102 : index
    %c0_521 = arith.constant 0 : index
    %738 = vector.load %arg4[%c102, %c0_521] : memref<121x128xf32, #tpu.memory_space<vmem>>, vector<1x128xf32>
    %c3_522 = arith.constant 3 : index
    %c9_523 = arith.constant 9 : index
    %c0_524 = arith.constant 0 : index
    %739 = vector.load %arg11[%c3_522, %c9_523, %c0_524] : memref<11x26x128xf32, #tpu.memory_space<vmem>>, vector<1x16x128xf32>
    %740 = vector.shape_cast %739 : vector<1x16x128xf32> to vector<16x128xf32>
    %741 = vector.broadcast %738 : vector<1x128xf32> to vector<16x128xf32>
    %742 = arith.mulf %740, %741 : vector<16x128xf32>
    %743 = arith.addf %719, %742 : vector<16x128xf32>
    %c103 = arith.constant 103 : index
    %c0_525 = arith.constant 0 : index
    %744 = vector.load %arg4[%c103, %c0_525] : memref<121x128xf32, #tpu.memory_space<vmem>>, vector<1x128xf32>
    %c4_526 = arith.constant 4 : index
    %c9_527 = arith.constant 9 : index
    %c0_528 = arith.constant 0 : index
    %745 = vector.load %arg11[%c4_526, %c9_527, %c0_528] : memref<11x26x128xf32, #tpu.memory_space<vmem>>, vector<1x16x128xf32>
    %746 = vector.shape_cast %745 : vector<1x16x128xf32> to vector<16x128xf32>
    %747 = vector.broadcast %744 : vector<1x128xf32> to vector<16x128xf32>
    %748 = arith.mulf %746, %747 : vector<16x128xf32>
    %749 = arith.addf %725, %748 : vector<16x128xf32>
    %c104 = arith.constant 104 : index
    %c0_529 = arith.constant 0 : index
    %750 = vector.load %arg4[%c104, %c0_529] : memref<121x128xf32, #tpu.memory_space<vmem>>, vector<1x128xf32>
    %c5_530 = arith.constant 5 : index
    %c9_531 = arith.constant 9 : index
    %c0_532 = arith.constant 0 : index
    %751 = vector.load %arg11[%c5_530, %c9_531, %c0_532] : memref<11x26x128xf32, #tpu.memory_space<vmem>>, vector<1x16x128xf32>
    %752 = vector.shape_cast %751 : vector<1x16x128xf32> to vector<16x128xf32>
    %753 = vector.broadcast %750 : vector<1x128xf32> to vector<16x128xf32>
    %754 = arith.mulf %752, %753 : vector<16x128xf32>
    %755 = arith.addf %731, %754 : vector<16x128xf32>
    %c105 = arith.constant 105 : index
    %c0_533 = arith.constant 0 : index
    %756 = vector.load %arg4[%c105, %c0_533] : memref<121x128xf32, #tpu.memory_space<vmem>>, vector<1x128xf32>
    %c6_534 = arith.constant 6 : index
    %c9_535 = arith.constant 9 : index
    %c0_536 = arith.constant 0 : index
    %757 = vector.load %arg11[%c6_534, %c9_535, %c0_536] : memref<11x26x128xf32, #tpu.memory_space<vmem>>, vector<1x16x128xf32>
    %758 = vector.shape_cast %757 : vector<1x16x128xf32> to vector<16x128xf32>
    %759 = vector.broadcast %756 : vector<1x128xf32> to vector<16x128xf32>
    %760 = arith.mulf %758, %759 : vector<16x128xf32>
    %761 = arith.addf %737, %760 : vector<16x128xf32>
    %c106 = arith.constant 106 : index
    %c0_537 = arith.constant 0 : index
    %762 = vector.load %arg4[%c106, %c0_537] : memref<121x128xf32, #tpu.memory_space<vmem>>, vector<1x128xf32>
    %c7_538 = arith.constant 7 : index
    %c9_539 = arith.constant 9 : index
    %c0_540 = arith.constant 0 : index
    %763 = vector.load %arg11[%c7_538, %c9_539, %c0_540] : memref<11x26x128xf32, #tpu.memory_space<vmem>>, vector<1x16x128xf32>
    %764 = vector.shape_cast %763 : vector<1x16x128xf32> to vector<16x128xf32>
    %765 = vector.broadcast %762 : vector<1x128xf32> to vector<16x128xf32>
    %766 = arith.mulf %764, %765 : vector<16x128xf32>
    %767 = arith.addf %743, %766 : vector<16x128xf32>
    %c107 = arith.constant 107 : index
    %c0_541 = arith.constant 0 : index
    %768 = vector.load %arg4[%c107, %c0_541] : memref<121x128xf32, #tpu.memory_space<vmem>>, vector<1x128xf32>
    %c8_542 = arith.constant 8 : index
    %c9_543 = arith.constant 9 : index
    %c0_544 = arith.constant 0 : index
    %769 = vector.load %arg11[%c8_542, %c9_543, %c0_544] : memref<11x26x128xf32, #tpu.memory_space<vmem>>, vector<1x16x128xf32>
    %770 = vector.shape_cast %769 : vector<1x16x128xf32> to vector<16x128xf32>
    %771 = vector.broadcast %768 : vector<1x128xf32> to vector<16x128xf32>
    %772 = arith.mulf %770, %771 : vector<16x128xf32>
    %773 = arith.addf %749, %772 : vector<16x128xf32>
    %c108 = arith.constant 108 : index
    %c0_545 = arith.constant 0 : index
    %774 = vector.load %arg4[%c108, %c0_545] : memref<121x128xf32, #tpu.memory_space<vmem>>, vector<1x128xf32>
    %c9_546 = arith.constant 9 : index
    %c9_547 = arith.constant 9 : index
    %c0_548 = arith.constant 0 : index
    %775 = vector.load %arg11[%c9_546, %c9_547, %c0_548] : memref<11x26x128xf32, #tpu.memory_space<vmem>>, vector<1x16x128xf32>
    %776 = vector.shape_cast %775 : vector<1x16x128xf32> to vector<16x128xf32>
    %777 = vector.broadcast %774 : vector<1x128xf32> to vector<16x128xf32>
    %778 = arith.mulf %776, %777 : vector<16x128xf32>
    %779 = arith.addf %755, %778 : vector<16x128xf32>
    %c109 = arith.constant 109 : index
    %c0_549 = arith.constant 0 : index
    %780 = vector.load %arg4[%c109, %c0_549] : memref<121x128xf32, #tpu.memory_space<vmem>>, vector<1x128xf32>
    %c10_550 = arith.constant 10 : index
    %c9_551 = arith.constant 9 : index
    %c0_552 = arith.constant 0 : index
    %781 = vector.load %arg11[%c10_550, %c9_551, %c0_552] : memref<11x26x128xf32, #tpu.memory_space<vmem>>, vector<1x16x128xf32>
    %782 = vector.shape_cast %781 : vector<1x16x128xf32> to vector<16x128xf32>
    %783 = vector.broadcast %780 : vector<1x128xf32> to vector<16x128xf32>
    %784 = arith.mulf %782, %783 : vector<16x128xf32>
    %785 = arith.addf %761, %784 : vector<16x128xf32>
    %c110 = arith.constant 110 : index
    %c0_553 = arith.constant 0 : index
    %786 = vector.load %arg4[%c110, %c0_553] : memref<121x128xf32, #tpu.memory_space<vmem>>, vector<1x128xf32>
    %c0_554 = arith.constant 0 : index
    %c10_555 = arith.constant 10 : index
    %c0_556 = arith.constant 0 : index
    %787 = vector.load %arg11[%c0_554, %c10_555, %c0_556] : memref<11x26x128xf32, #tpu.memory_space<vmem>>, vector<1x16x128xf32>
    %788 = vector.shape_cast %787 : vector<1x16x128xf32> to vector<16x128xf32>
    %789 = vector.broadcast %786 : vector<1x128xf32> to vector<16x128xf32>
    %790 = arith.mulf %788, %789 : vector<16x128xf32>
    %791 = arith.addf %767, %790 : vector<16x128xf32>
    %c111 = arith.constant 111 : index
    %c0_557 = arith.constant 0 : index
    %792 = vector.load %arg4[%c111, %c0_557] : memref<121x128xf32, #tpu.memory_space<vmem>>, vector<1x128xf32>
    %c1_558 = arith.constant 1 : index
    %c10_559 = arith.constant 10 : index
    %c0_560 = arith.constant 0 : index
    %793 = vector.load %arg11[%c1_558, %c10_559, %c0_560] : memref<11x26x128xf32, #tpu.memory_space<vmem>>, vector<1x16x128xf32>
    %794 = vector.shape_cast %793 : vector<1x16x128xf32> to vector<16x128xf32>
    %795 = vector.broadcast %792 : vector<1x128xf32> to vector<16x128xf32>
    %796 = arith.mulf %794, %795 : vector<16x128xf32>
    %797 = arith.addf %773, %796 : vector<16x128xf32>
    %c112 = arith.constant 112 : index
    %c0_561 = arith.constant 0 : index
    %798 = vector.load %arg4[%c112, %c0_561] : memref<121x128xf32, #tpu.memory_space<vmem>>, vector<1x128xf32>
    %c2_562 = arith.constant 2 : index
    %c10_563 = arith.constant 10 : index
    %c0_564 = arith.constant 0 : index
    %799 = vector.load %arg11[%c2_562, %c10_563, %c0_564] : memref<11x26x128xf32, #tpu.memory_space<vmem>>, vector<1x16x128xf32>
    %800 = vector.shape_cast %799 : vector<1x16x128xf32> to vector<16x128xf32>
    %801 = vector.broadcast %798 : vector<1x128xf32> to vector<16x128xf32>
    %802 = arith.mulf %800, %801 : vector<16x128xf32>
    %803 = arith.addf %779, %802 : vector<16x128xf32>
    %c113 = arith.constant 113 : index
    %c0_565 = arith.constant 0 : index
    %804 = vector.load %arg4[%c113, %c0_565] : memref<121x128xf32, #tpu.memory_space<vmem>>, vector<1x128xf32>
    %c3_566 = arith.constant 3 : index
    %c10_567 = arith.constant 10 : index
    %c0_568 = arith.constant 0 : index
    %805 = vector.load %arg11[%c3_566, %c10_567, %c0_568] : memref<11x26x128xf32, #tpu.memory_space<vmem>>, vector<1x16x128xf32>
    %806 = vector.shape_cast %805 : vector<1x16x128xf32> to vector<16x128xf32>
    %807 = vector.broadcast %804 : vector<1x128xf32> to vector<16x128xf32>
    %808 = arith.mulf %806, %807 : vector<16x128xf32>
    %809 = arith.addf %785, %808 : vector<16x128xf32>
    %c114 = arith.constant 114 : index
    %c0_569 = arith.constant 0 : index
    %810 = vector.load %arg4[%c114, %c0_569] : memref<121x128xf32, #tpu.memory_space<vmem>>, vector<1x128xf32>
    %c4_570 = arith.constant 4 : index
    %c10_571 = arith.constant 10 : index
    %c0_572 = arith.constant 0 : index
    %811 = vector.load %arg11[%c4_570, %c10_571, %c0_572] : memref<11x26x128xf32, #tpu.memory_space<vmem>>, vector<1x16x128xf32>
    %812 = vector.shape_cast %811 : vector<1x16x128xf32> to vector<16x128xf32>
    %813 = vector.broadcast %810 : vector<1x128xf32> to vector<16x128xf32>
    %814 = arith.mulf %812, %813 : vector<16x128xf32>
    %815 = arith.addf %791, %814 : vector<16x128xf32>
    %c115 = arith.constant 115 : index
    %c0_573 = arith.constant 0 : index
    %816 = vector.load %arg4[%c115, %c0_573] : memref<121x128xf32, #tpu.memory_space<vmem>>, vector<1x128xf32>
    %c5_574 = arith.constant 5 : index
    %c10_575 = arith.constant 10 : index
    %c0_576 = arith.constant 0 : index
    %817 = vector.load %arg11[%c5_574, %c10_575, %c0_576] : memref<11x26x128xf32, #tpu.memory_space<vmem>>, vector<1x16x128xf32>
    %818 = vector.shape_cast %817 : vector<1x16x128xf32> to vector<16x128xf32>
    %819 = vector.broadcast %816 : vector<1x128xf32> to vector<16x128xf32>
    %820 = arith.mulf %818, %819 : vector<16x128xf32>
    %821 = arith.addf %797, %820 : vector<16x128xf32>
    %c116 = arith.constant 116 : index
    %c0_577 = arith.constant 0 : index
    %822 = vector.load %arg4[%c116, %c0_577] : memref<121x128xf32, #tpu.memory_space<vmem>>, vector<1x128xf32>
    %c6_578 = arith.constant 6 : index
    %c10_579 = arith.constant 10 : index
    %c0_580 = arith.constant 0 : index
    %823 = vector.load %arg11[%c6_578, %c10_579, %c0_580] : memref<11x26x128xf32, #tpu.memory_space<vmem>>, vector<1x16x128xf32>
    %824 = vector.shape_cast %823 : vector<1x16x128xf32> to vector<16x128xf32>
    %825 = vector.broadcast %822 : vector<1x128xf32> to vector<16x128xf32>
    %826 = arith.mulf %824, %825 : vector<16x128xf32>
    %827 = arith.addf %803, %826 : vector<16x128xf32>
    %c117 = arith.constant 117 : index
    %c0_581 = arith.constant 0 : index
    %828 = vector.load %arg4[%c117, %c0_581] : memref<121x128xf32, #tpu.memory_space<vmem>>, vector<1x128xf32>
    %c7_582 = arith.constant 7 : index
    %c10_583 = arith.constant 10 : index
    %c0_584 = arith.constant 0 : index
    %829 = vector.load %arg11[%c7_582, %c10_583, %c0_584] : memref<11x26x128xf32, #tpu.memory_space<vmem>>, vector<1x16x128xf32>
    %830 = vector.shape_cast %829 : vector<1x16x128xf32> to vector<16x128xf32>
    %831 = vector.broadcast %828 : vector<1x128xf32> to vector<16x128xf32>
    %832 = arith.mulf %830, %831 : vector<16x128xf32>
    %833 = arith.addf %809, %832 : vector<16x128xf32>
    %c118 = arith.constant 118 : index
    %c0_585 = arith.constant 0 : index
    %834 = vector.load %arg4[%c118, %c0_585] : memref<121x128xf32, #tpu.memory_space<vmem>>, vector<1x128xf32>
    %c8_586 = arith.constant 8 : index
    %c10_587 = arith.constant 10 : index
    %c0_588 = arith.constant 0 : index
    %835 = vector.load %arg11[%c8_586, %c10_587, %c0_588] : memref<11x26x128xf32, #tpu.memory_space<vmem>>, vector<1x16x128xf32>
    %836 = vector.shape_cast %835 : vector<1x16x128xf32> to vector<16x128xf32>
    %837 = vector.broadcast %834 : vector<1x128xf32> to vector<16x128xf32>
    %838 = arith.mulf %836, %837 : vector<16x128xf32>
    %839 = arith.addf %815, %838 : vector<16x128xf32>
    %c119 = arith.constant 119 : index
    %c0_589 = arith.constant 0 : index
    %840 = vector.load %arg4[%c119, %c0_589] : memref<121x128xf32, #tpu.memory_space<vmem>>, vector<1x128xf32>
    %c9_590 = arith.constant 9 : index
    %c10_591 = arith.constant 10 : index
    %c0_592 = arith.constant 0 : index
    %841 = vector.load %arg11[%c9_590, %c10_591, %c0_592] : memref<11x26x128xf32, #tpu.memory_space<vmem>>, vector<1x16x128xf32>
    %842 = vector.shape_cast %841 : vector<1x16x128xf32> to vector<16x128xf32>
    %843 = vector.broadcast %840 : vector<1x128xf32> to vector<16x128xf32>
    %844 = arith.mulf %842, %843 : vector<16x128xf32>
    %845 = arith.addf %821, %844 : vector<16x128xf32>
    %c120 = arith.constant 120 : index
    %c0_593 = arith.constant 0 : index
    %846 = vector.load %arg4[%c120, %c0_593] : memref<121x128xf32, #tpu.memory_space<vmem>>, vector<1x128xf32>
    %c10_594 = arith.constant 10 : index
    %c10_595 = arith.constant 10 : index
    %c0_596 = arith.constant 0 : index
    %847 = vector.load %arg11[%c10_594, %c10_595, %c0_596] : memref<11x26x128xf32, #tpu.memory_space<vmem>>, vector<1x16x128xf32>
    %848 = vector.shape_cast %847 : vector<1x16x128xf32> to vector<16x128xf32>
    %849 = vector.broadcast %846 : vector<1x128xf32> to vector<16x128xf32>
    %850 = arith.mulf %848, %849 : vector<16x128xf32>
    %851 = arith.addf %827, %850 : vector<16x128xf32>
    %852 = arith.addf %851, %833 : vector<16x128xf32>
    %853 = arith.addf %852, %839 : vector<16x128xf32>
    %854 = arith.addf %853, %845 : vector<16x128xf32>
    %c0_597 = arith.constant 0 : index
    %c0_598 = arith.constant 0 : index
    %855 = vector.load %arg6[%c0_597, %c0_598] : memref<128x128xbf16, #tpu.memory_space<vmem>>, vector<128x128xbf16>
    %cst_599 = arith.constant dense<0.000000e+00> : vector<16x128xf32>
    %856 = tpu.matmul %2, %855, %cst_599 {dimension_numbers = #tpu.dot_dimension_numbers<[1], [0], [0], [1], [0, 0, 1, 1], [], []>} : vector<16x128xbf16>, vector<128x128xbf16>, vector<16x128xf32> -> vector<16x128xf32>
    %c0_600 = arith.constant 0 : index
    %c0_601 = arith.constant 0 : index
    %857 = vector.load %arg7[%c0_600, %c0_601] : memref<1x128xf32, #tpu.memory_space<vmem>>, vector<1x128xf32>
    %858 = vector.broadcast %857 : vector<1x128xf32> to vector<16x128xf32>
    %859 = arith.addf %856, %858 : vector<16x128xf32>
    %860 = arith.mulf %854, %859 : vector<16x128xf32>
    %861 = arith.truncf %860 : vector<16x128xf32> to vector<16x128xbf16>
    %c0_602 = arith.constant 0 : index
    %c0_603 = arith.constant 0 : index
    %862 = vector.load %arg8[%c0_602, %c0_603] : memref<128x128xbf16, #tpu.memory_space<vmem>>, vector<128x128xbf16>
    %cst_604 = arith.constant dense<0.000000e+00> : vector<16x128xf32>
    %863 = tpu.matmul %861, %862, %cst_604 {dimension_numbers = #tpu.dot_dimension_numbers<[1], [0], [0], [1], [0, 0, 1, 1], [], []>} : vector<16x128xbf16>, vector<128x128xbf16>, vector<16x128xf32> -> vector<16x128xf32>
    %864 = arith.addf %1, %863 : vector<16x128xf32>
    %c0_605 = arith.constant 0 : index
    %c0_606 = arith.constant 0 : index
    %865 = vector.load %arg9[%c0_605, %c0_606] : memref<1x128xf32, #tpu.memory_space<vmem>>, vector<1x128xf32>
    %866 = vector.broadcast %865 : vector<1x128xf32> to vector<16x128xf32>
    %867 = arith.addf %864, %866 : vector<16x128xf32>
    %c0_607 = arith.constant 0 : index
    %c0_608 = arith.constant 0 : index
    %c0_609 = arith.constant 0 : index
    %868 = vector.load %arg10[%c0_607, %c0_608, %c0_609] : memref<1x16x128xf32, #tpu.memory_space<vmem>>, vector<1x16x128xf32>
    %869 = vector.shape_cast %868 : vector<1x16x128xf32> to vector<16x128xf32>
    %870 = vector.shape_cast %867 : vector<16x128xf32> to vector<1x16x128xf32>
    tpu.vector_store %arg10[%c0_607, %c0_608, %c0_609], %870 {strides = array<i32>} : memref<1x16x128xf32, #tpu.memory_space<vmem>>, vector<1x16x128xf32>,
    return
  }
  func.func @transform_0(%arg0: i32) -> (i32, i32, i32) {
    %c0_i32 = arith.constant 0 : i32
    %c0_i32_0 = arith.constant 0 : i32
    %c0_i32_1 = arith.constant 0 : i32
    return %arg0, %c0_i32, %c0_i32_0 : i32, i32, i32
  }
  func.func @transform_1(%arg0: i32) -> (i32, i32) {
    %c0_i32 = arith.constant 0 : i32
    %c0_i32_0 = arith.constant 0 : i32
    %c0_i32_1 = arith.constant 0 : i32
    return %c0_i32, %c0_i32_0 : i32, i32
  }
  func.func @transform_2(%arg0: i32) -> (i32, i32) {
    %c0_i32 = arith.constant 0 : i32
    %c0_i32_0 = arith.constant 0 : i32
    %c0_i32_1 = arith.constant 0 : i32
    return %c0_i32, %c0_i32_0 : i32, i32
  }
  func.func @transform_3(%arg0: i32) -> (i32, i32) {
    %c0_i32 = arith.constant 0 : i32
    %c0_i32_0 = arith.constant 0 : i32
    %c0_i32_1 = arith.constant 0 : i32
    return %c0_i32, %c0_i32_0 : i32, i32
  }
  func.func @transform_4(%arg0: i32) -> (i32, i32) {
    %c0_i32 = arith.constant 0 : i32
    %c0_i32_0 = arith.constant 0 : i32
    %c0_i32_1 = arith.constant 0 : i32
    return %c0_i32, %c0_i32_0 : i32, i32
  }
  func.func @transform_5(%arg0: i32) -> (i32, i32) {
    %c0_i32 = arith.constant 0 : i32
    %c0_i32_0 = arith.constant 0 : i32
    %c0_i32_1 = arith.constant 0 : i32
    return %c0_i32, %c0_i32_0 : i32, i32
  }
  func.func @transform_6(%arg0: i32) -> (i32, i32) {
    %c0_i32 = arith.constant 0 : i32
    %c0_i32_0 = arith.constant 0 : i32
    %c0_i32_1 = arith.constant 0 : i32
    return %c0_i32, %c0_i32_0 : i32, i32
  }
  func.func @transform_7(%arg0: i32) -> (i32, i32) {
    %c0_i32 = arith.constant 0 : i32
    %c0_i32_0 = arith.constant 0 : i32
    %c0_i32_1 = arith.constant 0 : i32
    return %c0_i32, %c0_i32_0 : i32, i32
  }
  func.func @transform_8(%arg0: i32) -> (i32, i32) {
    %c0_i32 = arith.constant 0 : i32
    %c0_i32_0 = arith.constant 0 : i32
    %c0_i32_1 = arith.constant 0 : i32
    return %c0_i32, %c0_i32_0 : i32, i32
  }
  func.func @transform_9(%arg0: i32) -> (i32, i32, i32) {
    %c0_i32 = arith.constant 0 : i32
    %c0_i32_0 = arith.constant 0 : i32
    %c0_i32_1 = arith.constant 0 : i32
    return %arg0, %c0_i32, %c0_i32_0 : i32, i32, i32
  }
}

module attributes {stable_mosaic.version = 11 : i64} {
  func.func @mlp_kernel(%arg0: i32, %arg1: memref<1x16x128xf32, #tpu.memory_space<vmem>>, %arg2: memref<128x512xbf16, #tpu.memory_space<vmem>>, %arg3: memref<1x512xf32, #tpu.memory_space<vmem>>, %arg4: memref<9x512xf32, #tpu.memory_space<vmem>>, %arg5: memref<1x512xf32, #tpu.memory_space<vmem>>, %arg6: memref<512x128xbf16, #tpu.memory_space<vmem>>, %arg7: memref<1x128xf32, #tpu.memory_space<vmem>>, %arg8: memref<1x16x128xf32, #tpu.memory_space<vmem>>, %arg9: memref<3x18x512xf32, #tpu.memory_space<vmem>>) attributes {dimension_semantics = [#tpu.dimension_semantics<parallel>], iteration_bounds = array<i64: 2>, scalar_prefetch = 0 : i64, scratch_operands = 1 : i64, tpu.core_type = #tpu.core_type<tc>, window_params = [{transform_indices = @transform_0, window_bounds = array<i64: 1, 16, 128>}, {pipeline_mode = #tpu.pipeline_mode<synchronous>, transform_indices = @transform_1, window_bounds = array<i64: 128, 512>}, {pipeline_mode = #tpu.pipeline_mode<synchronous>, transform_indices = @transform_2, window_bounds = array<i64: 1, 512>}, {pipeline_mode = #tpu.pipeline_mode<synchronous>, transform_indices = @transform_3, window_bounds = array<i64: 9, 512>}, {pipeline_mode = #tpu.pipeline_mode<synchronous>, transform_indices = @transform_4, window_bounds = array<i64: 1, 512>}, {pipeline_mode = #tpu.pipeline_mode<synchronous>, transform_indices = @transform_5, window_bounds = array<i64: 512, 128>}, {pipeline_mode = #tpu.pipeline_mode<synchronous>, transform_indices = @transform_6, window_bounds = array<i64: 1, 128>}, {transform_indices = @transform_7, window_bounds = array<i64: 1, 16, 128>}]} {
    %c0 = arith.constant 0 : index
    %c0_0 = arith.constant 0 : index
    %c0_1 = arith.constant 0 : index
    %0 = vector.load %arg1[%c0, %c0_0, %c0_1] : memref<1x16x128xf32, #tpu.memory_space<vmem>>, vector<1x16x128xf32>
    %1 = vector.shape_cast %0 : vector<1x16x128xf32> to vector<16x128xf32>
    %2 = arith.truncf %1 : vector<16x128xf32> to vector<16x128xbf16>
    %c0_2 = arith.constant 0 : index
    %c0_3 = arith.constant 0 : index
    %3 = vector.load %arg2[%c0_2, %c0_3] : memref<128x512xbf16, #tpu.memory_space<vmem>>, vector<128x512xbf16>
    %cst = arith.constant dense<0.000000e+00> : vector<16x512xf32>
    %4 = tpu.matmul %2, %3, %cst {dimension_numbers = #tpu.dot_dimension_numbers<[1], [0], [0], [1], [0, 0, 1, 1], [], []>} : vector<16x128xbf16>, vector<128x512xbf16>, vector<16x512xf32> -> vector<16x512xf32>
    %c0_4 = arith.constant 0 : index
    %c0_5 = arith.constant 0 : index
    %5 = vector.load %arg3[%c0_4, %c0_5] : memref<1x512xf32, #tpu.memory_space<vmem>>, vector<1x512xf32>
    %6 = vector.broadcast %5 : vector<1x512xf32> to vector<16x512xf32>
    %7 = arith.addf %4, %6 : vector<16x512xf32>
    %cst_6 = arith.constant 0.000000e+00 : f32
    %8 = vector.broadcast %cst_6 : f32 to vector<16x512xf32>
    %9 = arith.maximumf %7, %8 : vector<16x512xf32>
    %cst_7 = arith.constant 0.000000e+00 : f32
    %10 = vector.broadcast %cst_7 : f32 to vector<1x512xf32>
    %c32_i32 = arith.constant 32 : i32
    %11 = tpu.dynamic_rotate %9 by %c32_i32 dim 1 : vector<16x512xf32>, i32 -> vector<16x512xf32>
    %c0_8 = arith.constant 0 : index
    %c0_9 = arith.constant 0 : index
    %c0_10 = arith.constant 0 : index
    %12 = vector.load %arg9[%c0_8, %c0_9, %c0_10] : memref<3x18x512xf32, #tpu.memory_space<vmem>>, vector<1x1x512xf32>
    %13 = vector.shape_cast %12 : vector<1x1x512xf32> to vector<1x512xf32>
    %14 = vector.shape_cast %10 : vector<1x512xf32> to vector<1x1x512xf32>
    tpu.vector_store %arg9[%c0_8, %c0_9, %c0_10], %14 {strides = array<i32>} : memref<3x18x512xf32, #tpu.memory_space<vmem>>, vector<1x1x512xf32>,
    %c0_11 = arith.constant 0 : index
    %c1 = arith.constant 1 : index
    %c0_12 = arith.constant 0 : index
    %15 = vector.load %arg9[%c0_11, %c1, %c0_12] : memref<3x18x512xf32, #tpu.memory_space<vmem>>, vector<1x16x512xf32>
    %16 = vector.shape_cast %15 : vector<1x16x512xf32> to vector<16x512xf32>
    %17 = vector.shape_cast %11 : vector<16x512xf32> to vector<1x16x512xf32>
    tpu.vector_store %arg9[%c0_11, %c1, %c0_12], %17 {strides = array<i32>} : memref<3x18x512xf32, #tpu.memory_space<vmem>>, vector<1x16x512xf32>,
    %c0_13 = arith.constant 0 : index
    %c17 = arith.constant 17 : index
    %c0_14 = arith.constant 0 : index
    %18 = vector.load %arg9[%c0_13, %c17, %c0_14] : memref<3x18x512xf32, #tpu.memory_space<vmem>>, vector<1x1x512xf32>
    %19 = vector.shape_cast %18 : vector<1x1x512xf32> to vector<1x512xf32>
    %20 = vector.shape_cast %10 : vector<1x512xf32> to vector<1x1x512xf32>
    tpu.vector_store %arg9[%c0_13, %c17, %c0_14], %20 {strides = array<i32>} : memref<3x18x512xf32, #tpu.memory_space<vmem>>, vector<1x1x512xf32>,
    %c1_15 = arith.constant 1 : index
    %c0_16 = arith.constant 0 : index
    %c0_17 = arith.constant 0 : index
    %21 = vector.load %arg9[%c1_15, %c0_16, %c0_17] : memref<3x18x512xf32, #tpu.memory_space<vmem>>, vector<1x1x512xf32>
    %22 = vector.shape_cast %21 : vector<1x1x512xf32> to vector<1x512xf32>
    %23 = vector.shape_cast %10 : vector<1x512xf32> to vector<1x1x512xf32>
    tpu.vector_store %arg9[%c1_15, %c0_16, %c0_17], %23 {strides = array<i32>} : memref<3x18x512xf32, #tpu.memory_space<vmem>>, vector<1x1x512xf32>,
    %c1_18 = arith.constant 1 : index
    %c1_19 = arith.constant 1 : index
    %c0_20 = arith.constant 0 : index
    %24 = vector.load %arg9[%c1_18, %c1_19, %c0_20] : memref<3x18x512xf32, #tpu.memory_space<vmem>>, vector<1x16x512xf32>
    %25 = vector.shape_cast %24 : vector<1x16x512xf32> to vector<16x512xf32>
    %26 = vector.shape_cast %9 : vector<16x512xf32> to vector<1x16x512xf32>
    tpu.vector_store %arg9[%c1_18, %c1_19, %c0_20], %26 {strides = array<i32>} : memref<3x18x512xf32, #tpu.memory_space<vmem>>, vector<1x16x512xf32>,
    %c1_21 = arith.constant 1 : index
    %c17_22 = arith.constant 17 : index
    %c0_23 = arith.constant 0 : index
    %27 = vector.load %arg9[%c1_21, %c17_22, %c0_23] : memref<3x18x512xf32, #tpu.memory_space<vmem>>, vector<1x1x512xf32>
    %28 = vector.shape_cast %27 : vector<1x1x512xf32> to vector<1x512xf32>
    %29 = vector.shape_cast %10 : vector<1x512xf32> to vector<1x1x512xf32>
    tpu.vector_store %arg9[%c1_21, %c17_22, %c0_23], %29 {strides = array<i32>} : memref<3x18x512xf32, #tpu.memory_space<vmem>>, vector<1x1x512xf32>,
    %c480_i32 = arith.constant 480 : i32
    %30 = tpu.dynamic_rotate %9 by %c480_i32 dim 1 : vector<16x512xf32>, i32 -> vector<16x512xf32>
    %c2 = arith.constant 2 : index
    %c0_24 = arith.constant 0 : index
    %c0_25 = arith.constant 0 : index
    %31 = vector.load %arg9[%c2, %c0_24, %c0_25] : memref<3x18x512xf32, #tpu.memory_space<vmem>>, vector<1x1x512xf32>
    %32 = vector.shape_cast %31 : vector<1x1x512xf32> to vector<1x512xf32>
    %33 = vector.shape_cast %10 : vector<1x512xf32> to vector<1x1x512xf32>
    tpu.vector_store %arg9[%c2, %c0_24, %c0_25], %33 {strides = array<i32>} : memref<3x18x512xf32, #tpu.memory_space<vmem>>, vector<1x1x512xf32>,
    %c2_26 = arith.constant 2 : index
    %c1_27 = arith.constant 1 : index
    %c0_28 = arith.constant 0 : index
    %34 = vector.load %arg9[%c2_26, %c1_27, %c0_28] : memref<3x18x512xf32, #tpu.memory_space<vmem>>, vector<1x16x512xf32>
    %35 = vector.shape_cast %34 : vector<1x16x512xf32> to vector<16x512xf32>
    %36 = vector.shape_cast %30 : vector<16x512xf32> to vector<1x16x512xf32>
    tpu.vector_store %arg9[%c2_26, %c1_27, %c0_28], %36 {strides = array<i32>} : memref<3x18x512xf32, #tpu.memory_space<vmem>>, vector<1x16x512xf32>,
    %c2_29 = arith.constant 2 : index
    %c17_30 = arith.constant 17 : index
    %c0_31 = arith.constant 0 : index
    %37 = vector.load %arg9[%c2_29, %c17_30, %c0_31] : memref<3x18x512xf32, #tpu.memory_space<vmem>>, vector<1x1x512xf32>
    %38 = vector.shape_cast %37 : vector<1x1x512xf32> to vector<1x512xf32>
    %39 = vector.shape_cast %10 : vector<1x512xf32> to vector<1x1x512xf32>
    tpu.vector_store %arg9[%c2_29, %c17_30, %c0_31], %39 {strides = array<i32>} : memref<3x18x512xf32, #tpu.memory_space<vmem>>, vector<1x1x512xf32>,
    %c0_32 = arith.constant 0 : index
    %c0_33 = arith.constant 0 : index
    %40 = vector.load %arg5[%c0_32, %c0_33] : memref<1x512xf32, #tpu.memory_space<vmem>>, vector<1x512xf32>
    %41 = vector.shape_cast %40 : vector<1x512xf32> to vector<1x512xf32>
    %42 = vector.broadcast %41 : vector<1x512xf32> to vector<16x512xf32>
    %cst_34 = arith.constant 0.000000e+00 : f32
    %43 = vector.broadcast %cst_34 : f32 to vector<16x512xf32>
    %c0_35 = arith.constant 0 : index
    %c0_36 = arith.constant 0 : index
    %44 = vector.load %arg4[%c0_35, %c0_36] : memref<9x512xf32, #tpu.memory_space<vmem>>, vector<1x512xf32>
    %c0_37 = arith.constant 0 : index
    %c0_38 = arith.constant 0 : index
    %c0_39 = arith.constant 0 : index
    %45 = vector.load %arg9[%c0_37, %c0_38, %c0_39] : memref<3x18x512xf32, #tpu.memory_space<vmem>>, vector<1x16x512xf32>
    %46 = vector.shape_cast %45 : vector<1x16x512xf32> to vector<16x512xf32>
    %47 = vector.broadcast %44 : vector<1x512xf32> to vector<16x512xf32>
    %48 = arith.mulf %46, %47 : vector<16x512xf32>
    %49 = arith.addf %42, %48 : vector<16x512xf32>
    %c1_40 = arith.constant 1 : index
    %c0_41 = arith.constant 0 : index
    %50 = vector.load %arg4[%c1_40, %c0_41] : memref<9x512xf32, #tpu.memory_space<vmem>>, vector<1x512xf32>
    %c1_42 = arith.constant 1 : index
    %c0_43 = arith.constant 0 : index
    %c0_44 = arith.constant 0 : index
    %51 = vector.load %arg9[%c1_42, %c0_43, %c0_44] : memref<3x18x512xf32, #tpu.memory_space<vmem>>, vector<1x16x512xf32>
    %52 = vector.shape_cast %51 : vector<1x16x512xf32> to vector<16x512xf32>
    %53 = vector.broadcast %50 : vector<1x512xf32> to vector<16x512xf32>
    %54 = arith.mulf %52, %53 : vector<16x512xf32>
    %55 = arith.addf %43, %54 : vector<16x512xf32>
    %c2_45 = arith.constant 2 : index
    %c0_46 = arith.constant 0 : index
    %56 = vector.load %arg4[%c2_45, %c0_46] : memref<9x512xf32, #tpu.memory_space<vmem>>, vector<1x512xf32>
    %c2_47 = arith.constant 2 : index
    %c0_48 = arith.constant 0 : index
    %c0_49 = arith.constant 0 : index
    %57 = vector.load %arg9[%c2_47, %c0_48, %c0_49] : memref<3x18x512xf32, #tpu.memory_space<vmem>>, vector<1x16x512xf32>
    %58 = vector.shape_cast %57 : vector<1x16x512xf32> to vector<16x512xf32>
    %59 = vector.broadcast %56 : vector<1x512xf32> to vector<16x512xf32>
    %60 = arith.mulf %58, %59 : vector<16x512xf32>
    %61 = arith.addf %49, %60 : vector<16x512xf32>
    %c3 = arith.constant 3 : index
    %c0_50 = arith.constant 0 : index
    %62 = vector.load %arg4[%c3, %c0_50] : memref<9x512xf32, #tpu.memory_space<vmem>>, vector<1x512xf32>
    %c0_51 = arith.constant 0 : index
    %c1_52 = arith.constant 1 : index
    %c0_53 = arith.constant 0 : index
    %63 = vector.load %arg9[%c0_51, %c1_52, %c0_53] : memref<3x18x512xf32, #tpu.memory_space<vmem>>, vector<1x16x512xf32>
    %64 = vector.shape_cast %63 : vector<1x16x512xf32> to vector<16x512xf32>
    %65 = vector.broadcast %62 : vector<1x512xf32> to vector<16x512xf32>
    %66 = arith.mulf %64, %65 : vector<16x512xf32>
    %67 = arith.addf %55, %66 : vector<16x512xf32>
    %c4 = arith.constant 4 : index
    %c0_54 = arith.constant 0 : index
    %68 = vector.load %arg4[%c4, %c0_54] : memref<9x512xf32, #tpu.memory_space<vmem>>, vector<1x512xf32>
    %c1_55 = arith.constant 1 : index
    %c1_56 = arith.constant 1 : index
    %c0_57 = arith.constant 0 : index
    %69 = vector.load %arg9[%c1_55, %c1_56, %c0_57] : memref<3x18x512xf32, #tpu.memory_space<vmem>>, vector<1x16x512xf32>
    %70 = vector.shape_cast %69 : vector<1x16x512xf32> to vector<16x512xf32>
    %71 = vector.broadcast %68 : vector<1x512xf32> to vector<16x512xf32>
    %72 = arith.mulf %70, %71 : vector<16x512xf32>
    %73 = arith.addf %61, %72 : vector<16x512xf32>
    %c5 = arith.constant 5 : index
    %c0_58 = arith.constant 0 : index
    %74 = vector.load %arg4[%c5, %c0_58] : memref<9x512xf32, #tpu.memory_space<vmem>>, vector<1x512xf32>
    %c2_59 = arith.constant 2 : index
    %c1_60 = arith.constant 1 : index
    %c0_61 = arith.constant 0 : index
    %75 = vector.load %arg9[%c2_59, %c1_60, %c0_61] : memref<3x18x512xf32, #tpu.memory_space<vmem>>, vector<1x16x512xf32>
    %76 = vector.shape_cast %75 : vector<1x16x512xf32> to vector<16x512xf32>
    %77 = vector.broadcast %74 : vector<1x512xf32> to vector<16x512xf32>
    %78 = arith.mulf %76, %77 : vector<16x512xf32>
    %79 = arith.addf %67, %78 : vector<16x512xf32>
    %c6 = arith.constant 6 : index
    %c0_62 = arith.constant 0 : index
    %80 = vector.load %arg4[%c6, %c0_62] : memref<9x512xf32, #tpu.memory_space<vmem>>, vector<1x512xf32>
    %c0_63 = arith.constant 0 : index
    %c2_64 = arith.constant 2 : index
    %c0_65 = arith.constant 0 : index
    %81 = vector.load %arg9[%c0_63, %c2_64, %c0_65] : memref<3x18x512xf32, #tpu.memory_space<vmem>>, vector<1x16x512xf32>
    %82 = vector.shape_cast %81 : vector<1x16x512xf32> to vector<16x512xf32>
    %83 = vector.broadcast %80 : vector<1x512xf32> to vector<16x512xf32>
    %84 = arith.mulf %82, %83 : vector<16x512xf32>
    %85 = arith.addf %73, %84 : vector<16x512xf32>
    %c7 = arith.constant 7 : index
    %c0_66 = arith.constant 0 : index
    %86 = vector.load %arg4[%c7, %c0_66] : memref<9x512xf32, #tpu.memory_space<vmem>>, vector<1x512xf32>
    %c1_67 = arith.constant 1 : index
    %c2_68 = arith.constant 2 : index
    %c0_69 = arith.constant 0 : index
    %87 = vector.load %arg9[%c1_67, %c2_68, %c0_69] : memref<3x18x512xf32, #tpu.memory_space<vmem>>, vector<1x16x512xf32>
    %88 = vector.shape_cast %87 : vector<1x16x512xf32> to vector<16x512xf32>
    %89 = vector.broadcast %86 : vector<1x512xf32> to vector<16x512xf32>
    %90 = arith.mulf %88, %89 : vector<16x512xf32>
    %91 = arith.addf %79, %90 : vector<16x512xf32>
    %c8 = arith.constant 8 : index
    %c0_70 = arith.constant 0 : index
    %92 = vector.load %arg4[%c8, %c0_70] : memref<9x512xf32, #tpu.memory_space<vmem>>, vector<1x512xf32>
    %c2_71 = arith.constant 2 : index
    %c2_72 = arith.constant 2 : index
    %c0_73 = arith.constant 0 : index
    %93 = vector.load %arg9[%c2_71, %c2_72, %c0_73] : memref<3x18x512xf32, #tpu.memory_space<vmem>>, vector<1x16x512xf32>
    %94 = vector.shape_cast %93 : vector<1x16x512xf32> to vector<16x512xf32>
    %95 = vector.broadcast %92 : vector<1x512xf32> to vector<16x512xf32>
    %96 = arith.mulf %94, %95 : vector<16x512xf32>
    %97 = arith.addf %85, %96 : vector<16x512xf32>
    %98 = arith.addf %97, %91 : vector<16x512xf32>
    %cst_74 = arith.constant 0.000000e+00 : f32
    %99 = vector.broadcast %cst_74 : f32 to vector<16x512xf32>
    %100 = arith.maximumf %98, %99 : vector<16x512xf32>
    %101 = arith.addf %9, %100 : vector<16x512xf32>
    %102 = arith.truncf %101 : vector<16x512xf32> to vector<16x512xbf16>
    %c0_75 = arith.constant 0 : index
    %c0_76 = arith.constant 0 : index
    %103 = vector.load %arg6[%c0_75, %c0_76] : memref<512x128xbf16, #tpu.memory_space<vmem>>, vector<512x128xbf16>
    %cst_77 = arith.constant dense<0.000000e+00> : vector<16x128xf32>
    %104 = tpu.matmul %102, %103, %cst_77 {dimension_numbers = #tpu.dot_dimension_numbers<[1], [0], [0], [1], [0, 0, 1, 1], [], []>} : vector<16x512xbf16>, vector<512x128xbf16>, vector<16x128xf32> -> vector<16x128xf32>
    %105 = arith.addf %1, %104 : vector<16x128xf32>
    %c0_78 = arith.constant 0 : index
    %c0_79 = arith.constant 0 : index
    %106 = vector.load %arg7[%c0_78, %c0_79] : memref<1x128xf32, #tpu.memory_space<vmem>>, vector<1x128xf32>
    %107 = vector.broadcast %106 : vector<1x128xf32> to vector<16x128xf32>
    %108 = arith.addf %105, %107 : vector<16x128xf32>
    %c0_80 = arith.constant 0 : index
    %c0_81 = arith.constant 0 : index
    %c0_82 = arith.constant 0 : index
    %109 = vector.load %arg8[%c0_80, %c0_81, %c0_82] : memref<1x16x128xf32, #tpu.memory_space<vmem>>, vector<1x16x128xf32>
    %110 = vector.shape_cast %109 : vector<1x16x128xf32> to vector<16x128xf32>
    %111 = vector.shape_cast %108 : vector<16x128xf32> to vector<1x16x128xf32>
    tpu.vector_store %arg8[%c0_80, %c0_81, %c0_82], %111 {strides = array<i32>} : memref<1x16x128xf32, #tpu.memory_space<vmem>>, vector<1x16x128xf32>,
    return
  }
  func.func @transform_0(%arg0: i32) -> (i32, i32, i32) {
    %c0_i32 = arith.constant 0 : i32
    %c0_i32_0 = arith.constant 0 : i32
    %c0_i32_1 = arith.constant 0 : i32
    return %arg0, %c0_i32, %c0_i32_0 : i32, i32, i32
  }
  func.func @transform_1(%arg0: i32) -> (i32, i32) {
    %c0_i32 = arith.constant 0 : i32
    %c0_i32_0 = arith.constant 0 : i32
    %c0_i32_1 = arith.constant 0 : i32
    return %c0_i32, %c0_i32_0 : i32, i32
  }
  func.func @transform_2(%arg0: i32) -> (i32, i32) {
    %c0_i32 = arith.constant 0 : i32
    %c0_i32_0 = arith.constant 0 : i32
    %c0_i32_1 = arith.constant 0 : i32
    return %c0_i32, %c0_i32_0 : i32, i32
  }
  func.func @transform_3(%arg0: i32) -> (i32, i32) {
    %c0_i32 = arith.constant 0 : i32
    %c0_i32_0 = arith.constant 0 : i32
    %c0_i32_1 = arith.constant 0 : i32
    return %c0_i32, %c0_i32_0 : i32, i32
  }
  func.func @transform_4(%arg0: i32) -> (i32, i32) {
    %c0_i32 = arith.constant 0 : i32
    %c0_i32_0 = arith.constant 0 : i32
    %c0_i32_1 = arith.constant 0 : i32
    return %c0_i32, %c0_i32_0 : i32, i32
  }
  func.func @transform_5(%arg0: i32) -> (i32, i32) {
    %c0_i32 = arith.constant 0 : i32
    %c0_i32_0 = arith.constant 0 : i32
    %c0_i32_1 = arith.constant 0 : i32
    return %c0_i32, %c0_i32_0 : i32, i32
  }
  func.func @transform_6(%arg0: i32) -> (i32, i32) {
    %c0_i32 = arith.constant 0 : i32
    %c0_i32_0 = arith.constant 0 : i32
    %c0_i32_1 = arith.constant 0 : i32
    return %c0_i32, %c0_i32_0 : i32, i32
  }
  func.func @transform_7(%arg0: i32) -> (i32, i32, i32) {
    %c0_i32 = arith.constant 0 : i32
    %c0_i32_0 = arith.constant 0 : i32
    %c0_i32_1 = arith.constant 0 : i32
    return %arg0, %c0_i32, %c0_i32_0 : i32, i32, i32
  }
}

</mosaic_0001>

<bundles_post_ra>
// kernel: block_forward.2
= control target key start
LH: loop header
LB: loop body
LE: loop exit
PB: predicated region body
PF: predicated region fallthrough
CT: control target
= control target key end

     0   :  { %s2041_s30 = smov 0   ;;  %s3603_s0 = inlined_call_operand.vmem [shape: f32[2,16,128], index: 0, kind: input, shape index: {}]   ;;  %s3604_s1 = inlined_call_operand.vmem [shape: bf16[128,128], index: 1, kind: input, shape index: {}]   ;;  %s3605_s2 = inlined_call_operand.vmem [shape: f32[1,128], index: 2, kind: input, shape index: {}]   ;;  %s3606_s3 = inlined_call_operand.vmem [shape: f32[121,128], index: 3, kind: input, shape index: {}]   ;;  %s3607_s4 = inlined_call_operand.vmem [shape: f32[1,128], index: 4, kind: input, shape index: {}]   ;;  %s3608_s5 = inlined_call_operand.vmem [shape: bf16[128,128], index: 5, kind: input, shape index: {}]   ;;  %s3609_s6 = inlined_call_operand.vmem [shape: f32[1,128], index: 6, kind: input, shape index: {}]   ;;  %s3610_s7 = inlined_call_operand.vmem [shape: bf16[128,128], index: 7, kind: input, shape index: {}]   ;;  %s3611_s8 = inlined_call_operand.vmem [shape: f32[1,128], index: 8, kind: input, shape index: {}]   ;;  %s3612_s9 = inlined_call_operand.vmem [shape: f32[2,16,128], index: 9, kind: output, shape index: {}]  }
   0x1 LB: > { %s1687_s10 = sadd.s32 4294967295, %s1978_s30   ;;  %p1691_p0 = scmp.ge.s32.totalorder %s1978_s30, 1  ;;  %s1978_s30 = sphi %s2041_s30, %s19_s30  }
   0x2   : > { %p287_p1 = scmp.lt.s32.totalorder %s1978_s30, 3 }
   0x4   : > { %p288_p2 = pnand %p1691_p0, %p287_p1 }
   0x6   : > { %291 = sbr.rel (%p288_p2) target bundleno = 682 (0x2aa), region = 56 }
   0xb   : > { %v1803_v0 = vld [vmem:[%s3604_s1 + $0x38] sm:$0xff]  ;;  %p323_p3 = scmp.lt.s32.totalorder %s1687_s10, 1  ;;  %v1802_v1 = vld [vmem:[%s3604_s1 + $0x30] sm:$0xff]  ;;  %v1801_v2 = vld [vmem:[%s3604_s1 + $0x28] sm:$0xff]  ;;  %v1980_v11 = vmov 0.0   ;;  %s1981_s14 = smov 32  }
   0xc   : > { %404 = vmatpush.bf16.msra.mxu0 %v1803_v0  ;;  %v1800_v3 = vld [vmem:[%s3604_s1 + $0x20] sm:$0xff]  ;;  %v1799_v4 = vld [vmem:[%s3604_s1 + $0x18] sm:$0xff]  ;;  %v1798_v5 = vld [vmem:[%s3604_s1 + $0x10] sm:$0xff]  ;;  %433 = vst [vmem:[#allocation2 + $0x20] sm:$0x1f] %v1980_v11  ;;  %s1982_s15 = smov 8  }
   0xd   : > { %s3981_s10 = smov (!%p323_p3, %s1687_s10), 1  ;;  %v1797_v6 = vld [vmem:[%s3604_s1 + $0x8] sm:$0xff]  ;;  %v1796_v7 = vld [vmem:[%s3604_s1] sm:$0xff]  ;;  %424 = vst [vmem:[#allocation2] sm:$0x1f] %v1980_v11  ;;  %s1983_s16 = smov 40  }
   0xe   : > { %s1794_s17 = sshll.u32 %s3981_s10, 4  ;;  %427 = vst [vmem:[#allocation2 + $0x15] sm:$0x1f] %v1980_v11  ;;  %v1839_v12 = vld [vmem:[%s3605_s2] ss:$0 sm:$0xff]  ;;  %s1984_s18 = smov 24  }
   0xf   : > { %s2078_s28 = scalar_lea.vmem %s3603_s0, %s1794_s17  ;;  %436 = vst [vmem:[#allocation2 + $0x35] sm:$0x1f] %v1980_v11  ;;  %s1985_s19 = smov 120   ;;  %v1811_v19 = vld [vmem:[%s3608_s5 + $0x38] sm:$0xff]  ;;  %v1810_v20 = vld [vmem:[%s3608_s5 + $0x30] sm:$0xff]  ;;  %v1809_v21 = vld [vmem:[%s3608_s5 + $0x28] sm:$0xff] }
  0x10   : > { %405 = vmatpush.bf16.msra.mxu0 %v1802_v1  ;;  %v333_v8 = vld [vmem:[%s2078_s28] sm:$0xff]  ;;  %v334_v9 = vld [vmem:[%s2078_s28 + $0x8] sm:$0xff]  ;;  %442 = vst [vmem:[#allocation2 + $0x40] sm:$0x1f] %v1980_v11  ;;  %s1986_s20 = smov 104   ;;  %s1987_s21 = smov 16   ;;  %1527 = vmatpush.bf16.msra.mxu1 %v1811_v19 }
  0x11   : > { %v2085_v10 = vpack.c.bf16 %v334_v9, %v333_v8  ;;  %445 = vst [vmem:[#allocation2 + $0x55] sm:$0x1f] %v1980_v11  ;;  %s1988_s22 = smov 112   ;;  %s1989_s23 = smov 96   ;;  %v1808_v22 = vld [vmem:[%s3608_s5 + $0x20] sm:$0xff]  ;;  %v1807_v23 = vld [vmem:[%s3608_s5 + $0x18] sm:$0xff] }
  0x12   : > { %451 = vst [vmem:[#allocation2 + $0x60] sm:$0x1f] %v1980_v11  ;;  %v1806_v24 = vld [vmem:[%s3608_s5 + $0x10] sm:$0xff]  ;;  %v1805_v25 = vld [vmem:[%s3608_s5 + $0x8] sm:$0xff]  ;;  %v1804_v26 = vld [vmem:[%s3608_s5] sm:$0xff]  ;;  %s332_s12 = scalar_lea.vmem %s3612_s9, %s1794_s17 }
  0x13   : > { %454 = vst [vmem:[#allocation2 + $0x75] sm:$0x1f] %v1980_v11  ;;  %v1859_v30 = vld [vmem:[%s3606_s3 + $0x5] ss:$0 sm:$0xff]  ;;  %v1870_v31 = vld [vmem:[%s3606_s3 + $0x10] ss:$0 sm:$0xff] }
  0x14   : > { %406 = vmatpush.bf16.msra.mxu0 %v1801_v2  ;;  %460 = vst [vmem:[#allocation2 + $0x80] sm:$0x1f] %v1980_v11  ;;  %1528 = vmatpush.bf16.msra.mxu1 %v1810_v20  ;;  %v1881_v36 = vld [vmem:[%s3606_s3 + $0x1b] ss:$0 sm:$0xff]  ;;  %v1892_v37 = vld [vmem:[%s3606_s3 + $0x26] ss:$0 sm:$0xff] }
  0x15   : > { %463 = vst [vmem:[#allocation2 + $0x95] sm:$0x1f] %v1980_v11  ;;  %v1903_v38 = vld [vmem:[%s3606_s3 + $0x31] ss:$0 sm:$0xff]  ;;  %v1913_v39 = vld [vmem:[%s3606_s3 + $0x3c] ss:$0 sm:$0xff] }
  0x16   : > { %465 = vst [vmem:[#allocation2 + $0xa0] sm:$0x1f] %v1980_v11  ;;  %v2153_v48 = vld [vmem:[%s3606_s3 + $0x5d] ss:$0 sm:$0xff]  ;;  %v2158_v52 = vld [vmem:[%s3606_s3 + $0x47] ss:$0 sm:$0xff] }
  0x17   : > { %468 = vst [vmem:[#allocation2 + $0xb5] sm:$0x1f] %v1980_v11  ;;  %v2163_v53 = vld [vmem:[%s3606_s3 + $0x52] ss:$0 sm:$0xff]  ;;  %v2168_v54 = vld [vmem:[%s3606_s3 + $0x68] ss:$0 sm:$0xff] }
  0x18   : > { %407 = vmatpush.bf16.msra.mxu0 %v1800_v3  ;;  %474 = vst [vmem:[#allocation2 + $0xc0] sm:$0x1f] %v1980_v11  ;;  %1529 = vmatpush.bf16.msra.mxu1 %v1809_v21  ;;  %v2173_v55 = vld [vmem:[%s3606_s3 + $0x1] ss:$0 sm:$0xff]  ;;  %v1956_v58 = vld [vmem:[%s3606_s3 + $0x73] ss:$0 sm:$0xff] }
  0x19   : > { %477 = vst [vmem:[#allocation2 + $0xd5] sm:$0x1f] %v1980_v11  ;;  %v2181_v60 = vld [vmem:[%s3606_s3 + $0x39] ss:$0 sm:$0xff]  ;;  %v2188_v62 = vld [vmem:[%s3606_s3 + $0xc] ss:$0 sm:$0xff] }
  0x1a   : > { %483 = vst [vmem:[#allocation2 + $0xe0] sm:$0x1f] %v1980_v11  ;;  %v2195_v0 = vld [vmem:[%s3606_s3 + $0x17] ss:$0 sm:$0xff]  ;;  %v2200_v1 = vld [vmem:[%s3606_s3 + $0x38] ss:$0 sm:$0xff] }
  0x1b   : > { %486 = vst [vmem:[#allocation2 + $0xf5] sm:$0x1f] %v1980_v11  ;;  %v2253_v20 = vld [vmem:[%s3606_s3 + $0x3a] ss:$0 sm:$0xff] }
  0x1c   : > { %408 = vmatpush.bf16.msra.mxu0 %v1799_v4  ;;  %492 = vst [vmem:[#allocation2 + $0x100] sm:$0x1f] %v1980_v11  ;;  %1530 = vmatpush.bf16.msra.mxu1 %v1808_v22  ;;  %v2207_v4 = vld [vmem:[%s3606_s3 + $0x22] ss:$0 sm:$0xff] }
  0x1d   : > { %495 = vst [vmem:[#allocation2 + $0x115] sm:$0x1f] %v1980_v11 }
  0x1e   : > { %501 = vst [vmem:[#allocation2 + $0x120] sm:$0x1f] %v1980_v11 }
  0x1f   : > { %504 = vst [vmem:[#allocation2 + $0x135] sm:$0x1f] %v1980_v11 }
  0x20   : > { %409 = vmatpush.bf16.msra.mxu0 %v1798_v5  ;;  %510 = vst [vmem:[#allocation2 + $0x140] sm:$0x1f] %v1980_v11  ;;  %1531 = vmatpush.bf16.msra.mxu1 %v1807_v23 }
  0x21   : > { %513 = vst [vmem:[#allocation2 + $0x155] sm:$0x1f] %v1980_v11  ;;  %v2223_v11 = vld [vmem:[%s3606_s3] ss:$0 sm:$0xff] }
  0x22   : > { %3671 = vst [vmem:[#allocation12_spill] sm:$0xff] %v2253_v20 }
  0x24   : > { %410 = vmatpush.bf16.msra.mxu0 %v1797_v6  ;;  %1532 = vmatpush.bf16.msra.mxu1 %v1806_v24  ;;  %v2214_v6 = vld [vmem:[%s3606_s3 + $0x2d] ss:$0 sm:$0xff] }
  0x28   : > { %411 = vmatpush.bf16.msra.mxu0 %v1796_v7  ;;  %1533 = vmatpush.bf16.msra.mxu1 %v1805_v25  ;;  %v2263_v25 = vld [vmem:[%s3606_s3 + $0x3] ss:$0 sm:$0xff] }
  0x29   : > { %3672 = vst [vmem:[#allocation13_spill] sm:$0xff] %v2263_v25 }
  0x2b   : > { %412 = vmatmul.bf16.vlgmr.msra.gmra.mxu0 %v2085_v10 }
  0x2c   : > { %1534 = vmatpush.bf16.msra.mxu1 %v1804_v26  ;;  %v2268_v26 = vld [vmem:[%s3606_s3 + $0xe] ss:$0 sm:$0xff] }
  0x2d   : > { %3673 = vst [vmem:[#allocation14_spill] sm:$0xff] %v2268_v26 }
  0x2f   : > { %1535 = vmatmul.bf16.vlgmr.msra.gmra.mxu1 %v2085_v10 }
  0xa8   : > { %v413_v13 = vpop.f32.mrf.mxu0 }
  0xa9   : > { %v414_v14 = vadd.f32 %v1839_v12, %v413_v13 }
  0xab   : > { %v418_v15 = vmax.f32 %v414_v14, 0.0 }
  0xad   : > { %466 = vst [vmem:[#allocation2 + $0xa5] sm:$0xff] %v418_v15  ;;  %428 = vrot.lane.b32.xlu2 %v418_v15, %s1981_s14  ;;  %455 = vrot.lane.b32.xlu1 %v418_v15, %s1982_s15 }
  0xae   : > { %420 = vrot.lane.b32.xlu0 %v418_v15, %s1983_s16 }
  0xb0   : > { %v415_v16 = vpop.f32.mrf.mxu0 }
  0xb1   : > { %v416_v17 = vadd.f32 %v1839_v12, %v415_v16  ;;  %v2228_v12 = vld [vmem:[%s3606_s3 + $0x2] ss:$0 sm:$0xff] }
  0xb2   : > { %3665 = vst [vmem:[#allocation6_spill] sm:$0xff] %v2228_v12 }
  0xb3   : > { %v419_v18 = vmax.f32 %v416_v17, 0.0  ;;  %v2243_v17 = vld [vmem:[%s3606_s3 + $0x18] ss:$0 sm:$0xff] }
  0xb4   : > { %v559_v34 = vld [vmem:[#allocation2 + $0xa0] sm:$0xff]  ;;  %3668 = vst [vmem:[#allocation9_spill] sm:$0xff] %v2243_v17 }
  0xb5   : > { %467 = vst [vmem:[#allocation2 + $0xad] sm:$0xff] %v419_v18  ;;  %437 = vrot.lane.b32.xlu2 %v418_v15, %s1984_s18  ;;  %469 = vrot.lane.b32.xlu1 %v418_v15, %s1985_s19  ;;  %v647_v35 = vld [vmem:[#allocation2 + $0xa1] sm:$0xff]  ;;  %v2183_v61 = vmul.f32 %v1859_v30, %v559_v34 }
  0xb6   : > { %487 = vrot.lane.b32.xlu0 %v418_v15, %s1986_s20  ;;  %v735_v41 = vld [vmem:[#allocation2 + $0xa2] sm:$0xff]  ;;  %v2190_v63 = vmul.f32 %v1870_v31, %v647_v35  ;;  %v2278_v35 = vld [vmem:[%s3606_s3 + $0x2e] ss:$0 sm:$0xff] }
  0xb7   : > { %v823_v42 = vld [vmem:[#allocation2 + $0xa3] sm:$0xff]  ;;  %v2202_v3 = vmul.f32 %v1881_v36, %v735_v41  ;;  %3675 = vst [vmem:[#allocation16_spill] sm:$0xff] %v2278_v35 }
  0xb8   : > { %v911_v43 = vld [vmem:[#allocation2 + $0xa4] sm:$0xff]  ;;  %v2209_v5 = vmul.f32 %v1892_v37, %v823_v42 }
  0xb9   : > { %v999_v44 = vld [vmem:[#allocation2 + $0xa5] sm:$0xff]  ;;  %v2216_v7 = vmul.f32 %v1903_v38, %v911_v43 }
  0xba   : > { %3662 = vst [vmem:[#allocation3_spill] sm:$0xff] %v2209_v5  ;;  %v2218_v8 = vmul.f32 %v1913_v39, %v999_v44  ;;  %v2436_v5 = vld [vmem:[%s3606_s3 + $0x1a] ss:$0 sm:$0xff] }
  0xbb   : > { %3663 = vst [vmem:[#allocation4_spill] sm:$0xff] %v2216_v7 }
  0xbc   : > { %v560_v45 = vld [vmem:[#allocation2 + $0xa8] sm:$0xff]  ;;  %3664 = vst [vmem:[#allocation5_spill] sm:$0xff] %v2218_v8  ;;  %v1258_v10 = vld [vmem:[#allocation2 + $0xb0] sm:$0xff] }
  0xbd   : > { %446 = vrot.lane.b32.xlu2 %v418_v15, %s1987_s21  ;;  %478 = vrot.lane.b32.xlu1 %v418_v15, %s1988_s22  ;;  %v2146_v46 = vld [vmem:[#allocation2 + $0xa9] sm:$0xff]  ;;  %v2230_v13 = vmul.f32 %v1859_v30, %v560_v45  ;;  %v1335_v21 = vld [vmem:[#allocation2 + $0xb1] sm:$0xff] }
  0xbe   : > { %496 = vrot.lane.b32.xlu0 %v418_v15, %s1989_s23  ;;  %v2148_v47 = vld [vmem:[#allocation2 + $0xaa] sm:$0xff]  ;;  %v2238_v16 = vmul.f32 %v1870_v31, %v2146_v46 }
  0xbf   : > { %v824_v49 = vld [vmem:[#allocation2 + $0xab] sm:$0xff] }
  0xc0   : > { %v912_v50 = vld [vmem:[#allocation2 + $0xac] sm:$0xff]  ;;  %3667 = vst [vmem:[#allocation8_spill] sm:$0xff] %v2238_v16  ;;  %v2248_v19 = vmul.f32 %v1892_v37, %v824_v49  ;;  %v2293_v49 = vld [vmem:[%s3606_s3 + $0x19] ss:$0 sm:$0xff] }
  0xc1   : > { %v1000_v51 = vld [vmem:[#allocation2 + $0xad] sm:$0xff]  ;;  %3679 = vst [vmem:[#allocation20_spill] sm:$0xff] %v2293_v49 }
  0xc2   : > { %v1087_v56 = vld [vmem:[#allocation2 + $0xa6] sm:$0xff]  ;;  %v1088_v2 = vld [vmem:[#allocation2 + $0xae] sm:$0xff]  ;;  %3670 = vst [vmem:[#allocation11_spill] sm:$0xff] %v2248_v19  ;;  %v2282_v37 = vmul.f32 %v1913_v39, %v1000_v51  ;;  %v2303_v39 = vld [vmem:[%s3606_s3 + $0x3b] ss:$0 sm:$0xff]  ;;  %v2313_v51 = vmul.f32 %v2168_v54, %v2146_v46 }
  0xc3   : > { %v1175_v57 = vld [vmem:[#allocation2 + $0xa7] sm:$0xff]  ;;  %v1176_v9 = vld [vmem:[#allocation2 + $0xaf] sm:$0xff]  ;;  %3681 = vst [vmem:[#allocation22_spill] sm:$0xff] %v2303_v39  ;;  %v2332_v46 = vld [vmem:[%s3607_s4] ss:$0 sm:$0xff] }
  0xc4   : > { %3677 = vst [vmem:[#allocation18_spill] sm:$0xff] %v2282_v37 }
  0xc5   : > { %430 = vrot.lane.b32.xlu2 %v419_v18, %s1981_s14  ;;  %457 = vrot.lane.b32.xlu1 %v419_v18, %s1982_s15  ;;  %3684 = vst [vmem:[#allocation25_spill] sm:$0xff] %v2313_v51  ;;  %v2343_v51 = vmul.f32 %v2163_v53, %v1176_v9 }
  0xc6   : > { %422 = vrot.lane.b32.xlu0 %v419_v18, %s1983_s16 }
  0xc7   : > { %3688 = vst [vmem:[#allocation29_spill] sm:$0xff] %v2343_v51 }
  0xcd   : > { %471 = vrot.lane.b32.xlu2 %v419_v18, %s1985_s19  ;;  %489 = vrot.lane.b32.xlu1 %v419_v18, %s1986_s20 }
  0xce   : > { %439 = vrot.lane.b32.xlu0 %v419_v18, %s1984_s18  ;;  %s1990_s18 = smov 88  }
  0xd5   : > { %480 = vrot.lane.b32.xlu2 %v419_v18, %s1988_s22  ;;  %498 = vrot.lane.b32.xlu1 %v419_v18, %s1989_s23 }
  0xd6   : > { %448 = vrot.lane.b32.xlu0 %v419_v18, %s1987_s21 }
  0xdd   : > { %507 = vrot.lane.b32.xlu1 %v419_v18, %s1990_s18  ;;  %v2246_v18 = vmul.f32 %v1881_v36, %v2148_v47  ;;  %v2280_v36 = vmul.f32 %v1903_v38, %v912_v50  ;;  %v2298_v38 = vld [vmem:[%s3606_s3 + $0x24] ss:$0 sm:$0xff]  ;;  %v2309_v50 = vmul.f32 %v2163_v53, %v1175_v57 }
  0xde   : > { %505 = vrot.lane.b32.xlu0 %v418_v15, %s1990_s18  ;;  %v2235_v15 = vld [vmem:[%s3606_s3 + $0xd] ss:$0 sm:$0xff]  ;;  %3680 = vst [vmem:[#allocation21_spill] sm:$0xff] %v2298_v38 }
  0xdf   : > { %3666 = vst [vmem:[#allocation7_spill] sm:$0xff] %v2235_v15 }
  0xe0   : > { %3669 = vst [vmem:[#allocation10_spill] sm:$0xff] %v2246_v18  ;;  %v2454_v18 = vld [vmem:[%s3606_s3 + $0x6] ss:$0 sm:$0xff] }
  0xe1   : > { %3676 = vst [vmem:[#allocation17_spill] sm:$0xff] %v2280_v36 }
  0xe2   : > { %3683 = vst [vmem:[#allocation24_spill] sm:$0xff] %v2309_v50  ;;  %v2346_v50 = vmul.f32 %v2153_v48, %v1258_v10 }
  0xe4   : > { %3689 = vst [vmem:[#allocation30_spill] sm:$0xff] %v2346_v50 }
 0x107   : > { %v2116_v27 = vpop.permute.xlu2 %428 }
 0x108   : > { %434 = vst [vmem:[#allocation2 + $0x25] sm:$0xff] %v2116_v27 }
 0x10f   : > { %v2119_v28 = vpop.permute.xlu2 %437  ;;  %v527_v59 = vld [vmem:[#allocation2 + $0x20] sm:$0xff] }
 0x110   : > { %443 = vst [vmem:[#allocation2 + $0x45] sm:$0xff] %v2119_v28  ;;  %v615_v14 = vld [vmem:[#allocation2 + $0x21] sm:$0xff]  ;;  %v530_v24 = vmul.f32 %v2173_v55, %v527_v59  ;;  %v2316_v59 = vmul.f32 %v1956_v58, %v2148_v47  ;;  %v2337_v58 = vld [vmem:[%s3606_s3 + $0x2f] ss:$0 sm:$0xff]  ;;  %v2353_v8 = vmul.f32 %v2181_v60, %v2119_v28  ;;  %v2369_v28 = vmul.f32 %v2200_v1, %v2116_v27 }
 0x111   : > { %v703_v30 = vld [vmem:[#allocation2 + $0x22] sm:$0xff]  ;;  %3686 = vst [vmem:[#allocation27_spill] sm:$0xff] %v2337_v58  ;;  %v2362_v53 = vmul.f32 %v2188_v62, %v615_v14  ;;  %v2380_v14 = vld [vmem:[%s3606_s3 + $0xb] ss:$0 sm:$0xff] }
 0x112   : > { %v791_v31 = vld [vmem:[#allocation2 + $0x23] sm:$0xff]  ;;  %3685 = vst [vmem:[#allocation26_spill] sm:$0xff] %v2316_v59  ;;  %v2340_v59 = vmul.f32 %v2158_v52, %v1088_v2  ;;  %v2365_v2 = vmul.f32 %v2195_v0, %v703_v30 }
 0x113   : > { %v879_v34 = vld [vmem:[#allocation2 + $0x24] sm:$0xff]  ;;  %3691 = vst [vmem:[#allocation32_spill] sm:$0xff] %v2353_v8  ;;  %v2383_v30 = vmul.f32 %v2207_v4, %v791_v31  ;;  %v2402_v31 = vld [vmem:[%s3606_s3 + $0xf] ss:$0 sm:$0xff] }
 0x114   : > { %3687 = vst [vmem:[#allocation28_spill] sm:$0xff] %v2340_v59  ;;  %v2386_v50 = vmul.f32 %v2214_v6, %v879_v34  ;;  %v2407_v34 = vld [vmem:[%s3606_s3 + $0x16] ss:$0 sm:$0xff]  ;;  %v1941_v8 = vld [vmem:[%s3606_s3 + $0x64] ss:$0 sm:$0xff] }
 0x115   : > { %3692 = vst [vmem:[#allocation33_spill] sm:$0xff] %v2369_v28 }
 0x116   : > { %3693 = vst [vmem:[#allocation34_spill] sm:$0xff] %v2383_v30 }
 0x117   : > { %v2122_v29 = vpop.permute.xlu2 %446  ;;  %v535_v42 = vld [vmem:[#allocation2 + $0x40] sm:$0xff]  ;;  %3694 = vst [vmem:[#allocation35_spill] sm:$0xff] %v2386_v50 }
 0x118   : > { %452 = vst [vmem:[#allocation2 + $0x65] sm:$0xff] %v2122_v29  ;;  %v623_v43 = vld [vmem:[#allocation2 + $0x41] sm:$0xff] }
 0x119   : > { %v711_v44 = vld [vmem:[#allocation2 + $0x42] sm:$0xff]  ;;  %v2397_v51 = vmul.f32 %v2235_v15, %v623_v43  ;;  %v1930_v43 = vld [vmem:[%s3606_s3 + $0x59] ss:$0 sm:$0xff]  ;;  %v2441_v50 = vld [vmem:[%s3606_s3 + $0x21] ss:$0 sm:$0xff] }
 0x11a   : > { %v799_v47 = vld [vmem:[#allocation2 + $0x43] sm:$0xff]  ;;  %v2410_v59 = vmul.f32 %v2243_v17, %v711_v44 }
 0x11b   : > { %v887_v57 = vld [vmem:[#allocation2 + $0x44] sm:$0xff] }
 0x11c   : > { %v2428_v44 = vld [vmem:[%s3606_s3 + $0x8] ss:$0 sm:$0xff]  ;;  %v2447_v30 = vmul.f32 %v2278_v35, %v887_v57  ;;  %v2465_v57 = vld [vmem:[%s3606_s3 + $0x25] ss:$0 sm:$0xff] }
 0x11d   : > { %3697 = vst [vmem:[#allocation38_spill] sm:$0xff] %v2428_v44 }
 0x11e   : > { %3700 = vst [vmem:[#allocation41_spill] sm:$0xff] %v2447_v30 }
 0x11f   : > { %v431_v32 = vpop.permute.xlu2 %430  ;;  %v2131_v33 = vpop.permute.xlu1 %455  ;;  %v543_v36 = vld [vmem:[#allocation2 + $0x60] sm:$0xff] }
 0x120   : > { %435 = vst [vmem:[#allocation2 + $0x2d] sm:$0xff] %v431_v32  ;;  %v421_v40 = vpop.permute.xlu0 %420  ;;  %v2273_v32 = vld [vmem:[%s3606_s3 + $0x23] ss:$0 sm:$0xff]  ;;  %v895_v27 = vld [vmem:[#allocation2 + $0x64] sm:$0xff]  ;;  %v2423_v28 = vmul.f32 %v2263_v25, %v543_v36  ;;  %v2474_v30 = vmul.f32 %v2303_v39, %v2131_v33 }
 0x121   : > { %461 = vst [vmem:[#allocation2 + $0x85] sm:$0xff] %v2131_v33  ;;  %v2444_v36 = vmul.f32 %v2273_v32, %v799_v47  ;;  %v2491_v33 = vmul.f32 %v2337_v58, %v895_v27  ;;  %v2516_v27 = vld [vmem:[%s3606_s3 + $0x3e] ss:$0 sm:$0xff] }
 0x122   : > { %425 = vst [vmem:[#allocation2 + $0x5] sm:$0xff] %v421_v40  ;;  %v2285_v40 = vmul.f32 %v2153_v48, %v560_v45  ;;  %v2306_v45 = vmul.f32 %v2158_v52, %v1087_v56  ;;  %v2326_v56 = vld [vmem:[%s3606_s3 + $0x3d] ss:$0 sm:$0xff]  ;;  %v2359_v52 = vld [vmem:[%s3606_s3 + $0x4] ss:$0 sm:$0xff] }
 0x123   : > { %3674 = vst [vmem:[#allocation15_spill] sm:$0xff] %v2273_v32  ;;  %v631_v48 = vld [vmem:[#allocation2 + $0x61] sm:$0xff] }
 0x124   : > { %3678 = vst [vmem:[#allocation19_spill] sm:$0xff] %v2285_v40  ;;  %v2321_v40 = vld [vmem:[%s3606_s3 + $0x43] ss:$0 sm:$0xff] }
 0x125   : > { %3682 = vst [vmem:[#allocation23_spill] sm:$0xff] %v2306_v45  ;;  %v2349_v45 = vmul.f32 %v2168_v54, %v1335_v21  ;;  %v719_v54 = vld [vmem:[#allocation2 + $0x62] sm:$0xff]  ;;  %v2375_v21 = vadd.f32 %v2183_v61, %v530_v24  ;;  %v2394_v24 = vmul.f32 %v2228_v12, %v535_v42  ;;  %v2414_v42 = vmul.f32 %v2253_v20, %v2122_v29 }
 0x126   : > { %3699 = vst [vmem:[#allocation40_spill] sm:$0xff] %v2444_v36  ;;  %v2457_v16 = vmul.f32 %v2293_v49, %v719_v54 }
 0x127   : > { %v2255_v22 = vpop.permute.xlu2 %471  ;;  %v2257_v23 = vpop.permute.xlu1 %469  ;;  %3690 = vst [vmem:[#allocation31_spill] sm:$0xff] %v2349_v45  ;;  %v2372_v10 = vld [vmem:[#allocation2 + $0x28] sm:$0xff] }
 0x128   : > { %476 = vst [vmem:[#allocation2 + $0xcd] sm:$0xff] %v2255_v22  ;;  %v2288_v41 = vpop.permute.xlu0 %487  ;;  %v807_v45 = vld [vmem:[#allocation2 + $0x63] sm:$0xff]  ;;  %v1056_v7 = vld [vmem:[#allocation2 + $0x2e] sm:$0xff] }
 0x129   : > { %v519_v37 = vld [vmem:[#allocation2] sm:$0xff]  ;;  %475 = vst [vmem:[#allocation2 + $0xc5] sm:$0xff] %v2257_v23  ;;  %v616_v29 = vld [vmem:[#allocation2 + $0x29] sm:$0xff]  ;;  %v2460_v47 = vmul.f32 %v2298_v38, %v807_v45  ;;  %v2481_v45 = vmul.f32 %v2326_v56, %v2255_v22  ;;  %v2501_v22 = vld [vmem:[%s3606_s3 + $0x37] ss:$0 sm:$0xff] }
 0x12a   : > { %493 = vst [vmem:[#allocation2 + $0x105] sm:$0xff] %v2288_v41  ;;  %v522_v9 = vmul.f32 %v2223_v11, %v519_v37  ;;  %v2391_v37 = vld [vmem:[%s3606_s3 + $0x3f] ss:$0 sm:$0xff]  ;;  %v1055_v61 = vld [vmem:[#allocation2 + $0x26] sm:$0xff] }
 0x12b   : > { %3695 = vst [vmem:[#allocation36_spill] sm:$0xff] %v2391_v37  ;;  %v551_v19 = vld [vmem:[#allocation2 + $0x80] sm:$0xff]  ;;  %v2477_v54 = vmul.f32 %v2321_v40, %v1055_v61  ;;  %v2488_v49 = vld [vmem:[#allocation2 + $0x2a] sm:$0xff] }
 0x12c   : > { %3696 = vst [vmem:[#allocation37_spill] sm:$0xff] %v2414_v42  ;;  %v2431_v42 = vmul.f32 %v2268_v26, %v631_v48  ;;  %v531_v48 = vmul.f32 %v2173_v55, %v2372_v10  ;;  %v639_v26 = vld [vmem:[#allocation2 + $0x81] sm:$0xff]  ;;  %v2470_v55 = vld [vmem:[%s3606_s3 + $0x2c] ss:$0 sm:$0xff]  ;;  %v524_v38 = vadd.f32 %v2332_v46, %v522_v9  ;;  %v2496_v61 = vld [vmem:[%s3606_s3 + $0x30] ss:$0 sm:$0xff] }
 0x12d   : > { %v695_v25 = vld [vmem:[#allocation2 + $0x2] sm:$0xff]  ;;  %3701 = vst [vmem:[#allocation42_spill] sm:$0xff] %v2457_v16  ;;  %v792_v58 = vld [vmem:[#allocation2 + $0x2b] sm:$0xff] }
 0x12e   : > { %3698 = vst [vmem:[#allocation39_spill] sm:$0xff] %v2431_v42  ;;  %v607_v42 = vld [vmem:[#allocation2 + $0x1] sm:$0xff]  ;;  %v2550_v39 = vadd.f32 %v2230_v13, %v531_v48  ;;  %v2556_v12 = vmul.f32 %v2407_v34, %v695_v25  ;;  %v2579_v48 = vld [vmem:[%s3606_s3 + $0x13] ss:$0 sm:$0xff] }
 0x12f   : > { %3702 = vst [vmem:[#allocation43_spill] sm:$0xff] %v2460_v47  ;;  %v2483_v47 = vpop.permute.xlu2 %480  ;;  %v2485_v16 = vpop.permute.xlu1 %478  ;;  %v727_v20 = vld [vmem:[#allocation2 + $0x82] sm:$0xff]  ;;  %v1096_v13 = vld [vmem:[#allocation2 + $0xce] sm:$0xff] }
 0x130   : > { %3703 = vst [vmem:[#allocation44_spill] sm:$0xff] %v2474_v30  ;;  %v783_v35 = vld [vmem:[#allocation2 + $0x3] sm:$0xff]  ;;  %v554_v30 = vmul.f32 %v2359_v52, %v551_v19 }
 0x131   : > { %3704 = vst [vmem:[#allocation45_spill] sm:$0xff] %v2477_v54  ;;  %v2506_v9 = vld [vmem:[%s3606_s3 + $0x48] ss:$0 sm:$0xff]  ;;  %v2518_v54 = vpop.permute.xlu0 %496  ;;  %v567_v19 = vld [vmem:[#allocation2 + $0xc0] sm:$0xff] }
 0x132   : > { %3705 = vst [vmem:[#allocation46_spill] sm:$0xff] %v2481_v45  ;;  %v2510_v45 = vmul.f32 %v2326_v56, %v2257_v23  ;;  %v815_v32 = vld [vmem:[#allocation2 + $0x83] sm:$0xff]  ;;  %v2525_v23 = vmul.f32 %v2321_v40, %v1056_v7  ;;  %v1919_v56 = vld [vmem:[%s3606_s3 + $0x4e] ss:$0 sm:$0xff]  ;;  %v2541_v7 = vmul.f32 %v2391_v37, %v2288_v41  ;;  %v2544_v40 = vmul.f32 %v1930_v43, %v2372_v10 }
 0x133   : > { %3706 = vst [vmem:[#allocation47_spill] sm:$0xff] %v2488_v49  ;;  %v871_v17 = vld [vmem:[#allocation2 + $0x4] sm:$0xff]  ;;  %v2560_v41 = vmul.f32 %v2195_v0, %v2488_v49  ;;  %v968_v43 = vld [vmem:[#allocation2 + $0x2d] sm:$0xff] }
 0x134   : > { %3707 = vst [vmem:[#allocation48_spill] sm:$0xff] %v2491_v33  ;;  %v2522_v33 = vmul.f32 %v2188_v62, %v616_v29  ;;  %v2537_v62 = vmul.f32 %v2380_v14, %v607_v42  ;;  %v903_v15 = vld [vmem:[#allocation2 + $0x84] sm:$0xff]  ;;  %v2553_v42 = vmul.f32 %v2402_v31, %v639_v26  ;;  %v1871_v0 = vld [vmem:[%s3606_s3 + $0x11] ss:$0 sm:$0xff] }
 0x135   : > { %3708 = vst [vmem:[#allocation49_spill] sm:$0xff] %v2496_v61  ;;  %v583_v36 = vld [vmem:[#allocation2 + $0x100] sm:$0xff]  ;;  %v2616_v37 = vld [vmem:[%s3606_s3 + $0x9] ss:$0 sm:$0xff] }
 0x136   : > { %3709 = vst [vmem:[#allocation50_spill] sm:$0xff] %v2510_v45  ;;  %v2534_v45 = vld [vmem:[%s3606_s3 + $0x40] ss:$0 sm:$0xff]  ;;  %v959_v10 = vld [vmem:[#allocation2 + $0x5] sm:$0xff]  ;;  %v586_v25 = vmul.f32 %v2428_v44, %v583_v36  ;;  %v1935_v36 = vld [vmem:[%s3606_s3 + $0x5e] ss:$0 sm:$0xff] }
 0x137   : > { %485 = vst [vmem:[#allocation2 + $0xed] sm:$0xff] %v2483_v47  ;;  %v2570_v26 = vld [vmem:[%s3606_s3 + $0x7] ss:$0 sm:$0xff] }
 0x138   : > { %3710 = vst [vmem:[#allocation51_spill] sm:$0xff] %v2522_v33  ;;  %v880_v33 = vld [vmem:[#allocation2 + $0x2c] sm:$0xff]  ;;  %v935_v49 = vld [vmem:[#allocation2 + $0x104] sm:$0xff] }
 0x139   : > { %3711 = vst [vmem:[#allocation52_spill] sm:$0xff] %v2525_v23  ;;  %v2546_v23 = vmul.f32 %v1941_v8, %v616_v29  ;;  %v2565_v8 = vld [vmem:[%s3606_s3 + $0x34] ss:$0 sm:$0xff]  ;;  %v556_v29 = vadd.f32 %v554_v30, %v524_v38  ;;  %v2585_v38 = vmul.f32 %v2441_v50, %v783_v35  ;;  %v1143_v30 = vld [vmem:[#allocation2 + $0x27] sm:$0xff]  ;;  %v2600_v35 = vmul.f32 %v2207_v4, %v792_v58 }
 0x13a   : > { %484 = vst [vmem:[#allocation2 + $0xe5] sm:$0xff] %v2485_v16  ;;  %v655_v44 = vld [vmem:[#allocation2 + $0xc1] sm:$0xff]  ;;  %v2618_v4 = vld [vmem:[#allocation2 + $0xc9] sm:$0xff] }
 0x13b   : > { %3712 = vst [vmem:[#allocation53_spill] sm:$0xff] %v2541_v7  ;;  %v568_v7 = vld [vmem:[#allocation2 + $0xc8] sm:$0xff] }
 0x13c   : > { %3713 = vst [vmem:[#allocation54_spill] sm:$0xff] %v2544_v40  ;;  %v1095_v40 = vld [vmem:[#allocation2 + $0xc6] sm:$0xff] }
 0x13d   : > { %3714 = vst [vmem:[#allocation55_spill] sm:$0xff] %v2546_v23  ;;  %v2582_v23 = vmul.f32 %v2436_v5, %v727_v20  ;;  %v2597_v20 = vld [vmem:[%s3606_s3 + $0x1e] ss:$0 sm:$0xff]  ;;  %v671_v58 = vld [vmem:[#allocation2 + $0x101] sm:$0xff] }
 0x13e   : > { %502 = vst [vmem:[#allocation2 + $0x125] sm:$0xff] %v2518_v54 }
 0x13f   : > { %3715 = vst [vmem:[#allocation56_spill] sm:$0xff] %v2550_v39  ;;  %v588_v39 = vadd.f32 %v586_v25, %v556_v29  ;;  %v2632_v29 = vmul.f32 %v2501_v22, %v959_v10  ;;  %v2635_v25 = vmul.f32 %v2506_v9, %v1096_v13  ;;  %v1904_v10 = vld [vmem:[%s3606_s3 + $0x32] ss:$0 sm:$0xff]  ;;  %v2652_v13 = vmul.f32 %v2200_v1, %v968_v43  ;;  %v847_v43 = vld [vmem:[#allocation2 + $0x103] sm:$0xff] }
 0x140   : > { %3716 = vst [vmem:[#allocation57_spill] sm:$0xff] %v2556_v12  ;;  %v570_v12 = vmul.f32 %v2454_v18, %v567_v19  ;;  %v2611_v19 = vmul.f32 %v2470_v55, %v871_v17  ;;  %v2629_v17 = vmul.f32 %v2496_v61, %v903_v15  ;;  %v759_v15 = vld [vmem:[#allocation2 + $0x102] sm:$0xff]  ;;  %v832_v1 = vld [vmem:[#allocation2 + $0xcb] sm:$0xff] }
 0x141   : > { %3717 = vst [vmem:[#allocation58_spill] sm:$0xff] %v2560_v41  ;;  %v1882_v41 = vld [vmem:[%s3606_s3 + $0x1c] ss:$0 sm:$0xff]  ;;  %v831_v61 = vld [vmem:[#allocation2 + $0xc3] sm:$0xff] }
 0x142   : > { %3718 = vst [vmem:[#allocation59_spill] sm:$0xff] %v2565_v8 }
 0x143   : > { %3719 = vst [vmem:[#allocation60_spill] sm:$0xff] %v2582_v23  ;;  %v2603_v23 = vmul.f32 %v2465_v57, %v815_v32  ;;  %v2623_v32 = vld [vmem:[%s3606_s3 + $0x29] ss:$0 sm:$0xff] }
 0x144   : > { %3720 = vst [vmem:[#allocation61_spill] sm:$0xff] %v2585_v38  ;;  %v2608_v38 = vld [vmem:[%s3606_s3 + $0x27] ss:$0 sm:$0xff] }
 0x145   : > { %3721 = vst [vmem:[#allocation62_spill] sm:$0xff] %v2600_v35  ;;  %v2626_v35 = vmul.f32 %v2214_v6, %v880_v33  ;;  %v743_v6 = vld [vmem:[#allocation2 + $0xc2] sm:$0xff]  ;;  %v2646_v33 = vld [vmem:[#allocation2 + $0xca] sm:$0xff] }
 0x146   : > { %3722 = vst [vmem:[#allocation63_spill] sm:$0xff] %v2603_v23  ;;  %v2639_v23 = vmul.f32 %v2516_v27, %v2485_v16  ;;  %v2657_v16 = vmul.f32 %v2506_v9, %v1095_v40  ;;  %v2676_v9 = vld [vmem:[%s3606_s3 + $0x53] ss:$0 sm:$0xff]  ;;  %v2678_v40 = vpop.permute.xlu0 %422 }
 0x147   : > { %3723 = vst [vmem:[#allocation64_spill] sm:$0xff] %v2611_v19  ;;  %v2644_v19 = vld [vmem:[%s3606_s3 + $0x14] ss:$0 sm:$0xff] }
 0x148   : > { %3724 = vst [vmem:[#allocation65_spill] sm:$0xff] %v2618_v4 }
 0x149   : > { %3725 = vst [vmem:[#allocation66_spill] sm:$0xff] %v2626_v35  ;;  %v2664_v35 = vmul.f32 %v2534_v45, %v2518_v54  ;;  %v2681_v54 = vadd.f32 %v570_v12, %v2394_v24  ;;  %v1819_v12 = vld [vmem:[%s3610_s7 + $0x38] sm:$0xff]  ;;  %v1872_v24 = vld [vmem:[%s3606_s3 + $0x12] ss:$0 sm:$0xff] }
 0x14a   : > { %3726 = vst [vmem:[#allocation67_spill] sm:$0xff] %v2629_v17  ;;  %v2667_v17 = vmul.f32 %v2454_v18, %v568_v7  ;;  %v575_v18 = vld [vmem:[#allocation2 + $0xe0] sm:$0xff]  ;;  %1608 = vmatpush.bf16.msra.mxu2 %v1819_v12 }
 0x14b   : > { %3727 = vst [vmem:[#allocation68_spill] sm:$0xff] %v2632_v29  ;;  %v458_v29 = vpop.permute.xlu1 %457 }
 0x14c   : > { %3728 = vst [vmem:[#allocation69_spill] sm:$0xff] %v2635_v25  ;;  %v2654_v25 = vmul.f32 %v1919_v56, %v1143_v30  ;;  %v2671_v56 = vmul.f32 %v2516_v27, %v2483_v47  ;;  %v620_v30 = vadd.f32 %v2362_v53, %v588_v39  ;;  %v2690_v47 = vld [vmem:[%s3606_s3 + $0x35] ss:$0 sm:$0xff]  ;;  %v2692_v27 = vmul.f32 %v1935_v36, %v568_v7  ;;  %v1183_v36 = vld [vmem:[#allocation2 + $0xc7] sm:$0xff] }
 0x14d   : > { %3729 = vst [vmem:[#allocation70_spill] sm:$0xff] %v2639_v23  ;;  %v1844_v23 = vld [vmem:[%s3606_s3 + $0x49] ss:$0 sm:$0xff]  ;;  %v578_v39 = vmul.f32 %v2570_v26, %v575_v18  ;;  %v2699_v53 = vmul.f32 %v1871_v0, %v655_v44  ;;  %v2708_v7 = vmul.f32 %v2579_v48, %v671_v58  ;;  %v591_v18 = vld [vmem:[#allocation2 + $0x120] sm:$0xff]  ;;  %v2713_v44 = vmul.f32 %v1882_v41, %v743_v6  ;;  %v1818_v6 = vld [vmem:[%s3610_s7 + $0x30] sm:$0xff] }
 0x14e   : > { %3730 = vst [vmem:[#allocation71_spill] sm:$0xff] %v2646_v33  ;;  %v2722_v58 = vmul.f32 %v2597_v20, %v759_v15  ;;  %v2738_v15 = vmul.f32 %v2608_v38, %v832_v1  ;;  %v652_v12 = vadd.f32 %v2190_v63, %v620_v30  ;;  %v1847_v63 = vld [vmem:[%s3606_s3 + $0x46] ss:$0 sm:$0xff]  ;;  %v2764_v30 = vld [vmem:[#allocation2 + $0xe9] sm:$0xff]  ;;  %1609 = vmatpush.bf16.msra.mxu2 %v1818_v6 }
 0x14f   : > { %3731 = vst [vmem:[#allocation72_spill] sm:$0xff] %v2652_v13  ;;  %v576_v13 = vld [vmem:[#allocation2 + $0xe8] sm:$0xff] }
 0x150   : > { %3732 = vst [vmem:[#allocation73_spill] sm:$0xff] %v2654_v25  ;;  %v919_v25 = vld [vmem:[#allocation2 + $0xc4] sm:$0xff] }
 0x151   : > { %3733 = vst [vmem:[#allocation74_spill] sm:$0xff] %v2657_v16  ;;  %v920_v16 = vld [vmem:[#allocation2 + $0xcc] sm:$0xff] }
 0x152   : > { %3734 = vst [vmem:[#allocation75_spill] sm:$0xff] %v2664_v35  ;;  %v2685_v35 = vmul.f32 %v2565_v8, %v935_v49  ;;  %v2702_v49 = vmul.f32 %v1871_v0, %v2618_v4  ;;  %v2716_v0 = vmul.f32 %v1882_v41, %v2646_v33  ;;  %v943_v4 = vld [vmem:[#allocation2 + $0x124] sm:$0xff]  ;;  %v594_v41 = vmul.f32 %v2616_v37, %v591_v18 }
 0x153   : > { %3735 = vst [vmem:[#allocation76_spill] sm:$0xff] %v2671_v56  ;;  %v1103_v56 = vld [vmem:[#allocation2 + $0xe6] sm:$0xff]  ;;  %v2753_v18 = vmul.f32 %v1904_v10, %v919_v25  ;;  %v2769_v25 = vmul.f32 %v2676_v9, %v1183_v36  ;;  %v2785_v36 = vmul.f32 %v2690_v47, %v943_v4  ;;  %v440_v4 = vpop.permute.xlu0 %439 }
 0x154   : > { %3736 = vst [vmem:[#allocation77_spill] sm:$0xff] %v2676_v9  ;;  %v679_v33 = vld [vmem:[#allocation2 + $0x121] sm:$0xff] }
 0x155   : > { %462 = vst [vmem:[#allocation2 + $0x8d] sm:$0xff] %v458_v29  ;;  %v1104_v29 = vld [vmem:[#allocation2 + $0xee] sm:$0xff]  ;;  %v682_v8 = vmul.f32 %v2644_v19, %v679_v33  ;;  %v596_v33 = vadd.f32 %v594_v41, %v2375_v21  ;;  %v767_v41 = vld [vmem:[#allocation2 + $0x122] sm:$0xff] }
 0x156   : > { %3737 = vst [vmem:[#allocation78_spill] sm:$0xff] %v2681_v54  ;;  %v2725_v54 = vmul.f32 %v2608_v38, %v831_v61  ;;  %v2741_v61 = vmul.f32 %v2623_v32, %v847_v43  ;;  %v2755_v38 = vmul.f32 %v1904_v10, %v920_v16  ;;  %v2757_v1 = vmul.f32 %v1844_v23, %v1104_v29  ;;  %v1848_v16 = vld [vmem:[%s3606_s3 + $0x42] ss:$0 sm:$0xff] }
 0x157   : > { %3738 = vst [vmem:[#allocation79_spill] sm:$0xff] %v2685_v35  ;;  %v1883_v35 = vld [vmem:[%s3606_s3 + $0x1d] ss:$0 sm:$0xff]  ;;  %v2771_v10 = vmul.f32 %v1844_v23, %v1103_v56  ;;  %v2777_v29 = vmul.f32 %v2570_v26, %v576_v13  ;;  %v684_v21 = vadd.f32 %v682_v8, %v652_v12  ;;  %v490_v23 = vpop.permute.xlu1 %489  ;;  %v855_v26 = vld [vmem:[#allocation2 + $0x123] sm:$0xff]  ;;  %v2792_v8 = vmul.f32 %v2501_v22, %v2678_v40 }
 0x158   : > { %3739 = vst [vmem:[#allocation80_spill] sm:$0xff] %v2692_v27  ;;  %v1936_v27 = vld [vmem:[%s3606_s3 + $0x5f] ss:$0 sm:$0xff]  ;;  %v628_v6 = vadd.f32 %v2397_v51, %v596_v33 }
 0x159   : > { %426 = vst [vmem:[#allocation2 + $0xd] sm:$0xff] %v2678_v40  ;;  %v2794_v12 = vmul.f32 %v1936_v27, %v576_v13 }
 0x15a   : > { %3740 = vst [vmem:[#allocation81_spill] sm:$0xff] %v2702_v49  ;;  %v580_v49 = vadd.f32 %v578_v39, %v2423_v28  ;;  %v1894_v28 = vld [vmem:[%s3606_s3 + $0x28] ss:$0 sm:$0xff]  ;;  %v2751_v39 = vld [vmem:[%s3606_s3 + $0x2a] ss:$0 sm:$0xff] }
 0x15b   : > { %3741 = vst [vmem:[#allocation82_spill] sm:$0xff] %v2716_v0  ;;  %v2735_v0 = vld [vmem:[%s3606_s3 + $0x1f] ss:$0 sm:$0xff] }
 0x15c   : > { %3742 = vst [vmem:[#allocation83_spill] sm:$0xff] %v2722_v58  ;;  %v663_v58 = vld [vmem:[#allocation2 + $0xe1] sm:$0xff]  ;;  %v612_v43 = vadd.f32 %v2537_v62, %v580_v49  ;;  %v2782_v49 = vld [vmem:[%s3606_s3 + $0x33] ss:$0 sm:$0xff] }
 0x15d   : > { %3743 = vst [vmem:[#allocation84_spill] sm:$0xff] %v2738_v15  ;;  %v2766_v15 = vld [vmem:[#allocation2 + $0xea] sm:$0xff]  ;;  %v2788_v9 = vmul.f32 %v1872_v24, %v663_v58 }
 0x15e   : > { %3744 = vst [vmem:[#allocation85_spill] sm:$0xff] %v2741_v61  ;;  %v751_v61 = vld [vmem:[#allocation2 + $0xe2] sm:$0xff]  ;;  %v644_v56 = vadd.f32 %v2553_v42, %v612_v43  ;;  %v2800_v42 = vmul.f32 %v1872_v24, %v2764_v30  ;;  %v2805_v43 = vmul.f32 %v1883_v35, %v2766_v15 }
 0x15f   : > { %3745 = vst [vmem:[#allocation86_spill] sm:$0xff] %v2753_v18  ;;  %v839_v62 = vld [vmem:[#allocation2 + $0xe3] sm:$0xff]  ;;  %v2802_v58 = vmul.f32 %v1883_v35, %v751_v61 }
 0x160   : > { %3746 = vst [vmem:[#allocation87_spill] sm:$0xff] %v2755_v38  ;;  %v1080_v38 = vld [vmem:[#allocation2 + $0x8e] sm:$0xff]  ;;  %v1047_v22 = vld [vmem:[#allocation2 + $0x6] sm:$0xff]  ;;  %v676_v27 = vadd.f32 %v2708_v7, %v644_v56  ;;  %v2812_v51 = vmul.f32 %v1894_v28, %v839_v62 }
 0x161   : > { %3747 = vst [vmem:[#allocation88_spill] sm:$0xff] %v2757_v1  ;;  %v840_v1 = vld [vmem:[#allocation2 + $0xeb] sm:$0xff]  ;;  %v2844_v56 = vmul.f32 %v1848_v16, %v1047_v22 }
 0x162   : > { %3748 = vst [vmem:[#allocation89_spill] sm:$0xff] %v2766_v15  ;;  %v2796_v18 = vld [vmem:[#allocation2 + $0x88] sm:$0xff]  ;;  %v2820_v33 = vmul.f32 %v1894_v28, %v840_v1  ;;  %v2823_v15 = vmul.f32 %v2751_v39, %v855_v26  ;;  %v708_v1 = vadd.f32 %v2365_v2, %v676_v27  ;;  %v2860_v2 = vld [vmem:[%s3606_s3 + $0x54] ss:$0 sm:$0xff]  ;;  %v2874_v27 = vmul.f32 %v2181_v60, %v440_v4 }
 0x163   : > { %3749 = vst [vmem:[#allocation90_spill] sm:$0xff] %v2769_v25  ;;  %v1079_v25 = vld [vmem:[#allocation2 + $0x86] sm:$0xff]  ;;  %v1048_v40 = vld [vmem:[#allocation2 + $0xe] sm:$0xff] }
 0x164   : > { %3750 = vst [vmem:[#allocation91_spill] sm:$0xff] %v2771_v10  ;;  %v927_v10 = vld [vmem:[#allocation2 + $0xe4] sm:$0xff]  ;;  %v2846_v26 = vmul.f32 %v1848_v16, %v1048_v40  ;;  %v928_v40 = vld [vmem:[#allocation2 + $0xec] sm:$0xff] }
 0x165   : > { %3751 = vst [vmem:[#allocation92_spill] sm:$0xff] %v2785_v36  ;;  %v2807_v13 = vld [vmem:[#allocation2 + $0x8] sm:$0xff]  ;;  %v2826_v7 = vmul.f32 %v2782_v49, %v927_v10  ;;  %v449_v36 = vpop.permute.xlu0 %448 }
 0x166   : > { %3752 = vst [vmem:[#allocation93_spill] sm:$0xff] %v2792_v8  ;;  %v523_v24 = vmul.f32 %v2223_v11, %v2807_v13  ;;  %v2816_v61 = vld [vmem:[#allocation2 + $0x9] sm:$0xff]  ;;  %v2835_v11 = vmul.f32 %v1847_v63, %v1080_v38 }
 0x167   : > { %3753 = vst [vmem:[#allocation94_spill] sm:$0xff] %v2794_v12  ;;  %v770_v12 = vmul.f32 %v2735_v0, %v767_v41  ;;  %v2818_v35 = vld [vmem:[#allocation2 + $0x89] sm:$0xff]  ;;  %v555_v41 = vmul.f32 %v2359_v52, %v2796_v18  ;;  %v2855_v52 = vld [vmem:[%s3606_s3 + $0x51] ss:$0 sm:$0xff] }
 0x168   : > { %494 = vst [vmem:[#allocation2 + $0x10d] sm:$0xff] %v490_v23  ;;  %v716_v23 = vadd.f32 %v2410_v59, %v684_v21  ;;  %v2831_v59 = vld [vmem:[%s3606_s3 + $0x4d] ss:$0 sm:$0xff]  ;;  %v2833_v21 = vmul.f32 %v1847_v63, %v1079_v25  ;;  %v525_v8 = vadd.f32 %v2332_v46, %v523_v24  ;;  %v2850_v25 = vadd.f32 %v2699_v53, %v628_v6  ;;  %v1849_v46 = vld [vmem:[%s3606_s3 + $0x44] ss:$0 sm:$0xff] }
 0x169   : > { %444 = vst [vmem:[#allocation2 + $0x4d] sm:$0xff] %v440_v4  ;;  %v2839_v28 = vld [vmem:[#allocation2 + $0xa] sm:$0xff]  ;;  %v2867_v53 = vmul.f32 %v2380_v14, %v2816_v61  ;;  %v740_v6 = vadd.f32 %v2202_v3, %v708_v1  ;;  %v2879_v24 = vld [vmem:[%s3606_s3 + $0x58] ss:$0 sm:$0xff]  ;;  %v499_v1 = vpop.permute.xlu1 %498 }
 0x16a   : > { %3754 = vst [vmem:[#allocation95_spill] sm:$0xff] %v2823_v15  ;;  %v2842_v62 = vld [vmem:[#allocation2 + $0x8a] sm:$0xff]  ;;  %v2871_v22 = vadd.f32 %v2713_v44, %v716_v23  ;;  %v2887_v14 = vmul.f32 %v2407_v34, %v2839_v28 }
 0x16b   : > { %3755 = vst [vmem:[#allocation96_spill] sm:$0xff] %v2826_v7  ;;  %v784_v10 = vld [vmem:[#allocation2 + $0xb] sm:$0xff]  ;;  %v2891_v3 = vmul.f32 %v2436_v5, %v2842_v62  ;;  %v2899_v4 = vld [vmem:[%s3606_s3 + $0x4a] ss:$0 sm:$0xff]  ;;  %v772_v34 = vadd.f32 %v770_v12, %v740_v6  ;;  %v3772_v7 = vld [vmem:[#allocation38_spill] sm:$0xff]  ;;  %v2915_v12 = vmul.f32 %v2782_v49, %v928_v40  ;;  %v2946_v40 = vmul.f32 %v2534_v45, %v499_v1 }
 0x16c   : > { %3756 = vst [vmem:[#allocation97_spill] sm:$0xff] %v2831_v59  ;;  %v816_v38 = vld [vmem:[#allocation2 + $0x8b] sm:$0xff]  ;;  %v2894_v60 = vmul.f32 %v2441_v50, %v784_v10 }
 0x16d   : > { %3757 = vst [vmem:[#allocation98_spill] sm:$0xff] %v2833_v21  ;;  %v872_v63 = vld [vmem:[#allocation2 + $0xc] sm:$0xff]  ;;  %v2883_v21 = vmul.f32 %v2402_v31, %v2818_v35 }
 0x16e   : > { %3758 = vst [vmem:[#allocation99_spill] sm:$0xff] %v2835_v11  ;;  %v904_v11 = vld [vmem:[#allocation2 + $0x8c] sm:$0xff]  ;;  %v2907_v5 = vmul.f32 %v2470_v55, %v872_v63  ;;  %v3774_v55 = vld [vmem:[#allocation6_spill] sm:$0xff] }
 0x16f   : > { %3759 = vst [vmem:[#allocation100_spill] sm:$0xff] %v2839_v28  ;;  %v1135_v16 = vld [vmem:[#allocation2 + $0x7] sm:$0xff]  ;;  %v3770_v50 = vld [vmem:[#allocation49_spill] sm:$0xff]  ;;  %v2934_v49 = vld [vmem:[%s3606_s3 + $0x4f] ss:$0 sm:$0xff] }
 0x170   : > { %3760 = vst [vmem:[#allocation101_spill] sm:$0xff] %v2842_v62  ;;  %v992_v44 = vld [vmem:[#allocation2 + $0x8d] sm:$0xff]  ;;  %v2910_v10 = vmul.f32 %v3770_v50, %v904_v11 }
 0x171   : > { %3761 = vst [vmem:[#allocation102_spill] sm:$0xff] %v2844_v56  ;;  %v1167_v23 = vld [vmem:[#allocation2 + $0x87] sm:$0xff]  ;;  %v2904_v56 = vmul.f32 %v2465_v57, %v816_v38  ;;  %v2918_v57 = vmul.f32 %v2831_v59, %v1135_v16  ;;  %v2943_v16 = vmul.f32 %v2879_v24, %v2807_v13 }
 0x172   : > { %3762 = vst [vmem:[#allocation103_spill] sm:$0xff] %v2846_v26  ;;  %v1111_v31 = vld [vmem:[#allocation2 + $0x106] sm:$0xff] }
 0x173   : > { %3763 = vst [vmem:[#allocation104_spill] sm:$0xff] %v2855_v52  ;;  %v2901_v26 = vld [vmem:[#allocation2 + $0x108] sm:$0xff]  ;;  %v3787_v13 = vld [vmem:[#allocation7_spill] sm:$0xff] }
 0x174   : > { %3764 = vst [vmem:[#allocation105_spill] sm:$0xff] %v2860_v2  ;;  %v1191_v62 = vld [vmem:[#allocation2 + $0xe7] sm:$0xff] }
 0x175   : > { %3765 = vst [vmem:[#allocation106_spill] sm:$0xff] %v2874_v27  ;;  %v1063_v28 = vld [vmem:[#allocation2 + $0x46] sm:$0xff]  ;;  %v1064_v27 = vld [vmem:[#allocation2 + $0x4e] sm:$0xff]  ;;  %v2954_v59 = vmul.f32 %v2860_v2, %v1191_v62 }
 0x176   : > { %3766 = vst [vmem:[#allocation107_spill] sm:$0xff] %v2879_v24  ;;  %v536_v15 = vld [vmem:[#allocation2 + $0x48] sm:$0xff] }
 0x177   : > { %3767 = vst [vmem:[#allocation108_spill] sm:$0xff] %v2891_v3  ;;  %v557_v3 = vadd.f32 %v555_v41, %v525_v8  ;;  %v539_v11 = vmul.f32 %v3774_v55, %v536_v15  ;;  %v2921_v38 = vld [vmem:[#allocation2 + $0x49] sm:$0xff]  ;;  %v3777_v41 = vld [vmem:[#allocation22_spill] sm:$0xff] }
 0x178   : > { %3768 = vst [vmem:[#allocation109_spill] sm:$0xff] %v2894_v60  ;;  %v587_v60 = vmul.f32 %v3772_v7, %v2901_v26  ;;  %v2923_v63 = vld [vmem:[#allocation2 + $0x109] sm:$0xff]  ;;  %v2939_v7 = vld [vmem:[%s3606_s3 + $0x55] ss:$0 sm:$0xff]  ;;  %v2962_v24 = vmul.f32 %v3787_v13, %v2921_v38 }
 0x179   : > { %3769 = vst [vmem:[#allocation110_spill] sm:$0xff] %v2899_v4  ;;  %v2925_v6 = vld [vmem:[#allocation2 + $0x4a] sm:$0xff]  ;;  %v2971_v62 = vadd.f32 %v2667_v17, %v539_v11  ;;  %v3791_v11 = vld [vmem:[#allocation15_spill] sm:$0xff] }
 0x17a   : > { %3771 = vst [vmem:[#allocation49_spill] sm:$0xff] %v2910_v10  ;;  %v3776_v50 = vld [vmem:[#allocation40_spill] sm:$0xff]  ;;  %v2929_v10 = vmul.f32 %v3777_v41, %v992_v44  ;;  %v2951_v41 = vmul.f32 %v2855_v52, %v1167_v23  ;;  %v1851_v23 = vld [vmem:[%s3606_s3 + $0x41] ss:$0 sm:$0xff]  ;;  %v3790_v13 = vld [vmem:[#allocation9_spill] sm:$0xff] }
 0x17b   : > { %503 = vst [vmem:[#allocation2 + $0x12d] sm:$0xff] %v499_v1  ;;  %v804_v8 = vadd.f32 %v3776_v50, %v772_v34  ;;  %v589_v34 = vadd.f32 %v587_v60, %v557_v3  ;;  %v2948_v44 = vld [vmem:[#allocation2 + $0x10a] sm:$0xff]  ;;  %v2965_v1 = vmul.f32 %v2899_v4, %v1111_v31  ;;  %v2980_v2 = vmul.f32 %v3790_v13, %v2925_v6  ;;  %v1850_v4 = vld [vmem:[%s3606_s3 + $0x45] ss:$0 sm:$0xff]  ;;  %v3001_v13 = vld [vmem:[%s3606_s3 + $0x5a] ss:$0 sm:$0xff] }
 0x17c   : > { %3773 = vst [vmem:[#allocation38_spill] sm:$0xff] %v2918_v57  ;;  %v800_v55 = vld [vmem:[#allocation2 + $0x4b] sm:$0xff]  ;;  %v2956_v57 = vmul.f32 %v1849_v46, %v1063_v28  ;;  %v3789_v28 = vld [vmem:[#allocation51_spill] sm:$0xff]  ;;  %v2987_v17 = vmul.f32 %v2597_v20, %v2948_v44 }
 0x17d   : > { %453 = vst [vmem:[#allocation2 + $0x6d] sm:$0xff] %v449_v36  ;;  %v848_v50 = vld [vmem:[#allocation2 + $0x10b] sm:$0xff] }
 0x17e   : > { %3775 = vst [vmem:[#allocation6_spill] sm:$0xff] %v2925_v6  ;;  %v888_v45 = vld [vmem:[#allocation2 + $0x4c] sm:$0xff] }
 0x17f   : > { %3778 = vst [vmem:[#allocation40_spill] sm:$0xff] %v2929_v10  ;;  %v2958_v10 = vmul.f32 %v1849_v46, %v1064_v27  ;;  %v936_v3 = vld [vmem:[#allocation2 + $0x10c] sm:$0xff]  ;;  %v621_v46 = vadd.f32 %v3789_v28, %v589_v34  ;;  %v2976_v27 = vmul.f32 %v2579_v48, %v2923_v63  ;;  %v2990_v34 = vmul.f32 %v3791_v11, %v800_v55  ;;  %v3795_v55 = vld [vmem:[#allocation59_spill] sm:$0xff] }
 0x180   : > { %3779 = vst [vmem:[#allocation22_spill] sm:$0xff] %v2934_v49  ;;  %v1024_v60 = vld [vmem:[#allocation2 + $0x10d] sm:$0xff]  ;;  %v2993_v48 = vadd.f32 %v2725_v54, %v804_v8  ;;  %v2996_v28 = vmul.f32 %v2623_v32, %v848_v50  ;;  %v3012_v11 = vmul.f32 %v3795_v55, %v936_v3 }
 0x181   : > { %3780 = vst [vmem:[#allocation111_spill] sm:$0xff] %v2939_v7  ;;  %v1151_v52 = vld [vmem:[#allocation2 + $0x47] sm:$0xff] }
 0x182   : > { %3781 = vst [vmem:[#allocation112_spill] sm:$0xff] %v2943_v16  ;;  %v1199_v31 = vld [vmem:[#allocation2 + $0x107] sm:$0xff]  ;;  %v3028_v16 = vld [vmem:[%s3606_s3 + $0x5b] ss:$0 sm:$0xff] }
 0x183   : > { %3782 = vst [vmem:[#allocation113_spill] sm:$0xff] %v2948_v44  ;;  %v3794_v20 = vld [vmem:[#allocation16_spill] sm:$0xff]  ;;  %v3046_v6 = vmul.f32 %v2939_v7, %v1199_v31 }
 0x184   : > { %3783 = vst [vmem:[#allocation114_spill] sm:$0xff] %v2951_v41  ;;  %v3009_v44 = vmul.f32 %v3794_v20, %v888_v45  ;;  %v3796_v54 = vld [vmem:[#allocation12_spill] sm:$0xff]  ;;  %v3023_v41 = vld [vmem:[%s3606_s3 + $0x50] ss:$0 sm:$0xff]  ;;  %v508_v45 = vpop.permute.xlu1 %507 }
 0x185   : > { %3784 = vst [vmem:[#allocation115_spill] sm:$0xff] %v2954_v59  ;;  %v3015_v8 = vmul.f32 %v3796_v54, %v449_v36  ;;  %v3798_v32 = vld [vmem:[#allocation36_spill] sm:$0xff]  ;;  %v3051_v59 = vld [vmem:[%s3606_s3 + $0x56] ss:$0 sm:$0xff] }
 0x186   : > { %3785 = vst [vmem:[#allocation116_spill] sm:$0xff] %v2956_v57  ;;  %v3018_v50 = vmul.f32 %v3798_v32, %v1024_v60  ;;  %v3030_v20 = vld [vmem:[#allocation2 + $0x128] sm:$0xff]  ;;  %v3043_v32 = vmul.f32 %v2934_v49, %v1151_v52  ;;  %v506_v57 = vpop.permute.xlu0 %505 }
 0x187   : > { %3786 = vst [vmem:[#allocation117_spill] sm:$0xff] %v2958_v10  ;;  %v3802_v3 = vld [vmem:[#allocation8_spill] sm:$0xff]  ;;  %v595_v52 = vmul.f32 %v2616_v37, %v3030_v20 }
 0x188   : > { %3788 = vst [vmem:[#allocation7_spill] sm:$0xff] %v2965_v1  ;;  %v3006_v1 = vld [vmem:[%s3606_s3 + $0x5c] ss:$0 sm:$0xff]  ;;  %v653_v55 = vadd.f32 %v3802_v3, %v621_v46  ;;  %v3033_v36 = vld [vmem:[#allocation2 + $0x129] sm:$0xff]  ;;  %v3054_v46 = vmul.f32 %v3001_v13, %v536_v15  ;;  %v3069_v15 = vld [vmem:[%s3606_s3 + $0x60] ss:$0 sm:$0xff] }
 0x189   : > { %3792 = vst [vmem:[#allocation51_spill] sm:$0xff] %v3001_v13  ;;  %v3035_v54 = vld [vmem:[#allocation2 + $0x12a] sm:$0xff]  ;;  %v683_v31 = vmul.f32 %v2644_v19, %v3033_v36  ;;  %v3064_v7 = vmul.f32 %v3006_v1, %v2796_v18  ;;  %v3084_v18 = vld [vmem:[%s3606_s3 + $0x61] ss:$0 sm:$0xff] }
 0x18a   : > { %3793 = vst [vmem:[#allocation9_spill] sm:$0xff] %v3006_v1  ;;  %v3040_v60 = vld [vmem:[%s3606_s3 + $0x4b] ss:$0 sm:$0xff]  ;;  %v3079_v19 = vmul.f32 %v2735_v0, %v3035_v54 }
 0x18b   : > { %3797 = vst [vmem:[#allocation15_spill] sm:$0xff] %v3015_v8  ;;  %v1071_v3 = vld [vmem:[#allocation2 + $0x66] sm:$0xff]  ;;  %v1072_v8 = vld [vmem:[#allocation2 + $0x6e] sm:$0xff]  ;;  %v685_v0 = vadd.f32 %v683_v31, %v653_v55 }
 0x18c   : > { %3799 = vst [vmem:[#allocation16_spill] sm:$0xff] %v3018_v50  ;;  %v1159_v10 = vld [vmem:[#allocation2 + $0x67] sm:$0xff]  ;;  %v3056_v50 = vmul.f32 %v1851_v23, %v508_v45  ;;  %v3071_v13 = vmul.f32 %v1850_v4, %v1071_v3  ;;  %v3089_v3 = vld [vmem:[%s3606_s3 + $0x63] ss:$0 sm:$0xff] }
 0x18d   : > { %3800 = vst [vmem:[#allocation59_spill] sm:$0xff] %v3023_v41  ;;  %v544_v37 = vld [vmem:[#allocation2 + $0x68] sm:$0xff] }
 0x18e   : > { %3801 = vst [vmem:[#allocation12_spill] sm:$0xff] %v3028_v16  ;;  %v632_v49 = vld [vmem:[#allocation2 + $0x69] sm:$0xff] }
 0x18f   : > { %3803 = vst [vmem:[#allocation36_spill] sm:$0xff] %v3033_v36  ;;  %v1864_v36 = vld [vmem:[%s3606_s3 + $0xa] ss:$0 sm:$0xff] }
 0x190   : > { %3804 = vst [vmem:[#allocation8_spill] sm:$0xff] %v3035_v54  ;;  %v3099_v54 = vmul.f32 %v3023_v41, %v1159_v10  ;;  %v944_v10 = vld [vmem:[#allocation2 + $0x12c] sm:$0xff] }
 0x191   : > { %3805 = vst [vmem:[#allocation118_spill] sm:$0xff] %v3040_v60  ;;  %v1119_v41 = vld [vmem:[#allocation2 + $0x126] sm:$0xff] }
 0x192   : > { %3806 = vst [vmem:[#allocation119_spill] sm:$0xff] %v3043_v32 }
 0x193   : > { %3807 = vst [vmem:[#allocation120_spill] sm:$0xff] %v3046_v6  ;;  %v808_v6 = vld [vmem:[#allocation2 + $0x6b] sm:$0xff] }
 0x194   : > { %3808 = vst [vmem:[#allocation121_spill] sm:$0xff] %v3051_v59 }
 0x195   : > { %3809 = vst [vmem:[#allocation122_spill] sm:$0xff] %v3054_v46  ;;  %v3075_v46 = vmul.f32 %v1851_v23, %v506_v57 }
 0x196   : > { %512 = vst [vmem:[#allocation2 + $0x14d] sm:$0xff] %v508_v45  ;;  %v3073_v45 = vmul.f32 %v1850_v4, %v1072_v8  ;;  %v1852_v4 = vld [vmem:[%s3606_s3 + $0x4c] ss:$0 sm:$0xff] }
 0x197   : > { %3810 = vst [vmem:[#allocation123_spill] sm:$0xff] %v3056_v50  ;;  %v3819_v8 = vld [vmem:[#allocation56_spill] sm:$0xff] }
 0x198   : > { %3811 = vst [vmem:[#allocation124_spill] sm:$0xff] %v3064_v7  ;;  %v597_v1 = vadd.f32 %v595_v52, %v3819_v8  ;;  %v856_v7 = vld [vmem:[#allocation2 + $0x12b] sm:$0xff] }
 0x199   : > { %3812 = vst [vmem:[#allocation125_spill] sm:$0xff] %v3069_v15  ;;  %v3823_v50 = vld [vmem:[#allocation20_spill] sm:$0xff]  ;;  %v3824_v52 = vld [vmem:[#allocation21_spill] sm:$0xff]  ;;  %v3115_v31 = vmul.f32 %v2751_v39, %v856_v7  ;;  %v3131_v39 = vld [vmem:[%s3606_s3 + $0x65] ss:$0 sm:$0xff] }
 0x19a   : > { %3813 = vst [vmem:[#allocation126_spill] sm:$0xff] %v3071_v13  ;;  %v3822_v13 = vld [vmem:[#allocation14_spill] sm:$0xff]  ;;  %v3112_v55 = vmul.f32 %v3824_v52, %v808_v6  ;;  %v896_v8 = vld [vmem:[#allocation2 + $0x6c] sm:$0xff]  ;;  %v3126_v6 = vmul.f32 %v3028_v16, %v544_v37  ;;  %v3826_v7 = vld [vmem:[#allocation27_spill] sm:$0xff] }
 0x19b   : > { %3814 = vst [vmem:[#allocation127_spill] sm:$0xff] %v3073_v45  ;;  %v3096_v45 = vld [vmem:[#allocation2 + $0x6a] sm:$0xff]  ;;  %v3105_v32 = vmul.f32 %v3822_v13, %v632_v49  ;;  %v717_v13 = vadd.f32 %v2980_v2, %v685_v0  ;;  %v3140_v2 = vmul.f32 %v3040_v60, %v1119_v41  ;;  %v1875_v52 = vld [vmem:[%s3606_s3 + $0x15] ss:$0 sm:$0xff] }
 0x19c   : > { %511 = vst [vmem:[#allocation2 + $0x145] sm:$0xff] %v506_v57  ;;  %v3818_v57 = vld [vmem:[#allocation13_spill] sm:$0xff]  ;;  %v3173_v16 = vld [vmem:[%s3606_s3 + $0x6a] ss:$0 sm:$0xff] }
 0x19d   : > { %3815 = vst [vmem:[#allocation128_spill] sm:$0xff] %v3075_v46  ;;  %v547_v23 = vmul.f32 %v3818_v57, %v544_v37  ;;  %v3109_v57 = vmul.f32 %v3823_v50, %v3096_v45  ;;  %v629_v46 = vadd.f32 %v2962_v24, %v597_v1  ;;  %v3123_v50 = vld [vmem:[%s3606_s3 + $0x36] ss:$0 sm:$0xff]  ;;  %v3137_v24 = vmul.f32 %v2690_v47, %v944_v10  ;;  %v3148_v37 = vld [vmem:[%s3606_s3 + $0x66] ss:$0 sm:$0xff] }
 0x19e   : > { %3816 = vst [vmem:[#allocation129_spill] sm:$0xff] %v3084_v18  ;;  %v3158_v47 = vld [vmem:[%s3606_s3 + $0x69] ss:$0 sm:$0xff]  ;;  %v3831_v0 = vld [vmem:[#allocation81_spill] sm:$0xff] }
 0x19f   : > { %3817 = vst [vmem:[#allocation130_spill] sm:$0xff] %v3089_v3 }
 0x1a0   : > { %3820 = vst [vmem:[#allocation13_spill] sm:$0xff] %v3096_v45  ;;  %v1207_v45 = vld [vmem:[#allocation2 + $0x127] sm:$0xff] }
 0x1a1   : > { %3821 = vst [vmem:[#allocation56_spill] sm:$0xff] %v3099_v54  ;;  %v581_v54 = vadd.f32 %v2777_v29, %v547_v23  ;;  %v3134_v29 = vmul.f32 %v3826_v7, %v896_v8  ;;  %v3143_v1 = vmul.f32 %v3051_v59, %v1207_v45  ;;  %v3153_v23 = vld [vmem:[%s3606_s3 + $0x67] ss:$0 sm:$0xff]  ;;  %v661_v45 = vadd.f32 %v3831_v0, %v629_v46  ;;  %v3832_v8 = vld [vmem:[#allocation82_spill] sm:$0xff]  ;;  %v1128_v59 = vld [vmem:[#allocation2 + $0x14e] sm:$0xff] }
 0x1a2   : > { %3825 = vst [vmem:[#allocation14_spill] sm:$0xff] %v3131_v39  ;;  %v749_v10 = vadd.f32 %v3832_v8, %v717_v13  ;;  %v3168_v7 = vmul.f32 %v3069_v15, %v2901_v26  ;;  %v3183_v46 = vmul.f32 %v3084_v18, %v3030_v20  ;;  %v3187_v26 = vmul.f32 %v3089_v3, %v2816_v61  ;;  %v3841_v61 = vld [vmem:[#allocation65_spill] sm:$0xff] }
 0x1a3   : > { %3827 = vst [vmem:[#allocation20_spill] sm:$0xff] %v3143_v1  ;;  %v613_v41 = vadd.f32 %v2867_v53, %v581_v54  ;;  %v1886_v53 = vld [vmem:[%s3606_s3 + $0x20] ss:$0 sm:$0xff]  ;;  %v1897_v54 = vld [vmem:[%s3606_s3 + $0x2b] ss:$0 sm:$0xff]  ;;  %v3191_v13 = vmul.f32 %v3131_v39, %v2921_v38  ;;  %v3194_v0 = vmul.f32 %v3148_v37, %v632_v49  ;;  %v3196_v8 = vmul.f32 %v1852_v4, %v1128_v59  ;;  %v687_v59 = vld [vmem:[#allocation2 + $0x141] sm:$0xff] }
 0x1a4   : > { %3828 = vst [vmem:[#allocation21_spill] sm:$0xff] %v3148_v37  ;;  %v951_v15 = vld [vmem:[#allocation2 + $0x144] sm:$0xff]  ;;  %v3201_v20 = vmul.f32 %v3153_v23, %v2818_v35  ;;  %v3205_v3 = vmul.f32 %v3158_v47, %v3841_v61  ;;  %v690_v61 = vmul.f32 %v1875_v52, %v687_v59 }
 0x1a5   : > { %3829 = vst [vmem:[#allocation27_spill] sm:$0xff] %v3153_v23  ;;  %v1127_v1 = vld [vmem:[#allocation2 + $0x146] sm:$0xff]  ;;  %v3214_v18 = vmul.f32 %v3123_v50, %v951_v15  ;;  %v3844_v23 = vld [vmem:[#allocation78_spill] sm:$0xff] }
 0x1a6   : > { %3830 = vst [vmem:[#allocation131_spill] sm:$0xff] %v3158_v47  ;;  %v599_v60 = vld [vmem:[#allocation2 + $0x140] sm:$0xff]  ;;  %v3207_v38 = vmul.f32 %v1852_v4, %v1127_v1  ;;  %v3209_v39 = vld [vmem:[#allocation2 + $0x148] sm:$0xff] }
 0x1a7   : > { %3833 = vst [vmem:[#allocation81_spill] sm:$0xff] %v3168_v7  ;;  %v645_v7 = vadd.f32 %v2883_v21, %v613_v41  ;;  %v602_v49 = vmul.f32 %v1864_v36, %v599_v60  ;;  %v3211_v37 = vld [vmem:[#allocation2 + $0x149] sm:$0xff]  ;;  %v3218_v21 = vmul.f32 %v3173_v16, %v2764_v30  ;;  %v603_v35 = vmul.f32 %v1864_v36, %v3209_v39  ;;  %v3846_v59 = vld [vmem:[#allocation39_spill] sm:$0xff] }
 0x1a8   : > { %3834 = vst [vmem:[#allocation82_spill] sm:$0xff] %v3173_v16  ;;  %v691_v4 = vmul.f32 %v1875_v52, %v3211_v37  ;;  %v775_v1 = vld [vmem:[#allocation2 + $0x142] sm:$0xff]  ;;  %v3223_v47 = vld [vmem:[#allocation2 + $0x14a] sm:$0xff]  ;;  %v692_v36 = vadd.f32 %v690_v61, %v2850_v25 }
 0x1a9   : > { %3835 = vst [vmem:[#allocation132_spill] sm:$0xff] %v3183_v46  ;;  %v677_v41 = vadd.f32 %v2976_v27, %v645_v7  ;;  %v863_v60 = vld [vmem:[#allocation2 + $0x143] sm:$0xff]  ;;  %v779_v15 = vmul.f32 %v1886_v53, %v3223_v47  ;;  %v605_v30 = vadd.f32 %v603_v35, %v2971_v62  ;;  %v3845_v27 = vld [vmem:[#allocation58_spill] sm:$0xff] }
 0x1aa   : > { %3836 = vst [vmem:[#allocation133_spill] sm:$0xff] %v3187_v26  ;;  %v866_v46 = vmul.f32 %v1897_v54, %v863_v60  ;;  %v693_v16 = vadd.f32 %v691_v4, %v661_v45  ;;  %v3848_v60 = vld [vmem:[#allocation10_spill] sm:$0xff]  ;;  %v3849_v25 = vld [vmem:[#allocation43_spill] sm:$0xff]  ;;  %v3856_v61 = vld [vmem:[#allocation96_spill] sm:$0xff] }
 0x1ab   : > { %3837 = vst [vmem:[#allocation134_spill] sm:$0xff] %v3191_v13  ;;  %v864_v13 = vld [vmem:[#allocation2 + $0x14b] sm:$0xff]  ;;  %v709_v7 = vadd.f32 %v3845_v27, %v677_v41 }
 0x1ac   : > { %3838 = vst [vmem:[#allocation135_spill] sm:$0xff] %v3194_v0  ;;  %v604_v0 = vadd.f32 %v602_v49, %v3844_v23  ;;  %v637_v23 = vadd.f32 %v3105_v32, %v605_v30  ;;  %v3847_v49 = vld [vmem:[#allocation42_spill] sm:$0xff] }
 0x1ad   : > { %3839 = vst [vmem:[#allocation136_spill] sm:$0xff] %v3196_v8  ;;  %v781_v8 = vadd.f32 %v779_v15, %v749_v10  ;;  %v741_v26 = vadd.f32 %v3848_v60, %v709_v7  ;;  %v3857_v15 = vld [vmem:[#allocation108_spill] sm:$0xff] }
 0x1ae   : > { %3840 = vst [vmem:[#allocation137_spill] sm:$0xff] %v3201_v20  ;;  %v636_v52 = vadd.f32 %v3846_v59, %v604_v0  ;;  %v867_v20 = vmul.f32 %v1897_v54, %v864_v13  ;;  %v868_v0 = vadd.f32 %v866_v46, %v2993_v48  ;;  %v3850_v54 = vld [vmem:[#allocation57_spill] sm:$0xff]  ;;  %v3851_v13 = vld [vmem:[#allocation48_spill] sm:$0xff] }
 0x1af   : > { %3842 = vst [vmem:[#allocation65_spill] sm:$0xff] %v3205_v3  ;;  %v778_v3 = vmul.f32 %v1886_v53, %v775_v1  ;;  %v724_v1 = vadd.f32 %v3847_v49, %v692_v36  ;;  %v725_v53 = vadd.f32 %v3109_v57, %v693_v16  ;;  %v813_v35 = vadd.f32 %v3112_v55, %v781_v8  ;;  %v3251_v48 = vld [vmem:[%s3606_s3 + $0x6b] ss:$0 sm:$0xff]  ;;  %v3858_v36 = vld [vmem:[#allocation63_spill] sm:$0xff] }
 0x1b0   : > { %3843 = vst [vmem:[#allocation138_spill] sm:$0xff] %v3218_v21  ;;  %v668_v62 = vadd.f32 %v2788_v9, %v636_v52  ;;  %v773_v10 = vadd.f32 %v3079_v19, %v741_v26  ;;  %v3854_v26 = vld [vmem:[#allocation60_spill] sm:$0xff]  ;;  %v3860_v52 = vld [vmem:[#allocation83_spill] sm:$0xff]  ;;  %v3270_v60 = vmul.f32 %v3251_v48, %v2923_v63 }
 0x1b1   : > { %v780_v21 = vadd.f32 %v778_v3, %v2871_v22  ;;  %v669_v22 = vadd.f32 %v2800_v42, %v637_v23  ;;  %v756_v3 = vadd.f32 %v2802_v58, %v724_v1  ;;  %v757_v32 = vadd.f32 %v2805_v43, %v725_v53  ;;  %v3852_v58 = vld [vmem:[#allocation61_spill] sm:$0xff]  ;;  %v3859_v7 = vld [vmem:[#allocation84_spill] sm:$0xff]  ;;  %v3861_v49 = vld [vmem:[#allocation67_spill] sm:$0xff] }
 0x1b2   : > { %v700_v16 = vadd.f32 %v3850_v54, %v668_v62  ;;  %v845_v9 = vadd.f32 %v2820_v33, %v813_v35  ;;  %v3853_v43 = vld [vmem:[#allocation109_spill] sm:$0xff]  ;;  %v805_v19 = vadd.f32 %v2990_v34, %v773_v10  ;;  %v3866_v10 = vld [vmem:[#allocation68_spill] sm:$0xff] }
 0x1b3   : > { %v812_v45 = vadd.f32 %v3849_v25, %v780_v21  ;;  %v900_v21 = vadd.f32 %v3851_v13, %v868_v0  ;;  %v701_v42 = vadd.f32 %v2887_v14, %v669_v22  ;;  %v788_v55 = vadd.f32 %v3852_v58, %v756_v3  ;;  %v3862_v1 = vld [vmem:[#allocation49_spill] sm:$0xff]  ;;  %v3865_v22 = vld [vmem:[#allocation79_spill] sm:$0xff]  ;;  %v3869_v13 = vld [vmem:[#allocation66_spill] sm:$0xff] }
 0x1b4   : > { %v789_v46 = vadd.f32 %v3853_v43, %v757_v32  ;;  %v732_v8 = vadd.f32 %v3854_v26, %v700_v16  ;;  %v877_v33 = vadd.f32 %v2907_v5, %v845_v9  ;;  %v837_v59 = vadd.f32 %v3859_v7, %v805_v19  ;;  %v3863_v62 = vld [vmem:[#allocation85_spill] sm:$0xff]  ;;  %v3867_v16 = vld [vmem:[#allocation62_spill] sm:$0xff]  ;;  %v3868_v9 = vld [vmem:[#allocation35_spill] sm:$0xff] }
 0x1b5   : > { %v844_v57 = vadd.f32 %v2812_v51, %v812_v45  ;;  %v3855_v51 = vld [vmem:[#allocation64_spill] sm:$0xff]  ;;  %v932_v4 = vadd.f32 %v3856_v61, %v900_v21  ;;  %v733_v30 = vadd.f32 %v3857_v15, %v701_v42  ;;  %v820_v27 = vadd.f32 %v3858_v36, %v788_v55  ;;  %v3870_v42 = vld [vmem:[#allocation3_spill] sm:$0xff]  ;;  %v3879_v36 = vld [vmem:[#allocation18_spill] sm:$0xff] }
 0x1b6   : > { %v821_v14 = vadd.f32 %v2904_v56, %v789_v46  ;;  %v764_v23 = vadd.f32 %v3860_v52, %v732_v8  ;;  %v909_v53 = vadd.f32 %v3862_v1, %v877_v33  ;;  %v869_v35 = vadd.f32 %v867_v20, %v837_v59  ;;  %v3864_v56 = vld [vmem:[#allocation34_spill] sm:$0xff]  ;;  %v3872_v55 = vld [vmem:[#allocation72_spill] sm:$0xff]  ;;  %v3874_v26 = vld [vmem:[#allocation11_spill] sm:$0xff] }
 0x1b7   : > { %v876_v41 = vadd.f32 %v3855_v51, %v844_v57  ;;  %v765_v5 = vadd.f32 %v2987_v17, %v733_v30  ;;  %v852_v25 = vadd.f32 %v3863_v62, %v820_v27  ;;  %v964_v54 = vadd.f32 %v3866_v10, %v932_v4  ;;  %v3873_v46 = vld [vmem:[#allocation44_spill] sm:$0xff]  ;;  %v3877_v4 = vld [vmem:[#allocation95_spill] sm:$0xff]  ;;  %v3878_v30 = vld [vmem:[#allocation5_spill] sm:$0xff] }
 0x1b8   : > { %v853_v45 = vadd.f32 %v2996_v28, %v821_v14  ;;  %v796_v0 = vadd.f32 %v3864_v56, %v764_v23  ;;  %v941_v32 = vadd.f32 %v3012_v11, %v909_v53  ;;  %v901_v17 = vadd.f32 %v3134_v29, %v869_v35  ;;  %v3871_v28 = vld [vmem:[#allocation33_spill] sm:$0xff]  ;;  %v3875_v8 = vld [vmem:[#allocation4_spill] sm:$0xff] }
 0x1b9   : > { %v908_v34 = vadd.f32 %v3861_v49, %v876_v41  ;;  %v797_v57 = vadd.f32 %v3867_v16, %v765_v5  ;;  %v884_v63 = vadd.f32 %v3868_v9, %v852_v25  ;;  %v996_v19 = vadd.f32 %v3873_v46, %v964_v54  ;;  %v3876_v41 = vld [vmem:[#allocation17_spill] sm:$0xff]  ;;  %v3881_v52 = vld [vmem:[#allocation92_spill] sm:$0xff]  ;;  %v3889_v16 = vld [vmem:[#allocation86_spill] sm:$0xff] }
 0x1ba   : > { %v885_v21 = vadd.f32 %v3869_v13, %v853_v45  ;;  %v828_v58 = vadd.f32 %v3870_v42, %v796_v0  ;;  %v973_v43 = vadd.f32 %v3872_v55, %v941_v32  ;;  %v933_v61 = vadd.f32 %v2915_v12, %v901_v17  ;;  %v3880_v14 = vld [vmem:[#allocation53_spill] sm:$0xff]  ;;  %v3884_v12 = vld [vmem:[#allocation75_spill] sm:$0xff]  ;;  %v3888_v10 = vld [vmem:[#allocation40_spill] sm:$0xff] }
 0x1bb   : > { %v940_v3 = vadd.f32 %v3865_v22, %v908_v34  ;;  %v829_v11 = vadd.f32 %v3874_v26, %v797_v57  ;;  %v916_v51 = vadd.f32 %v3875_v8, %v884_v63  ;;  %v1028_v7 = vadd.f32 %v3880_v14, %v996_v19  ;;  %v952_v34 = vld [vmem:[#allocation2 + $0x14c] sm:$0xff]  ;;  %v3891_v13 = vld [vmem:[#allocation23_spill] sm:$0xff] }
 0x1bc   : > { %v917_v33 = vadd.f32 %v3876_v41, %v885_v21  ;;  %v860_v15 = vadd.f32 %v3877_v4, %v828_v58  ;;  %v1005_v27 = vadd.f32 %v3879_v36, %v973_v43  ;;  %v3882_v1 = vld [vmem:[#allocation93_spill] sm:$0xff]  ;;  %v3886_v22 = vld [vmem:[#allocation32_spill] sm:$0xff]  ;;  %v955_v9 = vmul.f32 %v3123_v50, %v952_v34  ;;  %v3892_v17 = vld [vmem:[#allocation87_spill] sm:$0xff] }
 0x1bd   : > { %v972_v20 = vadd.f32 %v3871_v28, %v940_v3  ;;  %v861_v59 = vadd.f32 %v3115_v31, %v829_v11  ;;  %v948_v23 = vadd.f32 %v3881_v52, %v916_v51  ;;  %v965_v53 = vadd.f32 %v3882_v1, %v933_v61  ;;  %v3883_v5 = vld [vmem:[#allocation41_spill] sm:$0xff]  ;;  %v3887_v31 = vld [vmem:[#allocation106_spill] sm:$0xff]  ;;  %v3895_v43 = vld [vmem:[#allocation16_spill] sm:$0xff] }
 0x1be   : > { %v949_v49 = vadd.f32 %v3137_v24, %v917_v33  ;;  %v892_v62 = vadd.f32 %v3883_v5, %v860_v15  ;;  %v1037_v45 = vadd.f32 %v2946_v40, %v1005_v27  ;;  %v3885_v35 = vld [vmem:[#allocation45_spill] sm:$0xff]  ;;  %v3890_v40 = vld [vmem:[#allocation116_spill] sm:$0xff]  ;;  %v3893_v58 = vld [vmem:[#allocation50_spill] sm:$0xff] }
 0x1bf   : > { %v1004_v29 = vadd.f32 %v3878_v30, %v972_v20  ;;  %v1060_v56 = vadd.f32 %v3885_v35, %v1028_v7  ;;  %v893_v0 = vadd.f32 %v3009_v44, %v861_v59  ;;  %v980_v3 = vadd.f32 %v3886_v22, %v948_v23  ;;  %v3310_v24 = vld [vmem:[%s3606_s3 + $0x57] ss:$0 sm:$0xff]  ;;  %v1215_v44 = vld [vmem:[#allocation2 + $0x147] sm:$0xff]  ;;  %v3894_v20 = vld [vmem:[#allocation46_spill] sm:$0xff] }
 0x1c0   : > { %v981_v32 = vadd.f32 %v3887_v31, %v949_v49  ;;  %v997_v54 = vadd.f32 %v3888_v10, %v965_v53  ;;  %v924_v57 = vadd.f32 %v3889_v16, %v892_v62  ;;  %v3323_v19 = vld [vmem:[%s3606_s3 + $0x62] ss:$0 sm:$0xff]  ;;  %v3328_v50 = vld [vmem:[%s3606_s3 + $0x6c] ss:$0 sm:$0xff]  ;;  %v3896_v11 = vld [vmem:[#allocation117_spill] sm:$0xff]  ;;  %v1218_v27 = vmul.f32 %v3310_v24, %v1215_v44 }
 0x1c1   : > { %v1036_v25 = vadd.f32 %v3884_v12, %v1004_v29  ;;  %v1092_v21 = vadd.f32 %v3891_v13, %v1060_v56  ;;  %v925_v42 = vadd.f32 %v3892_v17, %v893_v0  ;;  %v1012_v28 = vadd.f32 %v3893_v58, %v980_v3  ;;  %v3897_v51 = vld [vmem:[#allocation74_spill] sm:$0xff]  ;;  %v3339_v61 = vld [vmem:[%s3606_s3 + $0x6d] ss:$0 sm:$0xff]  ;;  %v3899_v29 = vld [vmem:[#allocation123_spill] sm:$0xff] }
 0x1c2   : > { %v1013_v55 = vadd.f32 %v3894_v20, %v981_v32  ;;  %v1029_v46 = vadd.f32 %v3895_v43, %v997_v54  ;;  %v956_v26 = vadd.f32 %v3214_v18, %v924_v57  ;;  %v3332_v8 = vadd.f32 %v3896_v11, %v1037_v45  ;;  %v3898_v15 = vld [vmem:[#allocation128_spill] sm:$0xff]  ;;  %v3900_v14 = vld [vmem:[#allocation37_spill] sm:$0xff]  ;;  %v3902_v49 = vld [vmem:[#allocation119_spill] sm:$0xff] }
 0x1c3   : > { %v1068_v63 = vadd.f32 %v3890_v40, %v1036_v25  ;;  %v1124_v33 = vadd.f32 %v3140_v2, %v1092_v21  ;;  %v957_v4 = vadd.f32 %v955_v9, %v925_v42  ;;  %v1044_v30 = vadd.f32 %v3898_v15, %v1012_v28  ;;  %v3347_v18 = vld [vmem:[%s3606_s3 + $0x6e] ss:$0 sm:$0xff]  ;;  %v3352_v2 = vld [vmem:[%s3606_s3 + $0x6f] ss:$0 sm:$0xff]  ;;  %v3361_v1 = vld [vmem:[%s3606_s3 + $0x70] ss:$0 sm:$0xff] }
 0x1c4   : > { %v1045_v36 = vadd.f32 %v3899_v29, %v1013_v55  ;;  %v988_v7 = vadd.f32 %v3900_v14, %v956_v26  ;;  %v3901_v59 = vld [vmem:[#allocation52_spill] sm:$0xff]  ;;  %v3903_v53 = vld [vmem:[#allocation15_spill] sm:$0xff]  ;;  %v3904_v62 = vld [vmem:[#allocation126_spill] sm:$0xff]  ;;  %v3367_v25 = vmul.f32 %v3323_v19, %v3209_v39  ;;  %v3388_v10 = vmul.f32 %v3339_v61, %v3211_v37 }
 0x1c5   : > { %v1100_v41 = vadd.f32 %v3897_v51, %v1068_v63  ;;  %v1061_v52 = vadd.f32 %v3901_v59, %v1029_v46  ;;  %v1156_v34 = vadd.f32 %v3902_v49, %v1124_v33  ;;  %v989_v5 = vadd.f32 %v3903_v53, %v957_v4  ;;  %v3905_v45 = vld [vmem:[#allocation36_spill] sm:$0xff]  ;;  %v3381_v56 = vld [vmem:[%s3606_s3 + $0x72] ss:$0 sm:$0xff]  ;;  %v3906_v0 = vld [vmem:[#allocation70_spill] sm:$0xff] }
 0x1c6   : > { %v1076_v12 = vadd.f32 %v3904_v62, %v1044_v30  ;;  %v3371_v35 = vmul.f32 %v3328_v50, %v3905_v45  ;;  %v1020_v22 = vadd.f32 %v3906_v0, %v988_v7  ;;  %v3907_v3 = vld [vmem:[#allocation56_spill] sm:$0xff]  ;;  %v3908_v39 = vld [vmem:[#allocation90_spill] sm:$0xff]  ;;  %v3393_v54 = vld [vmem:[%s3606_s3 + $0x74] ss:$0 sm:$0xff] }
 0x1c7   : > { %v1132_v23 = vadd.f32 %v3207_v38, %v1100_v41  ;;  %v3376_v38 = vld [vmem:[%s3606_s3 + $0x71] ss:$0 sm:$0xff]  ;;  %v1188_v32 = vadd.f32 %v3908_v39, %v1156_v34  ;;  %v3909_v16 = vld [vmem:[#allocation76_spill] sm:$0xff]  ;;  %v3910_v9 = vld [vmem:[#allocation91_spill] sm:$0xff] }
 0x1c8   : > { %v1021_v57 = vadd.f32 %v3909_v16, %v989_v5  ;;  %v1108_v40 = vadd.f32 %v3910_v9, %v1076_v12  ;;  %v3911_v63 = vld [vmem:[#allocation100_spill] sm:$0xff]  ;;  %v3912_v21 = vld [vmem:[#allocation47_spill] sm:$0xff]  ;;  %v3408_v37 = vld [vmem:[%s3606_s3 + $0x75] ss:$0 sm:$0xff] }
 0x1c9   : > { %v1164_v31 = vadd.f32 %v3907_v3, %v1132_v23  ;;  %v3399_v13 = vmul.f32 %v3347_v18, %v3911_v63  ;;  %v3403_v44 = vmul.f32 %v3352_v2, %v3912_v21  ;;  %v3413_v17 = vld [vmem:[%s3606_s3 + $0x76] ss:$0 sm:$0xff]  ;;  %v3418_v42 = vld [vmem:[%s3606_s3 + $0x77] ss:$0 sm:$0xff]  ;;  %v3913_v58 = vld [vmem:[#allocation102_spill] sm:$0xff]  ;;  %v1220_v43 = vadd.f32 %v1218_v27, %v1188_v32 }
 0x1ca   : > { %v1052_v28 = vadd.f32 %v3913_v58, %v1020_v22  ;;  %v3914_v20 = vld [vmem:[#allocation115_spill] sm:$0xff]  ;;  %v3915_v46 = vld [vmem:[#allocation6_spill] sm:$0xff]  ;;  %v1817_v51 = vld [vmem:[%s3610_s7 + $0x28] sm:$0xff] }
 0x1cb   : > { %v1196_v55 = vadd.f32 %v3914_v20, %v1164_v31  ;;  %v3424_v26 = vmul.f32 %v3361_v1, %v3915_v46  ;;  %v3429_v11 = vld [vmem:[%s3606_s3 + $0x78] ss:$0 sm:$0xff]  ;;  %v3916_v41 = vld [vmem:[#allocation103_spill] sm:$0xff]  ;;  %v3918_v30 = vld [vmem:[#allocation13_spill] sm:$0xff]  ;;  %v1248_v34 = vadd.f32 %v3126_v6, %v1220_v43  ;;  %1610 = vmatpush.bf16.msra.mxu2 %v1817_v51 }
 0x1cc   : > { %v1053_v33 = vadd.f32 %v3916_v41, %v1021_v57  ;;  %v3917_v4 = vld [vmem:[#allocation38_spill] sm:$0xff]  ;;  %v3438_v29 = vmul.f32 %v3376_v38, %v3918_v30  ;;  %v3919_v27 = vld [vmem:[#allocation101_spill] sm:$0xff]  ;;  %v3921_v23 = vld [vmem:[#allocation112_spill] sm:$0xff]  ;;  %v3472_v58 = vmul.f32 %v3429_v11, %v3223_v47 }
 0x1cd   : > { %v1140_v15 = vadd.f32 %v3917_v4, %v1108_v40  ;;  %v3442_v14 = vmul.f32 %v3381_v56, %v3919_v27  ;;  %v3920_v7 = vld [vmem:[#allocation98_spill] sm:$0xff]  ;;  %v1227_v49 = vadd.f32 %v3921_v23, %v1196_v55  ;;  %v3922_v53 = vld [vmem:[#allocation71_spill] sm:$0xff]  ;;  %v3924_v0 = vld [vmem:[#allocation89_spill] sm:$0xff] }
 0x1ce   : > { %v1084_v59 = vadd.f32 %v3920_v7, %v1052_v28  ;;  %v3449_v5 = vmul.f32 %v3393_v54, %v3922_v53  ;;  %v1816_v62 = vld [vmem:[%s3610_s7 + $0x20] sm:$0xff]  ;;  %v3923_v12 = vld [vmem:[#allocation114_spill] sm:$0xff]  ;;  %v3457_v22 = vmul.f32 %v3408_v37, %v3924_v0  ;;  %v3925_v3 = vld [vmem:[#allocation113_spill] sm:$0xff] }
 0x1cf   : > { %v1172_v45 = vadd.f32 %v3923_v12, %v1140_v15  ;;  %v3461_v31 = vmul.f32 %v3413_v17, %v3925_v3  ;;  %v3926_v6 = vld [vmem:[#allocation8_spill] sm:$0xff]  ;;  %v3927_v16 = vld [vmem:[#allocation7_spill] sm:$0xff]  ;;  %v3929_v63 = vld [vmem:[#allocation94_spill] sm:$0xff]  ;;  %1611 = vmatpush.bf16.msra.mxu2 %v1816_v62 }
 0x1d0   : > { %v3465_v39 = vmul.f32 %v3418_v42, %v3926_v6  ;;  %v1112_v32 = vld [vmem:[#allocation2 + $0x10e] sm:$0xff]  ;;  %v1116_v57 = vadd.f32 %v3927_v16, %v1084_v59  ;;  %v1276_v21 = vadd.f32 %v3929_v63, %v1248_v34  ;;  %v3931_v43 = vld [vmem:[#allocation127_spill] sm:$0xff]  ;;  %v3938_v12 = vld [vmem:[#allocation54_spill] sm:$0xff] }
 0x1d1   : > { %v3928_v9 = vld [vmem:[#allocation124_spill] sm:$0xff]  ;;  %v1077_v46 = vadd.f32 %v3931_v43, %v1045_v36  ;;  %v3932_v51 = vld [vmem:[#allocation99_spill] sm:$0xff]  ;;  %v3934_v27 = vld [vmem:[#allocation73_spill] sm:$0xff] }
 0x1d2   : > { %v1255_v40 = vadd.f32 %v3928_v9, %v1227_v49  ;;  %v1120_v28 = vld [vmem:[#allocation2 + $0x12e] sm:$0xff]  ;;  %v1085_v41 = vadd.f32 %v3932_v51, %v1053_v33  ;;  %v1148_v7 = vadd.f32 %v3934_v27, %v1116_v57  ;;  %v3940_v36 = vld [vmem:[#allocation110_spill] sm:$0xff] }
 0x1d3   : > { %v3930_v20 = vld [vmem:[#allocation120_spill] sm:$0xff]  ;;  %v3935_v59 = vld [vmem:[#allocation81_spill] sm:$0xff]  ;;  %v1115_v6 = vmul.f32 %v3940_v36, %v1112_v32  ;;  %v3941_v33 = vld [vmem:[#allocation118_spill] sm:$0xff] }
 0x1d4   : > { %v1204_v55 = vadd.f32 %v3930_v20, %v1172_v45  ;;  %v3933_v4 = vld [vmem:[#allocation28_spill] sm:$0xff]  ;;  %v1283_v23 = vadd.f32 %v3935_v59, %v1255_v40  ;;  %v3936_v49 = vld [vmem:[#allocation133_spill] sm:$0xff]  ;;  %v1123_v16 = vmul.f32 %v3941_v33, %v1120_v28  ;;  %v3943_v20 = vld [vmem:[#allocation55_spill] sm:$0xff] }
 0x1d5   : > { %v1093_v15 = vadd.f32 %v3933_v4, %v1061_v52  ;;  %v1136_v30 = vld [vmem:[#allocation2 + $0xf] sm:$0xff]  ;;  %v1304_v34 = vadd.f32 %v3936_v49, %v1276_v21 }
 0x1d6   : > { %v3937_v47 = vld [vmem:[#allocation69_spill] sm:$0xff]  ;;  %v1234_v0 = vadd.f32 %v3938_v12, %v1204_v55  ;;  %v3939_v45 = vld [vmem:[#allocation88_spill] sm:$0xff]  ;;  %v1311_v40 = vadd.f32 %v3943_v20, %v1283_v23  ;;  %v1117_v55 = vadd.f32 %v1115_v6, %v1085_v41 }
 0x1d7   : > { %v1101_v53 = vadd.f32 %v3937_v47, %v3332_v8  ;;  %v1109_v3 = vadd.f32 %v3939_v45, %v1077_v46  ;;  %v1144_v52 = vld [vmem:[#allocation2 + $0x2f] sm:$0xff]  ;;  %v3946_v8 = vld [vmem:[#allocation19_spill] sm:$0xff]  ;;  %v1125_v59 = vadd.f32 %v1123_v16, %v1093_v15 }
 0x1d8   : > { %v1160_v9 = vld [vmem:[#allocation2 + $0x6f] sm:$0xff]  ;;  %v1262_v27 = vadd.f32 %v3946_v8, %v1234_v0  ;;  %v3951_v0 = vld [vmem:[#allocation22_spill] sm:$0xff]  ;;  %v3952_v15 = vld [vmem:[#allocation59_spill] sm:$0xff] }
 0x1d9   : > { %v3942_v63 = vld [vmem:[#allocation24_spill] sm:$0xff]  ;;  %v3944_v43 = vld [vmem:[#allocation137_spill] sm:$0xff]  ;;  %v1163_v6 = vmul.f32 %v3952_v15, %v1160_v9 }
 0x1da   : > { %v1180_v57 = vadd.f32 %v3942_v63, %v1148_v7  ;;  %v1332_v21 = vadd.f32 %v3944_v43, %v1304_v34  ;;  %v3945_v62 = vld [vmem:[#allocation136_spill] sm:$0xff]  ;;  %v3947_v46 = vld [vmem:[#allocation97_spill] sm:$0xff]  ;;  %v3954_v43 = vld [vmem:[#allocation134_spill] sm:$0xff] }
 0x1db   : > { %v1133_v51 = vadd.f32 %v3945_v62, %v1101_v53  ;;  %v1152_v4 = vld [vmem:[#allocation2 + $0x4f] sm:$0xff]  ;;  %v1139_v49 = vmul.f32 %v3947_v46, %v1136_v30  ;;  %v1964_v7 = vld [vmem:[%s3606_s3 + $0x4e] ss:$0 sm:$0xff]  ;;  %v3953_v30 = vld [vmem:[#allocation122_spill] sm:$0xff] }
 0x1dc   : > { %v3948_v32 = vld [vmem:[#allocation20_spill] sm:$0xff]  ;;  %v3949_v28 = vld [vmem:[#allocation25_spill] sm:$0xff]  ;;  %v1360_v45 = vadd.f32 %v3270_v60, %v1332_v21  ;;  %v1147_v23 = vmul.f32 %v1964_v7, %v1144_v52  ;;  %v1155_v41 = vmul.f32 %v3951_v0, %v1152_v4  ;;  %v3962_v0 = vld [vmem:[#allocation111_spill] sm:$0xff] }
 0x1dd   : > { %v1212_v47 = vadd.f32 %v3948_v32, %v1180_v57  ;;  %v1339_v12 = vadd.f32 %v3949_v28, %v1311_v40  ;;  %v1168_v34 = vld [vmem:[#allocation2 + $0x8f] sm:$0xff]  ;;  %v1141_v33 = vadd.f32 %v1139_v49, %v1109_v3  ;;  %v1165_v62 = vadd.f32 %v1163_v6, %v1133_v51  ;;  %v3957_v49 = vld [vmem:[#allocation26_spill] sm:$0xff] }
 0x1de   : > { %v3950_v53 = vld [vmem:[#allocation132_spill] sm:$0xff]  ;;  %v1388_v57 = vadd.f32 %v3403_v44, %v1360_v45  ;;  %v1149_v60 = vadd.f32 %v1147_v23, %v1117_v55  ;;  %v1157_v52 = vadd.f32 %v1155_v41, %v1125_v59  ;;  %v1815_v44 = vld [vmem:[%s3610_s7 + $0x18] sm:$0xff]  ;;  %v3959_v55 = vld [vmem:[#allocation65_spill] sm:$0xff] }
 0x1df   : > { %v1290_v36 = vadd.f32 %v3950_v53, %v1262_v27  ;;  %v1241_v16 = vadd.f32 %v3953_v30, %v1212_v47  ;;  %v1367_v63 = vadd.f32 %v3371_v35, %v1339_v12  ;;  %v1184_v20 = vld [vmem:[#allocation2 + $0xcf] sm:$0xff]  ;;  %1612 = vmatpush.bf16.msra.mxu2 %v1815_v44 }
 0x1e0   : > { %v1192_v40 = vld [vmem:[#allocation2 + $0xef] sm:$0xff]  ;;  %v1416_v32 = vadd.f32 %v3957_v49, %v1388_v57 }
 0x1e1   : > { %v1318_v21 = vadd.f32 %v3954_v43, %v1290_v36  ;;  %v3955_v8 = vld [vmem:[#allocation104_spill] sm:$0xff]  ;;  %v1395_v9 = vadd.f32 %v3424_v26, %v1367_v63  ;;  %v3958_v47 = vld [vmem:[#allocation29_spill] sm:$0xff] }
 0x1e2   : > { %v1171_v27 = vmul.f32 %v3955_v8, %v1168_v34  ;;  %v1200_v3 = vld [vmem:[#allocation2 + $0x10f] sm:$0xff]  ;;  %v1181_v35 = vadd.f32 %v3958_v47, %v1149_v60  ;;  %v3520_v36 = vadd.f32 %v3465_v39, %v1416_v32  ;;  %v3967_v47 = vld [vmem:[#allocation51_spill] sm:$0xff] }
 0x1e3   : > { %v3956_v46 = vld [vmem:[#allocation80_spill] sm:$0xff]  ;;  %v1346_v12 = vadd.f32 %v3959_v55, %v1318_v21  ;;  %v3960_v51 = vld [vmem:[#allocation77_spill] sm:$0xff]  ;;  %v1423_v26 = vadd.f32 %v3449_v5, %v1395_v9  ;;  %v1203_v41 = vmul.f32 %v3962_v0, %v1200_v3  ;;  %v3966_v9 = vld [vmem:[#allocation138_spill] sm:$0xff] }
 0x1e4   : > { %v1269_v4 = vadd.f32 %v3956_v46, %v1241_v16  ;;  %v1208_v28 = vld [vmem:[#allocation2 + $0x12f] sm:$0xff]  ;;  %v1173_v59 = vadd.f32 %v1171_v27, %v1141_v33  ;;  %v1187_v45 = vmul.f32 %v3960_v51, %v1184_v20  ;;  %v3964_v20 = vld [vmem:[#allocation135_spill] sm:$0xff] }
 0x1e5   : > { %v3961_v7 = vld [vmem:[#allocation105_spill] sm:$0xff]  ;;  %v1374_v30 = vadd.f32 %v3388_v10, %v1346_v12  ;;  %v3965_v46 = vld [vmem:[#allocation107_spill] sm:$0xff]  ;;  %v1965_v10 = vld [vmem:[%s3606_s3 + $0x59] ss:$0 sm:$0xff] }
 0x1e6   : > { %v1195_v23 = vmul.f32 %v3961_v7, %v1192_v40  ;;  %v1216_v34 = vld [vmem:[#allocation2 + $0x14f] sm:$0xff]  ;;  %v1297_v53 = vadd.f32 %v3367_v25, %v1269_v4  ;;  %v1189_v16 = vadd.f32 %v1187_v45, %v1157_v52  ;;  %v1451_v40 = vadd.f32 %v3472_v58, %v1423_v26  ;;  %v1966_v26 = vld [vmem:[%s3606_s3 + $0x5e] ss:$0 sm:$0xff] }
 0x1e7   : > { %v1223_v15 = vld [vmem:[#allocation2 + $0x10] sm:$0xff]  ;;  %v1205_v43 = vadd.f32 %v1203_v41, %v1173_v59  ;;  %v1219_v21 = vmul.f32 %v3310_v24, %v1216_v34  ;;  %v1402_v27 = vadd.f32 %v3438_v29, %v1374_v30  ;;  %v1813_v29 = vld [vmem:[%s3610_s7 + $0x8] sm:$0xff]  ;;  %v3970_v30 = vld [vmem:[#allocation30_spill] sm:$0xff] }
 0x1e8   : > { %v1230_v6 = vld [vmem:[#allocation2 + $0x30] sm:$0xff]  ;;  %v1197_v63 = vadd.f32 %v1195_v23, %v1165_v62  ;;  %v1325_v39 = vadd.f32 %v3964_v20, %v1297_v53  ;;  %v1226_v4 = vmul.f32 %v3965_v46, %v1223_v15  ;;  %v3973_v46 = vld [vmem:[#allocation130_spill] sm:$0xff] }
 0x1e9   : > { %v1814_v33 = vld [vmem:[%s3610_s7 + $0x10] sm:$0xff]  ;;  %v1233_v52 = vmul.f32 %v1965_v10, %v1230_v6  ;;  %v1221_v32 = vadd.f32 %v1219_v21, %v1189_v16 }
 0x1ea   : > { %v3963_v57 = vld [vmem:[#allocation121_spill] sm:$0xff]  ;;  %v1353_v49 = vadd.f32 %v3966_v9, %v1325_v39  ;;  %1613 = vmatpush.bf16.msra.mxu2 %v1814_v33  ;;  %v1228_v55 = vadd.f32 %v1226_v4, %v1197_v63  ;;  %v1967_v63 = vld [vmem:[%s3606_s3 + $0x5f] ss:$0 sm:$0xff] }
 0x1eb   : > { %v1211_v25 = vmul.f32 %v3963_v57, %v1208_v28  ;;  %v1237_v60 = vld [vmem:[#allocation2 + $0x50] sm:$0xff]  ;;  %v3968_v28 = vld [vmem:[#allocation12_spill] sm:$0xff]  ;;  %v1235_v12 = vadd.f32 %v1233_v52, %v1205_v43 }
 0x1ec   : > { %v1244_v5 = vld [vmem:[#allocation2 + $0x70] sm:$0xff]  ;;  %v1240_v58 = vmul.f32 %v3967_v47, %v1237_v60  ;;  %v1381_v23 = vadd.f32 %v3399_v13, %v1353_v49 }
 0x1ed   : > { %v1251_v8 = vld [vmem:[#allocation2 + $0x90] sm:$0xff]  ;;  %v1213_v3 = vadd.f32 %v1211_v25, %v1181_v35  ;;  %v1247_v44 = vmul.f32 %v3968_v28, %v1244_v5  ;;  %v1430_v35 = vadd.f32 %v3457_v22, %v1402_v27  ;;  %v1263_v16 = vadd.f32 %v3970_v30, %v1235_v12 }
 0x1ee   : > { %v1265_v62 = vld [vmem:[#allocation2 + $0xd0] sm:$0xff]  ;;  %v1409_v25 = vadd.f32 %v3442_v14, %v1381_v23  ;;  %1614 = vmatpush.bf16.msra.mxu2 %v1813_v29  ;;  %v1968_v14 = vld [vmem:[%s3606_s3 + $0x64] ss:$0 sm:$0xff] }
 0x1ef   : > { %v1272_v24 = vld [vmem:[#allocation2 + $0xf0] sm:$0xff]  ;;  %v1242_v34 = vadd.f32 %v1240_v58, %v1213_v3  ;;  %v1249_v53 = vadd.f32 %v1247_v44, %v1221_v32  ;;  %v1268_v0 = vmul.f32 %v1966_v26, %v1265_v62  ;;  %v1453_v33 = vadd.f32 %v1451_v40, %v1430_v35  ;;  %v1812_v40 = vld [vmem:[%s3610_s7] sm:$0xff]  ;;  %v3974_v32 = vld [vmem:[#allocation14_spill] sm:$0xff] }
 0x1f0   : > { %v3969_v59 = vld [vmem:[#allocation9_spill] sm:$0xff]  ;;  %v1275_v57 = vmul.f32 %v1967_v63, %v1272_v24  ;;  %v1437_v62 = vadd.f32 %v3461_v31, %v1409_v25  ;;  %v3976_v35 = vld [vmem:[#allocation27_spill] sm:$0xff] }
 0x1f1   : > { %v1254_v51 = vmul.f32 %v3969_v59, %v1251_v8  ;;  %v1279_v45 = vld [vmem:[#allocation2 + $0x110] sm:$0xff]  ;;  %v1270_v60 = vadd.f32 %v1268_v0, %v1242_v34  ;;  %v3978_v0 = vld [vmem:[#allocation82_spill] sm:$0xff] }
 0x1f2   : > { %v1286_v7 = vld [vmem:[#allocation2 + $0x130] sm:$0xff]  ;;  %v1277_v27 = vadd.f32 %v1275_v57, %v1249_v53  ;;  %v1455_v59 = vadd.f32 %v1453_v33, %v1437_v62  ;;  %1615 = vmatpush.bf16.msra.mxu2 %v1812_v40 }
 0x1f3   : > { %v1293_v41 = vld [vmem:[#allocation2 + $0x150] sm:$0xff]  ;;  %v1256_v22 = vadd.f32 %v1254_v51, %v1228_v55 }
 0x1f4   : > { %v1300_v15 = vld [vmem:[#allocation2 + $0x11] sm:$0xff]  ;;  %v1296_v3 = vmul.f32 %v3323_v19, %v1293_v41  ;;  %v1457_v30 = vadd.f32 %v1455_v59, %v3520_v36 }
 0x1f5   : > { %v1307_v6 = vld [vmem:[#allocation2 + $0x31] sm:$0xff]  ;;  %v1303_v4 = vmul.f32 %v3973_v46, %v1300_v15 }
 0x1f6   : > { %v1314_v13 = vld [vmem:[#allocation2 + $0x51] sm:$0xff]  ;;  %v1310_v10 = vmul.f32 %v1968_v14, %v1307_v6  ;;  %v1298_v44 = vadd.f32 %v1296_v3, %v1270_v60  ;;  %v1536_v60 = vpop.f32.mrf.mxu1 }
 0x1f7   : > { %v3971_v5 = vld [vmem:[#allocation125_spill] sm:$0xff]  ;;  %v1317_v47 = vmul.f32 %v3974_v32, %v1314_v13  ;;  %v1305_v24 = vadd.f32 %v1303_v4, %v1277_v27 }
 0x1f8   : > { %v1282_v20 = vmul.f32 %v3971_v5, %v1279_v45  ;;  %v3972_v39 = vld [vmem:[#allocation129_spill] sm:$0xff] }
 0x1f9   : > { %v1289_v43 = vmul.f32 %v3972_v39, %v1286_v7  ;;  %v1321_v21 = vld [vmem:[#allocation2 + $0x71] sm:$0xff]  ;;  %v3977_v7 = vld [vmem:[#allocation131_spill] sm:$0xff] }
 0x1fa   : > { %v1328_v8 = vld [vmem:[#allocation2 + $0x91] sm:$0xff]  ;;  %v1284_v9 = vadd.f32 %v1282_v20, %v1256_v22 }
 0x1fb   : > { %v1342_v52 = vld [vmem:[#allocation2 + $0xd1] sm:$0xff]  ;;  %v1291_v49 = vadd.f32 %v1289_v43, %v1263_v16  ;;  %v1331_v55 = vmul.f32 %v3976_v35, %v1328_v8  ;;  %v3979_v16 = vld [vmem:[#allocation31_spill] sm:$0xff] }
 0x1fc   : > { %v1349_v58 = vld [vmem:[#allocation2 + $0xf1] sm:$0xff]  ;;  %v1312_v51 = vadd.f32 %v1310_v10, %v1284_v9  ;;  %v1345_v23 = vmul.f32 %v3977_v7, %v1342_v52  ;;  %v1963_v7 = vld [vmem:[%s3611_s8] ss:$0 sm:$0xff] }
 0x1fd   : > { %v1356_v28 = vld [vmem:[#allocation2 + $0x111] sm:$0xff]  ;;  %v1319_v45 = vadd.f32 %v1317_v47, %v1291_v49  ;;  %v1333_v26 = vadd.f32 %v1331_v55, %v1305_v24  ;;  %v1352_v41 = vmul.f32 %v3978_v0, %v1349_v58 }
 0x1fe   : > { %v3975_v29 = vld [vmem:[#allocation21_spill] sm:$0xff]  ;;  %v1359_v15 = vmul.f32 %v3251_v48, %v1356_v28  ;;  %v1340_v63 = vadd.f32 %v3979_v16, %v1312_v51 }
 0x1ff   : > { %v1324_v19 = vmul.f32 %v3975_v29, %v1321_v21  ;;  %v1363_v12 = vld [vmem:[#allocation2 + $0x131] sm:$0xff]  ;;  %v1347_v33 = vadd.f32 %v1345_v23, %v1319_v45 }
 0x200   : > { %v1370_v34 = vld [vmem:[#allocation2 + $0x151] sm:$0xff]  ;;  %v1366_v57 = vmul.f32 %v3328_v50, %v1363_v12  ;;  %v1361_v20 = vadd.f32 %v1359_v15, %v1333_v26  ;;  %v1971_v26 = vld [vmem:[%s2078_s28 + $0x8] sm:$0xff] }
 0x201   : > { %v1377_v31 = vld [vmem:[#allocation2 + $0x12] sm:$0xff]  ;;  %v1326_v53 = vadd.f32 %v1324_v19, %v1298_v44  ;;  %v1373_v39 = vmul.f32 %v3339_v61, %v1370_v34  ;;  %v1538_v19 = vpop.f32.mrf.mxu1  ;;  %v1970_v34 = vld [vmem:[%s2078_s28] sm:$0xff] }
 0x202   : > { %v1384_v6 = vld [vmem:[#allocation2 + $0x32] sm:$0xff]  ;;  %v1380_v43 = vmul.f32 %v3347_v18, %v1377_v31  ;;  %v1368_v48 = vadd.f32 %v1366_v57, %v1340_v63 }
 0x203   : > { %v1391_v22 = vld [vmem:[#allocation2 + $0x52] sm:$0xff]  ;;  %v1354_v5 = vadd.f32 %v1352_v41, %v1326_v53  ;;  %v1387_v8 = vmul.f32 %v3352_v2, %v1384_v6  ;;  %v1375_v27 = vadd.f32 %v1373_v39, %v1347_v33 }
 0x204   : > { %v1398_v13 = vld [vmem:[#allocation2 + $0x72] sm:$0xff]  ;;  %v1394_v36 = vmul.f32 %v3361_v1, %v1391_v22 }
 0x205   : > { %v1405_v25 = vld [vmem:[#allocation2 + $0x92] sm:$0xff]  ;;  %v1382_v3 = vadd.f32 %v1380_v43, %v1354_v5  ;;  %v1401_v50 = vmul.f32 %v3376_v38, %v1398_v13  ;;  %v1389_v52 = vadd.f32 %v1387_v8, %v1361_v20 }
 0x206   : > { %v1419_v21 = vld [vmem:[#allocation2 + $0xd2] sm:$0xff]  ;;  %v1408_v46 = vmul.f32 %v3381_v56, %v1405_v25  ;;  %v1396_v61 = vadd.f32 %v1394_v36, %v1368_v48 }
 0x207   : > { %v1426_v40 = vld [vmem:[#allocation2 + $0xf2] sm:$0xff]  ;;  %v1422_v18 = vmul.f32 %v3393_v54, %v1419_v21  ;;  %v1403_v62 = vadd.f32 %v1401_v50, %v1375_v27  ;;  %v1962_v54 = vld [vmem:[%s3609_s6] ss:$0 sm:$0xff] }
 0x208   : > { %v1412_v4 = vld [vmem:[#allocation2 + $0xb2] sm:$0xff]  ;;  %v1410_v9 = vadd.f32 %v1408_v46, %v1382_v3  ;;  %v1429_v2 = vmul.f32 %v3408_v37, %v1426_v40  ;;  %v1537_v35 = vadd.f32 %v1962_v54, %v1536_v60  ;;  %v1539_v59 = vadd.f32 %v1962_v54, %v1538_v19 }
 0x209   : > { %v1433_v14 = vld [vmem:[#allocation2 + $0x112] sm:$0xff]  ;;  %v1424_v32 = vadd.f32 %v1422_v18, %v1396_v61 }
 0x20a   : > { %v1447_v10 = vld [vmem:[#allocation2 + $0x152] sm:$0xff]  ;;  %v1436_v38 = vmul.f32 %v3413_v17, %v1433_v14  ;;  %v1431_v47 = vadd.f32 %v1429_v2, %v1403_v62 }
 0x20b   : > { %v1969_v1 = vld [vmem:[%s3606_s3 + $0x73] ss:$0 sm:$0xff]  ;;  %v1450_v56 = vmul.f32 %v3429_v11, %v1447_v10  ;;  %v1541_v11 = vmul.f32 %v1537_v35, %v1457_v30 }
 0x20c   : > { %v1415_v49 = vmul.f32 %v1969_v1, %v1412_v4  ;;  %v1440_v58 = vld [vmem:[#allocation2 + $0x132] sm:$0xff]  ;;  %v1438_v44 = vadd.f32 %v1436_v38, %v1410_v9 }
 0x20d   : > { %v1452_v37 = vadd.f32 %v1450_v56, %v1424_v32  ;;  %v1443_v24 = vmul.f32 %v3418_v42, %v1440_v58 }
 0x20e   : > { %v1417_v28 = vadd.f32 %v1415_v49, %v1389_v52 }
 0x20f   : > { %v1454_v29 = vadd.f32 %v1452_v37, %v1431_v47 }
 0x210   : > { %v1445_v55 = vadd.f32 %v1443_v24, %v1417_v28 }
 0x211   : > { %v1456_v17 = vadd.f32 %v1454_v29, %v1438_v44 }
 0x213   : > { %v1458_v12 = vadd.f32 %v1456_v17, %v1445_v55 }
 0x215   : > { %v1542_v51 = vmul.f32 %v1539_v59, %v1458_v12 }
 0x217   : > { %v1543_v45 = vpack.c.bf16 %v1542_v51, %v1541_v11 }
 0x219   : > { %1616 = vmatmul.bf16.vlgmr.msra.gmra.mxu2 %v1543_v45 }
 0x29c   : > { %v1617_v23 = vpop.f32.mrf.mxu2 }
 0x29d   : > { %v1622_v42 = vadd.f32 %v1970_v34, %v1617_v23 }
 0x29f   : > { %v1628_v31 = vadd.f32 %v1963_v7, %v1622_v42 }
 0x2a1   : > { %1630 = vst [vmem:[%s332_s12] sm:$0xff] %v1628_v31 }
 0x2a4   : > { %v1619_v53 = vpop.f32.mrf.mxu2 }
 0x2a5   : > { %v1623_v0 = vadd.f32 %v1971_v26, %v1619_v53 }
 0x2a7   : > { %v1629_v41 = vadd.f32 %v1963_v7, %v1623_v0 }
 0x2a9   : > { %1631 = vst [vmem:[%s332_s12 + $0x8] sm:$0xff] %v1629_v41 }
 0x2aa PF: > { %s19_s30 = sadd.s32 1, %s1978_s30  }
 0x2ab   : > { %p16_p4 = scmp.ge.s32.totalorder %s19_s30, 4  }
 0x2ad   :  { %18 = sbr.rel (!%p16_p4) target bundleno = 1 (0x1), region = 96 }

// kernel: tile.74
= control target key start
LH: loop header
LB: loop body
LE: loop exit
PB: predicated region body
PF: predicated region fallthrough
CT: control target
= control target key end

     0   :  { %vm39_vm0 = vcmask 1043458   ;;  %vm44_vm1 = vcmask 1045508   ;;  %vm49_vm2 = vcmask 1047558   ;;  %s81_s6 = smov 3  ;;  %vm110_vm3 = vcmask 1042433   ;;  %s84_s9 = smov 12  ;;  %s860_s0 = inlined_call_operand.vmem [shape: f32[9,16,32], index: 0, kind: input, shape index: {}]   ;;  %s861_s1 = inlined_call_operand.vmem [shape: f32[9,512], index: 1, kind: output, shape index: {}]  }
   0x1   :  { %v400_v0 = vld [vmem:[%s860_s0 + $0x87] ss:$-16 sm:%s81_s6]   ;;  %s89_s10 = smov 48  ;;  %v406_v1 = vld [vmem:[%s860_s0 + $0x8b] sm:$0x1]   ;;  %s94_s17 = smov 192 }
   0x2   :  { %v401_v2 = vld [vmem:[%s860_s0 - $0x15] ss:$16 sm:%s84_s9]   ;;  %s34_s18 = smov 3  ;;  %s37_s23 = smov 12  ;;  %vm115_vm4 = vcmask 1044483   ;;  %vm120_vm5 = vcmask 1046533  }
   0x3   :  { %v402_v3 = vld [vmem:[%s860_s0 - $0x15] ss:$16 sm:%s89_s10]   ;;  %v87_v4 = vsel %vm39_vm0, %v401_v2, %v400_v0  ;;  %v390_v6 = vld [vmem:[%s860_s0 + $0x3] ss:$16 sm:%s34_s18]   ;;  %s42_s24 = smov 48  ;;  %s47_s29 = smov 192 }
   0x4   :  { %v403_v5 = vld [vmem:[%s860_s0 - $0x15] ss:$16 sm:%s94_s17]   ;;  %v92_v7 = vsel %vm44_vm1, %v402_v3, %v87_v4  ;;  %v391_v8 = vld [vmem:[%s860_s0 + $0x3] ss:$16 sm:%s37_s23]   ;;  %s108_s30 = smov 6  ;;  %s113_s6 = smov 24 }
   0x5   :  { %v392_v9 = vld [vmem:[%s860_s0 + $0x3] ss:$16 sm:%s42_s24]   ;;  %v97_v10 = vsel %vm49_vm2, %v403_v5, %v92_v7  ;;  %v40_v11 = vsel %vm39_vm0, %v391_v8, %v390_v6  ;;  %v407_v13 = vld [vmem:[%s860_s0 + $0x5b] ss:$16 sm:%s108_s30]   ;;  %s474_s7 = smov 96   ;;  %s118_s10 = smov 96 }
   0x6   :  { %v393_v12 = vld [vmem:[%s860_s0 + $0x3] ss:$16 sm:%s47_s29]   ;;  %98 = vrot.lane.b32.xlu1 %v97_v10, %s474_s7  ;;  %v45_v14 = vsel %vm44_vm1, %v392_v9, %v40_v11  ;;  %v111_v15 = vsel %vm110_vm3, %v407_v13, %v406_v1  ;;  %v410_v20 = vld [vmem:[%s860_s0 + $0x48] sm:$0x80]   ;;  %s56_s15 = smov 3  ;;  %s59_s16 = smov 12 }
   0x7   :  { %v408_v16 = vld [vmem:[%s860_s0 - $0x21] ss:$16 sm:%s113_s6]   ;;  %v50_v17 = vsel %vm49_vm2, %v393_v12, %v45_v14  ;;  %vm124_vm6 = vcmask 1047559   ;;  %s64_s19 = smov 48  ;;  %s69_s20 = smov 192  ;;  %vm3_vm7 = vcmask 261120  }
   0x8   :  { %v116_v18 = vsel %vm115_vm4, %v408_v16, %v111_v15  ;;  %v409_v19 = vld [vmem:[%s860_s0 - $0x21] ss:$16 sm:%s118_s10]   ;;  %51 = vrot.lane.b32.xlu0 %v50_v17, %s474_s7  ;;  %s196_s25 = smov 3  ;;  %s199_s30 = smov 12  ;;  %v460_v57 = vld [vmem:[%s860_s0 + $0x89] sm:$0x1]  }
   0x9   :  { %v121_v21 = vsel %vm120_vm5, %v409_v19, %v116_v18  ;;  %v394_v22 = vld [vmem:[%s860_s0 + $0x83] ss:$-124 sm:%s56_s15]   ;;  %v427_v27 = vld [vmem:[%s860_s0 + $0x86] ss:$-16 sm:%s196_s25]   ;;  %s204_s2 = smov 48  ;;  %s171_s5 = smov 3 }
   0xa   :  { %v395_v23 = vld [vmem:[%s860_s0 - $0x9] ss:$16 sm:%s59_s16]   ;;  %v125_v28 = vsel %vm124_vm6, %v410_v20, %v121_v21  ;;  %v428_v30 = vld [vmem:[%s860_s0 - $0x16] ss:$16 sm:%s199_s30]   ;;  %s174_s9 = smov 12  ;;  %s179_s10 = smov 48 }
   0xb   :  { %v396_v24 = vld [vmem:[%s860_s0 - $0x9] ss:$16 sm:%s64_s19]   ;;  %v62_v25 = vsel %vm39_vm0, %v395_v23, %v394_v22  ;;  %v421_v31 = vld [vmem:[%s860_s0 + $0x82] ss:$-124 sm:%s171_s5]   ;;  %v202_v33 = vsel %vm39_vm0, %v428_v30, %v427_v27  ;;  %s209_s13 = smov 192  ;;  %s134_s16 = smov 3 }
   0xc   :  { %v397_v26 = vld [vmem:[%s860_s0 - $0x9] ss:$16 sm:%s69_s20]   ;;  %v67_v29 = vsel %vm44_vm1, %v396_v24, %v62_v25  ;;  %v429_v34 = vld [vmem:[%s860_s0 - $0x16] ss:$16 sm:%s204_s2]   ;;  %s184_s19 = smov 192  ;;  %s137_s20 = smov 12 }
   0xd   :  { %v72_v32 = vsel %vm49_vm2, %v397_v26, %v67_v29  ;;  %v422_v35 = vld [vmem:[%s860_s0 - $0xa] ss:$16 sm:%s174_s9]   ;;  %v413_v38 = vld [vmem:[%s860_s0 + $0x8f] ss:$-48 sm:%s134_s16]   ;;  %s264_s25 = smov 3  ;;  %s267_s26 = smov 12  ;;  %v207_v40 = vsel %vm44_vm1, %v429_v34, %v202_v33 }
   0xe   :  { %126 = vrot.lane.b32.xlu1 %v125_v28, %s474_s7  ;;  %v423_v36 = vld [vmem:[%s860_s0 - $0xa] ss:$16 sm:%s179_s10]   ;;  %v177_v37 = vsel %vm39_vm0, %v422_v35, %v421_v31  ;;  %s272_s29 = smov 48  ;;  %s149_s6 = smov 3  ;;  %v433_v0 = vld [vmem:[%s860_s0 + $0x8a] sm:$0x1]  }
   0xf   :  { %v414_v39 = vld [vmem:[%s860_s0 + $0x4f] ss:$16 sm:%s137_s20]   ;;  %v430_v41 = vld [vmem:[%s860_s0 - $0x16] ss:$16 sm:%s209_s13]   ;;  %v182_v44 = vsel %vm44_vm1, %v423_v36, %v177_v37  ;;  %s152_s8 = smov 12  ;;  %s157_s11 = smov 48 }
  0x10   :  { %73 = vrot.lane.b32.xlu0 %v72_v32, %s474_s7  ;;  %v140_v42 = vsel %vm39_vm0, %v414_v39, %v413_v38  ;;  %v424_v43 = vld [vmem:[%s860_s0 - $0xa] ss:$16 sm:%s184_s19]   ;;  %v212_v47 = vsel %vm49_vm2, %v430_v41, %v207_v40  ;;  %s162_s12 = smov 192  ;;  %s277_s13 = smov 192  ;;  %v437_v4 = vld [vmem:[%s860_s0 + $0x47] sm:$0x80]  }
  0x11   :  { %141 = vrot.lane.b32.xlu2 %v140_v42, %s474_s7  ;;  %v444_v45 = vld [vmem:[%s860_s0 + $0x1] ss:$16 sm:%s264_s25]   ;;  %s338_s18 = smov 6  ;;  %v187_v51 = vsel %vm49_vm2, %v424_v43, %v182_v44  ;;  %s249_s19 = smov 3  ;;  %v464_v22 = vld [vmem:[%s860_s0 + $0x46] sm:$0x80]  }
  0x12   :  { %v445_v46 = vld [vmem:[%s860_s0 + $0x1] ss:$16 sm:%s267_s26]   ;;  %v417_v49 = vld [vmem:[%s860_s0 + $0x2] ss:$16 sm:%s149_s6]   ;;  %s475_s24 = smov 64   ;;  %s252_s25 = smov 12 }
  0x13   :  { %v446_v48 = vld [vmem:[%s860_s0 + $0x1] ss:$16 sm:%s272_s29]   ;;  %v418_v50 = vld [vmem:[%s860_s0 + $0x2] ss:$16 sm:%s152_s8]   ;;  %v270_v52 = vsel %vm39_vm0, %v445_v46, %v444_v45  ;;  %s343_s28 = smov 24  ;;  %s348_s3 = smov 96 }
  0x14   :  { %v155_v53 = vsel %vm39_vm0, %v418_v50, %v417_v49  ;;  %v419_v54 = vld [vmem:[%s860_s0 + $0x2] ss:$16 sm:%s157_s11]   ;;  %v447_v58 = vld [vmem:[%s860_s0 + $0x1] ss:$16 sm:%s277_s13]   ;;  %s311_s4 = smov 3  ;;  %v275_v61 = vsel %vm44_vm1, %v446_v48, %v270_v52  ;;  %s223_s8 = smov 6 }
  0x15   :  { %v420_v55 = vld [vmem:[%s860_s0 + $0x2] ss:$16 sm:%s162_s12]   ;;  %v160_v56 = vsel %vm44_vm1, %v419_v54, %v155_v53  ;;  %v461_v60 = vld [vmem:[%s860_s0 + $0x59] ss:$16 sm:%s338_s18]   ;;  %s228_s9 = smov 24  ;;  %s314_s12 = smov 12  ;;  %v280_v5 = vsel %vm49_vm2, %v447_v58, %v275_v61 }
  0x16   :  { %213 = vrot.lane.b32.xlu1 %v212_v47, %s475_s24  ;;  %v165_v59 = vsel %vm49_vm2, %v420_v55, %v160_v56  ;;  %v440_v62 = vld [vmem:[%s860_s0 + $0x8e] ss:$-48 sm:%s249_s19]   ;;  %s233_s15 = smov 96  ;;  %v341_v1 = vsel %vm110_vm3, %v461_v60, %v460_v57  ;;  %s286_s22 = smov 3  ;;  %v382_v35 = vld [vmem:[%s860_s0 + $0x40] ss:$4 sm:$0xff]  }
  0x17   :  { %v441_v63 = vld [vmem:[%s860_s0 + $0x4e] ss:$16 sm:%s252_s25]   ;;  %v462_v2 = vld [vmem:[%s860_s0 - $0x23] ss:$16 sm:%s343_s28]   ;;  %s289_s23 = smov 12  ;;  %s294_s11 = smov 48 }
  0x18   :  { %188 = vrot.lane.b32.xlu0 %v187_v51, %s475_s24  ;;  %v454_v3 = vld [vmem:[%s860_s0 + $0x85] ss:$-16 sm:%s311_s4]   ;;  %v255_v12 = vsel %vm39_vm0, %v441_v63, %v440_v62  ;;  %v346_v13 = vsel %vm115_vm4, %v462_v2, %v341_v1  ;;  %s299_s20 = smov 192  ;;  %s364_s25 = smov 3  ;;  %v385_v36 = vld [vmem:[%s860_s0 + $0x60] ss:$4 sm:$0xff]  }
  0x19   :  { %166 = vrot.lane.b32.xlu2 %v165_v59, %s475_s24  ;;  %v463_v6 = vld [vmem:[%s860_s0 - $0x23] ss:$16 sm:%s348_s3]   ;;  %s319_s3 = smov 48  ;;  %s367_s26 = smov 12  ;;  %v2_v38 = vld [vmem:[%s860_s0] ss:$4 sm:$0xff]  }
  0x1a   :  { %v434_v7 = vld [vmem:[%s860_s0 + $0x5a] ss:$16 sm:%s223_s8]   ;;  %v435_v8 = vld [vmem:[%s860_s0 - $0x22] ss:$16 sm:%s228_s9]   ;;  %v351_v21 = vsel %vm120_vm5, %v463_v6, %v346_v13  ;;  %vm53_vm8 = vcmask 1048320   ;;  %vm168_vm9 = vcmask 785920  }
  0x1b   :  { %v455_v9 = vld [vmem:[%s860_s0 - $0x17] ss:$16 sm:%s314_s12]   ;;  %v226_v10 = vsel %vm110_vm3, %v434_v7, %v433_v0  ;;  %v436_v11 = vld [vmem:[%s860_s0 - $0x22] ss:$16 sm:%s233_s15]   ;;  %s476_s12 = smov 32   ;;  %s324_s15 = smov 192  ;;  %v355_v27 = vsel %vm124_vm6, %v464_v22, %v351_v21 }
  0x1c   :  { %v231_v14 = vsel %vm115_vm4, %v435_v8, %v226_v10  ;;  %v448_v15 = vld [vmem:[%s860_s0 + $0x81] ss:$-124 sm:%s286_s22]   ;;  %v317_v18 = vsel %vm39_vm0, %v455_v9, %v454_v3  ;;  %383 = vst.msk [vmem:[%s861_s1 + $0x4] ss:$8 sm:$0xf] %vm3_vm7, %v382_v35   ;;  %vm283_vm10 = vcmask 523520  }
  0x1d   :  { %v449_v16 = vld [vmem:[%s860_s0 - $0xb] ss:$16 sm:%s289_s23]   ;;  %v236_v17 = vsel %vm120_vm5, %v436_v11, %v231_v14  ;;  %v456_v19 = vld [vmem:[%s860_s0 - $0x17] ss:$16 sm:%s319_s3]  }
  0x1e   :  { %281 = vrot.lane.b32.xlu1 %v280_v5, %s476_s12  ;;  %v240_v20 = vsel %vm124_vm6, %v437_v4, %v236_v17  ;;  %v292_v23 = vsel %vm39_vm0, %v449_v16, %v448_v15  ;;  %v450_v24 = vld [vmem:[%s860_s0 - $0xb] ss:$16 sm:%s294_s11]   ;;  %v322_v25 = vsel %vm44_vm1, %v456_v19, %v317_v18  ;;  %384 = vst.msk [vmem:[%s861_s1 - $0x1b] ss:$8 sm:$0xf0] %vm3_vm7, %v382_v35  }
  0x1f   :  { %v457_v26 = vld [vmem:[%s860_s0 - $0x17] ss:$16 sm:%s324_s15]   ;;  %v297_v28 = vsel %vm44_vm1, %v450_v24, %v292_v23  ;;  %v451_v29 = vld [vmem:[%s860_s0 - $0xb] ss:$16 sm:%s299_s20]  }
  0x20   :  { %256 = vrot.lane.b32.xlu0 %v255_v12, %s475_s24  ;;  %v327_v30 = vsel %vm49_vm2, %v457_v26, %v322_v25  ;;  %v302_v31 = vsel %vm49_vm2, %v451_v29, %v297_v28  ;;  %v467_v32 = vld [vmem:[%s860_s0 + $0x8d] ss:$-48 sm:%s364_s25]   ;;  %v388_v37 = vld [vmem:[%s860_s0 + $0x80] ss:$4 sm:$0xf]  }
  0x21   :  { %241 = vrot.lane.b32.xlu2 %v240_v20, %s475_s24  ;;  %v468_v33 = vld [vmem:[%s860_s0 + $0x4d] ss:$16 sm:%s367_s26]   ;;  %386 = vst.msk [vmem:[%s861_s1 + $0x6] ss:$8 sm:$0xf] %vm3_vm7, %v385_v36  }
  0x22   :  { %v370_v34 = vsel %vm39_vm0, %v468_v33, %v467_v32  ;;  %387 = vst.msk [vmem:[%s861_s1 - $0x19] ss:$8 sm:$0xf0] %vm3_vm7, %v385_v36   ;;  %v379_v39 = vld [vmem:[%s860_s0 + $0x20] ss:$4 sm:$0xff]  }
  0x23   :  { %389 = vst.msk [vmem:[%s861_s1 + $0x20] ss:$8 sm:$0xf] %vm3_vm7, %v388_v37  }
  0x24   :  { %4 = vst.msk [vmem:[%s861_s1] ss:$8 sm:$0xf] %vm3_vm7, %v2_v38  }
  0x25   :  { %378 = vst.msk [vmem:[%s861_s1 - $0x1f] ss:$8 sm:$0xf0] %vm3_vm7, %v2_v38  }
  0x26   :  { %356 = vrot.lane.b32.xlu1 %v355_v27, %s476_s12  ;;  %380 = vst.msk [vmem:[%s861_s1 + $0x2] ss:$8 sm:$0xf] %vm3_vm7, %v379_v39  }
  0x27   :  { %381 = vst.msk [vmem:[%s861_s1 - $0x1d] ss:$8 sm:$0xf0] %vm3_vm7, %v379_v39  }
  0x28   :  { %328 = vrot.lane.b32.xlu0 %v327_v30, %s476_s12 }
  0x29   :  { %303 = vrot.lane.b32.xlu2 %v302_v31, %s476_s12 }
  0x31   :  { %371 = vrot.lane.b32.xlu2 %v370_v34, %s476_s12 }
  0x6b   :  { %v142_v40 = vpop.permute.xlu2 %141  }
  0x6c   :  { %415 = vst.msk [vmem:[%s861_s1 + $0x38] ss:$-27 sm:$0x3] %vm53_vm8, %v142_v40  }
  0x6d   :  { %416 = vst.msk [vmem:[%s861_s1 + $0x1c] sm:$0xc] %vm53_vm8, %v142_v40  }
  0x73   :  { %v167_v41 = vpop.permute.xlu2 %166  }
  0x78   :  { %v99_v42 = vpop.permute.xlu1 %98  }
  0x79   :  { %404 = vst.msk [vmem:[%s861_s1 + $0x28] ss:$-25 sm:$0x3] %vm53_vm8, %v99_v42  }
  0x7a   :  { %v52_v43 = vpop.permute.xlu0 %51   ;;  %405 = vst.msk [vmem:[%s861_s1 + $0xe] sm:$0xfc] %vm53_vm8, %v99_v42  }
  0x7b   :  { %54 = vst.msk [vmem:[%s861_s1] sm:$0xff] %vm53_vm8, %v52_v43   ;;  %v242_v44 = vpop.permute.xlu2 %241  }
  0x7c   :  { %169 = vst.msk [vmem:[%s861_s1] sm:$0xff] %vm168_vm9, %v167_v41  }
  0x80   :  { %v127_v45 = vpop.permute.xlu1 %126  }
  0x81   :  { %411 = vst.msk [vmem:[%s861_s1 + $0x30] ss:$-26 sm:$0x3] %vm53_vm8, %v127_v45  }
  0x82   :  { %412 = vst.msk [vmem:[%s861_s1 + $0x15] sm:$0xfc] %vm53_vm8, %v127_v45   ;;  %v74_v46 = vpop.permute.xlu0 %73  }
  0x83   :  { %398 = vst.msk [vmem:[%s861_s1 + $0x20] ss:$-24 sm:$0x3] %vm53_vm8, %v74_v46   ;;  %v304_v47 = vpop.permute.xlu2 %303  }
  0x84   :  { %399 = vst.msk [vmem:[%s861_s1 + $0x7] sm:$0xfc] %vm53_vm8, %v74_v46  }
  0x85   :  { %438 = vst.msk [vmem:[%s861_s1 + $0x30] ss:$-26 sm:$0x3] %vm168_vm9, %v242_v44  }
  0x86   :  { %439 = vst.msk [vmem:[%s861_s1 + $0x15] sm:$0xfc] %vm168_vm9, %v242_v44  }
  0x88   :  { %v214_v48 = vpop.permute.xlu1 %213  }
  0x89   :  { %431 = vst.msk [vmem:[%s861_s1 + $0x28] ss:$-25 sm:$0x3] %vm168_vm9, %v214_v48  }
  0x8a   :  { %432 = vst.msk [vmem:[%s861_s1 + $0xe] sm:$0xfc] %vm168_vm9, %v214_v48   ;;  %v189_v49 = vpop.permute.xlu0 %188  }
  0x8b   :  { %425 = vst.msk [vmem:[%s861_s1 + $0x20] ss:$-24 sm:$0x3] %vm168_vm9, %v189_v49   ;;  %v372_v50 = vpop.permute.xlu2 %371  }
  0x8c   :  { %426 = vst.msk [vmem:[%s861_s1 + $0x7] sm:$0xfc] %vm168_vm9, %v189_v49  }
  0x8d   :  { %452 = vst.msk [vmem:[%s861_s1 + $0x20] ss:$-24 sm:$0x3] %vm283_vm10, %v304_v47  }
  0x8e   :  { %453 = vst.msk [vmem:[%s861_s1 + $0x7] sm:$0xfc] %vm283_vm10, %v304_v47  }
  0x90   :  { %v282_v51 = vpop.permute.xlu1 %281  }
  0x91   :  { %284 = vst.msk [vmem:[%s861_s1] sm:$0xff] %vm283_vm10, %v282_v51  }
  0x92   :  { %v257_v52 = vpop.permute.xlu0 %256  }
  0x93   :  { %442 = vst.msk [vmem:[%s861_s1 + $0x38] ss:$-27 sm:$0x3] %vm168_vm9, %v257_v52  }
  0x94   :  { %443 = vst.msk [vmem:[%s861_s1 + $0x1c] sm:$0xc] %vm168_vm9, %v257_v52  }
  0x95   :  { %469 = vst.msk [vmem:[%s861_s1 + $0x38] ss:$-27 sm:$0x3] %vm283_vm10, %v372_v50  }
  0x96   :  { %470 = vst.msk [vmem:[%s861_s1 + $0x1c] sm:$0xc] %vm283_vm10, %v372_v50  }
  0x98   :  { %v357_v53 = vpop.permute.xlu1 %356  }
  0x99   :  { %465 = vst.msk [vmem:[%s861_s1 + $0x30] ss:$-26 sm:$0x3] %vm283_vm10, %v357_v53  }
  0x9a   :  { %466 = vst.msk [vmem:[%s861_s1 + $0x15] sm:$0xfc] %vm283_vm10, %v357_v53   ;;  %v329_v54 = vpop.permute.xlu0 %328  }
  0x9b   :  { %458 = vst.msk [vmem:[%s861_s1 + $0x28] ss:$-25 sm:$0x3] %vm283_vm10, %v329_v54  }
  0x9c   :  { %459 = vst.msk [vmem:[%s861_s1 + $0xe] sm:$0xfc] %vm283_vm10, %v329_v54  }

// kernel: block_forward.3
= control target key start
LH: loop header
LB: loop body
LE: loop exit
PB: predicated region body
PF: predicated region fallthrough
CT: control target
= control target key end

     0   :  { %s2157_s24 = smov 0   ;;  %s3128_s0 = inlined_call_operand.vmem [shape: f32[2,16,128], index: 0, kind: input, shape index: {}]   ;;  %s3129_s1 = inlined_call_operand.vmem [shape: bf16[128,512], index: 1, kind: input, shape index: {}]   ;;  %s3130_s2 = inlined_call_operand.vmem [shape: f32[1,512], index: 2, kind: input, shape index: {}]   ;;  %s3131_s3 = inlined_call_operand.vmem [shape: f32[9,512], index: 3, kind: input, shape index: {}]   ;;  %s3132_s4 = inlined_call_operand.vmem [shape: f32[1,512], index: 4, kind: input, shape index: {}]   ;;  %s3133_s5 = inlined_call_operand.vmem [shape: bf16[512,128], index: 5, kind: input, shape index: {}]   ;;  %s3134_s6 = inlined_call_operand.vmem [shape: f32[1,128], index: 6, kind: input, shape index: {}]   ;;  %s3135_s7 = inlined_call_operand.vmem [shape: f32[2,16,128], index: 7, kind: output, shape index: {}]  }
   0x1 LB: > { %s1751_s25 = sadd.s32 4294967295, %s2112_s24   ;;  %p1755_p0 = scmp.ge.s32.totalorder %s2112_s24, 1  ;;  %s2112_s24 = sphi %s2157_s24, %s17_s24  }
   0x2   : > { %p237_p1 = scmp.lt.s32.totalorder %s2112_s24, 3 }
   0x4   : > { %p238_p2 = pnand %p1755_p0, %p237_p1 }
   0x6   : > { %241 = sbr.rel (%p238_p2) target bundleno = 535 (0x217), region = 48 }
   0xb   : > { %v1874_v0 = vld [vmem:[%s3129_s1 + $0xe0] sm:$0xf]  ;;  %v2058_v1 = vld [vmem:[%s3129_s1 + $0xec] sm:$0xf0]  ;;  %v2056_v2 = vld [vmem:[%s3129_s1 + $0xe4] sm:$0xf] }
   0xc   : > { %v1875_v3 = vor.u32 %v2058_v1, %v1874_v0  ;;  %v1876_v4 = vld [vmem:[%s3129_s1 + $0xf0] sm:$0xf0]  ;;  %v1882_v5 = vld [vmem:[%s3129_s1 + $0xe8] sm:$0xf]  ;;  %v2059_v6 = vld [vmem:[%s3129_s1 + $0xf4] sm:$0xf0] }
   0xd   : > { %v1879_v7 = vor.u32 %v2056_v2, %v1876_v4  ;;  %v1883_v8 = vor.u32 %v2059_v6, %v1882_v5  ;;  %v2057_v9 = vld [vmem:[%s3129_s1 + $0xec] sm:$0xf]  ;;  %v1884_v10 = vld [vmem:[%s3129_s1 + $0xf8] sm:$0xf0]  ;;  %v1858_v11 = vld [vmem:[%s3129_s1 + $0xc0] sm:$0xf] }
   0xe   : > { %484 = vmatpush.bf16.msra.mxu0 %v1875_v3  ;;  %v1887_v12 = vor.u32 %v2057_v9, %v1884_v10  ;;  %v2054_v13 = vld [vmem:[%s3129_s1 + $0xcc] sm:$0xf0]  ;;  %v2052_v14 = vld [vmem:[%s3129_s1 + $0xc4] sm:$0xf]  ;;  %v1860_v15 = vld [vmem:[%s3129_s1 + $0xd0] sm:$0xf0] }
   0xf   : > { %498 = vmatpush.bf16.msra.mxu1 %v1879_v7  ;;  %512 = vmatpush.bf16.msra.mxu2 %v1883_v8  ;;  %v1859_v16 = vor.u32 %v2054_v13, %v1858_v11  ;;  %v1863_v17 = vor.u32 %v2052_v14, %v1860_v15  ;;  %v1866_v18 = vld [vmem:[%s3129_s1 + $0xc8] sm:$0xf]  ;;  %v2055_v19 = vld [vmem:[%s3129_s1 + $0xd4] sm:$0xf0]  ;;  %v2053_v20 = vld [vmem:[%s3129_s1 + $0xcc] sm:$0xf] }
  0x10   : > { %526 = vmatpush.bf16.msra.mxu3 %v1887_v12  ;;  %v1867_v21 = vor.u32 %v2055_v19, %v1866_v18  ;;  %v1868_v22 = vld [vmem:[%s3129_s1 + $0xd8] sm:$0xf0]  ;;  %v1842_v23 = vld [vmem:[%s3129_s1 + $0xa0] sm:$0xf]  ;;  %v2050_v24 = vld [vmem:[%s3129_s1 + $0xac] sm:$0xf0] }
  0x11   : > { %v1871_v25 = vor.u32 %v2053_v20, %v1868_v22  ;;  %v2048_v26 = vld [vmem:[%s3129_s1 + $0xa4] sm:$0xf]  ;;  %v1844_v27 = vld [vmem:[%s3129_s1 + $0xb0] sm:$0xf0]  ;;  %v1850_v28 = vld [vmem:[%s3129_s1 + $0xa8] sm:$0xf]  ;;  %v1843_v29 = vor.u32 %v2050_v24, %v1842_v23 }
  0x12   : > { %485 = vmatpush.bf16.msra.mxu0 %v1859_v16  ;;  %v2051_v30 = vld [vmem:[%s3129_s1 + $0xb4] sm:$0xf0]  ;;  %v2049_v31 = vld [vmem:[%s3129_s1 + $0xac] sm:$0xf]  ;;  %v1852_v32 = vld [vmem:[%s3129_s1 + $0xb8] sm:$0xf0]  ;;  %v1847_v33 = vor.u32 %v2048_v26, %v1844_v27 }
  0x13   : > { %499 = vmatpush.bf16.msra.mxu1 %v1863_v17  ;;  %513 = vmatpush.bf16.msra.mxu2 %v1867_v21  ;;  %v1851_v34 = vor.u32 %v2051_v30, %v1850_v28  ;;  %v1826_v35 = vld [vmem:[%s3129_s1 + $0x80] sm:$0xf]  ;;  %v2046_v36 = vld [vmem:[%s3129_s1 + $0x8c] sm:$0xf0]  ;;  %v2044_v37 = vld [vmem:[%s3129_s1 + $0x84] sm:$0xf]  ;;  %v1855_v38 = vor.u32 %v2049_v31, %v1852_v32 }
  0x14   : > { %527 = vmatpush.bf16.msra.mxu3 %v1871_v25  ;;  %v1828_v39 = vld [vmem:[%s3129_s1 + $0x90] sm:$0xf0]  ;;  %v1834_v40 = vld [vmem:[%s3129_s1 + $0x88] sm:$0xf]  ;;  %v2047_v41 = vld [vmem:[%s3129_s1 + $0x94] sm:$0xf0]  ;;  %v1827_v44 = vor.u32 %v2046_v36, %v1826_v35  ;;  %v564_v35 = vlaneseq }
  0x15   : > { %v2045_v42 = vld [vmem:[%s3129_s1 + $0x8c] sm:$0xf]  ;;  %v1836_v43 = vld [vmem:[%s3129_s1 + $0x98] sm:$0xf0]  ;;  %v1831_v45 = vor.u32 %v2044_v37, %v1828_v39  ;;  %v1835_v46 = vor.u32 %v2047_v41, %v1834_v40  ;;  %v1810_v47 = vld [vmem:[%s3129_s1 + $0x60] sm:$0xf] }
  0x16   : > { %486 = vmatpush.bf16.msra.mxu0 %v1843_v29  ;;  %v2042_v48 = vld [vmem:[%s3129_s1 + $0x6c] sm:$0xf0]  ;;  %v2040_v49 = vld [vmem:[%s3129_s1 + $0x64] sm:$0xf]  ;;  %v1839_v50 = vor.u32 %v2045_v42, %v1836_v43  ;;  %v1812_v51 = vld [vmem:[%s3129_s1 + $0x70] sm:$0xf0] }
  0x17   : > { %500 = vmatpush.bf16.msra.mxu1 %v1847_v33  ;;  %514 = vmatpush.bf16.msra.mxu2 %v1851_v34  ;;  %v1818_v52 = vld [vmem:[%s3129_s1 + $0x68] sm:$0xf]  ;;  %v2043_v53 = vld [vmem:[%s3129_s1 + $0x74] sm:$0xf0]  ;;  %v2041_v54 = vld [vmem:[%s3129_s1 + $0x6c] sm:$0xf]  ;;  %v1811_v56 = vor.u32 %v2042_v48, %v1810_v47  ;;  %v1815_v57 = vor.u32 %v2040_v49, %v1812_v51 }
  0x18   : > { %528 = vmatpush.bf16.msra.mxu3 %v1855_v38  ;;  %v1820_v55 = vld [vmem:[%s3129_s1 + $0x78] sm:$0xf0]  ;;  %v1819_v58 = vor.u32 %v2043_v53, %v1818_v52  ;;  %v1794_v59 = vld [vmem:[%s3129_s1 + $0x40] sm:$0xf]  ;;  %v2038_v60 = vld [vmem:[%s3129_s1 + $0x4c] sm:$0xf0] }
  0x19   : > { %v2036_v61 = vld [vmem:[%s3129_s1 + $0x44] sm:$0xf]  ;;  %v1823_v62 = vor.u32 %v2041_v54, %v1820_v55  ;;  %v1796_v63 = vld [vmem:[%s3129_s1 + $0x50] sm:$0xf0]  ;;  %v1802_v0 = vld [vmem:[%s3129_s1 + $0x48] sm:$0xf]  ;;  %v1795_v4 = vor.u32 %v2038_v60, %v1794_v59 }
  0x1a   : > { %487 = vmatpush.bf16.msra.mxu0 %v1827_v44  ;;  %v2039_v1 = vld [vmem:[%s3129_s1 + $0x54] sm:$0xf0]  ;;  %v2037_v2 = vld [vmem:[%s3129_s1 + $0x4c] sm:$0xf]  ;;  %v1804_v3 = vld [vmem:[%s3129_s1 + $0x58] sm:$0xf0]  ;;  %v1799_v6 = vor.u32 %v2036_v61, %v1796_v63 }
  0x1b   : > { %501 = vmatpush.bf16.msra.mxu1 %v1831_v45  ;;  %515 = vmatpush.bf16.msra.mxu2 %v1835_v46  ;;  %v1778_v5 = vld [vmem:[%s3129_s1 + $0x20] sm:$0xf]  ;;  %v1803_v7 = vor.u32 %v2039_v1, %v1802_v0  ;;  %v2034_v8 = vld [vmem:[%s3129_s1 + $0x2c] sm:$0xf0]  ;;  %v2032_v9 = vld [vmem:[%s3129_s1 + $0x24] sm:$0xf]  ;;  %v1807_v11 = vor.u32 %v2037_v2, %v1804_v3 }
  0x1c   : > { %529 = vmatpush.bf16.msra.mxu3 %v1839_v50  ;;  %v1780_v10 = vld [vmem:[%s3129_s1 + $0x30] sm:$0xf0]  ;;  %v1786_v12 = vld [vmem:[%s3129_s1 + $0x28] sm:$0xf]  ;;  %v2035_v13 = vld [vmem:[%s3129_s1 + $0x34] sm:$0xf0]  ;;  %v1779_v16 = vor.u32 %v2034_v8, %v1778_v5 }
  0x1d   : > { %p269_p3 = scmp.lt.s32.totalorder %s1751_s25, 1  ;;  %v2033_v14 = vld [vmem:[%s3129_s1 + $0x2c] sm:$0xf]  ;;  %v1788_v15 = vld [vmem:[%s3129_s1 + $0x38] sm:$0xf0]  ;;  %v1783_v18 = vor.u32 %v2032_v9, %v1780_v10  ;;  %v1787_v19 = vor.u32 %v2035_v13, %v1786_v12  ;;  %vm577_vm0 = vcmp.lt.s32.totalorder %v564_v35, 512 }
  0x1e   : > { %488 = vmatpush.bf16.msra.mxu0 %v1811_v56  ;;  %v1762_v17 = vld [vmem:[%s3129_s1] sm:$0xf]  ;;  %v2030_v20 = vld [vmem:[%s3129_s1 + $0xc] sm:$0xf0]  ;;  %v2028_v21 = vld [vmem:[%s3129_s1 + $0x4] sm:$0xf]  ;;  %v1791_v23 = vor.u32 %v2033_v14, %v1788_v15 }
  0x1f   : > { %502 = vmatpush.bf16.msra.mxu1 %v1815_v57  ;;  %516 = vmatpush.bf16.msra.mxu2 %v1819_v58  ;;  %s3263_s25 = smov (!%p269_p3, %s1751_s25), 1  ;;  %v1764_v22 = vld [vmem:[%s3129_s1 + $0x10] sm:$0xf0]  ;;  %v1770_v24 = vld [vmem:[%s3129_s1 + $0x8] sm:$0xf]  ;;  %v1763_v28 = vor.u32 %v2030_v20, %v1762_v17  ;;  %v2114_v36 = vmov 0.0  }
  0x20   : > { %530 = vmatpush.bf16.msra.mxu3 %v1823_v62  ;;  %v2031_v25 = vld [vmem:[%s3129_s1 + $0x14] sm:$0xf0]  ;;  %s2026_s22 = sshll.u32 %s3263_s25, 4  ;;  %v2029_v26 = vld [vmem:[%s3129_s1 + $0xc] sm:$0xf]  ;;  %v1767_v31 = vor.u32 %v2028_v21, %v1764_v22  ;;  %s2115_s11 = smov 32  }
  0x21   : > { %v1772_v27 = vld [vmem:[%s3129_s1 + $0x18] sm:$0xf0]  ;;  %s2369_s8 = scalar_lea.vmem %s3128_s0, %s2026_s22  ;;  %v1771_v32 = vor.u32 %v2031_v25, %v1770_v24  ;;  %579 = vst.msk [vmem:[#allocation2] ss:$8 sm:$0xf] %vm577_vm0, %v2114_v36  ;;  %vm589_vm1 = vcmask 1040384   ;;  %s278_s28 = scalar_lea.vmem %s3135_s7, %s2026_s22 }
  0x22   : > { %489 = vmatpush.bf16.msra.mxu0 %v1795_v4  ;;  %v279_v29 = vld [vmem:[%s2369_s8] sm:$0xff]  ;;  %v280_v30 = vld [vmem:[%s2369_s8 + $0x8] sm:$0xff]  ;;  %v1775_v33 = vor.u32 %v2029_v26, %v1772_v27  ;;  %627 = vst.msk [vmem:[#allocation2 + $0x41] ss:$8 sm:$0xf] %vm577_vm0, %v2114_v36  ;;  %s2116_s12 = smov 96  }
  0x23   : > { %503 = vmatpush.bf16.msra.mxu1 %v1799_v6  ;;  %517 = vmatpush.bf16.msra.mxu2 %v1803_v7  ;;  %v281_v34 = vpack.c.bf16 %v280_v30, %v279_v29  ;;  %630 = vst.msk [vmem:[#allocation2 + $0x60] ss:$8 sm:$0xf] %vm577_vm0, %v2114_v36  ;;  %v314_v37 = vld [vmem:[%s3130_s2] sm:$0xf]  ;;  %vm911_vm2 = vcmask 1046528  }
  0x24   : > { %531 = vmatpush.bf16.msra.mxu3 %v1807_v11  ;;  %677 = vst.msk [vmem:[#allocation2 + $0xa1] ss:$8 sm:$0xf] %vm577_vm0, %v2114_v36  ;;  %v316_v38 = vperm.slane %v314_v37, 0  ;;  %v317_v39 = vperm.slane %v314_v37, 1  ;;  %v318_v46 = vperm.slane %v314_v37, 2 }
  0x25   : > { %705 = vst.msk [vmem:[#allocation2 + $0xc0] ss:$8 sm:$0xf] %vm577_vm0, %v2114_v36  ;;  %v319_v48 = vperm.slane %v314_v37, 3  ;;  %vm1149_vm3 = vcmask 1045504  }
  0x26   : > { %490 = vmatpush.bf16.msra.mxu0 %v1779_v16  ;;  %752 = vst.msk [vmem:[#allocation2 + $0x101] ss:$8 sm:$0xf] %vm577_vm0, %v2114_v36  ;;  %v1891_v14 = vld [vmem:[%s3131_s3 + $0x4] ss:$8 sm:$0xf] }
  0x27   : > { %504 = vmatpush.bf16.msra.mxu1 %v1783_v18  ;;  %518 = vmatpush.bf16.msra.mxu2 %v1787_v19  ;;  %v2437_v15 = vld [vmem:[%s3131_s3 + $0x1] ss:$8 sm:$0xf]  ;;  %v961_v16 = vperm.slane %v1891_v14, 2  ;;  %v959_v19 = vperm.slane %v1891_v14, 0  ;;  %v962_v26 = vperm.slane %v1891_v14, 3 }
  0x28   : > { %532 = vmatpush.bf16.msra.mxu3 %v1791_v23  ;;  %v1894_v18 = vld [vmem:[%s3131_s3 + $0x7] ss:$8 sm:$0xf] }
  0x29   : > { %v1199_v21 = vperm.slane %v1894_v18, 2 }
  0x2a   : > { %491 = vmatpush.bf16.msra.mxu0 %v1763_v28  ;;  %v809_v28 = vperm.slane %v2437_v15, 0 }
  0x2b   : > { %505 = vmatpush.bf16.msra.mxu1 %v1767_v31  ;;  %519 = vmatpush.bf16.msra.mxu2 %v1771_v32  ;;  %v811_v32 = vperm.slane %v2437_v15, 2 }
  0x2c   : > { %533 = vmatpush.bf16.msra.mxu3 %v1775_v33 }
  0x2d   : > { %492 = vmatmul.bf16.vlgmr.msra.gmra.mxu0 %v281_v34 }
  0x2e   : > { %506 = vmatmul.bf16.vlgmr.msra.gmra.mxu1 %v281_v34  ;;  %520 = vmatmul.bf16.vlgmr.msra.gmra.mxu2 %v281_v34 }
  0x2f   : > { %534 = vmatmul.bf16.vlgmr.msra.gmra.mxu3 %v281_v34  ;;  %v812_v34 = vperm.slane %v2437_v15, 3 }
  0xaa   : > { %v493_v40 = vpop.f32.mrf.mxu0 }
  0xab   : > { %v494_v41 = vadd.f32 %v493_v40, %v316_v38  ;;  %v507_v42 = vpop.f32.mrf.mxu1 }
  0xac   : > { %v508_v43 = vadd.f32 %v507_v42, %v317_v39 }
  0xad   : > { %v2377_v44 = vmax.f32 %v494_v41, 0.0 }
  0xae   : > { %v2379_v45 = vmax.f32 %v508_v43, 0.0 }
  0xaf   : > { %3158 = vst [vmem:[#allocation3_spill] sm:$0xff] %v2377_v44  ;;  %v640_v47 = vrot.slane %v2377_v44, 7  ;;  %548 = vrot.lane.b32.xlu1 %v2377_v44, %s2115_s11 }
  0xb0   : > { %3159 = vst [vmem:[#allocation4_spill] sm:$0xff] %v2379_v45  ;;  %v641_v49 = vrot.slane %v2379_v45, 7  ;;  %552 = vrot.lane.b32.xlu0 %v2379_v45, %s2115_s11 }
  0xb1   : > { %664 = vst [vmem:[#allocation2 + $0x60] sm:$0xfe] %v640_v47  ;;  %v521_v50 = vpop.f32.mrf.mxu2 }
  0xb2   : > { %665 = vst [vmem:[#allocation2 + $0x68] sm:$0xfe] %v641_v49  ;;  %v522_v51 = vadd.f32 %v521_v50, %v318_v46  ;;  %v535_v52 = vpop.f32.mrf.mxu3  ;;  %v495_v53 = vpop.f32.mrf.mxu0 }
  0xb3   : > { %v536_v54 = vadd.f32 %v535_v52, %v319_v48  ;;  %v496_v55 = vadd.f32 %v495_v53, %v316_v38  ;;  %v509_v56 = vpop.f32.mrf.mxu1  ;;  %v1200_v38 = vperm.slane %v1894_v18, 3 }
  0xb4   : > { %v2387_v57 = vmax.f32 %v522_v51, 0.0  ;;  %v510_v58 = vadd.f32 %v509_v56, %v317_v39 }
  0xb5   : > { %v2389_v59 = vmax.f32 %v536_v54, 0.0  ;;  %v2391_v60 = vmax.f32 %v496_v55, 0.0 }
  0xb6   : > { %v642_v61 = vrot.slane %v2387_v57, 7  ;;  %v2394_v62 = vmax.f32 %v510_v58, 0.0 }
  0xb7   : > { %3160 = vst [vmem:[#allocation5_spill] sm:$0xff] %v2389_v59  ;;  %v643_v63 = vrot.slane %v2389_v59, 7  ;;  %v644_v0 = vrot.slane %v2391_v60, 7  ;;  %560 = vrot.lane.b32.xlu2 %v2389_v59, %s2115_s11  ;;  %556 = vrot.lane.b32.xlu1 %v2387_v57, %s2115_s11 }
  0xb8   : > { %3161 = vst [vmem:[#allocation6_spill] sm:$0xff] %v2391_v60  ;;  %v646_v1 = vrot.slane %v2394_v62, 7  ;;  %679 = vrot.lane.b32.xlu0 %v2377_v44, %s2116_s12  ;;  %v950_v22 = vld [vmem:[#allocation2 + $0x60] sm:$0xfe] }
  0xb9   : > { %3162 = vst [vmem:[#allocation7_spill] sm:$0xff] %v2394_v62  ;;  %v2405_v2 = vsel %vm589_vm1, %v640_v47, %v644_v0  ;;  %v523_v3 = vpop.f32.mrf.mxu2  ;;  %v800_v27 = vld [vmem:[#allocation2 + $0x60] sm:$0xff]  ;;  %v2447_v30 = vmul.f32 %v959_v19, %v950_v22 }
  0xba   : > { %666 = vst [vmem:[#allocation2 + $0x70] sm:$0xfe] %v642_v61  ;;  %v647_v4 = vsel %vm589_vm1, %v641_v49, %v646_v1  ;;  %v524_v5 = vadd.f32 %v523_v3, %v318_v46  ;;  %v537_v6 = vpop.f32.mrf.mxu3  ;;  %v2453_v39 = vmul.f32 %v809_v28, %v800_v27  ;;  %v2457_v46 = vmul.f32 %v809_v28, %v2405_v2 }
  0xbb   : > { %667 = vst [vmem:[#allocation2 + $0x78] sm:$0xfe] %v643_v63  ;;  %v538_v7 = vadd.f32 %v537_v6, %v319_v48  ;;  %v2464_v50 = vmul.f32 %v959_v19, %v2405_v2  ;;  %v991_v51 = vrot.slane %v2447_v30, 1  ;;  %v2481_v6 = vand.u32 127, %v564_v35 }
  0xbc   : > { %672 = vst [vmem:[#allocation2 + $0xa0] sm:$0x1] %v644_v0  ;;  %v2408_v8 = vmax.f32 %v524_v5, 0.0  ;;  %v1197_v5 = vperm.slane %v1894_v18, 0  ;;  %v960_v27 = vperm.slane %v1891_v14, 1 }
  0xbd   : > { %669 = vst [vmem:[#allocation2 + $0x88] sm:$0xff] %v647_v4  ;;  %v2410_v9 = vmax.f32 %v538_v7, 0.0  ;;  %v992_v35 = vrot.slane %v2464_v50, 1  ;;  %v1189_v14 = vld [vmem:[#allocation2 + $0x68] sm:$0xfc]  ;;  %vm566_vm4 = vcmp.lt.s32.totalorder %v2481_v6, 32 }
  0xbe   : > { %3163 = vst [vmem:[#allocation8_spill] sm:$0xff] %v2408_v8  ;;  %v648_v10 = vrot.slane %v2408_v8, 7  ;;  %v2083_v50 = vld [vmem:[%s3133_s5 + $0xb8] sm:$0xff]  ;;  %vm695_vm5 = vcmp.lt.s32.totalorder %v2481_v6, 96 }
  0xbf   : > { %673 = vst [vmem:[#allocation2 + $0xa8] sm:$0x1] %v646_v1  ;;  %691 = vrot.lane.b32.xlu2 %v2389_v59, %s2116_s12  ;;  %558 = vrot.lane.b32.xlu1 %v2408_v8, %s2115_s11  ;;  %v650_v11 = vrot.slane %v2410_v9, 7  ;;  %v2559_v30 = vld [vmem:[%s3131_s3] ss:$8 sm:$0xf] }
  0xc0   : > { %3164 = vst [vmem:[#allocation9_spill] sm:$0xff] %v2410_v9  ;;  %v649_v12 = vsel %vm589_vm1, %v642_v61, %v648_v10  ;;  %687 = vrot.lane.b32.xlu0 %v2387_v57, %s2116_s12  ;;  %1656 = vmatpush.bf16.msrb.mxu2 %v2083_v50  ;;  %v2593_v50 = vld [vmem:[%s3132_s4] sm:$0xf] }
  0xc1   : > { %674 = vst [vmem:[#allocation2 + $0xb0] sm:$0x1] %v648_v10  ;;  %v651_v13 = vsel %vm589_vm1, %v643_v63, %v650_v11  ;;  %v952_v17 = vld [vmem:[#allocation2 + $0x70] sm:$0xfe]  ;;  %v2444_v25 = vmul.f32 %v961_v16, %v649_v12  ;;  %v2451_v36 = vmul.f32 %v1199_v21, %v649_v12  ;;  %v2469_v53 = vmul.f32 %v811_v32, %v649_v12  ;;  %v1188_v12 = vld [vmem:[#allocation2 + $0x60] sm:$0xfc] }
  0xc2   : > { %675 = vst [vmem:[#allocation2 + $0xb8] sm:$0x1] %v650_v11  ;;  %v1190_v23 = vld [vmem:[#allocation2 + $0x70] sm:$0xfc]  ;;  %v969_v24 = vmul.f32 %v961_v16, %v952_v17  ;;  %v953_v29 = vld [vmem:[#allocation2 + $0x78] sm:$0xfe]  ;;  %v2461_v48 = vmul.f32 %v962_v26, %v651_v13  ;;  %v2473_v61 = vmul.f32 %v812_v34, %v651_v13  ;;  %v2478_v4 = vmul.f32 %v1200_v38, %v651_v13 }
  0xc3   : > { %v802_v31 = vld [vmem:[#allocation2 + $0x70] sm:$0xff]  ;;  %v1207_v33 = vmul.f32 %v1199_v21, %v1190_v23  ;;  %v803_v37 = vld [vmem:[#allocation2 + $0x78] sm:$0xff]  ;;  %v998_v41 = vrot.slane %v2444_v25, 1  ;;  %v970_v42 = vmul.f32 %v962_v26, %v953_v29  ;;  %3165 = vst [vmem:[#allocation10_spill] sm:$0xff] %v2457_v46  ;;  %v954_v49 = vld [vmem:[#allocation2 + $0xa0] sm:$0x1] }
  0xc4   : > { %v997_v40 = vrot.slane %v969_v24, 1  ;;  %v1191_v43 = vld [vmem:[#allocation2 + $0x78] sm:$0xfc]  ;;  %v2459_v47 = vmul.f32 %v811_v32, %v802_v31  ;;  %v2471_v58 = vmul.f32 %v812_v34, %v803_v37  ;;  %v1236_v63 = vrot.slane %v2451_v36, 2  ;;  %v1192_v24 = vld [vmem:[#allocation2 + $0xa0] sm:$0x3] }
  0xc5   : > { %v1235_v56 = vrot.slane %v1207_v33, 2  ;;  %v2476_v3 = vmul.f32 %v1200_v38, %v1191_v43  ;;  %v1000_v10 = vrot.slane %v970_v42, 1  ;;  %v975_v11 = vmul.f32 %v959_v19, %v954_v49  ;;  %v951_v29 = vld [vmem:[#allocation2 + $0x68] sm:$0xfe] }
  0xc6   : > { %v2486_v7 = vsel %vm911_vm2, %v997_v40, %v998_v41  ;;  %v1001_v23 = vrot.slane %v2461_v48, 1  ;;  %v2492_v31 = vperm.slane %v1894_v18, 1  ;;  %v1205_v19 = vmul.f32 %v1197_v5, %v1188_v12  ;;  %v955_v33 = vld [vmem:[#allocation2 + $0xa8] sm:$0x1] }
  0xc7   : > { %550 = vrot.lane.b32.xlu2 %v2391_v60, %s2115_s11  ;;  %689 = vrot.lane.b32.xlu1 %v2408_v8, %s2116_s12  ;;  %v2497_v32 = vsel %vm1149_vm3, %v1235_v56, %v1236_v63  ;;  %v1003_v34 = vrot.slane %v975_v11, 1  ;;  %v1213_v37 = vmul.f32 %v1197_v5, %v1192_v24  ;;  %v2503_v18 = vld [vmem:[#allocation2 + $0x88] sm:$0xff]  ;;  %v2508_v43 = vmul.f32 %v960_v27, %v951_v29 }
  0xc8   : > { %554 = vrot.lane.b32.xlu0 %v2394_v62, %s2115_s11  ;;  %v956_v54 = vld [vmem:[#allocation2 + $0xb0] sm:$0x1]  ;;  %v2506_v42 = vsel %vm911_vm2, %v1000_v10, %v1001_v23  ;;  %v1193_v48 = vld [vmem:[#allocation2 + $0xa8] sm:$0x3]  ;;  %v2530_v11 = vmul.f32 %v960_v27, %v2503_v18  ;;  %v810_v29 = vperm.slane %v2437_v15, 1 }
  0xc9   : > { %v1194_v55 = vld [vmem:[#allocation2 + $0xb0] sm:$0x3]  ;;  %v957_v0 = vld [vmem:[#allocation2 + $0xb8] sm:$0x1]  ;;  %v977_v17 = vmul.f32 %v961_v16, %v956_v54  ;;  %v1238_v16 = vrot.slane %v2476_v3, 2  ;;  %v2538_v24 = vmul.f32 %v2492_v31, %v1193_v48 }
  0xca   : > { %v1195_v1 = vld [vmem:[#allocation2 + $0xb8] sm:$0x3]  ;;  %v1215_v22 = vmul.f32 %v1199_v21, %v1194_v55  ;;  %v978_v13 = vmul.f32 %v962_v26, %v957_v0  ;;  %v1209_v21 = vmul.f32 %v1197_v5, %v2405_v2  ;;  %v1239_v26 = vrot.slane %v2478_v4, 2  ;;  %v2574_v48 = vld [vmem:[%s3131_s3 + $0x3] ss:$8 sm:$0xf] }
  0xcb   : > { %v2489_v28 = vmul.f32 %v1200_v38, %v1195_v1  ;;  %v1007_v38 = vrot.slane %v977_v17, 1  ;;  %v2091_v54 = vld [vmem:[%s3133_s5 + $0xf8] sm:$0xff]  ;;  %v2519_v0 = vmul.f32 %v960_v27, %v955_v33  ;;  %v2522_v1 = vmul.f32 %v2492_v31, %v1189_v14  ;;  %3167 = vst [vmem:[#allocation12_spill] sm:$0xff] %v2538_v24  ;;  %v801_v27 = vld [vmem:[#allocation2 + $0x68] sm:$0xff]  ;;  %v2090_v33 = vld [vmem:[%s3133_s5 + $0xf0] sm:$0xff] }
  0xcc   : > { %v1245_v40 = vrot.slane %v1215_v22, 2  ;;  %v1009_v55 = vrot.slane %v978_v13, 1  ;;  %v1229_v5 = vrot.slane %v1205_v19, 2  ;;  %v1230_v10 = vrot.slane %v1209_v21, 2  ;;  %1670 = vmatpush.bf16.msrb.mxu3 %v2091_v54  ;;  %v2082_v21 = vld [vmem:[%s3133_s5 + $0xb0] sm:$0xff]  ;;  %3170 = vst [vmem:[#allocation15_spill] sm:$0xff] %v2574_v48 }
  0xcd   : > { %v1247_v56 = vrot.slane %v2489_v28, 2  ;;  %3166 = vst [vmem:[#allocation11_spill] sm:$0xff] %v2522_v1  ;;  %v1241_v22 = vrot.slane %v1213_v37, 2  ;;  %v2544_v28 = vsel %vm911_vm2, %v991_v51, %v992_v35  ;;  %v2562_v15 = vsel %vm1149_vm3, %v1238_v16, %v1239_v26  ;;  %1657 = vmatpush.bf16.msrb.mxu2 %v2082_v21  ;;  %v2598_v25 = vld [vmem:[%s3131_s3 + $0x6] ss:$8 sm:$0xf] }
  0xce   : > { %3168 = vst [vmem:[#allocation13_spill] sm:$0xff] %v2544_v28  ;;  %v2565_v51 = vsel %vm911_vm2, %v992_v35, %v1003_v34  ;;  %v2579_v16 = vsel %vm911_vm2, %v998_v41, %v1007_v38  ;;  %v2584_v35 = vsel %vm1149_vm3, %v1236_v63, %v1245_v40  ;;  %v2587_v34 = vsel %vm911_vm2, %v1001_v23, %v1009_v55  ;;  %v2615_v40 = vld [vmem:[%s3131_s3 + $0x2] ss:$8 sm:$0xf] }
  0xcf   : > { %562 = vrot.lane.b32.xlu2 %v2410_v9, %s2115_s11  ;;  %681 = vrot.lane.b32.xlu1 %v2391_v60, %s2116_s12  ;;  %3169 = vst [vmem:[#allocation14_spill] sm:$0xff] %v2565_v51  ;;  %v2601_v36 = vsel %vm1149_vm3, %v1239_v26, %v1247_v56  ;;  %v2604_v41 = vsel %vm1149_vm3, %v1229_v5, %v1230_v10  ;;  %v2618_v26 = vperm.slane %v2574_v48, 2  ;;  %v2067_v5 = vld [vmem:[%s3133_s5 + $0x38] sm:$0xff]  ;;  %v2088_v24 = vld [vmem:[%s3133_s5 + $0xe0] sm:$0xff]  ;;  %v3186_v1 = vrot.slane %v2519_v0, 1 }
  0xd0   : > { %693 = vrot.lane.b32.xlu0 %v2410_v9, %s2116_s12  ;;  %1671 = vmatpush.bf16.msrb.mxu3 %v2090_v33  ;;  %3171 = vst [vmem:[#allocation16_spill] sm:$0xff] %v2598_v25  ;;  %v2607_v63 = vsel %vm1149_vm3, %v1230_v10, %v1241_v22  ;;  %v2620_v54 = vmul.f32 %v810_v29, %v801_v27  ;;  %v2075_v10 = vld [vmem:[%s3133_s5 + $0x78] sm:$0xff]  ;;  %v2081_v22 = vld [vmem:[%s3133_s5 + $0xa8] sm:$0xff]  ;;  %v2635_v27 = vperm.slane %v2598_v25, 2  ;;  %v2638_v33 = vperm.slane %v2574_v48, 0 }
  0xd1   : > { %3172 = vst [vmem:[#allocation17_spill] sm:$0xff] %v2601_v36  ;;  %v2641_v23 = vmul.f32 %v810_v29, %v2503_v18  ;;  %v2089_v29 = vld [vmem:[%s3133_s5 + $0xe8] sm:$0xff]  ;;  %1628 = vmatpush.bf16.msrb.mxu0 %v2067_v5  ;;  %1642 = vmatpush.bf16.msrb.mxu1 %v2075_v10  ;;  %v774_v5 = vperm.slane %v2559_v30, 0 }
  0xd2   : > { %3173 = vst [vmem:[#allocation18_spill] sm:$0xff] %v2604_v41  ;;  %1658 = vmatpush.bf16.msrb.mxu2 %v2081_v22  ;;  %v2080_v22 = vld [vmem:[%s3133_s5 + $0xa0] sm:$0xff] }
  0xd3   : > { %3174 = vst [vmem:[#allocation19_spill] sm:$0xff] %v2607_v63  ;;  %v2731_v63 = vmul.f32 %v2492_v31, %v2503_v18 }
  0xd4   : > { %3175 = vst [vmem:[#allocation20_spill] sm:$0xff] %v2620_v54  ;;  %1672 = vmatpush.bf16.msrb.mxu3 %v2089_v29  ;;  %v2693_v29 = vld [vmem:[%s3131_s3 + $0x20] ss:$8 sm:$0xf]  ;;  %v3187_v54 = vrot.slane %v2530_v11, 1 }
  0xd5   : > { %3176 = vst [vmem:[#allocation21_spill] sm:$0xff] %v2641_v23  ;;  %v2772_v41 = vperm.slane %v2693_v29, 3 }
  0xd6   : > { %3179 = vst [vmem:[#allocation23_spill] sm:$0xff] %v2693_v29  ;;  %1659 = vmatpush.bf16.msrb.mxu2 %v2080_v22  ;;  %v2079_v22 = vld [vmem:[%s3133_s5 + $0x98] sm:$0xff] }
  0xd7   : > { %683 = vrot.lane.b32.xlu2 %v2379_v45, %s2116_s12  ;;  %3189 = vst [vmem:[#allocation28_spill] sm:$0xff] %v2731_v63 }
  0xd8   : > { %685 = vrot.lane.b32.xlu0 %v2394_v62, %s2116_s12  ;;  %1673 = vmatpush.bf16.msrb.mxu3 %v2088_v24  ;;  %v2065_v24 = vld [vmem:[%s3133_s5 + $0x28] sm:$0xff] }
  0xda   : > { %1660 = vmatpush.bf16.msrb.mxu2 %v2079_v22 }
 0x111   : > { %v2442_v20 = vpop.permute.xlu2 %560 }
 0x119   : > { %v2467_v52 = vpop.permute.xlu2 %691 }
 0x121   : > { %v2510_v49 = vpop.permute.xlu2 %550  ;;  %v549_v2 = vpop.permute.xlu1 %548 }
 0x122   : > { %v553_v3 = vpop.permute.xlu0 %552  ;;  %v2527_v4 = vsel %vm566_vm4, %v2442_v20, %v549_v2 }
 0x123   : > { %v2534_v12 = vsel %vm566_vm4, %v549_v2, %v553_v3  ;;  %v3137_v17 = vrot.slane %v2527_v4, 7  ;;  %v3178_v62 = vrot.slane %v2527_v4, 7  ;;  %v2697_v4 = vperm.slane %v2598_v25, 0 }
 0x124   : > { %v3136_v13 = vrot.slane %v2534_v12, 7 }
 0x125   : > { %614 = vst [vmem:[#allocation2] sm:$0xfe] %v3137_v17  ;;  %v3182_v17 = vrot.slane %v2508_v43, 1 }
 0x126   : > { %615 = vst [vmem:[#allocation2 + $0x8] sm:$0xfe] %v3136_v13 }
 0x127   : > { %3180 = vst [vmem:[#allocation24_spill] sm:$0xff] %v2697_v4 }
 0x129   : > { %v2622_v55 = vpop.permute.xlu2 %562  ;;  %v557_v56 = vpop.permute.xlu1 %556 }
 0x12a   : > { %v574_v37 = vsel %vm566_vm4, %v2622_v55, %v2510_v49  ;;  %v680_v13 = vpop.permute.xlu0 %679  ;;  %v2650_v38 = vsel %vm566_vm4, %v557_v56, %v2442_v20  ;;  %v2654_v21 = vsel %vm566_vm4, %v553_v3, %v557_v56  ;;  %v2668_v20 = vld [vmem:[%s3131_s3 + $0x5] ss:$8 sm:$0xf]  ;;  %v2672_v56 = vperm.slane %v2574_v48, 3 }
 0x12b   : > { %v594_v19 = vrot.slane %v574_v37, 7  ;;  %v2663_v2 = vsel %vm695_vm5, %v2467_v52, %v680_v13  ;;  %3177 = vst [vmem:[#allocation22_spill] sm:$0xff] %v2668_v20  ;;  %v2066_v3 = vld [vmem:[%s3133_s5 + $0x30] sm:$0xff]  ;;  %v2711_v23 = vperm.slane %v2668_v20, 3  ;;  %v2727_v48 = vsel %vm911_vm2, %v3187_v54, %v3186_v1  ;;  %v2073_v54 = vld [vmem:[%s3133_s5 + $0x68] sm:$0xff] }
 0x12c   : > { %v870_v10 = vld [vmem:[#allocation2] sm:$0xfe]  ;;  %v2074_v37 = vld [vmem:[%s3133_s5 + $0x70] sm:$0xff]  ;;  %v3185_v43 = vrot.slane %v2663_v2, 7  ;;  %1629 = vmatpush.bf16.msrb.mxu0 %v2066_v3  ;;  %3188 = vst [vmem:[#allocation27_spill] sm:$0xff] %v2727_v48  ;;  %v3192_v1 = vrot.slane %v2650_v38, 7 }
 0x12d   : > { %v595_v45 = vsel %vm589_vm1, %v3178_v62, %v594_v19  ;;  %622 = vst [vmem:[#allocation2 + $0x40] sm:$0x1] %v594_v19  ;;  %v887_v62 = vmul.f32 %v2638_v33, %v870_v10  ;;  %v3181_v19 = vrot.slane %v2530_v11, 1  ;;  %v756_v10 = vperm.slane %v2593_v50, 0  ;;  %v765_v60 = vld [vmem:[#allocation2] sm:$0xff]  ;;  %1643 = vmatpush.bf16.msrb.mxu1 %v2074_v37 }
 0x12e   : > { %v2715_v44 = vmul.f32 %v2638_v33, %v595_v45  ;;  %742 = vst [vmem:[#allocation2 + $0xd8] sm:$0xfe] %v3185_v43  ;;  %v3190_v43 = vrot.slane %v2654_v21, 7  ;;  %v2737_v37 = vperm.slane %v2668_v20, 2  ;;  %v2741_v11 = vmul.f32 %v2697_v4, %v595_v45 }
 0x12f   : > { %v2704_v14 = vsel %vm911_vm2, %v3182_v17, %v3181_v19  ;;  %v2720_v17 = vperm.slane %v2598_v25, 3  ;;  %v912_v19 = vrot.slane %v887_v62, 1  ;;  %617 = vst [vmem:[#allocation2 + $0x18] sm:$0xfe] %v3192_v1  ;;  %v2757_v62 = vperm.slane %v2693_v29, 2  ;;  %v2087_v25 = vld [vmem:[%s3133_s5 + $0xd8] sm:$0xff] }
 0x130   : > { %3183 = vst [vmem:[#allocation25_spill] sm:$0xff] %v2704_v14  ;;  %v1108_v14 = vld [vmem:[#allocation2] sm:$0xfc]  ;;  %v786_v1 = vmul.f32 %v774_v5, %v595_v45  ;;  %v3193_v45 = vrot.slane %v2715_v44, 1  ;;  %1630 = vmatpush.bf16.msrb.mxu0 %v2065_v24  ;;  %1674 = vmatpush.bf16.msrb.mxu3 %v2087_v25  ;;  %v2063_v25 = vld [vmem:[%s3133_s5 + $0x18] sm:$0xff] }
 0x131   : > { %3184 = vst [vmem:[#allocation26_spill] sm:$0xff] %v2715_v44  ;;  %v684_v31 = vpop.permute.xlu2 %683  ;;  %v2745_v18 = vpop.permute.xlu1 %558  ;;  %v1125_v3 = vmul.f32 %v2697_v4, %v1108_v14  ;;  %1644 = vmatpush.bf16.msrb.mxu1 %v2073_v54  ;;  %v2064_v29 = vld [vmem:[%s3133_s5 + $0x20] sm:$0xff]  ;;  %v3194_v54 = vrot.slane %v2650_v38, 7  ;;  %v2077_v38 = vld [vmem:[%s3133_s5 + $0x88] sm:$0xff]  ;;  %v3200_v44 = vperm.slane %v2615_v40, 3 }
 0x132   : > { %616 = vst [vmem:[#allocation2 + $0x10] sm:$0xfe] %v3190_v43  ;;  %v782_v43 = vmul.f32 %v774_v5, %v765_v60  ;;  %v2762_v0 = vsel %vm695_vm5, %v680_v13, %v684_v31  ;;  %v688_v48 = vpop.permute.xlu0 %687  ;;  %v568_v63 = vsel %vm566_vm4, %v2745_v18, %v2622_v55  ;;  %v914_v60 = vsel %vm911_vm2, %v912_v19, %v3193_v45  ;;  %v2072_v19 = vld [vmem:[%s3133_s5 + $0x60] sm:$0xff] }
 0x133   : > { %3191 = vst [vmem:[#allocation29_spill] sm:$0xff] %v2741_v11  ;;  %v3149_v13 = vrot.slane %v2762_v0, 7  ;;  %v2781_v14 = vsel %vm695_vm5, %v688_v48, %v2467_v52  ;;  %v2785_v55 = vsel %vm695_vm5, %v684_v31, %v688_v48  ;;  %v600_v5 = vrot.slane %v568_v63, 7  ;;  %v2078_v48 = vld [vmem:[%s3133_s5 + $0x90] sm:$0xff]  ;;  %v2071_v52 = vld [vmem:[%s3133_s5 + $0x58] sm:$0xff] }
 0x134   : > { %v2086_v63 = vld [vmem:[%s3133_s5 + $0xd0] sm:$0xff]  ;;  %v2814_v45 = vadd.f32 %v782_v43, %v756_v10  ;;  %v2816_v31 = vadd.f32 %v786_v1, %v756_v10  ;;  %v1150_v24 = vrot.slane %v1125_v3, 2  ;;  %v3196_v9 = vrot.slane %v2785_v55, 7  ;;  %1631 = vmatpush.bf16.msrb.mxu0 %v2064_v29  ;;  %v2085_v3 = vld [vmem:[%s3133_s5 + $0xc8] sm:$0xff]  ;;  %1661 = vmatpush.bf16.msrb.mxu2 %v2078_v48 }
 0x135   : > { %739 = vst [vmem:[#allocation2 + $0xc0] sm:$0xfe] %v3149_v13  ;;  %v601_v22 = vsel %vm589_vm1, %v3194_v54, %v600_v5  ;;  %v3197_v54 = vperm.slane %v2559_v30, 3  ;;  %v838_v59 = vld [vmem:[#allocation2 + $0xd8] sm:$0xff]  ;;  %v2832_v10 = vadd.f32 %v914_v60, %v2453_v39  ;;  %1645 = vmatpush.bf16.msrb.mxu1 %v2072_v19  ;;  %v3201_v39 = vrot.slane %v2741_v11, 2  ;;  %1675 = vmatpush.bf16.msrb.mxu3 %v2086_v63 }
 0x136   : > { %3195 = vst [vmem:[#allocation30_spill] sm:$0xff] %v2816_v31  ;;  %v2826_v46 = vmul.f32 %v2672_v56, %v601_v22  ;;  %v1032_v8 = vld [vmem:[#allocation2 + $0xd8] sm:$0xfe]  ;;  %v2829_v43 = vmul.f32 %v2720_v17, %v601_v22  ;;  %v855_v4 = vmul.f32 %v3200_v44, %v838_v59  ;;  %v3203_v29 = vperm.slane %v2559_v30, 2 }
 0x137   : > { %740 = vst [vmem:[#allocation2 + $0xc8] sm:$0xfe] %v3196_v9  ;;  %v789_v13 = vmul.f32 %v3197_v54, %v601_v22  ;;  %v3199_v9 = vrot.slane %v2781_v14, 7  ;;  %v2842_v22 = vmul.f32 %v2711_v23, %v1032_v8  ;;  %v2847_v60 = vsel %vm1149_vm3, %v1150_v24, %v3201_v39  ;;  %v768_v51 = vld [vmem:[#allocation2 + $0x18] sm:$0xff] }
 0x138   : > { %3198 = vst [vmem:[#allocation31_spill] sm:$0xff] %v2832_v10  ;;  %v3204_v44 = vperm.slane %v2593_v50, 3  ;;  %v873_v8 = vld [vmem:[#allocation2 + $0x18] sm:$0xfe]  ;;  %v3205_v48 = vperm.slane %v2559_v30, 3  ;;  %1632 = vmatpush.bf16.msrb.mxu0 %v2063_v25  ;;  %1662 = vmatpush.bf16.msrb.mxu2 %v2077_v38  ;;  %v3209_v38 = vrot.slane %v2534_v12, 7 }
 0x139   : > { %741 = vst [vmem:[#allocation2 + $0xd0] sm:$0xfe] %v3199_v9  ;;  %v767_v1 = vld [vmem:[#allocation2 + $0x10] sm:$0xff]  ;;  %v2858_v11 = vpop.permute.xlu1 %689  ;;  %v1111_v39 = vld [vmem:[#allocation2 + $0x18] sm:$0xfc]  ;;  %1646 = vmatpush.bf16.msrb.mxu1 %v2071_v52  ;;  %1676 = vmatpush.bf16.msrb.mxu3 %v2085_v3  ;;  %v3212_v12 = vperm.slane %v2559_v30, 2 }
 0x13a   : > { %v872_v54 = vld [vmem:[#allocation2 + $0x10] sm:$0xfe]  ;;  %3202 = vst [vmem:[#allocation32_spill] sm:$0xff] %v2847_v60  ;;  %v784_v19 = vmul.f32 %v3203_v29, %v767_v1  ;;  %v2856_v59 = vadd.f32 %v789_v13, %v3204_v44  ;;  %v785_v63 = vmul.f32 %v3205_v48, %v768_v51  ;;  %v890_v1 = vmul.f32 %v2672_v56, %v873_v8  ;;  %v555_v29 = vpop.permute.xlu0 %554  ;;  %v1270_v51 = vld [vmem:[#allocation2 + $0xd8] sm:$0xfc] }
 0x13b   : > { %v2852_v9 = vmul.f32 %v2618_v26, %v872_v54  ;;  %v1110_v10 = vld [vmem:[#allocation2 + $0x10] sm:$0xfc]  ;;  %625 = vst [vmem:[#allocation2 + $0x58] sm:$0x1] %v600_v5  ;;  %v3206_v5 = vperm.slane %v2593_v50, 2  ;;  %v2875_v20 = vmul.f32 %v2720_v17, %v1111_v39  ;;  %v570_v8 = vsel %vm566_vm4, %v555_v29, %v2745_v18 }
 0x13c   : > { %v2861_v24 = vmul.f32 %v2635_v27, %v1110_v10  ;;  %v2062_v13 = vld [vmem:[%s3133_s5 + $0x10] sm:$0xff]  ;;  %v572_v48 = vsel %vm566_vm4, %v2510_v49, %v555_v29  ;;  %v874_v18 = vld [vmem:[#allocation2 + $0x40] sm:$0x1]  ;;  %v598_v28 = vrot.slane %v570_v8, 7  ;;  %v921_v52 = vrot.slane %v890_v1, 1 }
 0x13d   : > { %v792_v44 = vadd.f32 %v784_v19, %v3206_v5  ;;  %v918_v60 = vrot.slane %v2852_v9, 1  ;;  %v2070_v19 = vld [vmem:[%s3133_s5 + $0x50] sm:$0xff]  ;;  %v2076_v9 = vld [vmem:[%s3133_s5 + $0x80] sm:$0xff]  ;;  %v3207_v5 = vperm.slane %v2593_v50, 3  ;;  %v596_v54 = vrot.slane %v572_v48, 7  ;;  %1633 = vmatpush.bf16.msrb.mxu0 %v2062_v13 }
 0x13e   : > { %v1156_v39 = vrot.slane %v2861_v24, 2  ;;  %v2084_v49 = vld [vmem:[%s3133_s5 + $0xc0] sm:$0xff]  ;;  %v1159_v25 = vrot.slane %v2875_v20, 2  ;;  %v2898_v24 = vmul.f32 %v2772_v41, %v1270_v51  ;;  %v3210_v1 = vrot.slane %v2654_v21, 7  ;;  %1647 = vmatpush.bf16.msrb.mxu1 %v2070_v19  ;;  %1663 = vmatpush.bf16.msrb.mxu2 %v2076_v9  ;;  %624 = vst [vmem:[#allocation2 + $0x50] sm:$0x1] %v598_v28 }
 0x13f   : > { %v793_v10 = vadd.f32 %v785_v63, %v3207_v5  ;;  %v835_v29 = vld [vmem:[#allocation2 + $0xc0] sm:$0xff]  ;;  %v3208_v63 = vperm.slane %v2615_v40, 0  ;;  %v2907_v3 = vsel %vm589_vm1, %v3209_v38, %v596_v54  ;;  %623 = vst [vmem:[#allocation2 + $0x48] sm:$0x1] %v596_v54  ;;  %v3211_v8 = vrot.slane %v2826_v46, 1  ;;  %1677 = vmatpush.bf16.msrb.mxu3 %v2084_v49 }
 0x140   : > { %v599_v20 = vsel %vm589_vm1, %v3210_v1, %v598_v28  ;;  %v2916_v5 = vmul.f32 %v2638_v33, %v874_v18  ;;  %v1269_v54 = vld [vmem:[#allocation2 + $0xd0] sm:$0xfc]  ;;  %v2061_v28 = vld [vmem:[%s3133_s5 + $0x8] sm:$0xff]  ;;  %v3221_v6 = vrot.slane %v2762_v0, 7 }
 0x141   : > { %v863_v36 = vadd.f32 %v855_v4, %v793_v10  ;;  %v2902_v48 = vmul.f32 %v3208_v63, %v835_v29  ;;  %v837_v4 = vld [vmem:[#allocation2 + $0xd0] sm:$0xff]  ;;  %v923_v51 = vsel %vm911_vm2, %v921_v52, %v3211_v8  ;;  %v788_v29 = vmul.f32 %v3212_v12, %v599_v20  ;;  %v682_v18 = vpop.permute.xlu1 %681  ;;  %1634 = vmatpush.bf16.msrb.mxu0 %v2061_v28 }
 0x142   : > { %v1031_v10 = vld [vmem:[#allocation2 + $0xd0] sm:$0xfe]  ;;  %v3213_v63 = vperm.slane %v2615_v40, 2  ;;  %v2923_v38 = vmul.f32 %v2618_v26, %v599_v20  ;;  %v2929_v33 = vmul.f32 %v2635_v27, %v599_v20  ;;  %v2932_v13 = vmul.f32 %v2757_v62, %v1269_v54  ;;  %v877_v19 = vld [vmem:[#allocation2 + $0x58] sm:$0x1] }
 0x143   : > { %v2926_v1 = vmul.f32 %v2737_v37, %v1031_v10  ;;  %v3214_v52 = vperm.slane %v2593_v50, 2  ;;  %v898_v9 = vmul.f32 %v2672_v56, %v877_v19  ;;  %v1115_v49 = vld [vmem:[#allocation2 + $0x58] sm:$0x3]  ;;  %v694_v10 = vpop.permute.xlu0 %693  ;;  %v2942_v31 = vadd.f32 %v923_v51, %v2471_v58  ;;  %v2060_v19 = vld [vmem:[%s3133_s5] sm:$0xff] }
 0x144   : > { %v854_v21 = vmul.f32 %v3213_v63, %v837_v4  ;;  %v919_v12 = vrot.slane %v2923_v38, 1  ;;  %v3157_v20 = vrot.slane %v2929_v33, 2  ;;  %v1314_v54 = vrot.slane %v2932_v13, 2 }
 0x145   : > { %v796_v4 = vadd.f32 %v788_v29, %v3214_v52  ;;  %v1076_v63 = vrot.slane %v2926_v1, 1  ;;  %v697_v56 = vsel %vm695_vm5, %v2858_v11, %v694_v10  ;;  %v703_v29 = vsel %vm695_vm5, %v694_v10, %v682_v18  ;;  %1635 = vmatpush.bf16.msrb.mxu0 %v2060_v19 }
 0x146   : > { %v862_v8 = vadd.f32 %v854_v21, %v792_v44  ;;  %v2069_v44 = vld [vmem:[%s3133_s5 + $0x48] sm:$0xff]  ;;  %v920_v21 = vsel %vm911_vm2, %v918_v60, %v919_v12  ;;  %v723_v51 = vrot.slane %v697_v56, 7  ;;  %v725_v38 = vrot.slane %v703_v29, 7 }
 0x147   : > { %v942_v1 = vadd.f32 %v920_v21, %v2459_v47  ;;  %v1158_v13 = vsel %vm1149_vm3, %v1156_v39, %v3157_v20  ;;  %1648 = vmatpush.bf16.msrb.mxu1 %v2069_v44  ;;  %v930_v10 = vrot.slane %v898_v9, 1  ;;  %v1022_v60 = vadd.f32 %v2506_v42, %v863_v36  ;;  %v2068_v47 = vld [vmem:[%s3133_s5 + $0x40] sm:$0xff] }
 0x148   : > { %v1021_v58 = vadd.f32 %v2486_v7, %v862_v8  ;;  %v1136_v7 = vmul.f32 %v2720_v17, %v1115_v49  ;;  %v3215_v8 = vrot.slane %v2781_v14, 7  ;;  %749 = vst [vmem:[#allocation2 + $0x110] sm:$0x1] %v723_v51  ;;  %v3216_v28 = vrot.slane %v2663_v2, 7  ;;  %v1114_v2 = vld [vmem:[#allocation2 + $0x50] sm:$0x3] }
 0x149   : > { %v3217_v56 = vrot.slane %v2829_v43, 2  ;;  %v3218_v36 = vperm.slane %v2615_v40, 2  ;;  %v3219_v29 = vperm.slane %v2615_v40, 3  ;;  %750 = vst [vmem:[#allocation2 + $0x118] sm:$0x1] %v725_v38 }
 0x14a   : > { %v1180_v52 = vadd.f32 %v1158_v13, %v1021_v58  ;;  %v724_v39 = vsel %vm589_vm1, %v3215_v8, %v723_v51  ;;  %v726_v44 = vsel %vm589_vm1, %v3216_v28, %v725_v38  ;;  %v876_v58 = vld [vmem:[#allocation2 + $0x50] sm:$0x1]  ;;  %v3220_v51 = vrot.slane %v2826_v46, 1 }
 0x14b   : > { %v1161_v9 = vsel %vm1149_vm3, %v1159_v25, %v3217_v56  ;;  %v858_v17 = vmul.f32 %v3218_v36, %v724_v39  ;;  %v1052_v49 = vmul.f32 %v2737_v37, %v724_v39  ;;  %v1290_v14 = vmul.f32 %v2757_v62, %v724_v39  ;;  %1649 = vmatpush.bf16.msrb.mxu1 %v2068_v47  ;;  %v686_v42 = vpop.permute.xlu0 %685 }
 0x14c   : > { %v859_v21 = vmul.f32 %v3219_v29, %v726_v44  ;;  %v931_v13 = vsel %vm911_vm2, %v3220_v51, %v930_v10  ;;  %v2989_v25 = vmul.f32 %v2711_v23, %v726_v44  ;;  %v1168_v8 = vrot.slane %v1136_v7, 2 }
 0x14d   : > { %v2991_v28 = vadd.f32 %v1161_v9, %v1022_v60  ;;  %v866_v56 = vadd.f32 %v858_v17, %v796_v4  ;;  %v897_v39 = vmul.f32 %v2618_v26, %v876_v58  ;;  %v1077_v36 = vrot.slane %v1052_v49, 1 }
 0x14e   : > { %v1135_v29 = vmul.f32 %v2635_v27, %v1114_v2  ;;  %v1315_v20 = vrot.slane %v1290_v14, 2  ;;  %v867_v46 = vadd.f32 %v859_v21, %v2856_v59  ;;  %v947_v10 = vadd.f32 %v931_v13, %v2473_v61 }
 0x14f   : > { %v1080_v51 = vrot.slane %v2989_v25, 1  ;;  %v699_v19 = vsel %vm695_vm5, %v686_v42, %v2858_v11  ;;  %v701_v4 = vsel %vm695_vm5, %v682_v18, %v686_v42  ;;  %v928_v26 = vrot.slane %v897_v39, 1  ;;  %v1035_v61 = vld [vmem:[#allocation2 + $0x110] sm:$0x1] }
 0x150   : > { %v1025_v38 = vadd.f32 %v2579_v16, %v866_v56  ;;  %v719_v27 = vrot.slane %v701_v4, 7  ;;  %v721_v60 = vrot.slane %v699_v19, 7  ;;  %v1078_v7 = vsel %vm911_vm2, %v1076_v63, %v1077_v36  ;;  %v1273_v17 = vld [vmem:[#allocation2 + $0x110] sm:$0x3]  ;;  %v1274_v25 = vld [vmem:[#allocation2 + $0x118] sm:$0x3] }
 0x151   : > { %v1166_v47 = vrot.slane %v1135_v29, 2  ;;  %v929_v59 = vsel %vm911_vm2, %v919_v12, %v928_v26  ;;  %v1100_v9 = vadd.f32 %v1078_v7, %v942_v1  ;;  %v1316_v49 = vsel %vm1149_vm3, %v1314_v54, %v1315_v20 }
 0x152   : > { %v1026_v11 = vadd.f32 %v2587_v34, %v867_v46  ;;  %v3011_v18 = vsel %vm589_vm1, %v3221_v6, %v719_v27  ;;  %v3222_v16 = vrot.slane %v2785_v55, 7  ;;  %747 = vst [vmem:[#allocation2 + $0x100] sm:$0x1] %v719_v27  ;;  %v946_v12 = vadd.f32 %v929_v59, %v2469_v53  ;;  %v1036_v55 = vld [vmem:[#allocation2 + $0x118] sm:$0x1] }
 0x153   : > { %v1056_v63 = vmul.f32 %v2737_v37, %v1035_v61  ;;  %v3223_v1 = vrot.slane %v2929_v33, 2  ;;  %v1259_v34 = vadd.f32 %v2497_v32, %v1100_v9  ;;  %v1294_v0 = vmul.f32 %v2757_v62, %v1273_v17  ;;  %748 = vst [vmem:[#allocation2 + $0x108] sm:$0x1] %v721_v60  ;;  %v1112_v59 = vld [vmem:[#allocation2 + $0x40] sm:$0x3] }
 0x154   : > { %v3016_v42 = vsel %vm589_vm1, %v3222_v16, %v721_v60  ;;  %v1338_v14 = vadd.f32 %v1316_v49, %v1180_v52  ;;  %v3224_v2 = vrot.slane %v2842_v22, 1  ;;  %v3225_v53 = vrot.slane %v2829_v43, 2  ;;  %v1029_v17 = vld [vmem:[#allocation2 + $0xc0] sm:$0xfe]  ;;  %v3229_v49 = vld [vmem:[#allocation17_spill] sm:$0xff] }
 0x155   : > { %v1167_v54 = vsel %vm1149_vm3, %v3223_v1, %v1166_v47  ;;  %v1086_v21 = vrot.slane %v1056_v63, 1  ;;  %v1324_v33 = vrot.slane %v1294_v0, 2  ;;  %v1057_v32 = vmul.f32 %v2711_v23, %v1036_v55 }
 0x156   : > { %v1184_v58 = vadd.f32 %v1167_v54, %v1025_v38  ;;  %v1081_v13 = vsel %vm911_vm2, %v3224_v2, %v1080_v51  ;;  %v1169_v37 = vsel %vm1149_vm3, %v3225_v53, %v1168_v8  ;;  %v1346_v56 = vadd.f32 %v1338_v14, %v1259_v34  ;;  %v3233_v34 = vld [vmem:[#allocation24_spill] sm:$0xff]  ;;  %v3234_v14 = vld [vmem:[#allocation26_spill] sm:$0xff] }
 0x157   : > { %v1101_v62 = vadd.f32 %v1081_v13, %v2942_v31  ;;  %v1087_v52 = vsel %vm911_vm2, %v1077_v36, %v1086_v21  ;;  %v1185_v39 = vadd.f32 %v1169_v37, %v1026_v11  ;;  %v1291_v29 = vmul.f32 %v2772_v41, %v726_v44  ;;  %v3237_v37 = vld [vmem:[#allocation10_spill] sm:$0xff] }
 0x158   : > { %v1295_v22 = vmul.f32 %v2772_v41, %v1274_v25  ;;  %v1104_v46 = vadd.f32 %v1087_v52, %v946_v12  ;;  %v1325_v43 = vsel %vm1149_vm3, %v1315_v20, %v1324_v33  ;;  %v1354_v19 = vmax.f32 %v1346_v56, 0.0  ;;  %v3231_v12 = vld [vmem:[#allocation22_spill] sm:$0xff] }
 0x159   : > { %v1088_v8 = vrot.slane %v1057_v32, 1  ;;  %v1342_v4 = vadd.f32 %v1325_v43, %v1184_v58  ;;  %v1260_v26 = vadd.f32 %v2562_v15, %v1101_v62  ;;  %v1318_v38 = vrot.slane %v1291_v29, 2  ;;  %v1033_v16 = vld [vmem:[#allocation2 + $0x100] sm:$0x1]  ;;  %v3238_v29 = vld [vmem:[#allocation5_spill] sm:$0xff]  ;;  %v3239_v43 = vld [vmem:[#allocation32_spill] sm:$0xff] }
 0x15a   : > { %v1326_v27 = vrot.slane %v1295_v22, 2  ;;  %v1263_v23 = vadd.f32 %v2584_v35, %v1104_v46  ;;  %v1362_v31 = vadd.f32 %v1354_v19, %v2387_v57  ;;  %v3226_v44 = vperm.slane %v2615_v40, 0 }
 0x15b   : > { %v1089_v36 = vsel %vm911_vm2, %v1080_v51, %v1088_v8  ;;  %v3227_v20 = vrot.slane %v2898_v24, 2  ;;  %v860_v15 = vadd.f32 %v2902_v48, %v2814_v45  ;;  %v3228_v51 = vld [vmem:[#allocation30_spill] sm:$0xff]  ;;  %v3230_v24 = vld [vmem:[#allocation13_spill] sm:$0xff]  ;;  %v1038_v63 = vperm.slane %v3231_v12, 0  ;;  %v1267_v8 = vld [vmem:[#allocation2 + $0xc0] sm:$0xfc] }
 0x15c   : > { %v856_v41 = vmul.f32 %v3226_v44, %v3011_v18  ;;  %v1105_v60 = vadd.f32 %v1089_v36, %v947_v10  ;;  %v1327_v47 = vsel %vm1149_vm3, %v1318_v38, %v1326_v27  ;;  %v1350_v35 = vadd.f32 %v1342_v4, %v1263_v23  ;;  %v3232_v45 = vld [vmem:[#allocation14_spill] sm:$0xff]  ;;  %v3240_v4 = vld [vmem:[#allocation9_spill] sm:$0xff]  ;;  %v1271_v44 = vld [vmem:[#allocation2 + $0x100] sm:$0x3] }
 0x15d   : > { %v1319_v7 = vsel %vm1149_vm3, %v3227_v20, %v1318_v38  ;;  %v1343_v61 = vadd.f32 %v1327_v47, %v1185_v39  ;;  %v924_v10 = vrot.slane %v2916_v5, 1  ;;  %v1019_v6 = vadd.f32 %v3230_v24, %v860_v15  ;;  %v3236_v5 = vld [vmem:[#allocation8_spill] sm:$0xff]  ;;  %v3241_v27 = vld [vmem:[#allocation29_spill] sm:$0xff]  ;;  %v3244_v20 = vld [vmem:[#allocation31_spill] sm:$0xff] }
 0x15e   : > { %v1339_v57 = vadd.f32 %v1319_v7, %v2991_v28  ;;  %v864_v9 = vadd.f32 %v856_v41, %v3228_v51  ;;  %v1264_v11 = vadd.f32 %v3229_v49, %v1105_v60  ;;  %v1358_v1 = vmax.f32 %v1350_v35, 0.0  ;;  %v3243_v41 = vld [vmem:[#allocation23_spill] sm:$0xff]  ;;  %v766_v51 = vld [vmem:[#allocation2 + $0x8] sm:$0xff] }
 0x15f   : > { %v1133_v0 = vmul.f32 %v3233_v34, %v1112_v59  ;;  %v3235_v21 = vrot.slane %v3234_v14, 1  ;;  %v1046_v55 = vmul.f32 %v1038_v63, %v1029_v17  ;;  %v1050_v2 = vmul.f32 %v1038_v63, %v3011_v18  ;;  %v3245_v17 = vld [vmem:[#allocation18_spill] sm:$0xff] }
 0x160   : > { %v1347_v54 = vadd.f32 %v1339_v57, %v1260_v26  ;;  %v1023_v48 = vadd.f32 %v3232_v45, %v864_v9  ;;  %v1351_v28 = vadd.f32 %v1343_v61, %v1264_v11  ;;  %v1366_v13 = vadd.f32 %v1358_v1, %v3236_v5  ;;  %v836_v9 = vld [vmem:[#allocation2 + $0xc8] sm:$0xff] }
 0x161   : > { %v925_v58 = vsel %vm911_vm2, %v3235_v21, %v924_v10  ;;  %v1054_v33 = vmul.f32 %v1038_v63, %v1033_v16  ;;  %v1070_v32 = vrot.slane %v1046_v55, 1  ;;  %v1071_v62 = vrot.slane %v1050_v2, 1  ;;  %v3246_v16 = vld [vmem:[#allocation19_spill] sm:$0xff] }
 0x162   : > { %v1355_v53 = vmax.f32 %v1347_v54, 0.0  ;;  %v944_v25 = vadd.f32 %v925_v58, %v3237_v37  ;;  %v1359_v56 = vmax.f32 %v1351_v28, 0.0  ;;  %v1162_v52 = vrot.slane %v1133_v0, 2  ;;  %v3247_v54 = vld [vmem:[#allocation15_spill] sm:$0xff]  ;;  %v875_v28 = vld [vmem:[#allocation2 + $0x48] sm:$0x1] }
 0x163   : > { %v1370_v39 = vpack.c.bf16 %v1366_v13, %v1362_v31  ;;  %v1082_v46 = vrot.slane %v1054_v33, 1  ;;  %v1178_v19 = vadd.f32 %v3239_v43, %v1019_v6  ;;  %v1072_v38 = vsel %vm911_vm2, %v1070_v32, %v1071_v62  ;;  %v871_v6 = vld [vmem:[#allocation2 + $0x8] sm:$0xfe] }
 0x164   : > { %v1363_v22 = vadd.f32 %v1355_v53, %v3238_v29  ;;  %v1367_v26 = vadd.f32 %v1359_v56, %v3240_v4  ;;  %v3242_v23 = vrot.slane %v3241_v27, 2  ;;  %v1276_v60 = vperm.slane %v3243_v41, 0  ;;  %v1109_v43 = vld [vmem:[#allocation2 + $0x8] sm:$0xfc]  ;;  %v3250_v27 = vld [vmem:[#allocation25_spill] sm:$0xff] }
 0x165   : > { %1664 = vmatmul.bf16.vlgmr.msrb.gmra.mxu2 %v1370_v39  ;;  %v1083_v31 = vsel %vm911_vm2, %v1071_v62, %v1082_v46  ;;  %v1098_v7 = vadd.f32 %v1072_v38, %v3244_v20  ;;  %v757_v15 = vperm.slane %v2593_v50, 1  ;;  %v775_v10 = vperm.slane %v2559_v30, 1  ;;  %v1030_v62 = vld [vmem:[#allocation2 + $0xc8] sm:$0xfe]  ;;  %v1034_v46 = vld [vmem:[#allocation2 + $0x108] sm:$0x1] }
 0x166   : > { %v1163_v36 = vsel %vm1149_vm3, %v3242_v23, %v1162_v52  ;;  %v1371_v59 = vpack.c.bf16 %v1367_v26, %v1363_v22  ;;  %v1102_v35 = vadd.f32 %v1083_v31, %v944_v25  ;;  %v1284_v57 = vmul.f32 %v1276_v60, %v1267_v8  ;;  %v3248_v8 = vld [vmem:[#allocation16_spill] sm:$0xff] }
 0x167   : > { %v1182_v47 = vadd.f32 %v1163_v36, %v1023_v48  ;;  %v1288_v61 = vmul.f32 %v1276_v60, %v3011_v18  ;;  %v1257_v49 = vadd.f32 %v3245_v17, %v1098_v7  ;;  %v1292_v11 = vmul.f32 %v1276_v60, %v1271_v44  ;;  %v3249_v26 = vld [vmem:[#allocation20_spill] sm:$0xff] }
 0x168   : > { %v845_v24 = vperm.slane %v2615_v40, 1  ;;  %1678 = vmatmul.bf16.vlgmr.msrb.gmra.mxu3 %v1371_v59  ;;  %v1261_v63 = vadd.f32 %v3246_v16, %v1102_v35  ;;  %v1308_v1 = vrot.slane %v1284_v57, 2  ;;  %v880_v45 = vperm.slane %v3247_v54, 1  ;;  %v3251_v36 = vld [vmem:[#allocation28_spill] sm:$0xff]  ;;  %v3253_v59 = vld [vmem:[#allocation27_spill] sm:$0xff] }
 0x169   : > { %v1309_v50 = vrot.slane %v1288_v61, 2  ;;  %v1320_v48 = vrot.slane %v1292_v11, 2  ;;  %v783_v34 = vmul.f32 %v775_v10, %v766_v51  ;;  %v787_v18 = vmul.f32 %v775_v10, %v2907_v3  ;;  %v1113_v7 = vld [vmem:[#allocation2 + $0x48] sm:$0x3]  ;;  %v3254_v51 = vld [vmem:[#allocation6_spill] sm:$0xff] }
 0x16a   : > { %v853_v0 = vmul.f32 %v845_v24, %v836_v9  ;;  %v857_v30 = vmul.f32 %v845_v24, %v3016_v42  ;;  %v888_v21 = vmul.f32 %v880_v45, %v871_v6  ;;  %v892_v40 = vmul.f32 %v880_v45, %v2907_v3  ;;  %v1268_v10 = vld [vmem:[#allocation2 + $0xc8] sm:$0xfc]  ;;  %v3255_v24 = vld [vmem:[#allocation21_spill] sm:$0xff] }
 0x16b   : > { %v1310_v14 = vsel %vm1149_vm3, %v1308_v1, %v1309_v50  ;;  %v1321_v58 = vsel %vm1149_vm3, %v1309_v50, %v1320_v48  ;;  %v791_v2 = vadd.f32 %v783_v34, %v757_v15  ;;  %v795_v5 = vadd.f32 %v787_v18, %v757_v15  ;;  %v1272_v1 = vld [vmem:[#allocation2 + $0x108] sm:$0x3] }
 0x16c   : > { %v1336_v55 = vadd.f32 %v1310_v14, %v1178_v19  ;;  %v1340_v13 = vadd.f32 %v1321_v58, %v1182_v47  ;;  %v896_v53 = vmul.f32 %v880_v45, %v875_v28  ;;  %v915_v37 = vrot.slane %v888_v21, 1  ;;  %v3252_v47 = vld [vmem:[#allocation3_spill] sm:$0xff] }
 0x16d   : > { %v916_v25 = vrot.slane %v892_v40, 1  ;;  %v861_v56 = vadd.f32 %v853_v0, %v791_v2  ;;  %v865_v32 = vadd.f32 %v857_v30, %v795_v5  ;;  %v1039_v52 = vperm.slane %v3231_v12, 1  ;;  %v3256_v58 = vld [vmem:[#allocation11_spill] sm:$0xff]  ;;  %v3258_v2 = vld [vmem:[#allocation12_spill] sm:$0xff] }
 0x16e   : > { %v1344_v33 = vadd.f32 %v1336_v55, %v1257_v49  ;;  %v1348_v39 = vadd.f32 %v1340_v13, %v1261_v63  ;;  %v926_v22 = vrot.slane %v896_v53, 1  ;;  %v1118_v19 = vperm.slane %v3248_v8, 1 }
 0x16f   : > { %v917_v29 = vsel %vm911_vm2, %v915_v37, %v916_v25  ;;  %v1020_v23 = vadd.f32 %v3250_v27, %v861_v56  ;;  %v1233_v44 = vrot.slane %v3251_v36, 2  ;;  %v1047_v20 = vmul.f32 %v1039_v52, %v1030_v62 }
 0x170   : > { %v1352_v4 = vmax.f32 %v1344_v33, 0.0  ;;  %v941_v38 = vadd.f32 %v917_v29, %v3249_v26  ;;  %v1356_v60 = vmax.f32 %v1348_v39, 0.0  ;;  %v927_v31 = vsel %vm911_vm2, %v916_v25, %v926_v22 }
 0x171   : > { %v1051_v12 = vmul.f32 %v1039_v52, %v3016_v42  ;;  %v1024_v35 = vadd.f32 %v3253_v59, %v865_v32  ;;  %v1055_v57 = vmul.f32 %v1039_v52, %v1034_v46  ;;  %v1126_v61 = vmul.f32 %v1118_v19, %v1109_v43  ;;  %v2104_v59 = vld [vmem:[%s2369_s8] sm:$0xff] }
 0x172   : > { %v1360_v15 = vadd.f32 %v1352_v4, %v3252_v47  ;;  %v1364_v9 = vadd.f32 %v1356_v60, %v3254_v51  ;;  %v1073_v17 = vrot.slane %v1047_v20, 1  ;;  %v1130_v11 = vmul.f32 %v1118_v19, %v2907_v3  ;;  %v3260_v4 = vld [vmem:[#allocation4_spill] sm:$0xff]  ;;  %v2103_v47 = vld [vmem:[%s3134_s6] ss:$0 sm:$0xff] }
 0x173   : > { %v1074_v49 = vrot.slane %v1051_v12, 1  ;;  %v945_v6 = vadd.f32 %v927_v31, %v3255_v24  ;;  %v1084_v16 = vrot.slane %v1055_v57, 1  ;;  %v1134_v63 = vmul.f32 %v1118_v19, %v1113_v7 }
 0x174   : > { %v1277_v50 = vperm.slane %v3243_v41, 1  ;;  %v1368_v54 = vpack.c.bf16 %v1364_v9, %v1360_v15  ;;  %v1153_v48 = vrot.slane %v1126_v61, 2  ;;  %v1154_v34 = vrot.slane %v1130_v11, 2 }
 0x175   : > { %v1075_v45 = vsel %vm911_vm2, %v1073_v17, %v1074_v49  ;;  %v1085_v18 = vsel %vm911_vm2, %v1074_v49, %v1084_v16  ;;  %v1164_v28 = vrot.slane %v1134_v63, 2  ;;  %v3257_v55 = vrot.slane %v3256_v58, 2 }
 0x176   : > { %v1099_v0 = vadd.f32 %v1075_v45, %v941_v38  ;;  %v1285_v14 = vmul.f32 %v1277_v50, %v1268_v10  ;;  %1636 = vmatmul.bf16.vlgmr.msrb.gmra.mxu0 %v1368_v54  ;;  %v1103_v3 = vadd.f32 %v1085_v18, %v945_v6  ;;  %v1155_v30 = vsel %vm1149_vm3, %v1153_v48, %v1154_v34  ;;  %v3261_v38 = vld [vmem:[#allocation7_spill] sm:$0xff]  ;;  %v2105_v10 = vld [vmem:[%s2369_s8 + $0x8] sm:$0xff] }
 0x177   : > { %v1289_v21 = vmul.f32 %v1277_v50, %v3016_v42  ;;  %v1293_v40 = vmul.f32 %v1277_v50, %v1272_v1  ;;  %v1234_v41 = vsel %vm1149_vm3, %v3257_v55, %v1233_v44  ;;  %v3259_v5 = vrot.slane %v3258_v2, 2 }
 0x178   : > { %v1165_v53 = vsel %vm1149_vm3, %v1154_v34, %v1164_v28  ;;  %v1311_v37 = vrot.slane %v1285_v14, 2  ;;  %v1179_v56 = vadd.f32 %v1155_v30, %v1020_v23  ;;  %v1258_v62 = vadd.f32 %v1234_v41, %v1099_v0 }
 0x179   : > { %v1244_v13 = vsel %vm1149_vm3, %v1233_v44, %v3259_v5  ;;  %v1312_v25 = vrot.slane %v1289_v21, 2  ;;  %v1322_v33 = vrot.slane %v1293_v40, 2  ;;  %v1183_v32 = vadd.f32 %v1165_v53, %v1024_v35 }
 0x17a   : > { %v1262_v52 = vadd.f32 %v1244_v13, %v1103_v3 }
 0x17b   : > { %v1313_v42 = vsel %vm1149_vm3, %v1311_v37, %v1312_v25  ;;  %v1323_v39 = vsel %vm1149_vm3, %v1312_v25, %v1322_v33 }
 0x17c   : > { %v1337_v29 = vadd.f32 %v1313_v42, %v1179_v56  ;;  %v1341_v22 = vadd.f32 %v1323_v39, %v1183_v32 }
 0x17e   : > { %v1345_v46 = vadd.f32 %v1337_v29, %v1258_v62  ;;  %v1349_v43 = vadd.f32 %v1341_v22, %v1262_v52 }
 0x180   : > { %v1353_v8 = vmax.f32 %v1345_v46, 0.0  ;;  %v1357_v19 = vmax.f32 %v1349_v43, 0.0 }
 0x182   : > { %v1361_v26 = vadd.f32 %v1353_v8, %v3260_v4  ;;  %v1365_v27 = vadd.f32 %v1357_v19, %v3261_v38 }
 0x184   : > { %v1369_v23 = vpack.c.bf16 %v1365_v27, %v1361_v26 }
 0x186   : > { %1650 = vmatmul.bf16.vlgmr.msrb.gmra.mxu1 %v1369_v23 }
 0x1e8   : > { %v1665_v44 = vpop.f32.mrf.mxu2 }
 0x1eb   : > { %v1679_v20 = vpop.f32.mrf.mxu3 }
 0x1f0   : > { %v1667_v9 = vpop.f32.mrf.mxu2 }
 0x1f3   : > { %v1637_v36 = vpop.f32.mrf.mxu0  ;;  %v1681_v49 = vpop.f32.mrf.mxu3 }
 0x1fb   : > { %v1639_v15 = vpop.f32.mrf.mxu0 }
 0x203   : > { %v1651_v60 = vpop.f32.mrf.mxu1 }
 0x204   : > { %v1652_v31 = vadd.f32 %v1651_v60, %v1637_v36 }
 0x206   : > { %v1666_v12 = vadd.f32 %v1665_v44, %v1652_v31 }
 0x208   : > { %v1680_v7 = vadd.f32 %v1679_v20, %v1666_v12 }
 0x20a   : > { %v1684_v35 = vadd.f32 %v2104_v59, %v1680_v7 }
 0x20b   : > { %v1653_v57 = vpop.f32.mrf.mxu1 }
 0x20c   : > { %v1690_v61 = vadd.f32 %v2103_v47, %v1684_v35  ;;  %v1654_v51 = vadd.f32 %v1653_v57, %v1639_v15 }
 0x20e   : > { %1692 = vst [vmem:[%s278_s28] sm:$0xff] %v1690_v61  ;;  %v1668_v17 = vadd.f32 %v1667_v9, %v1654_v51 }
 0x210   : > { %v1682_v11 = vadd.f32 %v1681_v49, %v1668_v17 }
 0x212   : > { %v1685_v24 = vadd.f32 %v2105_v10, %v1682_v11 }
 0x214   : > { %v1691_v6 = vadd.f32 %v2103_v47, %v1685_v24 }
 0x216   : > { %1693 = vst [vmem:[%s278_s28 + $0x8] sm:$0xff] %v1691_v6 }
 0x217 PF: > { %s17_s24 = sadd.s32 1, %s2112_s24  }
 0x218   : > { %p14_p4 = scmp.ge.s32.totalorder %s17_s24, 4  }
 0x21a   :  { %16 = sbr.rel (!%p14_p4) target bundleno = 1 (0x1), region = 91 }

</bundles_post_ra>
